<compile_context>
chip_gen: v5e
topology: v5e:2x2
jax: 0.10.0
libtpu: 0.0.40
codegen_flags: <defaults>
</compile_context>

<pallas_src>
import functools

import jax
import jax.numpy as jnp
import numpy as np
from jax.experimental import pallas as pl
from jax.experimental.pallas import tpu as pltpu

# ----------------------------- miniature config ------------------------------
B = 2
IN_CH = 3
IMG = 32            # input spatial size
VIT_IMG = 16        # stands in for Resize((224, 224))
PATCH = 8           # stands in for patch16
EMBED = 32          # stands in for vit_tiny embed_dim = 192
HEADS = 2           # stands in for 3 heads
HEAD_DIM = EMBED // HEADS
DEPTH = 2           # stands in for 12 blocks
MLP_HID = 4 * EMBED
MBN_FEAT = 64       # stands in for MobileNetV2's 1280 final channels
N_POS = 3
N_ORI = 4
HEAD_OUT = 8        # N_POS + N_ORI = 7, padded to 8 lanes (no masked lane store)
DROPOUT_RATE = 0.5  # eval-mode => identity
BN_EPS = 1e-5
LN_EPS = 1e-6
STEM_K_PAD = 32     # im2col contraction dim 3*3*3 = 27, zero-padded to 32
NP = (VIT_IMG // PATCH) ** 2          # 4 patch tokens
T = 8                                 # 1 CLS + NP patches + 3 pad tokens (sublane aligned)
KP = PATCH * PATCH * IN_CH            # 192 patch-embed contraction dim


def _tensorcores_per_chip():
    """2 on v7x (2 TensorCores / chip); 1 on v5e / v6e."""
    try:
        kind = jax.devices()[0].device_kind.lower()
    except Exception:
        return 1
    return 2 if "v7" in kind else 1


# ============================== Pallas kernels ===============================

def _mm_bias_relu6_kernel(x_ref, w_ref, b_ref, o_ref):
    acc = jnp.dot(x_ref[...], w_ref[...], preferred_element_type=jnp.float32)
    o_ref[...] = jnp.clip(acc + b_ref[...], 0.0, 6.0)


def matmul_bias_relu6(x, w, b):
    """relu6(x @ w + b).  Full M as a single block (grid=(1,)): the stem matmul is
    ~0.5 MFLOP and fits VMEM with >100x margin, so blocking only adds step overhead."""
    M, K = x.shape
    N = w.shape[1]
    return pl.pallas_call(
        _mm_bias_relu6_kernel,
        out_shape=jax.ShapeDtypeStruct((M, N), jnp.float32),
        grid=(1,),
        in_specs=[
            pl.BlockSpec((M, K), lambda i: (0, 0)),
            pl.BlockSpec((K, N), lambda i: (0, 0)),
            pl.BlockSpec((1, N), lambda i: (0, 0)),
        ],
        out_specs=pl.BlockSpec((M, N), lambda i: (0, 0)),
        compiler_params=pltpu.CompilerParams(dimension_semantics=("arbitrary",)),
        cost_estimate=pl.CostEstimate(
            flops=int(2 * M * K * N), transcendentals=0,
            bytes_accessed=int(4 * (M * K + K * N + N + M * N))),
    )(x, w, b)


def _fused_invres_kernel(p_ref, we_ref, be_ref, wd_ref, bd_ref, wp_ref, bp_ref,
                         o_ref, *, taps, residual):
    """Fused MobileNetV2 inverted residual: expand(1x1+BN+ReLU6) -> dw3x3(+BN+ReLU6)
    -> project(1x1+BN).  The expansion is recomputed per tap so the wide expanded
    activations never leave VMEM; with the folded eval-mode BN bias being zero,
    expanding the zero-padded border patches matches zero-padding the expanded map."""
    # TODO(synk): computing the 1x1 expansion once and gathering shifted rows of the
    # expanded map in VMEM would cut expansion MXU work ~9x, but needs in-kernel
    # strided gathers; left as-is since this kernel is launch-overhead dominated here.
    acc = None
    for t in range(taps):                                    # static 9-tap unroll (VPU FMAs)
        e = jnp.dot(p_ref[t], we_ref[...], preferred_element_type=jnp.float32)
        e = jnp.clip(e + be_ref[...], 0.0, 6.0)              # expand + folded BN + ReLU6
        c = e * wd_ref[t]                                    # (rows, Cexp) * (1, Cexp)
        acc = c if acc is None else acc + c
    h = jnp.clip(acc + bd_ref[...], 0.0, 6.0)                # dw folded BN + ReLU6
    y = jnp.dot(h, wp_ref[...], preferred_element_type=jnp.float32) + bp_ref[...]
    if residual:                                             # stride 1 and Cin == Cout
        y = y + p_ref[taps // 2]                             # center tap == input pixel
    o_ref[...] = y


def fused_inverted_residual(patches, we, be, wd, bd, wp, bp, residual):
    """patches:(taps, rows, Cin) tap-major -> (rows, Cout)."""
    taps, R, Cin = patches.shape
    Cexp = we.shape[1]
    Cout = wp.shape[1]
    # Only split rows where 2 TensorCores exist (v7x). On v5e/v6e the "parallel"
    # 2-step grid is a sequential loop: smaller MXU tiles + extra per-step overhead.
    nblk = 2 if (_tensorcores_per_chip() >= 2
                 and R % 2 == 0 and (R // 2) % 8 == 0) else 1
    rb = R // nblk
    flops = 2 * R * Cexp * (taps * Cin + Cout) + 2 * taps * R * Cexp
    byts = 4 * (taps * R * Cin + Cin * Cexp + taps * Cexp + Cexp * Cout + R * Cout)
    return pl.pallas_call(
        functools.partial(_fused_invres_kernel, taps=taps, residual=residual),
        out_shape=jax.ShapeDtypeStruct((R, Cout), jnp.float32),
        grid=(nblk,),
        in_specs=[
            pl.BlockSpec((taps, rb, Cin), lambda i: (0, i, 0)),
            pl.BlockSpec((Cin, Cexp), lambda i: (0, 0)),
            pl.BlockSpec((1, Cexp), lambda i: (0, 0)),
            pl.BlockSpec((taps, 1, Cexp), lambda i: (0, 0, 0)),
            pl.BlockSpec((1, Cexp), lambda i: (0, 0)),
            pl.BlockSpec((Cexp, Cout), lambda i: (0, 0)),
            pl.BlockSpec((1, Cout), lambda i: (0, 0)),
        ],
        out_specs=pl.BlockSpec((rb, Cout), lambda i: (i, 0)),
        compiler_params=pltpu.CompilerParams(dimension_semantics=("parallel",)),
        cost_estimate=pl.CostEstimate(flops=int(flops), transcendentals=0,
                                      bytes_accessed=int(byts)),
    )(patches, we, be, wd, bd, wp, bp)


def _fused_invres_last_pool_kernel(p_ref, we_ref, be_ref, wd_ref, bd_ref,
                                   wp_ref, bp_ref, wl_ref, bl_ref, o_ref, *, taps):
    """Inverted residual (stride 1, + residual) fused with the final 1x1 conv (+BN+ReLU6)
    and the global average pool for one image (grid step = one batch element)."""
    acc = None
    for t in range(taps):
        e = jnp.dot(p_ref[t], we_ref[...], preferred_element_type=jnp.float32)
        e = jnp.clip(e + be_ref[...], 0.0, 6.0)
        c = e * wd_ref[t]
        acc = c if acc is None else acc + c
    h = jnp.clip(acc + bd_ref[...], 0.0, 6.0)
    y = jnp.dot(h, wp_ref[...], preferred_element_type=jnp.float32) + bp_ref[...]
    y = y + p_ref[taps // 2]                                 # residual (stride 1)
    y = jnp.dot(y, wl_ref[...], preferred_element_type=jnp.float32) + bl_ref[...]
    y = jnp.clip(y, 0.0, 6.0)                                # last 1x1 conv + BN + ReLU6
    o_ref[...] = jnp.mean(y, axis=0, keepdims=True).reshape(1, 1, -1)   # global avg pool


def fused_invres_last_pool(patches, batch, we, be, wd, bd, wp, bp, wl, bl):
    """patches:(taps, batch*hw, Cin) -> pooled features (batch, 1, Cout)."""
    taps, R, Cin = patches.shape
    hw = R // batch
    Cexp = we.shape[1]
    Cmid = wp.shape[1]
    Cout = wl.shape[1]
    flops = 2 * R * (taps * Cin * Cexp + Cexp * Cmid + Cmid * Cout) + 2 * taps * R * Cexp
    byts = 4 * (taps * R * Cin + Cin * Cexp + taps * Cexp + Cexp * Cmid + Cmid * Cout
                + batch * Cout)
    return pl.pallas_call(
        functools.partial(_fused_invres_last_pool_kernel, taps=taps),
        out_shape=jax.ShapeDtypeStruct((batch, 1, Cout), jnp.float32),
        grid=(batch,),
        in_specs=[
            pl.BlockSpec((taps, hw, Cin), lambda bi: (0, bi, 0)),
            pl.BlockSpec((Cin, Cexp), lambda bi: (0, 0)),
            pl.BlockSpec((1, Cexp), lambda bi: (0, 0)),
            pl.BlockSpec((taps, 1, Cexp), lambda bi: (0, 0, 0)),
            pl.BlockSpec((1, Cexp), lambda bi: (0, 0)),
            pl.BlockSpec((Cexp, Cmid), lambda bi: (0, 0)),
            pl.BlockSpec((1, Cmid), lambda bi: (0, 0)),
            pl.BlockSpec((Cmid, Cout), lambda bi: (0, 0)),
            pl.BlockSpec((1, Cout), lambda bi: (0, 0)),
        ],
        out_specs=pl.BlockSpec((1, 1, Cout), lambda bi: (bi, 0, 0)),
        compiler_params=pltpu.CompilerParams(dimension_semantics=("parallel",)),
        cost_estimate=pl.CostEstimate(flops=int(flops), transcendentals=0,
                                      bytes_accessed=int(byts)),
    )(patches, we, be, wd, bd, wp, bp, wl, bl)


def _ln(x, g, b):
    mu = jnp.mean(x, axis=-1, keepdims=True)
    var = jnp.mean(jnp.square(x - mu), axis=-1, keepdims=True)
    return (x - mu) * jax.lax.rsqrt(var + LN_EPS) * g + b


def _vit_head_kernel(cols_ref, pw_ref, base_ref, kmask_ref, mbn_ref,
                     ln1g_ref, ln1b_ref, qkvw_ref, qkvb_ref, prw_ref, prb_ref,
                     ln2g_ref, ln2b_ref, f1w_ref, f1b_ref, f2w_ref, f2b_ref,
                     ng_ref, nb_ref, hwm_ref, hwv_ref, hb_ref,
                     o_ref, tok_ref, *, heads, head_dim, embed):
    """Whole ViT + the [pos|ori] head for one image.  grid = (batch, depth); the (T, E)
    residual stream lives in a VMEM scratch carried across the depth axis, and the last
    depth step fuses the final LayerNorm, feature concat and head matmul."""
    d = pl.program_id(1)

    # ---- depth step 0: patch embed + CLS / pos-embed assembly ----
    @pl.when(d == 0)
    def _():
        # cols rows 1..NP hold the image patches; the CLS row and the 3 pad rows are
        # zero, and the patch-embed bias is folded into `base`, so one matmul suffices.
        tok_ref[...] = base_ref[...] + jnp.dot(cols_ref[0], pw_ref[...],
                                               preferred_element_type=jnp.float32)

    x = tok_ref[...]                                         # (T, E) residual stream

    # ---- multi-head self-attention (pre-norm), fused QKV ----
    xn = _ln(x, ln1g_ref[0], ln1b_ref[0])
    qkv = jnp.dot(xn, qkvw_ref[0], preferred_element_type=jnp.float32) + qkvb_ref[0]
    scale = head_dim ** -0.5
    heads_out = []
    for h in range(heads):                                   # static unroll, lane slices
        q = qkv[:, h * head_dim:(h + 1) * head_dim]
        k = qkv[:, embed + h * head_dim:embed + (h + 1) * head_dim]
        v = qkv[:, 2 * embed + h * head_dim:2 * embed + (h + 1) * head_dim]
        s = jax.lax.dot_general(q, k, (((1,), (1,)), ((), ())),
                                preferred_element_type=jnp.float32) * scale
        s = s + kmask_ref[...]                               # mask pad key tokens
        s = s - jnp.max(s, axis=-1, keepdims=True)
        pa = jnp.exp(s)
        pa = pa * pl.reciprocal(jnp.sum(pa, axis=-1, keepdims=True), approx=True)
        heads_out.append(jnp.dot(pa, v, preferred_element_type=jnp.float32))
    oa = jnp.concatenate(heads_out, axis=-1)                 # (T, E) head concat
    x = x + jnp.dot(oa, prw_ref[0], preferred_element_type=jnp.float32) + prb_ref[0]

    # ---- MLP (pre-norm) ----
    xn2 = _ln(x, ln2g_ref[0], ln2b_ref[0])
    # TODO(synk): timm ViT uses exact-erf GELU; tanh approximation used here.
    h1 = jax.nn.gelu(jnp.dot(xn2, f1w_ref[0], preferred_element_type=jnp.float32)
                     + f1b_ref[0], approximate=True)
    x = x + jnp.dot(h1, f2w_ref[0], preferred_element_type=jnp.float32) + f2b_ref[0]

    last = pl.num_programs(1) - 1

    @pl.when(d != last)
    def _():
        tok_ref[...] = x                                     # carry to next depth step

    @pl.when(d == last)
    def _():
        xf = _ln(x, ng_ref[...], nb_ref[...])                # final LayerNorm, fused
        cls = xf[0:1, :]                                     # CLS-token features (1, E)
        # combined = [mobilenet | vit]; concat folded into two matmuls on split weights
        # TODO(synk): nn.Dropout(p=dropout_rate) before `ori` is identity in eval mode.
        out = (jnp.dot(mbn_ref[0], hwm_ref[...], preferred_element_type=jnp.float32)
               + jnp.dot(cls, hwv_ref[...], preferred_element_type=jnp.float32)
               + hb_ref[...])
        o_ref[...] = out.reshape(1, 1, -1)                   # (1, 1, HEAD_OUT)


# ============================ glue (im2col helpers) ===========================

def _conv_taps(x, k, stride, pad):
    """NHWC x -> list of k*k tap arrays, each (B*Ho*Wo, C), tap order (dy, dx)."""
    Bn, H, W, C = x.shape
    xp = jnp.pad(x, ((0, 0), (pad, pad), (pad, pad), (0, 0))) if pad else x
    Ho = (H + 2 * pad - k) // stride + 1
    Wo = (W + 2 * pad - k) // stride + 1
    taps = []
    for dy in range(k):
        for dx in range(k):
            t = xp[:, dy:dy + (Ho - 1) * stride + 1:stride,
                      dx:dx + (Wo - 1) * stride + 1:stride, :]
            taps.append(t.reshape(Bn * Ho * Wo, C))
    return taps, Ho, Wo


def _per_depth_spec(arr):
    nd = arr.ndim
    return pl.BlockSpec((1,) + arr.shape[1:], lambda b, d: (d,) + (0,) * (nd - 1))


def _per_batch_spec(arr):
    nd = arr.ndim
    return pl.BlockSpec((1,) + arr.shape[1:], lambda b, d: (b,) + (0,) * (nd - 1))


def _const_spec(arr):
    nd = arr.ndim
    return pl.BlockSpec(arr.shape, lambda b, d: (0,) * nd)


# =============================== parameter init ===============================

def init_params(key):
    kit = iter(jax.random.split(key, 64))
    bn_s = 1.0 / float(jnp.sqrt(1.0 + BN_EPS))  # folded eval BN (gamma=1,beta=0,mean=0,var=1)

    def conv_w(o, i, k):
        # nn.init.kaiming_normal_(mode='fan_out'): std = sqrt(2 / (O * k * k))
        std = (2.0 / (o * k * k)) ** 0.5
        return std * jax.random.normal(next(kit), (o, i, k, k), jnp.float32)

    def conv_mat(o, i, k, bn=True):
        # OIHW conv weight (optionally folded eval BN) -> (k*k*i, o) matmul weight
        w = conv_w(o, i, k) * (bn_s if bn else 1.0)
        return jnp.transpose(w, (2, 3, 1, 0)).reshape(k * k * i, o)

    def dw_taps(c):
        # depthwise (c,1,3,3) conv (+folded BN) -> (9, 1, c) tap-major weights
        w = conv_w(c, 1, 3) * bn_s
        return jnp.transpose(w.reshape(c, 9), (1, 0)).reshape(9, 1, c)

    def linear(out_f, in_f):
        w = 0.01 * jax.random.normal(next(kit), (out_f, in_f), jnp.float32)
        return w, jnp.zeros((out_f,), jnp.float32)

    z2 = lambda n: jnp.zeros((1, n), jnp.float32)

    stem = conv_mat(16, IN_CH, 3)
    mbn = dict(
        stem_w=jnp.pad(stem, ((0, STEM_K_PAD - stem.shape[0]), (0, 0))),  # K pad 27->32
        stem_b=z2(16),
        b1_exp_w=conv_mat(96, 16, 1), b1_exp_b=z2(96),
        b1_dw_w=dw_taps(96), b1_dw_b=z2(96),
        b1_proj_w=conv_mat(24, 96, 1), b1_proj_b=z2(24),
        b2_exp_w=conv_mat(144, 24, 1), b2_exp_b=z2(144),
        b2_dw_w=dw_taps(144), b2_dw_b=z2(144),
        b2_proj_w=conv_mat(24, 144, 1), b2_proj_b=z2(24),
        last_w=conv_mat(MBN_FEAT, 24, 1), last_b=z2(MBN_FEAT),
    )

    ln1_g, ln1_b, ln2_g, ln2_b = [], [], [], []
    qkvw, qkvb, prw, prb, f1w, f1b, f2w, f2b = [], [], [], [], [], [], [], []
    for _ in range(DEPTH):
        qkv_w, qkv_b = linear(3 * EMBED, EMBED)
        pw_, pb_ = linear(EMBED, EMBED)
        w1, b1 = linear(MLP_HID, EMBED)
        w2, b2 = linear(EMBED, MLP_HID)
        ln1_g.append(jnp.ones((1, EMBED), jnp.float32)); ln1_b.append(z2(EMBED))
        ln2_g.append(jnp.ones((1, EMBED), jnp.float32)); ln2_b.append(z2(EMBED))
        qkvw.append(qkv_w.T)                     # (E, 3E): columns [q | k | v], per head 16-wide
        qkvb.append(qkv_b.reshape(1, 3 * EMBED))
        prw.append(pw_.T); prb.append(pb_.reshape(1, EMBED))
        f1w.append(w1.T); f1b.append(b1.reshape(1, MLP_HID))
        f2w.append(w2.T); f2b.append(b2.reshape(1, EMBED))

    vit = dict(
        patch_w=conv_mat(EMBED, IN_CH, PATCH, bn=False), patch_b=z2(EMBED),
        cls_token=0.02 * jax.random.normal(next(kit), (1, EMBED), jnp.float32),
        pos_embed=0.02 * jax.random.normal(next(kit), (1 + NP, EMBED), jnp.float32),
        ln1_g=jnp.stack(ln1_g), ln1_b=jnp.stack(ln1_b),
        qkv_w=jnp.stack(qkvw), qkv_b=jnp.stack(qkvb),
        proj_w=jnp.stack(prw), proj_b=jnp.stack(prb),
        ln2_g=jnp.stack(ln2_g), ln2_b=jnp.stack(ln2_b),
        fc1_w=jnp.stack(f1w), fc1_b=jnp.stack(f1b),
        fc2_w=jnp.stack(f2w), fc2_b=jnp.stack(f2b),
        norm_g=jnp.ones((1, EMBED), jnp.float32), norm_b=z2(EMBED),
    )

    comb = MBN_FEAT + EMBED
    n_used = N_POS + N_ORI
    pos_w, pos_b = linear(N_POS, comb)
    ori_w, ori_b = linear(N_ORI, comb)
    head_w = jnp.pad(jnp.concatenate([pos_w, ori_w], axis=0).T,         # (comb, 7)
                     ((0, 0), (0, HEAD_OUT - n_used)))                  # pad N 7 -> 8
    head_b = jnp.pad(jnp.concatenate([pos_b, ori_b]).reshape(1, -1),
                     ((0, 0), (0, HEAD_OUT - n_used)))
    head = dict(w_mbn=head_w[:MBN_FEAT], w_vit=head_w[MBN_FEAT:], b=head_b)

    return dict(mbn=mbn, vit=vit, head=head)


# ================================ forward pass ================================

def mobilenet_features(p, x):
    """Mini MobileNetV2 features + global average pool.  x: NHWC -> (B, 1, MBN_FEAT)."""
    Bn = x.shape[0]
    # stem: 3x3/s2 conv (+folded BN + ReLU6), one full-M matmul block, K padded 27->32
    # TODO(synk): the 3x3 im2col for the stem / inverted-residual blocks is still built
    # in XLA (9x activation blow-up); in-kernel tap formation from a VMEM-resident NHWC
    # map would remove that glue but needs strided in-kernel slicing.
    taps, Ho, Wo = _conv_taps(x, 3, 2, 1)
    cols = jnp.concatenate(taps, axis=-1)
    cols = jnp.pad(cols, ((0, 0), (0, STEM_K_PAD - cols.shape[1])))
    stem = matmul_bias_relu6(cols, p["stem_w"], p["stem_b"]).reshape(Bn, Ho, Wo, -1)

    # inverted residual 1: expand -> dw3x3/s2 -> project, fully fused (no residual)
    taps1, H1, W1 = _conv_taps(stem, 3, 2, 1)
    h1 = fused_inverted_residual(jnp.stack(taps1, axis=0),
                                 p["b1_exp_w"], p["b1_exp_b"],
                                 p["b1_dw_w"], p["b1_dw_b"],
                                 p["b1_proj_w"], p["b1_proj_b"],
                                 residual=False).reshape(Bn, H1, W1, -1)

    # inverted residual 2 (stride 1, +residual) + final 1x1 conv + global avg pool
    taps2, _, _ = _conv_taps(h1, 3, 1, 1)
    return fused_invres_last_pool(jnp.stack(taps2, axis=0), Bn,
                                  p["b2_exp_w"], p["b2_exp_b"],
                                  p["b2_dw_w"], p["b2_dw_b"],
                                  p["b2_proj_w"], p["b2_proj_b"],
                                  p["last_w"], p["last_b"])          # (B, 1, MBN_FEAT)


def vit_head_forward(vp, hp, x_nhwc, mbn_feat):
    """Mini ViT (ONE pallas_call over grid (batch, depth)) fused with the [pos|ori] head."""
    Bn = x_nhwc.shape[0]
    # TODO(synk): torchvision Resize uses antialiased bilinear; plain bilinear used here.
    xr = jax.image.resize(x_nhwc, (Bn, VIT_IMG, VIT_IMG, IN_CH), method="bilinear")
    taps, Hp, Wp = _conv_taps(xr, PATCH, PATCH, 0)
    cols = jnp.concatenate(taps, axis=-1).reshape(Bn, NP, KP)     # (B, NP, 192)
    cols = jnp.pad(cols, ((0, 0), (1, T - 1 - NP), (0, 0)))       # patch tokens at rows 1..NP

    # trace-time constants: token base (cls+pos, patch-bias folded in) and pad-key mask
    base = jnp.concatenate([vp["cls_token"] + vp["pos_embed"][0:1],
                            vp["pos_embed"][1:] + vp["patch_b"],
                            jnp.zeros((T - 1 - NP, EMBED), jnp.float32)], axis=0)   # (T, E)
    kmask = jnp.asarray(np.where(np.arange(T) < 1 + NP, 0.0, -1e30)
                        [None, :].astype(np.float32))                               # (1, T)

    flops = Bn * (2 * T * KP * EMBED
                  + DEPTH * (2 * T * EMBED * 3 * EMBED          # fused qkv
                             + HEADS * 4 * T * T * HEAD_DIM     # qk^T + pv
                             + 2 * T * EMBED * EMBED            # proj
                             + 4 * T * EMBED * MLP_HID)         # mlp
                  + 2 * (MBN_FEAT + EMBED) * HEAD_OUT)
    trans = Bn * DEPTH * (HEADS * T * T + T * MLP_HID)
    w_bytes = 4 * sum(vp[k].size for k in (
        "patch_w", "ln1_g", "ln1_b", "qkv_w", "qkv_b", "proj_w", "proj_b",
        "ln2_g", "ln2_b", "fc1_w", "fc1_b", "fc2_w", "fc2_b", "norm_g", "norm_b"))
    byts = w_bytes + 4 * (cols.size + base.size + kmask.size + mbn_feat.size
                          + Bn * HEAD_OUT
                          + sum(hp[k].size for k in ("w_mbn", "w_vit", "b")))

    out = pl.pallas_call(
        functools.partial(_vit_head_kernel, heads=HEADS, head_dim=HEAD_DIM, embed=EMBED),
        out_shape=jax.ShapeDtypeStruct((Bn, 1, HEAD_OUT), jnp.float32),
        grid=(Bn, DEPTH),
        in_specs=[
            _per_batch_spec(cols),
            _const_spec(vp["patch_w"]),
            _const_spec(base), _const_spec(kmask),
            _per_batch_spec(mbn_feat),
            _per_depth_spec(vp["ln1_g"]), _per_depth_spec(vp["ln1_b"]),
            _per_depth_spec(vp["qkv_w"]), _per_depth_spec(vp["qkv_b"]),
            _per_depth_spec(vp["proj_w"]), _per_depth_spec(vp["proj_b"]),
            _per_depth_spec(vp["ln2_g"]), _per_depth_spec(vp["ln2_b"]),
            _per_depth_spec(vp["fc1_w"]), _per_depth_spec(vp["fc1_b"]),
            _per_depth_spec(vp["fc2_w"]), _per_depth_spec(vp["fc2_b"]),
            _const_spec(vp["norm_g"]), _const_spec(vp["norm_b"]),
            _const_spec(hp["w_mbn"]), _const_spec(hp["w_vit"]), _const_spec(hp["b"]),
        ],
        out_specs=pl.BlockSpec((1, 1, HEAD_OUT), lambda b, d: (b, 0, 0)),
        scratch_shapes=[pltpu.VMEM((T, EMBED), jnp.float32)],       # resident token carry
        compiler_params=pltpu.CompilerParams(
            dimension_semantics=("parallel", "arbitrary")),
        cost_estimate=pl.CostEstimate(flops=int(flops), transcendentals=int(trans),
                                      bytes_accessed=int(byts)),
    )(cols, vp["patch_w"], base, kmask, mbn_feat,
      vp["ln1_g"], vp["ln1_b"], vp["qkv_w"], vp["qkv_b"], vp["proj_w"], vp["proj_b"],
      vp["ln2_g"], vp["ln2_b"], vp["fc1_w"], vp["fc1_b"], vp["fc2_w"], vp["fc2_b"],
      vp["norm_g"], vp["norm_b"], hp["w_mbn"], hp["w_vit"], hp["b"])
    return out.reshape(Bn, HEAD_OUT)


def combined_forward(params, x_nchw):
    """(ori, pos) = Combined_ViT_MobileNet(x).  x is NCHW like PyTorch."""
    x = jnp.transpose(x_nchw, (0, 2, 3, 1)).astype(jnp.float32)       # NCHW -> NHWC
    mbn_feat = mobilenet_features(params["mbn"], x)                   # (B, 1, MBN_FEAT)
    out = vit_head_forward(params["vit"], params["head"], x, mbn_feat)  # (B, HEAD_OUT)
    pos = out[:, :N_POS]
    ori = out[:, N_POS:N_POS + N_ORI]
    return ori, pos


# ===================================== main ===================================

if __name__ == "__main__":
    key = jax.random.PRNGKey(0)
    pkey, xkey = jax.random.split(key)
    params = init_params(pkey)
    x = jax.random.normal(xkey, (B, IN_CH, IMG, IMG), jnp.float32)    # NCHW input
    fwd = jax.jit(combined_forward)
    ori, pos = fwd(params, x)
    jax.block_until_ready((ori, pos))
    assert ori.shape == (B, N_ORI) and pos.shape == (B, N_POS)
    assert ori.dtype == jnp.float32 and pos.dtype == jnp.float32
    assert bool(jnp.all(jnp.isfinite(ori))) and bool(jnp.all(jnp.isfinite(pos)))
    print("KERNEL_OK")
</pallas_src>

<mosaic_0001>
module attributes {stable_mosaic.version = 11 : i64} {
  func.func @_mm_bias_relu6_kernel(%arg0: i32, %arg1: memref<512x32xf32, #tpu.memory_space<vmem>>, %arg2: memref<32x16xf32, #tpu.memory_space<vmem>>, %arg3: memref<1x16xf32, #tpu.memory_space<vmem>>, %arg4: memref<512x16xf32, #tpu.memory_space<vmem>>) attributes {dimension_semantics = [#tpu.dimension_semantics<arbitrary>], iteration_bounds = array<i64: 1>, scalar_prefetch = 0 : i64, scratch_operands = 0 : i64, tpu.core_type = #tpu.core_type<tc>, window_params = [{pipeline_mode = #tpu.pipeline_mode<synchronous>, transform_indices = @transform_0, window_bounds = array<i64: 512, 32>}, {pipeline_mode = #tpu.pipeline_mode<synchronous>, transform_indices = @transform_1, window_bounds = array<i64: 32, 16>}, {pipeline_mode = #tpu.pipeline_mode<synchronous>, transform_indices = @transform_2, window_bounds = array<i64: 1, 16>}, {pipeline_mode = #tpu.pipeline_mode<synchronous>, transform_indices = @transform_3, window_bounds = array<i64: 512, 16>}]} {
    %c0 = arith.constant 0 : index
    %c0_0 = arith.constant 0 : index
    %0 = vector.load %arg1[%c0, %c0_0] : memref<512x32xf32, #tpu.memory_space<vmem>>, vector<512x32xf32>
    %c0_1 = arith.constant 0 : index
    %c0_2 = arith.constant 0 : index
    %1 = vector.load %arg2[%c0_1, %c0_2] : memref<32x16xf32, #tpu.memory_space<vmem>>, vector<32x16xf32>
    %cst = arith.constant dense<0.000000e+00> : vector<512x16xf32>
    %2 = tpu.matmul %0, %1, %cst {dimension_numbers = #tpu.dot_dimension_numbers<[1], [0], [0], [1], [0, 0, 1, 1], [], []>} : vector<512x32xf32>, vector<32x16xf32>, vector<512x16xf32> -> vector<512x16xf32>
    %c0_3 = arith.constant 0 : index
    %c0_4 = arith.constant 0 : index
    %3 = vector.load %arg3[%c0_3, %c0_4] : memref<1x16xf32, #tpu.memory_space<vmem>>, vector<1x16xf32>
    %4 = vector.broadcast %3 : vector<1x16xf32> to vector<512x16xf32>
    %5 = arith.addf %2, %4 : vector<512x16xf32>
    %cst_5 = arith.constant 0.000000e+00 : f32
    %cst_6 = arith.constant 6.000000e+00 : f32
    %6 = vector.broadcast %cst_5 : f32 to vector<512x16xf32>
    %7 = arith.maximumf %6, %5 : vector<512x16xf32>
    %8 = vector.broadcast %cst_6 : f32 to vector<512x16xf32>
    %9 = arith.minimumf %8, %7 : vector<512x16xf32>
    %c0_7 = arith.constant 0 : index
    %c0_8 = arith.constant 0 : index
    %10 = vector.load %arg4[%c0_7, %c0_8] : memref<512x16xf32, #tpu.memory_space<vmem>>, vector<512x16xf32>
    tpu.vector_store %arg4[%c0_7, %c0_8], %9 {strides = array<i32>} : memref<512x16xf32, #tpu.memory_space<vmem>>, vector<512x16xf32>,
    return
  }
  func.func @transform_0(%arg0: i32) -> (i32, i32) {
    %c0_i32 = arith.constant 0 : i32
    %c0_i32_0 = arith.constant 0 : i32
    %c0_i32_1 = arith.constant 0 : i32
    return %c0_i32, %c0_i32_0 : i32, i32
  }
  func.func @transform_1(%arg0: i32) -> (i32, i32) {
    %c0_i32 = arith.constant 0 : i32
    %c0_i32_0 = arith.constant 0 : i32
    %c0_i32_1 = arith.constant 0 : i32
    return %c0_i32, %c0_i32_0 : i32, i32
  }
  func.func @transform_2(%arg0: i32) -> (i32, i32) {
    %c0_i32 = arith.constant 0 : i32
    %c0_i32_0 = arith.constant 0 : i32
    %c0_i32_1 = arith.constant 0 : i32
    return %c0_i32, %c0_i32_0 : i32, i32
  }
  func.func @transform_3(%arg0: i32) -> (i32, i32) {
    %c0_i32 = arith.constant 0 : i32
    %c0_i32_0 = arith.constant 0 : i32
    %c0_i32_1 = arith.constant 0 : i32
    return %c0_i32, %c0_i32_0 : i32, i32
  }
}

module attributes {stable_mosaic.version = 11 : i64} {
  func.func @_fused_invres_kernel(%arg0: i32, %arg1: memref<9x128x16xf32, #tpu.memory_space<vmem>>, %arg2: memref<16x96xf32, #tpu.memory_space<vmem>>, %arg3: memref<1x96xf32, #tpu.memory_space<vmem>>, %arg4: memref<9x1x96xf32, #tpu.memory_space<vmem>>, %arg5: memref<1x96xf32, #tpu.memory_space<vmem>>, %arg6: memref<96x24xf32, #tpu.memory_space<vmem>>, %arg7: memref<1x24xf32, #tpu.memory_space<vmem>>, %arg8: memref<128x24xf32, #tpu.memory_space<vmem>>) attributes {dimension_semantics = [#tpu.dimension_semantics<parallel>], iteration_bounds = array<i64: 1>, scalar_prefetch = 0 : i64, scratch_operands = 0 : i64, tpu.core_type = #tpu.core_type<tc>, window_params = [{transform_indices = @transform_0, window_bounds = array<i64: 9, 128, 16>}, {pipeline_mode = #tpu.pipeline_mode<synchronous>, transform_indices = @transform_1, window_bounds = array<i64: 16, 96>}, {pipeline_mode = #tpu.pipeline_mode<synchronous>, transform_indices = @transform_2, window_bounds = array<i64: 1, 96>}, {pipeline_mode = #tpu.pipeline_mode<synchronous>, transform_indices = @transform_3, window_bounds = array<i64: 9, 1, 96>}, {pipeline_mode = #tpu.pipeline_mode<synchronous>, transform_indices = @transform_4, window_bounds = array<i64: 1, 96>}, {pipeline_mode = #tpu.pipeline_mode<synchronous>, transform_indices = @transform_5, window_bounds = array<i64: 96, 24>}, {pipeline_mode = #tpu.pipeline_mode<synchronous>, transform_indices = @transform_6, window_bounds = array<i64: 1, 24>}, {transform_indices = @transform_7, window_bounds = array<i64: 128, 24>}]} {
    %c0 = arith.constant 0 : index
    %c0_0 = arith.constant 0 : index
    %c0_1 = arith.constant 0 : index
    %0 = vector.load %arg1[%c0, %c0_0, %c0_1] : memref<9x128x16xf32, #tpu.memory_space<vmem>>, vector<1x128x16xf32>
    %1 = vector.shape_cast %0 : vector<1x128x16xf32> to vector<128x16xf32>
    %c0_2 = arith.constant 0 : index
    %c0_3 = arith.constant 0 : index
    %2 = vector.load %arg2[%c0_2, %c0_3] : memref<16x96xf32, #tpu.memory_space<vmem>>, vector<16x96xf32>
    %cst = arith.constant dense<0.000000e+00> : vector<128x96xf32>
    %3 = tpu.matmul %1, %2, %cst {dimension_numbers = #tpu.dot_dimension_numbers<[1], [0], [0], [1], [0, 0, 1, 1], [], []>} : vector<128x16xf32>, vector<16x96xf32>, vector<128x96xf32> -> vector<128x96xf32>
    %c0_4 = arith.constant 0 : index
    %c0_5 = arith.constant 0 : index
    %4 = vector.load %arg3[%c0_4, %c0_5] : memref<1x96xf32, #tpu.memory_space<vmem>>, vector<1x96xf32>
    %5 = vector.broadcast %4 : vector<1x96xf32> to vector<128x96xf32>
    %6 = arith.addf %3, %5 : vector<128x96xf32>
    %cst_6 = arith.constant 0.000000e+00 : f32
    %cst_7 = arith.constant 6.000000e+00 : f32
    %7 = vector.broadcast %cst_6 : f32 to vector<128x96xf32>
    %8 = arith.maximumf %7, %6 : vector<128x96xf32>
    %9 = vector.broadcast %cst_7 : f32 to vector<128x96xf32>
    %10 = arith.minimumf %9, %8 : vector<128x96xf32>
    %c0_8 = arith.constant 0 : index
    %c0_9 = arith.constant 0 : index
    %c0_10 = arith.constant 0 : index
    %11 = vector.load %arg4[%c0_8, %c0_9, %c0_10] : memref<9x1x96xf32, #tpu.memory_space<vmem>>, vector<1x1x96xf32>
    %12 = vector.shape_cast %11 : vector<1x1x96xf32> to vector<1x96xf32>
    %13 = vector.broadcast %12 : vector<1x96xf32> to vector<128x96xf32>
    %14 = arith.mulf %10, %13 : vector<128x96xf32>
    %c1 = arith.constant 1 : index
    %c0_11 = arith.constant 0 : index
    %c0_12 = arith.constant 0 : index
    %15 = vector.load %arg1[%c1, %c0_11, %c0_12] : memref<9x128x16xf32, #tpu.memory_space<vmem>>, vector<1x128x16xf32>
    %16 = vector.shape_cast %15 : vector<1x128x16xf32> to vector<128x16xf32>
    %c0_13 = arith.constant 0 : index
    %c0_14 = arith.constant 0 : index
    %17 = vector.load %arg2[%c0_13, %c0_14] : memref<16x96xf32, #tpu.memory_space<vmem>>, vector<16x96xf32>
    %cst_15 = arith.constant dense<0.000000e+00> : vector<128x96xf32>
    %18 = tpu.matmul %16, %17, %cst_15 {dimension_numbers = #tpu.dot_dimension_numbers<[1], [0], [0], [1], [0, 0, 1, 1], [], []>} : vector<128x16xf32>, vector<16x96xf32>, vector<128x96xf32> -> vector<128x96xf32>
    %c0_16 = arith.constant 0 : index
    %c0_17 = arith.constant 0 : index
    %19 = vector.load %arg3[%c0_16, %c0_17] : memref<1x96xf32, #tpu.memory_space<vmem>>, vector<1x96xf32>
    %20 = vector.broadcast %19 : vector<1x96xf32> to vector<128x96xf32>
    %21 = arith.addf %18, %20 : vector<128x96xf32>
    %cst_18 = arith.constant 0.000000e+00 : f32
    %cst_19 = arith.constant 6.000000e+00 : f32
    %22 = vector.broadcast %cst_18 : f32 to vector<128x96xf32>
    %23 = arith.maximumf %22, %21 : vector<128x96xf32>
    %24 = vector.broadcast %cst_19 : f32 to vector<128x96xf32>
    %25 = arith.minimumf %24, %23 : vector<128x96xf32>
    %c1_20 = arith.constant 1 : index
    %c0_21 = arith.constant 0 : index
    %c0_22 = arith.constant 0 : index
    %26 = vector.load %arg4[%c1_20, %c0_21, %c0_22] : memref<9x1x96xf32, #tpu.memory_space<vmem>>, vector<1x1x96xf32>
    %27 = vector.shape_cast %26 : vector<1x1x96xf32> to vector<1x96xf32>
    %28 = vector.broadcast %27 : vector<1x96xf32> to vector<128x96xf32>
    %29 = arith.mulf %25, %28 : vector<128x96xf32>
    %30 = arith.addf %14, %29 : vector<128x96xf32>
    %c2 = arith.constant 2 : index
    %c0_23 = arith.constant 0 : index
    %c0_24 = arith.constant 0 : index
    %31 = vector.load %arg1[%c2, %c0_23, %c0_24] : memref<9x128x16xf32, #tpu.memory_space<vmem>>, vector<1x128x16xf32>
    %32 = vector.shape_cast %31 : vector<1x128x16xf32> to vector<128x16xf32>
    %c0_25 = arith.constant 0 : index
    %c0_26 = arith.constant 0 : index
    %33 = vector.load %arg2[%c0_25, %c0_26] : memref<16x96xf32, #tpu.memory_space<vmem>>, vector<16x96xf32>
    %cst_27 = arith.constant dense<0.000000e+00> : vector<128x96xf32>
    %34 = tpu.matmul %32, %33, %cst_27 {dimension_numbers = #tpu.dot_dimension_numbers<[1], [0], [0], [1], [0, 0, 1, 1], [], []>} : vector<128x16xf32>, vector<16x96xf32>, vector<128x96xf32> -> vector<128x96xf32>
    %c0_28 = arith.constant 0 : index
    %c0_29 = arith.constant 0 : index
    %35 = vector.load %arg3[%c0_28, %c0_29] : memref<1x96xf32, #tpu.memory_space<vmem>>, vector<1x96xf32>
    %36 = vector.broadcast %35 : vector<1x96xf32> to vector<128x96xf32>
    %37 = arith.addf %34, %36 : vector<128x96xf32>
    %cst_30 = arith.constant 0.000000e+00 : f32
    %cst_31 = arith.constant 6.000000e+00 : f32
    %38 = vector.broadcast %cst_30 : f32 to vector<128x96xf32>
    %39 = arith.maximumf %38, %37 : vector<128x96xf32>
    %40 = vector.broadcast %cst_31 : f32 to vector<128x96xf32>
    %41 = arith.minimumf %40, %39 : vector<128x96xf32>
    %c2_32 = arith.constant 2 : index
    %c0_33 = arith.constant 0 : index
    %c0_34 = arith.constant 0 : index
    %42 = vector.load %arg4[%c2_32, %c0_33, %c0_34] : memref<9x1x96xf32, #tpu.memory_space<vmem>>, vector<1x1x96xf32>
    %43 = vector.shape_cast %42 : vector<1x1x96xf32> to vector<1x96xf32>
    %44 = vector.broadcast %43 : vector<1x96xf32> to vector<128x96xf32>
    %45 = arith.mulf %41, %44 : vector<128x96xf32>
    %46 = arith.addf %30, %45 : vector<128x96xf32>
    %c3 = arith.constant 3 : index
    %c0_35 = arith.constant 0 : index
    %c0_36 = arith.constant 0 : index
    %47 = vector.load %arg1[%c3, %c0_35, %c0_36] : memref<9x128x16xf32, #tpu.memory_space<vmem>>, vector<1x128x16xf32>
    %48 = vector.shape_cast %47 : vector<1x128x16xf32> to vector<128x16xf32>
    %c0_37 = arith.constant 0 : index
    %c0_38 = arith.constant 0 : index
    %49 = vector.load %arg2[%c0_37, %c0_38] : memref<16x96xf32, #tpu.memory_space<vmem>>, vector<16x96xf32>
    %cst_39 = arith.constant dense<0.000000e+00> : vector<128x96xf32>
    %50 = tpu.matmul %48, %49, %cst_39 {dimension_numbers = #tpu.dot_dimension_numbers<[1], [0], [0], [1], [0, 0, 1, 1], [], []>} : vector<128x16xf32>, vector<16x96xf32>, vector<128x96xf32> -> vector<128x96xf32>
    %c0_40 = arith.constant 0 : index
    %c0_41 = arith.constant 0 : index
    %51 = vector.load %arg3[%c0_40, %c0_41] : memref<1x96xf32, #tpu.memory_space<vmem>>, vector<1x96xf32>
    %52 = vector.broadcast %51 : vector<1x96xf32> to vector<128x96xf32>
    %53 = arith.addf %50, %52 : vector<128x96xf32>
    %cst_42 = arith.constant 0.000000e+00 : f32
    %cst_43 = arith.constant 6.000000e+00 : f32
    %54 = vector.broadcast %cst_42 : f32 to vector<128x96xf32>
    %55 = arith.maximumf %54, %53 : vector<128x96xf32>
    %56 = vector.broadcast %cst_43 : f32 to vector<128x96xf32>
    %57 = arith.minimumf %56, %55 : vector<128x96xf32>
    %c3_44 = arith.constant 3 : index
    %c0_45 = arith.constant 0 : index
    %c0_46 = arith.constant 0 : index
    %58 = vector.load %arg4[%c3_44, %c0_45, %c0_46] : memref<9x1x96xf32, #tpu.memory_space<vmem>>, vector<1x1x96xf32>
    %59 = vector.shape_cast %58 : vector<1x1x96xf32> to vector<1x96xf32>
    %60 = vector.broadcast %59 : vector<1x96xf32> to vector<128x96xf32>
    %61 = arith.mulf %57, %60 : vector<128x96xf32>
    %62 = arith.addf %46, %61 : vector<128x96xf32>
    %c4 = arith.constant 4 : index
    %c0_47 = arith.constant 0 : index
    %c0_48 = arith.constant 0 : index
    %63 = vector.load %arg1[%c4, %c0_47, %c0_48] : memref<9x128x16xf32, #tpu.memory_space<vmem>>, vector<1x128x16xf32>
    %64 = vector.shape_cast %63 : vector<1x128x16xf32> to vector<128x16xf32>
    %c0_49 = arith.constant 0 : index
    %c0_50 = arith.constant 0 : index
    %65 = vector.load %arg2[%c0_49, %c0_50] : memref<16x96xf32, #tpu.memory_space<vmem>>, vector<16x96xf32>
    %cst_51 = arith.constant dense<0.000000e+00> : vector<128x96xf32>
    %66 = tpu.matmul %64, %65, %cst_51 {dimension_numbers = #tpu.dot_dimension_numbers<[1], [0], [0], [1], [0, 0, 1, 1], [], []>} : vector<128x16xf32>, vector<16x96xf32>, vector<128x96xf32> -> vector<128x96xf32>
    %c0_52 = arith.constant 0 : index
    %c0_53 = arith.constant 0 : index
    %67 = vector.load %arg3[%c0_52, %c0_53] : memref<1x96xf32, #tpu.memory_space<vmem>>, vector<1x96xf32>
    %68 = vector.broadcast %67 : vector<1x96xf32> to vector<128x96xf32>
    %69 = arith.addf %66, %68 : vector<128x96xf32>
    %cst_54 = arith.constant 0.000000e+00 : f32
    %cst_55 = arith.constant 6.000000e+00 : f32
    %70 = vector.broadcast %cst_54 : f32 to vector<128x96xf32>
    %71 = arith.maximumf %70, %69 : vector<128x96xf32>
    %72 = vector.broadcast %cst_55 : f32 to vector<128x96xf32>
    %73 = arith.minimumf %72, %71 : vector<128x96xf32>
    %c4_56 = arith.constant 4 : index
    %c0_57 = arith.constant 0 : index
    %c0_58 = arith.constant 0 : index
    %74 = vector.load %arg4[%c4_56, %c0_57, %c0_58] : memref<9x1x96xf32, #tpu.memory_space<vmem>>, vector<1x1x96xf32>
    %75 = vector.shape_cast %74 : vector<1x1x96xf32> to vector<1x96xf32>
    %76 = vector.broadcast %75 : vector<1x96xf32> to vector<128x96xf32>
    %77 = arith.mulf %73, %76 : vector<128x96xf32>
    %78 = arith.addf %62, %77 : vector<128x96xf32>
    %c5 = arith.constant 5 : index
    %c0_59 = arith.constant 0 : index
    %c0_60 = arith.constant 0 : index
    %79 = vector.load %arg1[%c5, %c0_59, %c0_60] : memref<9x128x16xf32, #tpu.memory_space<vmem>>, vector<1x128x16xf32>
    %80 = vector.shape_cast %79 : vector<1x128x16xf32> to vector<128x16xf32>
    %c0_61 = arith.constant 0 : index
    %c0_62 = arith.constant 0 : index
    %81 = vector.load %arg2[%c0_61, %c0_62] : memref<16x96xf32, #tpu.memory_space<vmem>>, vector<16x96xf32>
    %cst_63 = arith.constant dense<0.000000e+00> : vector<128x96xf32>
    %82 = tpu.matmul %80, %81, %cst_63 {dimension_numbers = #tpu.dot_dimension_numbers<[1], [0], [0], [1], [0, 0, 1, 1], [], []>} : vector<128x16xf32>, vector<16x96xf32>, vector<128x96xf32> -> vector<128x96xf32>
    %c0_64 = arith.constant 0 : index
    %c0_65 = arith.constant 0 : index
    %83 = vector.load %arg3[%c0_64, %c0_65] : memref<1x96xf32, #tpu.memory_space<vmem>>, vector<1x96xf32>
    %84 = vector.broadcast %83 : vector<1x96xf32> to vector<128x96xf32>
    %85 = arith.addf %82, %84 : vector<128x96xf32>
    %cst_66 = arith.constant 0.000000e+00 : f32
    %cst_67 = arith.constant 6.000000e+00 : f32
    %86 = vector.broadcast %cst_66 : f32 to vector<128x96xf32>
    %87 = arith.maximumf %86, %85 : vector<128x96xf32>
    %88 = vector.broadcast %cst_67 : f32 to vector<128x96xf32>
    %89 = arith.minimumf %88, %87 : vector<128x96xf32>
    %c5_68 = arith.constant 5 : index
    %c0_69 = arith.constant 0 : index
    %c0_70 = arith.constant 0 : index
    %90 = vector.load %arg4[%c5_68, %c0_69, %c0_70] : memref<9x1x96xf32, #tpu.memory_space<vmem>>, vector<1x1x96xf32>
    %91 = vector.shape_cast %90 : vector<1x1x96xf32> to vector<1x96xf32>
    %92 = vector.broadcast %91 : vector<1x96xf32> to vector<128x96xf32>
    %93 = arith.mulf %89, %92 : vector<128x96xf32>
    %94 = arith.addf %78, %93 : vector<128x96xf32>
    %c6 = arith.constant 6 : index
    %c0_71 = arith.constant 0 : index
    %c0_72 = arith.constant 0 : index
    %95 = vector.load %arg1[%c6, %c0_71, %c0_72] : memref<9x128x16xf32, #tpu.memory_space<vmem>>, vector<1x128x16xf32>
    %96 = vector.shape_cast %95 : vector<1x128x16xf32> to vector<128x16xf32>
    %c0_73 = arith.constant 0 : index
    %c0_74 = arith.constant 0 : index
    %97 = vector.load %arg2[%c0_73, %c0_74] : memref<16x96xf32, #tpu.memory_space<vmem>>, vector<16x96xf32>
    %cst_75 = arith.constant dense<0.000000e+00> : vector<128x96xf32>
    %98 = tpu.matmul %96, %97, %cst_75 {dimension_numbers = #tpu.dot_dimension_numbers<[1], [0], [0], [1], [0, 0, 1, 1], [], []>} : vector<128x16xf32>, vector<16x96xf32>, vector<128x96xf32> -> vector<128x96xf32>
    %c0_76 = arith.constant 0 : index
    %c0_77 = arith.constant 0 : index
    %99 = vector.load %arg3[%c0_76, %c0_77] : memref<1x96xf32, #tpu.memory_space<vmem>>, vector<1x96xf32>
    %100 = vector.broadcast %99 : vector<1x96xf32> to vector<128x96xf32>
    %101 = arith.addf %98, %100 : vector<128x96xf32>
    %cst_78 = arith.constant 0.000000e+00 : f32
    %cst_79 = arith.constant 6.000000e+00 : f32
    %102 = vector.broadcast %cst_78 : f32 to vector<128x96xf32>
    %103 = arith.maximumf %102, %101 : vector<128x96xf32>
    %104 = vector.broadcast %cst_79 : f32 to vector<128x96xf32>
    %105 = arith.minimumf %104, %103 : vector<128x96xf32>
    %c6_80 = arith.constant 6 : index
    %c0_81 = arith.constant 0 : index
    %c0_82 = arith.constant 0 : index
    %106 = vector.load %arg4[%c6_80, %c0_81, %c0_82] : memref<9x1x96xf32, #tpu.memory_space<vmem>>, vector<1x1x96xf32>
    %107 = vector.shape_cast %106 : vector<1x1x96xf32> to vector<1x96xf32>
    %108 = vector.broadcast %107 : vector<1x96xf32> to vector<128x96xf32>
    %109 = arith.mulf %105, %108 : vector<128x96xf32>
    %110 = arith.addf %94, %109 : vector<128x96xf32>
    %c7 = arith.constant 7 : index
    %c0_83 = arith.constant 0 : index
    %c0_84 = arith.constant 0 : index
    %111 = vector.load %arg1[%c7, %c0_83, %c0_84] : memref<9x128x16xf32, #tpu.memory_space<vmem>>, vector<1x128x16xf32>
    %112 = vector.shape_cast %111 : vector<1x128x16xf32> to vector<128x16xf32>
    %c0_85 = arith.constant 0 : index
    %c0_86 = arith.constant 0 : index
    %113 = vector.load %arg2[%c0_85, %c0_86] : memref<16x96xf32, #tpu.memory_space<vmem>>, vector<16x96xf32>
    %cst_87 = arith.constant dense<0.000000e+00> : vector<128x96xf32>
    %114 = tpu.matmul %112, %113, %cst_87 {dimension_numbers = #tpu.dot_dimension_numbers<[1], [0], [0], [1], [0, 0, 1, 1], [], []>} : vector<128x16xf32>, vector<16x96xf32>, vector<128x96xf32> -> vector<128x96xf32>
    %c0_88 = arith.constant 0 : index
    %c0_89 = arith.constant 0 : index
    %115 = vector.load %arg3[%c0_88, %c0_89] : memref<1x96xf32, #tpu.memory_space<vmem>>, vector<1x96xf32>
    %116 = vector.broadcast %115 : vector<1x96xf32> to vector<128x96xf32>
    %117 = arith.addf %114, %116 : vector<128x96xf32>
    %cst_90 = arith.constant 0.000000e+00 : f32
    %cst_91 = arith.constant 6.000000e+00 : f32
    %118 = vector.broadcast %cst_90 : f32 to vector<128x96xf32>
    %119 = arith.maximumf %118, %117 : vector<128x96xf32>
    %120 = vector.broadcast %cst_91 : f32 to vector<128x96xf32>
    %121 = arith.minimumf %120, %119 : vector<128x96xf32>
    %c7_92 = arith.constant 7 : index
    %c0_93 = arith.constant 0 : index
    %c0_94 = arith.constant 0 : index
    %122 = vector.load %arg4[%c7_92, %c0_93, %c0_94] : memref<9x1x96xf32, #tpu.memory_space<vmem>>, vector<1x1x96xf32>
    %123 = vector.shape_cast %122 : vector<1x1x96xf32> to vector<1x96xf32>
    %124 = vector.broadcast %123 : vector<1x96xf32> to vector<128x96xf32>
    %125 = arith.mulf %121, %124 : vector<128x96xf32>
    %126 = arith.addf %110, %125 : vector<128x96xf32>
    %c8 = arith.constant 8 : index
    %c0_95 = arith.constant 0 : index
    %c0_96 = arith.constant 0 : index
    %127 = vector.load %arg1[%c8, %c0_95, %c0_96] : memref<9x128x16xf32, #tpu.memory_space<vmem>>, vector<1x128x16xf32>
    %128 = vector.shape_cast %127 : vector<1x128x16xf32> to vector<128x16xf32>
    %c0_97 = arith.constant 0 : index
    %c0_98 = arith.constant 0 : index
    %129 = vector.load %arg2[%c0_97, %c0_98] : memref<16x96xf32, #tpu.memory_space<vmem>>, vector<16x96xf32>
    %cst_99 = arith.constant dense<0.000000e+00> : vector<128x96xf32>
    %130 = tpu.matmul %128, %129, %cst_99 {dimension_numbers = #tpu.dot_dimension_numbers<[1], [0], [0], [1], [0, 0, 1, 1], [], []>} : vector<128x16xf32>, vector<16x96xf32>, vector<128x96xf32> -> vector<128x96xf32>
    %c0_100 = arith.constant 0 : index
    %c0_101 = arith.constant 0 : index
    %131 = vector.load %arg3[%c0_100, %c0_101] : memref<1x96xf32, #tpu.memory_space<vmem>>, vector<1x96xf32>
    %132 = vector.broadcast %131 : vector<1x96xf32> to vector<128x96xf32>
    %133 = arith.addf %130, %132 : vector<128x96xf32>
    %cst_102 = arith.constant 0.000000e+00 : f32
    %cst_103 = arith.constant 6.000000e+00 : f32
    %134 = vector.broadcast %cst_102 : f32 to vector<128x96xf32>
    %135 = arith.maximumf %134, %133 : vector<128x96xf32>
    %136 = vector.broadcast %cst_103 : f32 to vector<128x96xf32>
    %137 = arith.minimumf %136, %135 : vector<128x96xf32>
    %c8_104 = arith.constant 8 : index
    %c0_105 = arith.constant 0 : index
    %c0_106 = arith.constant 0 : index
    %138 = vector.load %arg4[%c8_104, %c0_105, %c0_106] : memref<9x1x96xf32, #tpu.memory_space<vmem>>, vector<1x1x96xf32>
    %139 = vector.shape_cast %138 : vector<1x1x96xf32> to vector<1x96xf32>
    %140 = vector.broadcast %139 : vector<1x96xf32> to vector<128x96xf32>
    %141 = arith.mulf %137, %140 : vector<128x96xf32>
    %142 = arith.addf %126, %141 : vector<128x96xf32>
    %c0_107 = arith.constant 0 : index
    %c0_108 = arith.constant 0 : index
    %143 = vector.load %arg5[%c0_107, %c0_108] : memref<1x96xf32, #tpu.memory_space<vmem>>, vector<1x96xf32>
    %144 = vector.broadcast %143 : vector<1x96xf32> to vector<128x96xf32>
    %145 = arith.addf %142, %144 : vector<128x96xf32>
    %cst_109 = arith.constant 0.000000e+00 : f32
    %cst_110 = arith.constant 6.000000e+00 : f32
    %146 = vector.broadcast %cst_109 : f32 to vector<128x96xf32>
    %147 = arith.maximumf %146, %145 : vector<128x96xf32>
    %148 = vector.broadcast %cst_110 : f32 to vector<128x96xf32>
    %149 = arith.minimumf %148, %147 : vector<128x96xf32>
    %c0_111 = arith.constant 0 : index
    %c0_112 = arith.constant 0 : index
    %150 = vector.load %arg6[%c0_111, %c0_112] : memref<96x24xf32, #tpu.memory_space<vmem>>, vector<96x24xf32>
    %cst_113 = arith.constant dense<0.000000e+00> : vector<128x24xf32>
    %151 = tpu.matmul %149, %150, %cst_113 {dimension_numbers = #tpu.dot_dimension_numbers<[1], [0], [0], [1], [0, 0, 1, 1], [], []>} : vector<128x96xf32>, vector<96x24xf32>, vector<128x24xf32> -> vector<128x24xf32>
    %c0_114 = arith.constant 0 : index
    %c0_115 = arith.constant 0 : index
    %152 = vector.load %arg7[%c0_114, %c0_115] : memref<1x24xf32, #tpu.memory_space<vmem>>, vector<1x24xf32>
    %153 = vector.broadcast %152 : vector<1x24xf32> to vector<128x24xf32>
    %154 = arith.addf %151, %153 : vector<128x24xf32>
    %c0_116 = arith.constant 0 : index
    %c0_117 = arith.constant 0 : index
    %155 = vector.load %arg8[%c0_116, %c0_117] : memref<128x24xf32, #tpu.memory_space<vmem>>, vector<128x24xf32>
    tpu.vector_store %arg8[%c0_116, %c0_117], %154 {strides = array<i32>} : memref<128x24xf32, #tpu.memory_space<vmem>>, vector<128x24xf32>,
    return
  }
  func.func @transform_0(%arg0: i32) -> (i32, i32, i32) {
    %c0_i32 = arith.constant 0 : i32
    %c0_i32_0 = arith.constant 0 : i32
    %c0_i32_1 = arith.constant 0 : i32
    return %c0_i32, %arg0, %c0_i32_0 : i32, i32, i32
  }
  func.func @transform_1(%arg0: i32) -> (i32, i32) {
    %c0_i32 = arith.constant 0 : i32
    %c0_i32_0 = arith.constant 0 : i32
    %c0_i32_1 = arith.constant 0 : i32
    return %c0_i32, %c0_i32_0 : i32, i32
  }
  func.func @transform_2(%arg0: i32) -> (i32, i32) {
    %c0_i32 = arith.constant 0 : i32
    %c0_i32_0 = arith.constant 0 : i32
    %c0_i32_1 = arith.constant 0 : i32
    return %c0_i32, %c0_i32_0 : i32, i32
  }
  func.func @transform_3(%arg0: i32) -> (i32, i32, i32) {
    %c0_i32 = arith.constant 0 : i32
    %c0_i32_0 = arith.constant 0 : i32
    %c0_i32_1 = arith.constant 0 : i32
    %c0_i32_2 = arith.constant 0 : i32
    return %c0_i32, %c0_i32_0, %c0_i32_1 : i32, i32, i32
  }
  func.func @transform_4(%arg0: i32) -> (i32, i32) {
    %c0_i32 = arith.constant 0 : i32
    %c0_i32_0 = arith.constant 0 : i32
    %c0_i32_1 = arith.constant 0 : i32
    return %c0_i32, %c0_i32_0 : i32, i32
  }
  func.func @transform_5(%arg0: i32) -> (i32, i32) {
    %c0_i32 = arith.constant 0 : i32
    %c0_i32_0 = arith.constant 0 : i32
    %c0_i32_1 = arith.constant 0 : i32
    return %c0_i32, %c0_i32_0 : i32, i32
  }
  func.func @transform_6(%arg0: i32) -> (i32, i32) {
    %c0_i32 = arith.constant 0 : i32
    %c0_i32_0 = arith.constant 0 : i32
    %c0_i32_1 = arith.constant 0 : i32
    return %c0_i32, %c0_i32_0 : i32, i32
  }
  func.func @transform_7(%arg0: i32) -> (i32, i32) {
    %c0_i32 = arith.constant 0 : i32
    %c0_i32_0 = arith.constant 0 : i32
    return %arg0, %c0_i32 : i32, i32
  }
}

module attributes {stable_mosaic.version = 11 : i64} {
  func.func @_fused_invres_last_pool_kernel(%arg0: i32, %arg1: memref<9x64x24xf32, #tpu.memory_space<vmem>>, %arg2: memref<24x144xf32, #tpu.memory_space<vmem>>, %arg3: memref<1x144xf32, #tpu.memory_space<vmem>>, %arg4: memref<9x1x144xf32, #tpu.memory_space<vmem>>, %arg5: memref<1x144xf32, #tpu.memory_space<vmem>>, %arg6: memref<144x24xf32, #tpu.memory_space<vmem>>, %arg7: memref<1x24xf32, #tpu.memory_space<vmem>>, %arg8: memref<24x64xf32, #tpu.memory_space<vmem>>, %arg9: memref<1x64xf32, #tpu.memory_space<vmem>>, %arg10: memref<1x1x64xf32, #tpu.memory_space<vmem>>) attributes {dimension_semantics = [#tpu.dimension_semantics<parallel>], iteration_bounds = array<i64: 2>, scalar_prefetch = 0 : i64, scratch_operands = 0 : i64, tpu.core_type = #tpu.core_type<tc>, window_params = [{transform_indices = @transform_0, window_bounds = array<i64: 9, 64, 24>}, {pipeline_mode = #tpu.pipeline_mode<synchronous>, transform_indices = @transform_1, window_bounds = array<i64: 24, 144>}, {pipeline_mode = #tpu.pipeline_mode<synchronous>, transform_indices = @transform_2, window_bounds = array<i64: 1, 144>}, {pipeline_mode = #tpu.pipeline_mode<synchronous>, transform_indices = @transform_3, window_bounds = array<i64: 9, 1, 144>}, {pipeline_mode = #tpu.pipeline_mode<synchronous>, transform_indices = @transform_4, window_bounds = array<i64: 1, 144>}, {pipeline_mode = #tpu.pipeline_mode<synchronous>, transform_indices = @transform_5, window_bounds = array<i64: 144, 24>}, {pipeline_mode = #tpu.pipeline_mode<synchronous>, transform_indices = @transform_6, window_bounds = array<i64: 1, 24>}, {pipeline_mode = #tpu.pipeline_mode<synchronous>, transform_indices = @transform_7, window_bounds = array<i64: 24, 64>}, {pipeline_mode = #tpu.pipeline_mode<synchronous>, transform_indices = @transform_8, window_bounds = array<i64: 1, 64>}, {transform_indices = @transform_9, window_bounds = array<i64: 1, 1, 64>}]} {
    %c0 = arith.constant 0 : index
    %c0_0 = arith.constant 0 : index
    %c0_1 = arith.constant 0 : index
    %0 = vector.load %arg1[%c0, %c0_0, %c0_1] : memref<9x64x24xf32, #tpu.memory_space<vmem>>, vector<1x64x24xf32>
    %1 = vector.shape_cast %0 : vector<1x64x24xf32> to vector<64x24xf32>
    %c0_2 = arith.constant 0 : index
    %c0_3 = arith.constant 0 : index
    %2 = vector.load %arg2[%c0_2, %c0_3] : memref<24x144xf32, #tpu.memory_space<vmem>>, vector<24x144xf32>
    %cst = arith.constant dense<0.000000e+00> : vector<64x144xf32>
    %3 = tpu.matmul %1, %2, %cst {dimension_numbers = #tpu.dot_dimension_numbers<[1], [0], [0], [1], [0, 0, 1, 1], [], []>} : vector<64x24xf32>, vector<24x144xf32>, vector<64x144xf32> -> vector<64x144xf32>
    %c0_4 = arith.constant 0 : index
    %c0_5 = arith.constant 0 : index
    %4 = vector.load %arg3[%c0_4, %c0_5] : memref<1x144xf32, #tpu.memory_space<vmem>>, vector<1x144xf32>
    %5 = vector.broadcast %4 : vector<1x144xf32> to vector<64x144xf32>
    %6 = arith.addf %3, %5 : vector<64x144xf32>
    %cst_6 = arith.constant 0.000000e+00 : f32
    %cst_7 = arith.constant 6.000000e+00 : f32
    %7 = vector.broadcast %cst_6 : f32 to vector<64x144xf32>
    %8 = arith.maximumf %7, %6 : vector<64x144xf32>
    %9 = vector.broadcast %cst_7 : f32 to vector<64x144xf32>
    %10 = arith.minimumf %9, %8 : vector<64x144xf32>
    %c0_8 = arith.constant 0 : index
    %c0_9 = arith.constant 0 : index
    %c0_10 = arith.constant 0 : index
    %11 = vector.load %arg4[%c0_8, %c0_9, %c0_10] : memref<9x1x144xf32, #tpu.memory_space<vmem>>, vector<1x1x144xf32>
    %12 = vector.shape_cast %11 : vector<1x1x144xf32> to vector<1x144xf32>
    %13 = vector.broadcast %12 : vector<1x144xf32> to vector<64x144xf32>
    %14 = arith.mulf %10, %13 : vector<64x144xf32>
    %c1 = arith.constant 1 : index
    %c0_11 = arith.constant 0 : index
    %c0_12 = arith.constant 0 : index
    %15 = vector.load %arg1[%c1, %c0_11, %c0_12] : memref<9x64x24xf32, #tpu.memory_space<vmem>>, vector<1x64x24xf32>
    %16 = vector.shape_cast %15 : vector<1x64x24xf32> to vector<64x24xf32>
    %c0_13 = arith.constant 0 : index
    %c0_14 = arith.constant 0 : index
    %17 = vector.load %arg2[%c0_13, %c0_14] : memref<24x144xf32, #tpu.memory_space<vmem>>, vector<24x144xf32>
    %cst_15 = arith.constant dense<0.000000e+00> : vector<64x144xf32>
    %18 = tpu.matmul %16, %17, %cst_15 {dimension_numbers = #tpu.dot_dimension_numbers<[1], [0], [0], [1], [0, 0, 1, 1], [], []>} : vector<64x24xf32>, vector<24x144xf32>, vector<64x144xf32> -> vector<64x144xf32>
    %c0_16 = arith.constant 0 : index
    %c0_17 = arith.constant 0 : index
    %19 = vector.load %arg3[%c0_16, %c0_17] : memref<1x144xf32, #tpu.memory_space<vmem>>, vector<1x144xf32>
    %20 = vector.broadcast %19 : vector<1x144xf32> to vector<64x144xf32>
    %21 = arith.addf %18, %20 : vector<64x144xf32>
    %cst_18 = arith.constant 0.000000e+00 : f32
    %cst_19 = arith.constant 6.000000e+00 : f32
    %22 = vector.broadcast %cst_18 : f32 to vector<64x144xf32>
    %23 = arith.maximumf %22, %21 : vector<64x144xf32>
    %24 = vector.broadcast %cst_19 : f32 to vector<64x144xf32>
    %25 = arith.minimumf %24, %23 : vector<64x144xf32>
    %c1_20 = arith.constant 1 : index
    %c0_21 = arith.constant 0 : index
    %c0_22 = arith.constant 0 : index
    %26 = vector.load %arg4[%c1_20, %c0_21, %c0_22] : memref<9x1x144xf32, #tpu.memory_space<vmem>>, vector<1x1x144xf32>
    %27 = vector.shape_cast %26 : vector<1x1x144xf32> to vector<1x144xf32>
    %28 = vector.broadcast %27 : vector<1x144xf32> to vector<64x144xf32>
    %29 = arith.mulf %25, %28 : vector<64x144xf32>
    %30 = arith.addf %14, %29 : vector<64x144xf32>
    %c2 = arith.constant 2 : index
    %c0_23 = arith.constant 0 : index
    %c0_24 = arith.constant 0 : index
    %31 = vector.load %arg1[%c2, %c0_23, %c0_24] : memref<9x64x24xf32, #tpu.memory_space<vmem>>, vector<1x64x24xf32>
    %32 = vector.shape_cast %31 : vector<1x64x24xf32> to vector<64x24xf32>
    %c0_25 = arith.constant 0 : index
    %c0_26 = arith.constant 0 : index
    %33 = vector.load %arg2[%c0_25, %c0_26] : memref<24x144xf32, #tpu.memory_space<vmem>>, vector<24x144xf32>
    %cst_27 = arith.constant dense<0.000000e+00> : vector<64x144xf32>
    %34 = tpu.matmul %32, %33, %cst_27 {dimension_numbers = #tpu.dot_dimension_numbers<[1], [0], [0], [1], [0, 0, 1, 1], [], []>} : vector<64x24xf32>, vector<24x144xf32>, vector<64x144xf32> -> vector<64x144xf32>
    %c0_28 = arith.constant 0 : index
    %c0_29 = arith.constant 0 : index
    %35 = vector.load %arg3[%c0_28, %c0_29] : memref<1x144xf32, #tpu.memory_space<vmem>>, vector<1x144xf32>
    %36 = vector.broadcast %35 : vector<1x144xf32> to vector<64x144xf32>
    %37 = arith.addf %34, %36 : vector<64x144xf32>
    %cst_30 = arith.constant 0.000000e+00 : f32
    %cst_31 = arith.constant 6.000000e+00 : f32
    %38 = vector.broadcast %cst_30 : f32 to vector<64x144xf32>
    %39 = arith.maximumf %38, %37 : vector<64x144xf32>
    %40 = vector.broadcast %cst_31 : f32 to vector<64x144xf32>
    %41 = arith.minimumf %40, %39 : vector<64x144xf32>
    %c2_32 = arith.constant 2 : index
    %c0_33 = arith.constant 0 : index
    %c0_34 = arith.constant 0 : index
    %42 = vector.load %arg4[%c2_32, %c0_33, %c0_34] : memref<9x1x144xf32, #tpu.memory_space<vmem>>, vector<1x1x144xf32>
    %43 = vector.shape_cast %42 : vector<1x1x144xf32> to vector<1x144xf32>
    %44 = vector.broadcast %43 : vector<1x144xf32> to vector<64x144xf32>
    %45 = arith.mulf %41, %44 : vector<64x144xf32>
    %46 = arith.addf %30, %45 : vector<64x144xf32>
    %c3 = arith.constant 3 : index
    %c0_35 = arith.constant 0 : index
    %c0_36 = arith.constant 0 : index
    %47 = vector.load %arg1[%c3, %c0_35, %c0_36] : memref<9x64x24xf32, #tpu.memory_space<vmem>>, vector<1x64x24xf32>
    %48 = vector.shape_cast %47 : vector<1x64x24xf32> to vector<64x24xf32>
    %c0_37 = arith.constant 0 : index
    %c0_38 = arith.constant 0 : index
    %49 = vector.load %arg2[%c0_37, %c0_38] : memref<24x144xf32, #tpu.memory_space<vmem>>, vector<24x144xf32>
    %cst_39 = arith.constant dense<0.000000e+00> : vector<64x144xf32>
    %50 = tpu.matmul %48, %49, %cst_39 {dimension_numbers = #tpu.dot_dimension_numbers<[1], [0], [0], [1], [0, 0, 1, 1], [], []>} : vector<64x24xf32>, vector<24x144xf32>, vector<64x144xf32> -> vector<64x144xf32>
    %c0_40 = arith.constant 0 : index
    %c0_41 = arith.constant 0 : index
    %51 = vector.load %arg3[%c0_40, %c0_41] : memref<1x144xf32, #tpu.memory_space<vmem>>, vector<1x144xf32>
    %52 = vector.broadcast %51 : vector<1x144xf32> to vector<64x144xf32>
    %53 = arith.addf %50, %52 : vector<64x144xf32>
    %cst_42 = arith.constant 0.000000e+00 : f32
    %cst_43 = arith.constant 6.000000e+00 : f32
    %54 = vector.broadcast %cst_42 : f32 to vector<64x144xf32>
    %55 = arith.maximumf %54, %53 : vector<64x144xf32>
    %56 = vector.broadcast %cst_43 : f32 to vector<64x144xf32>
    %57 = arith.minimumf %56, %55 : vector<64x144xf32>
    %c3_44 = arith.constant 3 : index
    %c0_45 = arith.constant 0 : index
    %c0_46 = arith.constant 0 : index
    %58 = vector.load %arg4[%c3_44, %c0_45, %c0_46] : memref<9x1x144xf32, #tpu.memory_space<vmem>>, vector<1x1x144xf32>
    %59 = vector.shape_cast %58 : vector<1x1x144xf32> to vector<1x144xf32>
    %60 = vector.broadcast %59 : vector<1x144xf32> to vector<64x144xf32>
    %61 = arith.mulf %57, %60 : vector<64x144xf32>
    %62 = arith.addf %46, %61 : vector<64x144xf32>
    %c4 = arith.constant 4 : index
    %c0_47 = arith.constant 0 : index
    %c0_48 = arith.constant 0 : index
    %63 = vector.load %arg1[%c4, %c0_47, %c0_48] : memref<9x64x24xf32, #tpu.memory_space<vmem>>, vector<1x64x24xf32>
    %64 = vector.shape_cast %63 : vector<1x64x24xf32> to vector<64x24xf32>
    %c0_49 = arith.constant 0 : index
    %c0_50 = arith.constant 0 : index
    %65 = vector.load %arg2[%c0_49, %c0_50] : memref<24x144xf32, #tpu.memory_space<vmem>>, vector<24x144xf32>
    %cst_51 = arith.constant dense<0.000000e+00> : vector<64x144xf32>
    %66 = tpu.matmul %64, %65, %cst_51 {dimension_numbers = #tpu.dot_dimension_numbers<[1], [0], [0], [1], [0, 0, 1, 1], [], []>} : vector<64x24xf32>, vector<24x144xf32>, vector<64x144xf32> -> vector<64x144xf32>
    %c0_52 = arith.constant 0 : index
    %c0_53 = arith.constant 0 : index
    %67 = vector.load %arg3[%c0_52, %c0_53] : memref<1x144xf32, #tpu.memory_space<vmem>>, vector<1x144xf32>
    %68 = vector.broadcast %67 : vector<1x144xf32> to vector<64x144xf32>
    %69 = arith.addf %66, %68 : vector<64x144xf32>
    %cst_54 = arith.constant 0.000000e+00 : f32
    %cst_55 = arith.constant 6.000000e+00 : f32
    %70 = vector.broadcast %cst_54 : f32 to vector<64x144xf32>
    %71 = arith.maximumf %70, %69 : vector<64x144xf32>
    %72 = vector.broadcast %cst_55 : f32 to vector<64x144xf32>
    %73 = arith.minimumf %72, %71 : vector<64x144xf32>
    %c4_56 = arith.constant 4 : index
    %c0_57 = arith.constant 0 : index
    %c0_58 = arith.constant 0 : index
    %74 = vector.load %arg4[%c4_56, %c0_57, %c0_58] : memref<9x1x144xf32, #tpu.memory_space<vmem>>, vector<1x1x144xf32>
    %75 = vector.shape_cast %74 : vector<1x1x144xf32> to vector<1x144xf32>
    %76 = vector.broadcast %75 : vector<1x144xf32> to vector<64x144xf32>
    %77 = arith.mulf %73, %76 : vector<64x144xf32>
    %78 = arith.addf %62, %77 : vector<64x144xf32>
    %c5 = arith.constant 5 : index
    %c0_59 = arith.constant 0 : index
    %c0_60 = arith.constant 0 : index
    %79 = vector.load %arg1[%c5, %c0_59, %c0_60] : memref<9x64x24xf32, #tpu.memory_space<vmem>>, vector<1x64x24xf32>
    %80 = vector.shape_cast %79 : vector<1x64x24xf32> to vector<64x24xf32>
    %c0_61 = arith.constant 0 : index
    %c0_62 = arith.constant 0 : index
    %81 = vector.load %arg2[%c0_61, %c0_62] : memref<24x144xf32, #tpu.memory_space<vmem>>, vector<24x144xf32>
    %cst_63 = arith.constant dense<0.000000e+00> : vector<64x144xf32>
    %82 = tpu.matmul %80, %81, %cst_63 {dimension_numbers = #tpu.dot_dimension_numbers<[1], [0], [0], [1], [0, 0, 1, 1], [], []>} : vector<64x24xf32>, vector<24x144xf32>, vector<64x144xf32> -> vector<64x144xf32>
    %c0_64 = arith.constant 0 : index
    %c0_65 = arith.constant 0 : index
    %83 = vector.load %arg3[%c0_64, %c0_65] : memref<1x144xf32, #tpu.memory_space<vmem>>, vector<1x144xf32>
    %84 = vector.broadcast %83 : vector<1x144xf32> to vector<64x144xf32>
    %85 = arith.addf %82, %84 : vector<64x144xf32>
    %cst_66 = arith.constant 0.000000e+00 : f32
    %cst_67 = arith.constant 6.000000e+00 : f32
    %86 = vector.broadcast %cst_66 : f32 to vector<64x144xf32>
    %87 = arith.maximumf %86, %85 : vector<64x144xf32>
    %88 = vector.broadcast %cst_67 : f32 to vector<64x144xf32>
    %89 = arith.minimumf %88, %87 : vector<64x144xf32>
    %c5_68 = arith.constant 5 : index
    %c0_69 = arith.constant 0 : index
    %c0_70 = arith.constant 0 : index
    %90 = vector.load %arg4[%c5_68, %c0_69, %c0_70] : memref<9x1x144xf32, #tpu.memory_space<vmem>>, vector<1x1x144xf32>
    %91 = vector.shape_cast %90 : vector<1x1x144xf32> to vector<1x144xf32>
    %92 = vector.broadcast %91 : vector<1x144xf32> to vector<64x144xf32>
    %93 = arith.mulf %89, %92 : vector<64x144xf32>
    %94 = arith.addf %78, %93 : vector<64x144xf32>
    %c6 = arith.constant 6 : index
    %c0_71 = arith.constant 0 : index
    %c0_72 = arith.constant 0 : index
    %95 = vector.load %arg1[%c6, %c0_71, %c0_72] : memref<9x64x24xf32, #tpu.memory_space<vmem>>, vector<1x64x24xf32>
    %96 = vector.shape_cast %95 : vector<1x64x24xf32> to vector<64x24xf32>
    %c0_73 = arith.constant 0 : index
    %c0_74 = arith.constant 0 : index
    %97 = vector.load %arg2[%c0_73, %c0_74] : memref<24x144xf32, #tpu.memory_space<vmem>>, vector<24x144xf32>
    %cst_75 = arith.constant dense<0.000000e+00> : vector<64x144xf32>
    %98 = tpu.matmul %96, %97, %cst_75 {dimension_numbers = #tpu.dot_dimension_numbers<[1], [0], [0], [1], [0, 0, 1, 1], [], []>} : vector<64x24xf32>, vector<24x144xf32>, vector<64x144xf32> -> vector<64x144xf32>
    %c0_76 = arith.constant 0 : index
    %c0_77 = arith.constant 0 : index
    %99 = vector.load %arg3[%c0_76, %c0_77] : memref<1x144xf32, #tpu.memory_space<vmem>>, vector<1x144xf32>
    %100 = vector.broadcast %99 : vector<1x144xf32> to vector<64x144xf32>
    %101 = arith.addf %98, %100 : vector<64x144xf32>
    %cst_78 = arith.constant 0.000000e+00 : f32
    %cst_79 = arith.constant 6.000000e+00 : f32
    %102 = vector.broadcast %cst_78 : f32 to vector<64x144xf32>
    %103 = arith.maximumf %102, %101 : vector<64x144xf32>
    %104 = vector.broadcast %cst_79 : f32 to vector<64x144xf32>
    %105 = arith.minimumf %104, %103 : vector<64x144xf32>
    %c6_80 = arith.constant 6 : index
    %c0_81 = arith.constant 0 : index
    %c0_82 = arith.constant 0 : index
    %106 = vector.load %arg4[%c6_80, %c0_81, %c0_82] : memref<9x1x144xf32, #tpu.memory_space<vmem>>, vector<1x1x144xf32>
    %107 = vector.shape_cast %106 : vector<1x1x144xf32> to vector<1x144xf32>
    %108 = vector.broadcast %107 : vector<1x144xf32> to vector<64x144xf32>
    %109 = arith.mulf %105, %108 : vector<64x144xf32>
    %110 = arith.addf %94, %109 : vector<64x144xf32>
    %c7 = arith.constant 7 : index
    %c0_83 = arith.constant 0 : index
    %c0_84 = arith.constant 0 : index
    %111 = vector.load %arg1[%c7, %c0_83, %c0_84] : memref<9x64x24xf32, #tpu.memory_space<vmem>>, vector<1x64x24xf32>
    %112 = vector.shape_cast %111 : vector<1x64x24xf32> to vector<64x24xf32>
    %c0_85 = arith.constant 0 : index
    %c0_86 = arith.constant 0 : index
    %113 = vector.load %arg2[%c0_85, %c0_86] : memref<24x144xf32, #tpu.memory_space<vmem>>, vector<24x144xf32>
    %cst_87 = arith.constant dense<0.000000e+00> : vector<64x144xf32>
    %114 = tpu.matmul %112, %113, %cst_87 {dimension_numbers = #tpu.dot_dimension_numbers<[1], [0], [0], [1], [0, 0, 1, 1], [], []>} : vector<64x24xf32>, vector<24x144xf32>, vector<64x144xf32> -> vector<64x144xf32>
    %c0_88 = arith.constant 0 : index
    %c0_89 = arith.constant 0 : index
    %115 = vector.load %arg3[%c0_88, %c0_89] : memref<1x144xf32, #tpu.memory_space<vmem>>, vector<1x144xf32>
    %116 = vector.broadcast %115 : vector<1x144xf32> to vector<64x144xf32>
    %117 = arith.addf %114, %116 : vector<64x144xf32>
    %cst_90 = arith.constant 0.000000e+00 : f32
    %cst_91 = arith.constant 6.000000e+00 : f32
    %118 = vector.broadcast %cst_90 : f32 to vector<64x144xf32>
    %119 = arith.maximumf %118, %117 : vector<64x144xf32>
    %120 = vector.broadcast %cst_91 : f32 to vector<64x144xf32>
    %121 = arith.minimumf %120, %119 : vector<64x144xf32>
    %c7_92 = arith.constant 7 : index
    %c0_93 = arith.constant 0 : index
    %c0_94 = arith.constant 0 : index
    %122 = vector.load %arg4[%c7_92, %c0_93, %c0_94] : memref<9x1x144xf32, #tpu.memory_space<vmem>>, vector<1x1x144xf32>
    %123 = vector.shape_cast %122 : vector<1x1x144xf32> to vector<1x144xf32>
    %124 = vector.broadcast %123 : vector<1x144xf32> to vector<64x144xf32>
    %125 = arith.mulf %121, %124 : vector<64x144xf32>
    %126 = arith.addf %110, %125 : vector<64x144xf32>
    %c8 = arith.constant 8 : index
    %c0_95 = arith.constant 0 : index
    %c0_96 = arith.constant 0 : index
    %127 = vector.load %arg1[%c8, %c0_95, %c0_96] : memref<9x64x24xf32, #tpu.memory_space<vmem>>, vector<1x64x24xf32>
    %128 = vector.shape_cast %127 : vector<1x64x24xf32> to vector<64x24xf32>
    %c0_97 = arith.constant 0 : index
    %c0_98 = arith.constant 0 : index
    %129 = vector.load %arg2[%c0_97, %c0_98] : memref<24x144xf32, #tpu.memory_space<vmem>>, vector<24x144xf32>
    %cst_99 = arith.constant dense<0.000000e+00> : vector<64x144xf32>
    %130 = tpu.matmul %128, %129, %cst_99 {dimension_numbers = #tpu.dot_dimension_numbers<[1], [0], [0], [1], [0, 0, 1, 1], [], []>} : vector<64x24xf32>, vector<24x144xf32>, vector<64x144xf32> -> vector<64x144xf32>
    %c0_100 = arith.constant 0 : index
    %c0_101 = arith.constant 0 : index
    %131 = vector.load %arg3[%c0_100, %c0_101] : memref<1x144xf32, #tpu.memory_space<vmem>>, vector<1x144xf32>
    %132 = vector.broadcast %131 : vector<1x144xf32> to vector<64x144xf32>
    %133 = arith.addf %130, %132 : vector<64x144xf32>
    %cst_102 = arith.constant 0.000000e+00 : f32
    %cst_103 = arith.constant 6.000000e+00 : f32
    %134 = vector.broadcast %cst_102 : f32 to vector<64x144xf32>
    %135 = arith.maximumf %134, %133 : vector<64x144xf32>
    %136 = vector.broadcast %cst_103 : f32 to vector<64x144xf32>
    %137 = arith.minimumf %136, %135 : vector<64x144xf32>
    %c8_104 = arith.constant 8 : index
    %c0_105 = arith.constant 0 : index
    %c0_106 = arith.constant 0 : index
    %138 = vector.load %arg4[%c8_104, %c0_105, %c0_106] : memref<9x1x144xf32, #tpu.memory_space<vmem>>, vector<1x1x144xf32>
    %139 = vector.shape_cast %138 : vector<1x1x144xf32> to vector<1x144xf32>
    %140 = vector.broadcast %139 : vector<1x144xf32> to vector<64x144xf32>
    %141 = arith.mulf %137, %140 : vector<64x144xf32>
    %142 = arith.addf %126, %141 : vector<64x144xf32>
    %c0_107 = arith.constant 0 : index
    %c0_108 = arith.constant 0 : index
    %143 = vector.load %arg5[%c0_107, %c0_108] : memref<1x144xf32, #tpu.memory_space<vmem>>, vector<1x144xf32>
    %144 = vector.broadcast %143 : vector<1x144xf32> to vector<64x144xf32>
    %145 = arith.addf %142, %144 : vector<64x144xf32>
    %cst_109 = arith.constant 0.000000e+00 : f32
    %cst_110 = arith.constant 6.000000e+00 : f32
    %146 = vector.broadcast %cst_109 : f32 to vector<64x144xf32>
    %147 = arith.maximumf %146, %145 : vector<64x144xf32>
    %148 = vector.broadcast %cst_110 : f32 to vector<64x144xf32>
    %149 = arith.minimumf %148, %147 : vector<64x144xf32>
    %c0_111 = arith.constant 0 : index
    %c0_112 = arith.constant 0 : index
    %150 = vector.load %arg6[%c0_111, %c0_112] : memref<144x24xf32, #tpu.memory_space<vmem>>, vector<144x24xf32>
    %cst_113 = arith.constant dense<0.000000e+00> : vector<64x24xf32>
    %151 = tpu.matmul %149, %150, %cst_113 {dimension_numbers = #tpu.dot_dimension_numbers<[1], [0], [0], [1], [0, 0, 1, 1], [], []>} : vector<64x144xf32>, vector<144x24xf32>, vector<64x24xf32> -> vector<64x24xf32>
    %c0_114 = arith.constant 0 : index
    %c0_115 = arith.constant 0 : index
    %152 = vector.load %arg7[%c0_114, %c0_115] : memref<1x24xf32, #tpu.memory_space<vmem>>, vector<1x24xf32>
    %153 = vector.broadcast %152 : vector<1x24xf32> to vector<64x24xf32>
    %154 = arith.addf %151, %153 : vector<64x24xf32>
    %c4_116 = arith.constant 4 : index
    %c0_117 = arith.constant 0 : index
    %c0_118 = arith.constant 0 : index
    %155 = vector.load %arg1[%c4_116, %c0_117, %c0_118] : memref<9x64x24xf32, #tpu.memory_space<vmem>>, vector<1x64x24xf32>
    %156 = vector.shape_cast %155 : vector<1x64x24xf32> to vector<64x24xf32>
    %157 = arith.addf %154, %156 : vector<64x24xf32>
    %c0_119 = arith.constant 0 : index
    %c0_120 = arith.constant 0 : index
    %158 = vector.load %arg8[%c0_119, %c0_120] : memref<24x64xf32, #tpu.memory_space<vmem>>, vector<24x64xf32>
    %cst_121 = arith.constant dense<0.000000e+00> : vector<64x64xf32>
    %159 = tpu.matmul %157, %158, %cst_121 {dimension_numbers = #tpu.dot_dimension_numbers<[1], [0], [0], [1], [0, 0, 1, 1], [], []>} : vector<64x24xf32>, vector<24x64xf32>, vector<64x64xf32> -> vector<64x64xf32>
    %c0_122 = arith.constant 0 : index
    %c0_123 = arith.constant 0 : index
    %160 = vector.load %arg9[%c0_122, %c0_123] : memref<1x64xf32, #tpu.memory_space<vmem>>, vector<1x64xf32>
    %161 = vector.broadcast %160 : vector<1x64xf32> to vector<64x64xf32>
    %162 = arith.addf %159, %161 : vector<64x64xf32>
    %cst_124 = arith.constant 0.000000e+00 : f32
    %cst_125 = arith.constant 6.000000e+00 : f32
    %163 = vector.broadcast %cst_124 : f32 to vector<64x64xf32>
    %164 = arith.maximumf %163, %162 : vector<64x64xf32>
    %165 = vector.broadcast %cst_125 : f32 to vector<64x64xf32>
    %166 = arith.minimumf %165, %164 : vector<64x64xf32>
    %cst_126 = arith.constant dense<0.000000e+00> : vector<64xf32>
    %167 = vector.multi_reduction <add>, %166, %cst_126 [0] : vector<64x64xf32> to vector<64xf32>
    %168 = vector.shape_cast %167 : vector<64xf32> to vector<1x64xf32>
    %cst_127 = arith.constant 6.400000e+01 : f32
    %169 = vector.broadcast %cst_127 : f32 to vector<1x64xf32>
    %170 = arith.divf %168, %169 : vector<1x64xf32>
    %171 = vector.shape_cast %170 : vector<1x64xf32> to vector<1x1x64xf32>
    %c0_128 = arith.constant 0 : index
    %c0_129 = arith.constant 0 : index
    %c0_130 = arith.constant 0 : index
    %172 = vector.load %arg10[%c0_128, %c0_129, %c0_130] : memref<1x1x64xf32, #tpu.memory_space<vmem>>, vector<1x1x64xf32>
    tpu.vector_store %arg10[%c0_128, %c0_129, %c0_130], %171 {strides = array<i32>} : memref<1x1x64xf32, #tpu.memory_space<vmem>>, vector<1x1x64xf32>,
    return
  }
  func.func @transform_0(%arg0: i32) -> (i32, i32, i32) {
    %c0_i32 = arith.constant 0 : i32
    %c0_i32_0 = arith.constant 0 : i32
    %c0_i32_1 = arith.constant 0 : i32
    return %c0_i32, %arg0, %c0_i32_0 : i32, i32, i32
  }
  func.func @transform_1(%arg0: i32) -> (i32, i32) {
    %c0_i32 = arith.constant 0 : i32
    %c0_i32_0 = arith.constant 0 : i32
    %c0_i32_1 = arith.constant 0 : i32
    return %c0_i32, %c0_i32_0 : i32, i32
  }
  func.func @transform_2(%arg0: i32) -> (i32, i32) {
    %c0_i32 = arith.constant 0 : i32
    %c0_i32_0 = arith.constant 0 : i32
    %c0_i32_1 = arith.constant 0 : i32
    return %c0_i32, %c0_i32_0 : i32, i32
  }
  func.func @transform_3(%arg0: i32) -> (i32, i32, i32) {
    %c0_i32 = arith.constant 0 : i32
    %c0_i32_0 = arith.constant 0 : i32
    %c0_i32_1 = arith.constant 0 : i32
    %c0_i32_2 = arith.constant 0 : i32
    return %c0_i32, %c0_i32_0, %c0_i32_1 : i32, i32, i32
  }
  func.func @transform_4(%arg0: i32) -> (i32, i32) {
    %c0_i32 = arith.constant 0 : i32
    %c0_i32_0 = arith.constant 0 : i32
    %c0_i32_1 = arith.constant 0 : i32
    return %c0_i32, %c0_i32_0 : i32, i32
  }
  func.func @transform_5(%arg0: i32) -> (i32, i32) {
    %c0_i32 = arith.constant 0 : i32
    %c0_i32_0 = arith.constant 0 : i32
    %c0_i32_1 = arith.constant 0 : i32
    return %c0_i32, %c0_i32_0 : i32, i32
  }
  func.func @transform_6(%arg0: i32) -> (i32, i32) {
    %c0_i32 = arith.constant 0 : i32
    %c0_i32_0 = arith.constant 0 : i32
    %c0_i32_1 = arith.constant 0 : i32
    return %c0_i32, %c0_i32_0 : i32, i32
  }
  func.func @transform_7(%arg0: i32) -> (i32, i32) {
    %c0_i32 = arith.constant 0 : i32
    %c0_i32_0 = arith.constant 0 : i32
    %c0_i32_1 = arith.constant 0 : i32
    return %c0_i32, %c0_i32_0 : i32, i32
  }
  func.func @transform_8(%arg0: i32) -> (i32, i32) {
    %c0_i32 = arith.constant 0 : i32
    %c0_i32_0 = arith.constant 0 : i32
    %c0_i32_1 = arith.constant 0 : i32
    return %c0_i32, %c0_i32_0 : i32, i32
  }
  func.func @transform_9(%arg0: i32) -> (i32, i32, i32) {
    %c0_i32 = arith.constant 0 : i32
    %c0_i32_0 = arith.constant 0 : i32
    %c0_i32_1 = arith.constant 0 : i32
    return %arg0, %c0_i32, %c0_i32_0 : i32, i32, i32
  }
}

module attributes {stable_mosaic.version = 11 : i64} {
  func.func @_vit_head_kernel(%arg0: i32, %arg1: i32, %arg2: memref<1x8x192xf32, #tpu.memory_space<vmem>>, %arg3: memref<192x32xf32, #tpu.memory_space<vmem>>, %arg4: memref<8x32xf32, #tpu.memory_space<vmem>>, %arg5: memref<1x8xf32, #tpu.memory_space<vmem>>, %arg6: memref<1x1x64xf32, #tpu.memory_space<vmem>>, %arg7: memref<1x1x32xf32, #tpu.memory_space<vmem>>, %arg8: memref<1x1x32xf32, #tpu.memory_space<vmem>>, %arg9: memref<1x32x96xf32, #tpu.memory_space<vmem>>, %arg10: memref<1x1x96xf32, #tpu.memory_space<vmem>>, %arg11: memref<1x32x32xf32, #tpu.memory_space<vmem>>, %arg12: memref<1x1x32xf32, #tpu.memory_space<vmem>>, %arg13: memref<1x1x32xf32, #tpu.memory_space<vmem>>, %arg14: memref<1x1x32xf32, #tpu.memory_space<vmem>>, %arg15: memref<1x32x128xf32, #tpu.memory_space<vmem>>, %arg16: memref<1x1x128xf32, #tpu.memory_space<vmem>>, %arg17: memref<1x128x32xf32, #tpu.memory_space<vmem>>, %arg18: memref<1x1x32xf32, #tpu.memory_space<vmem>>, %arg19: memref<1x32xf32, #tpu.memory_space<vmem>>, %arg20: memref<1x32xf32, #tpu.memory_space<vmem>>, %arg21: memref<64x8xf32, #tpu.memory_space<vmem>>, %arg22: memref<32x8xf32, #tpu.memory_space<vmem>>, %arg23: memref<1x8xf32, #tpu.memory_space<vmem>>, %arg24: memref<1x1x8xf32, #tpu.memory_space<vmem>>, %arg25: memref<8x32xf32, #tpu.memory_space<vmem>>) attributes {dimension_semantics = [#tpu.dimension_semantics<parallel>, #tpu.dimension_semantics<arbitrary>], iteration_bounds = array<i64: 2, 2>, scalar_prefetch = 0 : i64, scratch_operands = 1 : i64, tpu.core_type = #tpu.core_type<tc>, window_params = [{transform_indices = @transform_0, window_bounds = array<i64: 1, 8, 192>}, {pipeline_mode = #tpu.pipeline_mode<synchronous>, transform_indices = @transform_1, window_bounds = array<i64: 192, 32>}, {pipeline_mode = #tpu.pipeline_mode<synchronous>, transform_indices = @transform_2, window_bounds = array<i64: 8, 32>}, {pipeline_mode = #tpu.pipeline_mode<synchronous>, transform_indices = @transform_3, window_bounds = array<i64: 1, 8>}, {transform_indices = @transform_4, window_bounds = array<i64: 1, 1, 64>}, {transform_indices = @transform_5, window_bounds = array<i64: 1, 1, 32>}, {transform_indices = @transform_6, window_bounds = array<i64: 1, 1, 32>}, {transform_indices = @transform_7, window_bounds = array<i64: 1, 32, 96>}, {transform_indices = @transform_8, window_bounds = array<i64: 1, 1, 96>}, {transform_indices = @transform_9, window_bounds = array<i64: 1, 32, 32>}, {transform_indices = @transform_10, window_bounds = array<i64: 1, 1, 32>}, {transform_indices = @transform_11, window_bounds = array<i64: 1, 1, 32>}, {transform_indices = @transform_12, window_bounds = array<i64: 1, 1, 32>}, {transform_indices = @transform_13, window_bounds = array<i64: 1, 32, 128>}, {transform_indices = @transform_14, window_bounds = array<i64: 1, 1, 128>}, {transform_indices = @transform_15, window_bounds = array<i64: 1, 128, 32>}, {transform_indices = @transform_16, window_bounds = array<i64: 1, 1, 32>}, {pipeline_mode = #tpu.pipeline_mode<synchronous>, transform_indices = @transform_17, window_bounds = array<i64: 1, 32>}, {pipeline_mode = #tpu.pipeline_mode<synchronous>, transform_indices = @transform_18, window_bounds = array<i64: 1, 32>}, {pipeline_mode = #tpu.pipeline_mode<synchronous>, transform_indices = @transform_19, window_bounds = array<i64: 64, 8>}, {pipeline_mode = #tpu.pipeline_mode<synchronous>, transform_indices = @transform_20, window_bounds = array<i64: 32, 8>}, {pipeline_mode = #tpu.pipeline_mode<synchronous>, transform_indices = @transform_21, window_bounds = array<i64: 1, 8>}, {transform_indices = @transform_22, window_bounds = array<i64: 1, 1, 8>}]} {
    %c0_i32 = arith.constant 0 : i32
    %0 = arith.cmpi eq, %arg1, %c0_i32 : i32
    %1 = arith.extui %0 : i1 to i32
    %c0_i32_0 = arith.constant 0 : i32
    %2 = arith.cmpi ne, %1, %c0_i32_0 : i32
    scf.if %2 {
      %c0_72 = arith.constant 0 : index
      %c0_73 = arith.constant 0 : index
      %146 = vector.load %arg4[%c0_72, %c0_73] : memref<8x32xf32, #tpu.memory_space<vmem>>, vector<8x32xf32>
      %c0_74 = arith.constant 0 : index
      %c0_75 = arith.constant 0 : index
      %c0_76 = arith.constant 0 : index
      %147 = vector.load %arg2[%c0_74, %c0_75, %c0_76] : memref<1x8x192xf32, #tpu.memory_space<vmem>>, vector<1x8x192xf32>
      %148 = vector.shape_cast %147 : vector<1x8x192xf32> to vector<8x192xf32>
      %c0_77 = arith.constant 0 : index
      %c0_78 = arith.constant 0 : index
      %149 = vector.load %arg3[%c0_77, %c0_78] : memref<192x32xf32, #tpu.memory_space<vmem>>, vector<192x32xf32>
      %cst_79 = arith.constant dense<0.000000e+00> : vector<8x32xf32>
      %150 = tpu.matmul %148, %149, %cst_79 {dimension_numbers = #tpu.dot_dimension_numbers<[1], [0], [0], [1], [0, 0, 1, 1], [], []>} : vector<8x192xf32>, vector<192x32xf32>, vector<8x32xf32> -> vector<8x32xf32>
      %151 = arith.addf %146, %150 : vector<8x32xf32>
      %c0_80 = arith.constant 0 : index
      %c0_81 = arith.constant 0 : index
      %152 = vector.load %arg25[%c0_80, %c0_81] : memref<8x32xf32, #tpu.memory_space<vmem>>, vector<8x32xf32>
      tpu.vector_store %arg25[%c0_80, %c0_81], %151 {strides = array<i32>} : memref<8x32xf32, #tpu.memory_space<vmem>>, vector<8x32xf32>,
    } else {
    }
    %c0 = arith.constant 0 : index
    %c0_1 = arith.constant 0 : index
    %3 = vector.load %arg25[%c0, %c0_1] : memref<8x32xf32, #tpu.memory_space<vmem>>, vector<8x32xf32>
    %c0_2 = arith.constant 0 : index
    %c0_3 = arith.constant 0 : index
    %c0_4 = arith.constant 0 : index
    %4 = vector.load %arg7[%c0_2, %c0_3, %c0_4] : memref<1x1x32xf32, #tpu.memory_space<vmem>>, vector<1x1x32xf32>
    %5 = vector.shape_cast %4 : vector<1x1x32xf32> to vector<1x32xf32>
    %c0_5 = arith.constant 0 : index
    %c0_6 = arith.constant 0 : index
    %c0_7 = arith.constant 0 : index
    %6 = vector.load %arg8[%c0_5, %c0_6, %c0_7] : memref<1x1x32xf32, #tpu.memory_space<vmem>>, vector<1x1x32xf32>
    %7 = vector.shape_cast %6 : vector<1x1x32xf32> to vector<1x32xf32>
    %cst = arith.constant dense<0.000000e+00> : vector<8xf32>
    %8 = vector.multi_reduction <add>, %3, %cst [1] : vector<8x32xf32> to vector<8xf32>
    %9 = vector.shape_cast %8 : vector<8xf32> to vector<8x1xf32>
    %cst_8 = arith.constant 3.200000e+01 : f32
    %10 = vector.broadcast %cst_8 : f32 to vector<8x1xf32>
    %11 = arith.divf %9, %10 : vector<8x1xf32>
    %12 = vector.broadcast %11 : vector<8x1xf32> to vector<8x32xf32>
    %13 = arith.subf %3, %12 : vector<8x32xf32>
    %14 = arith.mulf %13, %13 : vector<8x32xf32>
    %cst_9 = arith.constant dense<0.000000e+00> : vector<8xf32>
    %15 = vector.multi_reduction <add>, %14, %cst_9 [1] : vector<8x32xf32> to vector<8xf32>
    %16 = vector.shape_cast %15 : vector<8xf32> to vector<8x1xf32>
    %cst_10 = arith.constant 3.200000e+01 : f32
    %17 = vector.broadcast %cst_10 : f32 to vector<8x1xf32>
    %18 = arith.divf %16, %17 : vector<8x1xf32>
    %19 = vector.broadcast %11 : vector<8x1xf32> to vector<8x32xf32>
    %20 = arith.subf %3, %19 : vector<8x32xf32>
    %cst_11 = arith.constant 9.99999997E-7 : f32
    %21 = vector.broadcast %cst_11 : f32 to vector<8x1xf32>
    %22 = arith.addf %18, %21 : vector<8x1xf32>
    %23 = math.rsqrt %22 : vector<8x1xf32>
    %24 = vector.broadcast %23 : vector<8x1xf32> to vector<8x32xf32>
    %25 = arith.mulf %20, %24 : vector<8x32xf32>
    %26 = vector.broadcast %5 : vector<1x32xf32> to vector<8x32xf32>
    %27 = arith.mulf %25, %26 : vector<8x32xf32>
    %28 = vector.broadcast %7 : vector<1x32xf32> to vector<8x32xf32>
    %29 = arith.addf %27, %28 : vector<8x32xf32>
    %c0_12 = arith.constant 0 : index
    %c0_13 = arith.constant 0 : index
    %c0_14 = arith.constant 0 : index
    %30 = vector.load %arg9[%c0_12, %c0_13, %c0_14] : memref<1x32x96xf32, #tpu.memory_space<vmem>>, vector<1x32x96xf32>
    %31 = vector.shape_cast %30 : vector<1x32x96xf32> to vector<32x96xf32>
    %cst_15 = arith.constant dense<0.000000e+00> : vector<8x96xf32>
    %32 = tpu.matmul %29, %31, %cst_15 {dimension_numbers = #tpu.dot_dimension_numbers<[1], [0], [0], [1], [0, 0, 1, 1], [], []>} : vector<8x32xf32>, vector<32x96xf32>, vector<8x96xf32> -> vector<8x96xf32>
    %c0_16 = arith.constant 0 : index
    %c0_17 = arith.constant 0 : index
    %c0_18 = arith.constant 0 : index
    %33 = vector.load %arg10[%c0_16, %c0_17, %c0_18] : memref<1x1x96xf32, #tpu.memory_space<vmem>>, vector<1x1x96xf32>
    %34 = vector.shape_cast %33 : vector<1x1x96xf32> to vector<1x96xf32>
    %35 = vector.broadcast %34 : vector<1x96xf32> to vector<8x96xf32>
    %36 = arith.addf %32, %35 : vector<8x96xf32>
    %37 = vector.extract_strided_slice %36 {offsets = [0, 0], sizes = [8, 16], strides = [1, 1]} : vector<8x96xf32> to vector<8x16xf32>
    %38 = vector.extract_strided_slice %36 {offsets = [0, 32], sizes = [8, 16], strides = [1, 1]} : vector<8x96xf32> to vector<8x16xf32>
    %39 = vector.extract_strided_slice %36 {offsets = [0, 64], sizes = [8, 16], strides = [1, 1]} : vector<8x96xf32> to vector<8x16xf32>
    %cst_19 = arith.constant dense<0.000000e+00> : vector<8x8xf32>
    %40 = tpu.matmul %37, %38, %cst_19 {dimension_numbers = #tpu.dot_dimension_numbers<[1], [1], [0], [0], [0, 0, 1, 0], [], []>} : vector<8x16xf32>, vector<8x16xf32>, vector<8x8xf32> -> vector<8x8xf32>
    %cst_20 = arith.constant 2.500000e-01 : f32
    %41 = vector.broadcast %cst_20 : f32 to vector<8x8xf32>
    %42 = arith.mulf %40, %41 : vector<8x8xf32>
    %c0_21 = arith.constant 0 : index
    %c0_22 = arith.constant 0 : index
    %43 = vector.load %arg5[%c0_21, %c0_22] : memref<1x8xf32, #tpu.memory_space<vmem>>, vector<1x8xf32>
    %44 = vector.broadcast %43 : vector<1x8xf32> to vector<8x8xf32>
    %45 = arith.addf %42, %44 : vector<8x8xf32>
    %cst_23 = arith.constant dense<0xFF800000> : vector<8xf32>
    %46 = vector.multi_reduction <maximumf>, %45, %cst_23 [1] : vector<8x8xf32> to vector<8xf32>
    %47 = vector.shape_cast %46 : vector<8xf32> to vector<8x1xf32>
    %48 = vector.broadcast %47 : vector<8x1xf32> to vector<8x8xf32>
    %49 = arith.subf %45, %48 : vector<8x8xf32>
    %50 = math.exp %49 : vector<8x8xf32>
    %cst_24 = arith.constant dense<0.000000e+00> : vector<8xf32>
    %51 = vector.multi_reduction <add>, %50, %cst_24 [1] : vector<8x8xf32> to vector<8xf32>
    %52 = vector.shape_cast %51 : vector<8xf32> to vector<8x1xf32>
    %53 = tpu.reciprocal %52 {approx = true} : vector<8x1xf32> -> vector<8x1xf32>
    %54 = vector.broadcast %53 : vector<8x1xf32> to vector<8x8xf32>
    %55 = arith.mulf %50, %54 : vector<8x8xf32>
    %cst_25 = arith.constant dense<0.000000e+00> : vector<8x16xf32>
    %56 = tpu.matmul %55, %39, %cst_25 {dimension_numbers = #tpu.dot_dimension_numbers<[1], [0], [0], [1], [0, 0, 1, 1], [], []>} : vector<8x8xf32>, vector<8x16xf32>, vector<8x16xf32> -> vector<8x16xf32>
    %57 = vector.extract_strided_slice %36 {offsets = [0, 16], sizes = [8, 16], strides = [1, 1]} : vector<8x96xf32> to vector<8x16xf32>
    %58 = vector.extract_strided_slice %36 {offsets = [0, 48], sizes = [8, 16], strides = [1, 1]} : vector<8x96xf32> to vector<8x16xf32>
    %59 = vector.extract_strided_slice %36 {offsets = [0, 80], sizes = [8, 16], strides = [1, 1]} : vector<8x96xf32> to vector<8x16xf32>
    %cst_26 = arith.constant dense<0.000000e+00> : vector<8x8xf32>
    %60 = tpu.matmul %57, %58, %cst_26 {dimension_numbers = #tpu.dot_dimension_numbers<[1], [1], [0], [0], [0, 0, 1, 0], [], []>} : vector<8x16xf32>, vector<8x16xf32>, vector<8x8xf32> -> vector<8x8xf32>
    %cst_27 = arith.constant 2.500000e-01 : f32
    %61 = vector.broadcast %cst_27 : f32 to vector<8x8xf32>
    %62 = arith.mulf %60, %61 : vector<8x8xf32>
    %c0_28 = arith.constant 0 : index
    %c0_29 = arith.constant 0 : index
    %63 = vector.load %arg5[%c0_28, %c0_29] : memref<1x8xf32, #tpu.memory_space<vmem>>, vector<1x8xf32>
    %64 = vector.broadcast %63 : vector<1x8xf32> to vector<8x8xf32>
    %65 = arith.addf %62, %64 : vector<8x8xf32>
    %cst_30 = arith.constant dense<0xFF800000> : vector<8xf32>
    %66 = vector.multi_reduction <maximumf>, %65, %cst_30 [1] : vector<8x8xf32> to vector<8xf32>
    %67 = vector.shape_cast %66 : vector<8xf32> to vector<8x1xf32>
    %68 = vector.broadcast %67 : vector<8x1xf32> to vector<8x8xf32>
    %69 = arith.subf %65, %68 : vector<8x8xf32>
    %70 = math.exp %69 : vector<8x8xf32>
    %cst_31 = arith.constant dense<0.000000e+00> : vector<8xf32>
    %71 = vector.multi_reduction <add>, %70, %cst_31 [1] : vector<8x8xf32> to vector<8xf32>
    %72 = vector.shape_cast %71 : vector<8xf32> to vector<8x1xf32>
    %73 = tpu.reciprocal %72 {approx = true} : vector<8x1xf32> -> vector<8x1xf32>
    %74 = vector.broadcast %73 : vector<8x1xf32> to vector<8x8xf32>
    %75 = arith.mulf %70, %74 : vector<8x8xf32>
    %cst_32 = arith.constant dense<0.000000e+00> : vector<8x16xf32>
    %76 = tpu.matmul %75, %59, %cst_32 {dimension_numbers = #tpu.dot_dimension_numbers<[1], [0], [0], [1], [0, 0, 1, 1], [], []>} : vector<8x8xf32>, vector<8x16xf32>, vector<8x16xf32> -> vector<8x16xf32>
    %77 = tpu.concatenate %56, %76 in 1 : vector<8x16xf32>, vector<8x16xf32> -> vector<8x32xf32>
    %c0_33 = arith.constant 0 : index
    %c0_34 = arith.constant 0 : index
    %c0_35 = arith.constant 0 : index
    %78 = vector.load %arg11[%c0_33, %c0_34, %c0_35] : memref<1x32x32xf32, #tpu.memory_space<vmem>>, vector<1x32x32xf32>
    %79 = vector.shape_cast %78 : vector<1x32x32xf32> to vector<32x32xf32>
    %cst_36 = arith.constant dense<0.000000e+00> : vector<8x32xf32>
    %80 = tpu.matmul %77, %79, %cst_36 {dimension_numbers = #tpu.dot_dimension_numbers<[1], [0], [0], [1], [0, 0, 1, 1], [], []>} : vector<8x32xf32>, vector<32x32xf32>, vector<8x32xf32> -> vector<8x32xf32>
    %81 = arith.addf %3, %80 : vector<8x32xf32>
    %c0_37 = arith.constant 0 : index
    %c0_38 = arith.constant 0 : index
    %c0_39 = arith.constant 0 : index
    %82 = vector.load %arg12[%c0_37, %c0_38, %c0_39] : memref<1x1x32xf32, #tpu.memory_space<vmem>>, vector<1x1x32xf32>
    %83 = vector.shape_cast %82 : vector<1x1x32xf32> to vector<1x32xf32>
    %84 = vector.broadcast %83 : vector<1x32xf32> to vector<8x32xf32>
    %85 = arith.addf %81, %84 : vector<8x32xf32>
    %c0_40 = arith.constant 0 : index
    %c0_41 = arith.constant 0 : index
    %c0_42 = arith.constant 0 : index
    %86 = vector.load %arg13[%c0_40, %c0_41, %c0_42] : memref<1x1x32xf32, #tpu.memory_space<vmem>>, vector<1x1x32xf32>
    %87 = vector.shape_cast %86 : vector<1x1x32xf32> to vector<1x32xf32>
    %c0_43 = arith.constant 0 : index
    %c0_44 = arith.constant 0 : index
    %c0_45 = arith.constant 0 : index
    %88 = vector.load %arg14[%c0_43, %c0_44, %c0_45] : memref<1x1x32xf32, #tpu.memory_space<vmem>>, vector<1x1x32xf32>
    %89 = vector.shape_cast %88 : vector<1x1x32xf32> to vector<1x32xf32>
    %cst_46 = arith.constant dense<0.000000e+00> : vector<8xf32>
    %90 = vector.multi_reduction <add>, %85, %cst_46 [1] : vector<8x32xf32> to vector<8xf32>
    %91 = vector.shape_cast %90 : vector<8xf32> to vector<8x1xf32>
    %cst_47 = arith.constant 3.200000e+01 : f32
    %92 = vector.broadcast %cst_47 : f32 to vector<8x1xf32>
    %93 = arith.divf %91, %92 : vector<8x1xf32>
    %94 = vector.broadcast %93 : vector<8x1xf32> to vector<8x32xf32>
    %95 = arith.subf %85, %94 : vector<8x32xf32>
    %96 = arith.mulf %95, %95 : vector<8x32xf32>
    %cst_48 = arith.constant dense<0.000000e+00> : vector<8xf32>
    %97 = vector.multi_reduction <add>, %96, %cst_48 [1] : vector<8x32xf32> to vector<8xf32>
    %98 = vector.shape_cast %97 : vector<8xf32> to vector<8x1xf32>
    %cst_49 = arith.constant 3.200000e+01 : f32
    %99 = vector.broadcast %cst_49 : f32 to vector<8x1xf32>
    %100 = arith.divf %98, %99 : vector<8x1xf32>
    %101 = vector.broadcast %93 : vector<8x1xf32> to vector<8x32xf32>
    %102 = arith.subf %85, %101 : vector<8x32xf32>
    %cst_50 = arith.constant 9.99999997E-7 : f32
    %103 = vector.broadcast %cst_50 : f32 to vector<8x1xf32>
    %104 = arith.addf %100, %103 : vector<8x1xf32>
    %105 = math.rsqrt %104 : vector<8x1xf32>
    %106 = vector.broadcast %105 : vector<8x1xf32> to vector<8x32xf32>
    %107 = arith.mulf %102, %106 : vector<8x32xf32>
    %108 = vector.broadcast %87 : vector<1x32xf32> to vector<8x32xf32>
    %109 = arith.mulf %107, %108 : vector<8x32xf32>
    %110 = vector.broadcast %89 : vector<1x32xf32> to vector<8x32xf32>
    %111 = arith.addf %109, %110 : vector<8x32xf32>
    %c0_51 = arith.constant 0 : index
    %c0_52 = arith.constant 0 : index
    %c0_53 = arith.constant 0 : index
    %112 = vector.load %arg15[%c0_51, %c0_52, %c0_53] : memref<1x32x128xf32, #tpu.memory_space<vmem>>, vector<1x32x128xf32>
    %113 = vector.shape_cast %112 : vector<1x32x128xf32> to vector<32x128xf32>
    %cst_54 = arith.constant dense<0.000000e+00> : vector<8x128xf32>
    %114 = tpu.matmul %111, %113, %cst_54 {dimension_numbers = #tpu.dot_dimension_numbers<[1], [0], [0], [1], [0, 0, 1, 1], [], []>} : vector<8x32xf32>, vector<32x128xf32>, vector<8x128xf32> -> vector<8x128xf32>
    %c0_55 = arith.constant 0 : index
    %c0_56 = arith.constant 0 : index
    %c0_57 = arith.constant 0 : index
    %115 = vector.load %arg16[%c0_55, %c0_56, %c0_57] : memref<1x1x128xf32, #tpu.memory_space<vmem>>, vector<1x1x128xf32>
    %116 = vector.shape_cast %115 : vector<1x1x128xf32> to vector<1x128xf32>
    %117 = vector.broadcast %116 : vector<1x128xf32> to vector<8x128xf32>
    %118 = arith.addf %114, %117 : vector<8x128xf32>
    %119 = arith.mulf %118, %118 : vector<8x128xf32>
    %120 = arith.mulf %118, %119 : vector<8x128xf32>
    %cst_58 = arith.constant 4.471500e-02 : f32
    %121 = vector.broadcast %cst_58 : f32 to vector<8x128xf32>
    %122 = arith.mulf %121, %120 : vector<8x128xf32>
    %123 = arith.addf %118, %122 : vector<8x128xf32>
    %cst_59 = arith.constant 0.797884583 : f32
    %124 = vector.broadcast %cst_59 : f32 to vector<8x128xf32>
    %125 = arith.mulf %124, %123 : vector<8x128xf32>
    %126 = math.tanh %125 : vector<8x128xf32>
    %cst_60 = arith.constant 1.000000e+00 : f32
    %127 = vector.broadcast %cst_60 : f32 to vector<8x128xf32>
    %128 = arith.addf %127, %126 : vector<8x128xf32>
    %cst_61 = arith.constant 5.000000e-01 : f32
    %129 = vector.broadcast %cst_61 : f32 to vector<8x128xf32>
    %130 = arith.mulf %129, %128 : vector<8x128xf32>
    %131 = arith.mulf %118, %130 : vector<8x128xf32>
    %c0_62 = arith.constant 0 : index
    %c0_63 = arith.constant 0 : index
    %c0_64 = arith.constant 0 : index
    %132 = vector.load %arg17[%c0_62, %c0_63, %c0_64] : memref<1x128x32xf32, #tpu.memory_space<vmem>>, vector<1x128x32xf32>
    %133 = vector.shape_cast %132 : vector<1x128x32xf32> to vector<128x32xf32>
    %cst_65 = arith.constant dense<0.000000e+00> : vector<8x32xf32>
    %134 = tpu.matmul %131, %133, %cst_65 {dimension_numbers = #tpu.dot_dimension_numbers<[1], [0], [0], [1], [0, 0, 1, 1], [], []>} : vector<8x128xf32>, vector<128x32xf32>, vector<8x32xf32> -> vector<8x32xf32>
    %135 = arith.addf %85, %134 : vector<8x32xf32>
    %c0_66 = arith.constant 0 : index
    %c0_67 = arith.constant 0 : index
    %c0_68 = arith.constant 0 : index
    %136 = vector.load %arg18[%c0_66, %c0_67, %c0_68] : memref<1x1x32xf32, #tpu.memory_space<vmem>>, vector<1x1x32xf32>
    %137 = vector.shape_cast %136 : vector<1x1x32xf32> to vector<1x32xf32>
    %138 = vector.broadcast %137 : vector<1x32xf32> to vector<8x32xf32>
    %139 = arith.addf %135, %138 : vector<8x32xf32>
    %c1_i32 = arith.constant 1 : i32
    %140 = arith.cmpi ne, %arg1, %c1_i32 : i32
    %141 = arith.extui %140 : i1 to i32
    %c0_i32_69 = arith.constant 0 : i32
    %142 = arith.cmpi ne, %141, %c0_i32_69 : i32
    scf.if %142 {
      %c0_72 = arith.constant 0 : index
      %c0_73 = arith.constant 0 : index
      %146 = vector.load %arg25[%c0_72, %c0_73] : memref<8x32xf32, #tpu.memory_space<vmem>>, vector<8x32xf32>
      tpu.vector_store %arg25[%c0_72, %c0_73], %139 {strides = array<i32>} : memref<8x32xf32, #tpu.memory_space<vmem>>, vector<8x32xf32>,
    } else {
    }
    %c1_i32_70 = arith.constant 1 : i32
    %143 = arith.cmpi eq, %arg1, %c1_i32_70 : i32
    %144 = arith.extui %143 : i1 to i32
    %c0_i32_71 = arith.constant 0 : i32
    %145 = arith.cmpi ne, %144, %c0_i32_71 : i32
    scf.if %145 {
      %c0_72 = arith.constant 0 : index
      %c0_73 = arith.constant 0 : index
      %146 = vector.load %arg19[%c0_72, %c0_73] : memref<1x32xf32, #tpu.memory_space<vmem>>, vector<1x32xf32>
      %c0_74 = arith.constant 0 : index
      %c0_75 = arith.constant 0 : index
      %147 = vector.load %arg20[%c0_74, %c0_75] : memref<1x32xf32, #tpu.memory_space<vmem>>, vector<1x32xf32>
      %cst_76 = arith.constant dense<0.000000e+00> : vector<8xf32>
      %148 = vector.multi_reduction <add>, %139, %cst_76 [1] : vector<8x32xf32> to vector<8xf32>
      %149 = vector.shape_cast %148 : vector<8xf32> to vector<8x1xf32>
      %cst_77 = arith.constant 3.200000e+01 : f32
      %150 = vector.broadcast %cst_77 : f32 to vector<8x1xf32>
      %151 = arith.divf %149, %150 : vector<8x1xf32>
      %152 = vector.broadcast %151 : vector<8x1xf32> to vector<8x32xf32>
      %153 = arith.subf %139, %152 : vector<8x32xf32>
      %154 = arith.mulf %153, %153 : vector<8x32xf32>
      %cst_78 = arith.constant dense<0.000000e+00> : vector<8xf32>
      %155 = vector.multi_reduction <add>, %154, %cst_78 [1] : vector<8x32xf32> to vector<8xf32>
      %156 = vector.shape_cast %155 : vector<8xf32> to vector<8x1xf32>
      %cst_79 = arith.constant 3.200000e+01 : f32
      %157 = vector.broadcast %cst_79 : f32 to vector<8x1xf32>
      %158 = arith.divf %156, %157 : vector<8x1xf32>
      %159 = vector.broadcast %151 : vector<8x1xf32> to vector<8x32xf32>
      %160 = arith.subf %139, %159 : vector<8x32xf32>
      %cst_80 = arith.constant 9.99999997E-7 : f32
      %161 = vector.broadcast %cst_80 : f32 to vector<8x1xf32>
      %162 = arith.addf %158, %161 : vector<8x1xf32>
      %163 = math.rsqrt %162 : vector<8x1xf32>
      %164 = vector.broadcast %163 : vector<8x1xf32> to vector<8x32xf32>
      %165 = arith.mulf %160, %164 : vector<8x32xf32>
      %166 = vector.broadcast %146 : vector<1x32xf32> to vector<8x32xf32>
      %167 = arith.mulf %165, %166 : vector<8x32xf32>
      %168 = vector.broadcast %147 : vector<1x32xf32> to vector<8x32xf32>
      %169 = arith.addf %167, %168 : vector<8x32xf32>
      %170 = vector.extract_strided_slice %169 {offsets = [0, 0], sizes = [1, 32], strides = [1, 1]} : vector<8x32xf32> to vector<1x32xf32>
      %c0_81 = arith.constant 0 : index
      %c0_82 = arith.constant 0 : index
      %c0_83 = arith.constant 0 : index
      %171 = vector.load %arg6[%c0_81, %c0_82, %c0_83] : memref<1x1x64xf32, #tpu.memory_space<vmem>>, vector<1x1x64xf32>
      %172 = vector.shape_cast %171 : vector<1x1x64xf32> to vector<1x64xf32>
      %c0_84 = arith.constant 0 : index
      %c0_85 = arith.constant 0 : index
      %173 = vector.load %arg21[%c0_84, %c0_85] : memref<64x8xf32, #tpu.memory_space<vmem>>, vector<64x8xf32>
      %cst_86 = arith.constant dense<0.000000e+00> : vector<1x8xf32>
      %174 = tpu.matmul %172, %173, %cst_86 {dimension_numbers = #tpu.dot_dimension_numbers<[1], [0], [0], [1], [0, 0, 1, 1], [], []>} : vector<1x64xf32>, vector<64x8xf32>, vector<1x8xf32> -> vector<1x8xf32>
      %c0_87 = arith.constant 0 : index
      %c0_88 = arith.constant 0 : index
      %175 = vector.load %arg22[%c0_87, %c0_88] : memref<32x8xf32, #tpu.memory_space<vmem>>, vector<32x8xf32>
      %cst_89 = arith.constant dense<0.000000e+00> : vector<1x8xf32>
      %176 = tpu.matmul %170, %175, %cst_89 {dimension_numbers = #tpu.dot_dimension_numbers<[1], [0], [0], [1], [0, 0, 1, 1], [], []>} : vector<1x32xf32>, vector<32x8xf32>, vector<1x8xf32> -> vector<1x8xf32>
      %177 = arith.addf %174, %176 : vector<1x8xf32>
      %c0_90 = arith.constant 0 : index
      %c0_91 = arith.constant 0 : index
      %178 = vector.load %arg23[%c0_90, %c0_91] : memref<1x8xf32, #tpu.memory_space<vmem>>, vector<1x8xf32>
      %179 = arith.addf %177, %178 : vector<1x8xf32>
      %180 = vector.shape_cast %179 : vector<1x8xf32> to vector<1x1x8xf32>
      %c0_92 = arith.constant 0 : index
      %c0_93 = arith.constant 0 : index
      %c0_94 = arith.constant 0 : index
      %181 = vector.load %arg24[%c0_92, %c0_93, %c0_94] : memref<1x1x8xf32, #tpu.memory_space<vmem>>, vector<1x1x8xf32>
      tpu.vector_store %arg24[%c0_92, %c0_93, %c0_94], %180 {strides = array<i32>} : memref<1x1x8xf32, #tpu.memory_space<vmem>>, vector<1x1x8xf32>,
    } else {
    }
    return
  }
  func.func @transform_0(%arg0: i32, %arg1: i32) -> (i32, i32, i32) {
    %c0_i32 = arith.constant 0 : i32
    %c0_i32_0 = arith.constant 0 : i32
    %c0_i32_1 = arith.constant 0 : i32
    return %arg0, %c0_i32, %c0_i32_0 : i32, i32, i32
  }
  func.func @transform_1(%arg0: i32, %arg1: i32) -> (i32, i32) {
    %c0_i32 = arith.constant 0 : i32
    %c0_i32_0 = arith.constant 0 : i32
    %c0_i32_1 = arith.constant 0 : i32
    return %c0_i32, %c0_i32_0 : i32, i32
  }
  func.func @transform_2(%arg0: i32, %arg1: i32) -> (i32, i32) {
    %c0_i32 = arith.constant 0 : i32
    %c0_i32_0 = arith.constant 0 : i32
    %c0_i32_1 = arith.constant 0 : i32
    return %c0_i32, %c0_i32_0 : i32, i32
  }
  func.func @transform_3(%arg0: i32, %arg1: i32) -> (i32, i32) {
    %c0_i32 = arith.constant 0 : i32
    %c0_i32_0 = arith.constant 0 : i32
    %c0_i32_1 = arith.constant 0 : i32
    return %c0_i32, %c0_i32_0 : i32, i32
  }
  func.func @transform_4(%arg0: i32, %arg1: i32) -> (i32, i32, i32) {
    %c0_i32 = arith.constant 0 : i32
    %c0_i32_0 = arith.constant 0 : i32
    %c0_i32_1 = arith.constant 0 : i32
    return %arg0, %c0_i32, %c0_i32_0 : i32, i32, i32
  }
  func.func @transform_5(%arg0: i32, %arg1: i32) -> (i32, i32, i32) {
    %c0_i32 = arith.constant 0 : i32
    %c0_i32_0 = arith.constant 0 : i32
    %c0_i32_1 = arith.constant 0 : i32
    return %arg1, %c0_i32, %c0_i32_0 : i32, i32, i32
  }
  func.func @transform_6(%arg0: i32, %arg1: i32) -> (i32, i32, i32) {
    %c0_i32 = arith.constant 0 : i32
    %c0_i32_0 = arith.constant 0 : i32
    %c0_i32_1 = arith.constant 0 : i32
    return %arg1, %c0_i32, %c0_i32_0 : i32, i32, i32
  }
  func.func @transform_7(%arg0: i32, %arg1: i32) -> (i32, i32, i32) {
    %c0_i32 = arith.constant 0 : i32
    %c0_i32_0 = arith.constant 0 : i32
    %c0_i32_1 = arith.constant 0 : i32
    return %arg1, %c0_i32, %c0_i32_0 : i32, i32, i32
  }
  func.func @transform_8(%arg0: i32, %arg1: i32) -> (i32, i32, i32) {
    %c0_i32 = arith.constant 0 : i32
    %c0_i32_0 = arith.constant 0 : i32
    %c0_i32_1 = arith.constant 0 : i32
    return %arg1, %c0_i32, %c0_i32_0 : i32, i32, i32
  }
  func.func @transform_9(%arg0: i32, %arg1: i32) -> (i32, i32, i32) {
    %c0_i32 = arith.constant 0 : i32
    %c0_i32_0 = arith.constant 0 : i32
    %c0_i32_1 = arith.constant 0 : i32
    return %arg1, %c0_i32, %c0_i32_0 : i32, i32, i32
  }
  func.func @transform_10(%arg0: i32, %arg1: i32) -> (i32, i32, i32) {
    %c0_i32 = arith.constant 0 : i32
    %c0_i32_0 = arith.constant 0 : i32
    %c0_i32_1 = arith.constant 0 : i32
    return %arg1, %c0_i32, %c0_i32_0 : i32, i32, i32
  }
  func.func @transform_11(%arg0: i32, %arg1: i32) -> (i32, i32, i32) {
    %c0_i32 = arith.constant 0 : i32
    %c0_i32_0 = arith.constant 0 : i32
    %c0_i32_1 = arith.constant 0 : i32
    return %arg1, %c0_i32, %c0_i32_0 : i32, i32, i32
  }
  func.func @transform_12(%arg0: i32, %arg1: i32) -> (i32, i32, i32) {
    %c0_i32 = arith.constant 0 : i32
    %c0_i32_0 = arith.constant 0 : i32
    %c0_i32_1 = arith.constant 0 : i32
    return %arg1, %c0_i32, %c0_i32_0 : i32, i32, i32
  }
  func.func @transform_13(%arg0: i32, %arg1: i32) -> (i32, i32, i32) {
    %c0_i32 = arith.constant 0 : i32
    %c0_i32_0 = arith.constant 0 : i32
    %c0_i32_1 = arith.constant 0 : i32
    return %arg1, %c0_i32, %c0_i32_0 : i32, i32, i32
  }
  func.func @transform_14(%arg0: i32, %arg1: i32) -> (i32, i32, i32) {
    %c0_i32 = arith.constant 0 : i32
    %c0_i32_0 = arith.constant 0 : i32
    %c0_i32_1 = arith.constant 0 : i32
    return %arg1, %c0_i32, %c0_i32_0 : i32, i32, i32
  }
  func.func @transform_15(%arg0: i32, %arg1: i32) -> (i32, i32, i32) {
    %c0_i32 = arith.constant 0 : i32
    %c0_i32_0 = arith.constant 0 : i32
    %c0_i32_1 = arith.constant 0 : i32
    return %arg1, %c0_i32, %c0_i32_0 : i32, i32, i32
  }
  func.func @transform_16(%arg0: i32, %arg1: i32) -> (i32, i32, i32) {
    %c0_i32 = arith.constant 0 : i32
    %c0_i32_0 = arith.constant 0 : i32
    %c0_i32_1 = arith.constant 0 : i32
    return %arg1, %c0_i32, %c0_i32_0 : i32, i32, i32
  }
  func.func @transform_17(%arg0: i32, %arg1: i32) -> (i32, i32) {
    %c0_i32 = arith.constant 0 : i32
    %c0_i32_0 = arith.constant 0 : i32
    %c0_i32_1 = arith.constant 0 : i32
    return %c0_i32, %c0_i32_0 : i32, i32
  }
  func.func @transform_18(%arg0: i32, %arg1: i32) -> (i32, i32) {
    %c0_i32 = arith.constant 0 : i32
    %c0_i32_0 = arith.constant 0 : i32
    %c0_i32_1 = arith.constant 0 : i32
    return %c0_i32, %c0_i32_0 : i32, i32
  }
  func.func @transform_19(%arg0: i32, %arg1: i32) -> (i32, i32) {
    %c0_i32 = arith.constant 0 : i32
    %c0_i32_0 = arith.constant 0 : i32
    %c0_i32_1 = arith.constant 0 : i32
    return %c0_i32, %c0_i32_0 : i32, i32
  }
  func.func @transform_20(%arg0: i32, %arg1: i32) -> (i32, i32) {
    %c0_i32 = arith.constant 0 : i32
    %c0_i32_0 = arith.constant 0 : i32
    %c0_i32_1 = arith.constant 0 : i32
    return %c0_i32, %c0_i32_0 : i32, i32
  }
  func.func @transform_21(%arg0: i32, %arg1: i32) -> (i32, i32) {
    %c0_i32 = arith.constant 0 : i32
    %c0_i32_0 = arith.constant 0 : i32
    %c0_i32_1 = arith.constant 0 : i32
    return %c0_i32, %c0_i32_0 : i32, i32
  }
  func.func @transform_22(%arg0: i32, %arg1: i32) -> (i32, i32, i32) {
    %c0_i32 = arith.constant 0 : i32
    %c0_i32_0 = arith.constant 0 : i32
    %c0_i32_1 = arith.constant 0 : i32
    return %arg0, %c0_i32, %c0_i32_0 : i32, i32, i32
  }
}

</mosaic_0001>

<bundles_post_ra>
// kernel: combined_forward.4
= control target key start
LH: loop header
LB: loop body
LE: loop exit
PB: predicated region body
PF: predicated region fallthrough
CT: control target
= control target key end

     0   :  { %vm86_vm0 = vcmask 261120   ;;  %vm616_vm1 = vcmask 130048   ;;  %s1375_s1 = inlined_call_operand.vmem [shape: f32[32,16], index: 1, kind: input, shape index: {}]   ;;  %s1376_s0 = inlined_call_operand.vmem [shape: f32[512,32], index: 0, kind: input, shape index: {}]   ;;  %s1377_s2 = inlined_call_operand.vmem [shape: f32[1,16], index: 2, kind: input, shape index: {}]   ;;  %s1378_s3 = inlined_call_operand.vmem [shape: f32[512,16], index: 3, kind: output, shape index: {}]  }
   0x1   :  { %v81_v0 = vld [vmem:[%s1375_s1 + $0x18] sm:$0xff]  ;;  %v80_v1 = vld [vmem:[%s1375_s1 + $0x10] sm:$0xff]  ;;  %v79_v2 = vld [vmem:[%s1375_s1 + $0x8] sm:$0xff] }
   0x2   :  { %750 = vmatpush.msra.mxu2 %v81_v0  ;;  %751 = vmatpush.msra.mxu3 %v81_v0  ;;  %v78_v3 = vld [vmem:[%s1375_s1] sm:$0xff]  ;;  %v47_v8 = vld [vmem:[%s1376_s0 + $0x108] sm:$0xff]  ;;  %v48_v12 = vld [vmem:[%s1376_s0 + $0x110] sm:$0xff] }
   0x3   :  { %291 = vmatpush.msra.mxu0 %v81_v0  ;;  %749 = vmatpush.msra.mxu1 %v81_v0  ;;  %v46_v4 = vld [vmem:[%s1376_s0 + $0x100] sm:$0xff]  ;;  %v63_v9 = vld [vmem:[%s1376_s0 + $0x188] sm:$0xff]  ;;  %v64_v13 = vld [vmem:[%s1376_s0 + $0x190] sm:$0xff] }
   0x4   :  { %753 = vmatpush.msra.mxu2 %v80_v1  ;;  %754 = vmatpush.msra.mxu3 %v80_v1  ;;  %v62_v5 = vld [vmem:[%s1376_s0 + $0x180] sm:$0xff]  ;;  %v15_v10 = vld [vmem:[%s1376_s0 + $0x8] sm:$0xff]  ;;  %v16_v14 = vld [vmem:[%s1376_s0 + $0x10] sm:$0xff] }
   0x5   :  { %292 = vmatpush.msra.mxu0 %v80_v1  ;;  %752 = vmatpush.msra.mxu1 %v80_v1  ;;  %v14_v6 = vld [vmem:[%s1376_s0] sm:$0xff]  ;;  %v31_v11 = vld [vmem:[%s1376_s0 + $0x88] sm:$0xff]  ;;  %v32_v15 = vld [vmem:[%s1376_s0 + $0x90] sm:$0xff] }
   0x6   :  { %756 = vmatpush.msra.mxu2 %v79_v2  ;;  %757 = vmatpush.msra.mxu3 %v79_v2  ;;  %v30_v7 = vld [vmem:[%s1376_s0 + $0x80] sm:$0xff]  ;;  %v49_v16 = vld [vmem:[%s1376_s0 + $0x118] sm:$0xff]  ;;  %v51_v24 = vld [vmem:[%s1376_s0 + $0x128] sm:$0xff] }
   0x7   :  { %293 = vmatpush.msra.mxu0 %v79_v2  ;;  %755 = vmatpush.msra.mxu1 %v79_v2  ;;  %v65_v17 = vld [vmem:[%s1376_s0 + $0x198] sm:$0xff]  ;;  %v50_v20 = vld [vmem:[%s1376_s0 + $0x120] sm:$0xff]  ;;  %v67_v25 = vld [vmem:[%s1376_s0 + $0x1a8] sm:$0xff] }
   0x8   :  { %759 = vmatpush.msra.mxu2 %v78_v3  ;;  %760 = vmatpush.msra.mxu3 %v78_v3  ;;  %v17_v18 = vld [vmem:[%s1376_s0 + $0x18] sm:$0xff]  ;;  %v66_v21 = vld [vmem:[%s1376_s0 + $0x1a0] sm:$0xff]  ;;  %v19_v26 = vld [vmem:[%s1376_s0 + $0x28] sm:$0xff] }
   0x9   :  { %717 = vmatmul.msk.f32.vlgmr.msra.gmra.mxu2 %vm86_vm0, %v46_v4  ;;  %733 = vmatmul.msk.f32.vlgmr.msra.gmra.mxu3 %vm86_vm0, %v62_v5  ;;  %v33_v19 = vld [vmem:[%s1376_s0 + $0x98] sm:$0xff]  ;;  %v18_v22 = vld [vmem:[%s1376_s0 + $0x20] sm:$0xff]  ;;  %v35_v27 = vld [vmem:[%s1376_s0 + $0xa8] sm:$0xff] }
   0xa   :  { %294 = vmatpush.msra.mxu0 %v78_v3  ;;  %758 = vmatpush.msra.mxu1 %v78_v3  ;;  %v34_v23 = vld [vmem:[%s1376_s0 + $0xa0] sm:$0xff]  ;;  %v52_v28 = vld [vmem:[%s1376_s0 + $0x130] sm:$0xff]  ;;  %v53_v32 = vld [vmem:[%s1376_s0 + $0x138] sm:$0xff] }
   0xb   :  { %685 = vmatmul.msk.f32.vlgmr.msra.gmra.mxu0 %vm86_vm0, %v14_v6  ;;  %701 = vmatmul.msk.f32.vlgmr.msra.gmra.mxu1 %vm86_vm0, %v30_v7  ;;  %v68_v29 = vld [vmem:[%s1376_s0 + $0x1b0] sm:$0xff]  ;;  %v69_v33 = vld [vmem:[%s1376_s0 + $0x1b8] sm:$0xff]  ;;  %v54_v36 = vld [vmem:[%s1376_s0 + $0x140] sm:$0xff] }
   0xc   :  { %v20_v30 = vld [vmem:[%s1376_s0 + $0x30] sm:$0xff]  ;;  %v21_v34 = vld [vmem:[%s1376_s0 + $0x38] sm:$0xff]  ;;  %v70_v37 = vld [vmem:[%s1376_s0 + $0x1c0] sm:$0xff] }
   0xd   :  { %v36_v31 = vld [vmem:[%s1376_s0 + $0xb0] sm:$0xff]  ;;  %v37_v35 = vld [vmem:[%s1376_s0 + $0xb8] sm:$0xff]  ;;  %v22_v38 = vld [vmem:[%s1376_s0 + $0x40] sm:$0xff] }
   0xe   :  { %v38_v39 = vld [vmem:[%s1376_s0 + $0xc0] sm:$0xff]  ;;  %v55_v40 = vld [vmem:[%s1376_s0 + $0x148] sm:$0xff]  ;;  %v56_v44 = vld [vmem:[%s1376_s0 + $0x150] sm:$0xff] }
   0xf   :  { %v71_v41 = vld [vmem:[%s1376_s0 + $0x1c8] sm:$0xff]  ;;  %v72_v45 = vld [vmem:[%s1376_s0 + $0x1d0] sm:$0xff]  ;;  %v57_v48 = vld [vmem:[%s1376_s0 + $0x158] sm:$0xff] }
  0x10   :  { %v23_v42 = vld [vmem:[%s1376_s0 + $0x48] sm:$0xff]  ;;  %v24_v46 = vld [vmem:[%s1376_s0 + $0x50] sm:$0xff]  ;;  %v73_v49 = vld [vmem:[%s1376_s0 + $0x1d8] sm:$0xff] }
  0x11   :  { %718 = vmatmul.msk.f32.gmra.mxu2 %vm86_vm0, %v47_v8  ;;  %734 = vmatmul.msk.f32.gmra.mxu3 %vm86_vm0, %v63_v9  ;;  %v39_v43 = vld [vmem:[%s1376_s0 + $0xc8] sm:$0xff]  ;;  %v40_v47 = vld [vmem:[%s1376_s0 + $0xd0] sm:$0xff]  ;;  %v25_v50 = vld [vmem:[%s1376_s0 + $0x58] sm:$0xff] }
  0x12   :  { %v41_v51 = vld [vmem:[%s1376_s0 + $0xd8] sm:$0xff]  ;;  %v58_v52 = vld [vmem:[%s1376_s0 + $0x160] sm:$0xff]  ;;  %v59_v56 = vld [vmem:[%s1376_s0 + $0x168] sm:$0xff] }
  0x13   :  { %686 = vmatmul.msk.f32.gmra.mxu0 %vm86_vm0, %v15_v10  ;;  %702 = vmatmul.msk.f32.gmra.mxu1 %vm86_vm0, %v31_v11  ;;  %v74_v53 = vld [vmem:[%s1376_s0 + $0x1e0] sm:$0xff]  ;;  %v75_v57 = vld [vmem:[%s1376_s0 + $0x1e8] sm:$0xff]  ;;  %v60_v60 = vld [vmem:[%s1376_s0 + $0x170] sm:$0xff] }
  0x14   :  { %v26_v54 = vld [vmem:[%s1376_s0 + $0x60] sm:$0xff]  ;;  %v27_v58 = vld [vmem:[%s1376_s0 + $0x68] sm:$0xff]  ;;  %v76_v61 = vld [vmem:[%s1376_s0 + $0x1f0] sm:$0xff] }
  0x15   :  { %v42_v55 = vld [vmem:[%s1376_s0 + $0xe0] sm:$0xff]  ;;  %v43_v59 = vld [vmem:[%s1376_s0 + $0xe8] sm:$0xff]  ;;  %v28_v62 = vld [vmem:[%s1376_s0 + $0x70] sm:$0xff] }
  0x16   :  { %v44_v63 = vld [vmem:[%s1376_s0 + $0xf0] sm:$0xff]  ;;  %v61_v0 = vld [vmem:[%s1376_s0 + $0x178] sm:$0xff]  ;;  %v1053_v4 = vld [vmem:[%s1377_s2] ss:$0 sm:$0xff] }
  0x17   :  { %v77_v1 = vld [vmem:[%s1376_s0 + $0x1f8] sm:$0xff] }
  0x18   :  { %v29_v2 = vld [vmem:[%s1376_s0 + $0x78] sm:$0xff] }
  0x19   :  { %719 = vmatmul.msk.f32.gmra.mxu2 %vm86_vm0, %v48_v12  ;;  %735 = vmatmul.msk.f32.gmra.mxu3 %vm86_vm0, %v64_v13  ;;  %v45_v3 = vld [vmem:[%s1376_s0 + $0xf8] sm:$0xff] }
  0x1b   :  { %687 = vmatmul.msk.f32.gmra.mxu0 %vm86_vm0, %v16_v14  ;;  %703 = vmatmul.msk.f32.gmra.mxu1 %vm86_vm0, %v32_v15 }
  0x21   :  { %720 = vmatmul.msk.f32.gmra.mxu2 %vm86_vm0, %v49_v16  ;;  %736 = vmatmul.msk.f32.gmra.mxu3 %vm86_vm0, %v65_v17 }
  0x23   :  { %688 = vmatmul.msk.f32.gmra.mxu0 %vm86_vm0, %v17_v18  ;;  %704 = vmatmul.msk.f32.gmra.mxu1 %vm86_vm0, %v33_v19 }
  0x29   :  { %721 = vmatmul.msk.f32.gmra.mxu2 %vm86_vm0, %v50_v20  ;;  %737 = vmatmul.msk.f32.gmra.mxu3 %vm86_vm0, %v66_v21 }
  0x2b   :  { %689 = vmatmul.msk.f32.gmra.mxu0 %vm86_vm0, %v18_v22  ;;  %705 = vmatmul.msk.f32.gmra.mxu1 %vm86_vm0, %v34_v23 }
  0x31   :  { %722 = vmatmul.msk.f32.gmra.mxu2 %vm86_vm0, %v51_v24  ;;  %738 = vmatmul.msk.f32.gmra.mxu3 %vm86_vm0, %v67_v25 }
  0x33   :  { %690 = vmatmul.msk.f32.gmra.mxu0 %vm86_vm0, %v19_v26  ;;  %706 = vmatmul.msk.f32.gmra.mxu1 %vm86_vm0, %v35_v27 }
  0x39   :  { %723 = vmatmul.msk.f32.gmra.mxu2 %vm86_vm0, %v52_v28  ;;  %739 = vmatmul.msk.f32.gmra.mxu3 %vm86_vm0, %v68_v29 }
  0x3b   :  { %691 = vmatmul.msk.f32.gmra.mxu0 %vm86_vm0, %v20_v30  ;;  %707 = vmatmul.msk.f32.gmra.mxu1 %vm86_vm0, %v36_v31 }
  0x41   :  { %724 = vmatmul.msk.f32.gmra.mxu2 %vm86_vm0, %v53_v32  ;;  %740 = vmatmul.msk.f32.gmra.mxu3 %vm86_vm0, %v69_v33 }
  0x43   :  { %692 = vmatmul.msk.f32.gmra.mxu0 %vm86_vm0, %v21_v34  ;;  %708 = vmatmul.msk.f32.gmra.mxu1 %vm86_vm0, %v37_v35 }
  0x49   :  { %725 = vmatmul.msk.f32.gmra.mxu2 %vm86_vm0, %v54_v36  ;;  %741 = vmatmul.msk.f32.gmra.mxu3 %vm86_vm0, %v70_v37 }
  0x4b   :  { %693 = vmatmul.msk.f32.gmra.mxu0 %vm86_vm0, %v22_v38  ;;  %709 = vmatmul.msk.f32.gmra.mxu1 %vm86_vm0, %v38_v39 }
  0x51   :  { %726 = vmatmul.msk.f32.gmra.mxu2 %vm86_vm0, %v55_v40  ;;  %742 = vmatmul.msk.f32.gmra.mxu3 %vm86_vm0, %v71_v41 }
  0x53   :  { %694 = vmatmul.msk.f32.gmra.mxu0 %vm86_vm0, %v23_v42  ;;  %710 = vmatmul.msk.f32.gmra.mxu1 %vm86_vm0, %v39_v43 }
  0x59   :  { %727 = vmatmul.msk.f32.gmra.mxu2 %vm86_vm0, %v56_v44  ;;  %743 = vmatmul.msk.f32.gmra.mxu3 %vm86_vm0, %v72_v45 }
  0x5b   :  { %695 = vmatmul.msk.f32.gmra.mxu0 %vm86_vm0, %v24_v46  ;;  %711 = vmatmul.msk.f32.gmra.mxu1 %vm86_vm0, %v40_v47 }
  0x61   :  { %728 = vmatmul.msk.f32.gmra.mxu2 %vm86_vm0, %v57_v48  ;;  %744 = vmatmul.msk.f32.gmra.mxu3 %vm86_vm0, %v73_v49 }
  0x63   :  { %696 = vmatmul.msk.f32.gmra.mxu0 %vm86_vm0, %v25_v50  ;;  %712 = vmatmul.msk.f32.gmra.mxu1 %vm86_vm0, %v41_v51 }
  0x69   :  { %729 = vmatmul.msk.f32.gmra.mxu2 %vm86_vm0, %v58_v52  ;;  %745 = vmatmul.msk.f32.gmra.mxu3 %vm86_vm0, %v74_v53 }
  0x6b   :  { %697 = vmatmul.msk.f32.gmra.mxu0 %vm86_vm0, %v26_v54  ;;  %713 = vmatmul.msk.f32.gmra.mxu1 %vm86_vm0, %v42_v55 }
  0x71   :  { %730 = vmatmul.msk.f32.gmra.mxu2 %vm86_vm0, %v59_v56  ;;  %746 = vmatmul.msk.f32.gmra.mxu3 %vm86_vm0, %v75_v57 }
  0x73   :  { %698 = vmatmul.msk.f32.gmra.mxu0 %vm86_vm0, %v27_v58  ;;  %714 = vmatmul.msk.f32.gmra.mxu1 %vm86_vm0, %v43_v59 }
  0x79   :  { %731 = vmatmul.msk.f32.gmra.mxu2 %vm86_vm0, %v60_v60  ;;  %747 = vmatmul.msk.f32.gmra.mxu3 %vm86_vm0, %v76_v61 }
  0x7b   :  { %699 = vmatmul.msk.f32.gmra.mxu0 %vm86_vm0, %v28_v62  ;;  %715 = vmatmul.msk.f32.gmra.mxu1 %vm86_vm0, %v44_v63 }
  0x81   :  { %732 = vmatmul.msk.f32.gmra.mxu2 %vm86_vm0, %v61_v0  ;;  %748 = vmatmul.msk.f32.gmra.mxu3 %vm86_vm0, %v77_v1 }
  0x83   :  { %700 = vmatmul.msk.f32.gmra.mxu0 %vm86_vm0, %v29_v2  ;;  %716 = vmatmul.msk.f32.gmra.mxu1 %vm86_vm0, %v45_v3 }
  0x88   :  { %v296_v5 = vpop.f32.mrf.mxu0  ;;  %v344_v6 = vpop.f32.mrf.mxu1 }
  0x89   :  { %v297_v7 = vadd.f32 %v1053_v4, %v296_v5  ;;  %v345_v8 = vadd.f32 %v1053_v4, %v344_v6 }
  0x8b   :  { %v488_v9 = vmax.f32 %v297_v7, 0.0  ;;  %v504_v10 = vmax.f32 %v345_v8, 0.0 }
  0x8c   :  { %v392_v11 = vpop.f32.mrf.mxu2  ;;  %v440_v12 = vpop.f32.mrf.mxu3 }
  0x8d   :  { %v552_v13 = vmin.f32 %v488_v9, 6.0  ;;  %v568_v14 = vmin.f32 %v504_v10, 6.0  ;;  %v393_v15 = vadd.f32 %v1053_v4, %v392_v11  ;;  %v441_v16 = vadd.f32 %v1053_v4, %v440_v12 }
  0x8f   :  { %617 = vst.msk [vmem:[%s1378_s3] sm:$0xff] %vm616_vm1, %v552_v13  ;;  %v520_v17 = vmax.f32 %v393_v15, 0.0  ;;  %v536_v18 = vmax.f32 %v441_v16, 0.0 }
  0x90   :  { %633 = vst.msk [vmem:[%s1378_s3 + $0x80] sm:$0xff] %vm616_vm1, %v568_v14  ;;  %v299_v19 = vpop.f32.mrf.mxu0  ;;  %v347_v20 = vpop.f32.mrf.mxu1 }
  0x91   :  { %v584_v21 = vmin.f32 %v520_v17, 6.0  ;;  %v600_v22 = vmin.f32 %v536_v18, 6.0  ;;  %v300_v23 = vadd.f32 %v1053_v4, %v299_v19  ;;  %v348_v24 = vadd.f32 %v1053_v4, %v347_v20 }
  0x93   :  { %649 = vst.msk [vmem:[%s1378_s3 + $0x100] sm:$0xff] %vm616_vm1, %v584_v21  ;;  %v489_v25 = vmax.f32 %v300_v23, 0.0  ;;  %v505_v26 = vmax.f32 %v348_v24, 0.0 }
  0x94   :  { %665 = vst.msk [vmem:[%s1378_s3 + $0x180] sm:$0xff] %vm616_vm1, %v600_v22  ;;  %v395_v27 = vpop.f32.mrf.mxu2  ;;  %v443_v28 = vpop.f32.mrf.mxu3 }
  0x95   :  { %v553_v29 = vmin.f32 %v489_v25, 6.0  ;;  %v569_v30 = vmin.f32 %v505_v26, 6.0  ;;  %v396_v31 = vadd.f32 %v1053_v4, %v395_v27  ;;  %v444_v32 = vadd.f32 %v1053_v4, %v443_v28 }
  0x97   :  { %618 = vst.msk [vmem:[%s1378_s3 + $0x8] sm:$0xff] %vm616_vm1, %v553_v29  ;;  %v521_v33 = vmax.f32 %v396_v31, 0.0  ;;  %v537_v34 = vmax.f32 %v444_v32, 0.0 }
  0x98   :  { %634 = vst.msk [vmem:[%s1378_s3 + $0x88] sm:$0xff] %vm616_vm1, %v569_v30  ;;  %v302_v35 = vpop.f32.mrf.mxu0  ;;  %v350_v36 = vpop.f32.mrf.mxu1 }
  0x99   :  { %v585_v37 = vmin.f32 %v521_v33, 6.0  ;;  %v601_v38 = vmin.f32 %v537_v34, 6.0  ;;  %v303_v39 = vadd.f32 %v1053_v4, %v302_v35  ;;  %v351_v40 = vadd.f32 %v1053_v4, %v350_v36 }
  0x9b   :  { %650 = vst.msk [vmem:[%s1378_s3 + $0x108] sm:$0xff] %vm616_vm1, %v585_v37  ;;  %v490_v41 = vmax.f32 %v303_v39, 0.0  ;;  %v506_v42 = vmax.f32 %v351_v40, 0.0 }
  0x9c   :  { %666 = vst.msk [vmem:[%s1378_s3 + $0x188] sm:$0xff] %vm616_vm1, %v601_v38  ;;  %v398_v43 = vpop.f32.mrf.mxu2  ;;  %v446_v44 = vpop.f32.mrf.mxu3 }
  0x9d   :  { %v554_v45 = vmin.f32 %v490_v41, 6.0  ;;  %v570_v46 = vmin.f32 %v506_v42, 6.0  ;;  %v399_v47 = vadd.f32 %v1053_v4, %v398_v43  ;;  %v447_v48 = vadd.f32 %v1053_v4, %v446_v44 }
  0x9f   :  { %619 = vst.msk [vmem:[%s1378_s3 + $0x10] sm:$0xff] %vm616_vm1, %v554_v45  ;;  %v522_v49 = vmax.f32 %v399_v47, 0.0  ;;  %v538_v50 = vmax.f32 %v447_v48, 0.0 }
  0xa0   :  { %635 = vst.msk [vmem:[%s1378_s3 + $0x90] sm:$0xff] %vm616_vm1, %v570_v46  ;;  %v305_v51 = vpop.f32.mrf.mxu0  ;;  %v353_v52 = vpop.f32.mrf.mxu1 }
  0xa1   :  { %v586_v53 = vmin.f32 %v522_v49, 6.0  ;;  %v602_v54 = vmin.f32 %v538_v50, 6.0  ;;  %v306_v55 = vadd.f32 %v1053_v4, %v305_v51  ;;  %v354_v56 = vadd.f32 %v1053_v4, %v353_v52 }
  0xa3   :  { %651 = vst.msk [vmem:[%s1378_s3 + $0x110] sm:$0xff] %vm616_vm1, %v586_v53  ;;  %v491_v57 = vmax.f32 %v306_v55, 0.0  ;;  %v507_v58 = vmax.f32 %v354_v56, 0.0 }
  0xa4   :  { %667 = vst.msk [vmem:[%s1378_s3 + $0x190] sm:$0xff] %vm616_vm1, %v602_v54  ;;  %v401_v59 = vpop.f32.mrf.mxu2  ;;  %v449_v60 = vpop.f32.mrf.mxu3 }
  0xa5   :  { %v555_v61 = vmin.f32 %v491_v57, 6.0  ;;  %v571_v62 = vmin.f32 %v507_v58, 6.0  ;;  %v402_v63 = vadd.f32 %v1053_v4, %v401_v59  ;;  %v450_v0 = vadd.f32 %v1053_v4, %v449_v60 }
  0xa7   :  { %620 = vst.msk [vmem:[%s1378_s3 + $0x18] sm:$0xff] %vm616_vm1, %v555_v61  ;;  %v523_v1 = vmax.f32 %v402_v63, 0.0  ;;  %v539_v2 = vmax.f32 %v450_v0, 0.0 }
  0xa8   :  { %636 = vst.msk [vmem:[%s1378_s3 + $0x98] sm:$0xff] %vm616_vm1, %v571_v62  ;;  %v308_v3 = vpop.f32.mrf.mxu0  ;;  %v356_v5 = vpop.f32.mrf.mxu1 }
  0xa9   :  { %v587_v6 = vmin.f32 %v523_v1, 6.0  ;;  %v603_v7 = vmin.f32 %v539_v2, 6.0  ;;  %v309_v8 = vadd.f32 %v1053_v4, %v308_v3  ;;  %v357_v9 = vadd.f32 %v1053_v4, %v356_v5 }
  0xab   :  { %652 = vst.msk [vmem:[%s1378_s3 + $0x118] sm:$0xff] %vm616_vm1, %v587_v6  ;;  %v492_v10 = vmax.f32 %v309_v8, 0.0  ;;  %v508_v11 = vmax.f32 %v357_v9, 0.0 }
  0xac   :  { %668 = vst.msk [vmem:[%s1378_s3 + $0x198] sm:$0xff] %vm616_vm1, %v603_v7  ;;  %v404_v12 = vpop.f32.mrf.mxu2  ;;  %v452_v13 = vpop.f32.mrf.mxu3 }
  0xad   :  { %v556_v14 = vmin.f32 %v492_v10, 6.0  ;;  %v572_v15 = vmin.f32 %v508_v11, 6.0  ;;  %v405_v16 = vadd.f32 %v1053_v4, %v404_v12  ;;  %v453_v17 = vadd.f32 %v1053_v4, %v452_v13 }
  0xaf   :  { %621 = vst.msk [vmem:[%s1378_s3 + $0x20] sm:$0xff] %vm616_vm1, %v556_v14  ;;  %v524_v18 = vmax.f32 %v405_v16, 0.0  ;;  %v540_v19 = vmax.f32 %v453_v17, 0.0 }
  0xb0   :  { %637 = vst.msk [vmem:[%s1378_s3 + $0xa0] sm:$0xff] %vm616_vm1, %v572_v15  ;;  %v311_v20 = vpop.f32.mrf.mxu0  ;;  %v359_v21 = vpop.f32.mrf.mxu1 }
  0xb1   :  { %v588_v22 = vmin.f32 %v524_v18, 6.0  ;;  %v604_v23 = vmin.f32 %v540_v19, 6.0  ;;  %v312_v24 = vadd.f32 %v1053_v4, %v311_v20  ;;  %v360_v25 = vadd.f32 %v1053_v4, %v359_v21 }
  0xb3   :  { %653 = vst.msk [vmem:[%s1378_s3 + $0x120] sm:$0xff] %vm616_vm1, %v588_v22  ;;  %v493_v26 = vmax.f32 %v312_v24, 0.0  ;;  %v509_v27 = vmax.f32 %v360_v25, 0.0 }
  0xb4   :  { %669 = vst.msk [vmem:[%s1378_s3 + $0x1a0] sm:$0xff] %vm616_vm1, %v604_v23  ;;  %v407_v28 = vpop.f32.mrf.mxu2  ;;  %v455_v29 = vpop.f32.mrf.mxu3 }
  0xb5   :  { %v557_v30 = vmin.f32 %v493_v26, 6.0  ;;  %v573_v31 = vmin.f32 %v509_v27, 6.0  ;;  %v408_v32 = vadd.f32 %v1053_v4, %v407_v28  ;;  %v456_v33 = vadd.f32 %v1053_v4, %v455_v29 }
  0xb7   :  { %622 = vst.msk [vmem:[%s1378_s3 + $0x28] sm:$0xff] %vm616_vm1, %v557_v30  ;;  %v525_v34 = vmax.f32 %v408_v32, 0.0  ;;  %v541_v35 = vmax.f32 %v456_v33, 0.0 }
  0xb8   :  { %638 = vst.msk [vmem:[%s1378_s3 + $0xa8] sm:$0xff] %vm616_vm1, %v573_v31  ;;  %v314_v36 = vpop.f32.mrf.mxu0  ;;  %v362_v37 = vpop.f32.mrf.mxu1 }
  0xb9   :  { %v589_v38 = vmin.f32 %v525_v34, 6.0  ;;  %v605_v39 = vmin.f32 %v541_v35, 6.0  ;;  %v315_v40 = vadd.f32 %v1053_v4, %v314_v36  ;;  %v363_v41 = vadd.f32 %v1053_v4, %v362_v37 }
  0xbb   :  { %654 = vst.msk [vmem:[%s1378_s3 + $0x128] sm:$0xff] %vm616_vm1, %v589_v38  ;;  %v494_v42 = vmax.f32 %v315_v40, 0.0  ;;  %v510_v43 = vmax.f32 %v363_v41, 0.0 }
  0xbc   :  { %670 = vst.msk [vmem:[%s1378_s3 + $0x1a8] sm:$0xff] %vm616_vm1, %v605_v39  ;;  %v410_v44 = vpop.f32.mrf.mxu2  ;;  %v458_v45 = vpop.f32.mrf.mxu3 }
  0xbd   :  { %v558_v46 = vmin.f32 %v494_v42, 6.0  ;;  %v574_v47 = vmin.f32 %v510_v43, 6.0  ;;  %v411_v48 = vadd.f32 %v1053_v4, %v410_v44  ;;  %v459_v49 = vadd.f32 %v1053_v4, %v458_v45 }
  0xbf   :  { %623 = vst.msk [vmem:[%s1378_s3 + $0x30] sm:$0xff] %vm616_vm1, %v558_v46  ;;  %v526_v50 = vmax.f32 %v411_v48, 0.0  ;;  %v542_v51 = vmax.f32 %v459_v49, 0.0 }
  0xc0   :  { %639 = vst.msk [vmem:[%s1378_s3 + $0xb0] sm:$0xff] %vm616_vm1, %v574_v47  ;;  %v317_v52 = vpop.f32.mrf.mxu0  ;;  %v365_v53 = vpop.f32.mrf.mxu1 }
  0xc1   :  { %v590_v54 = vmin.f32 %v526_v50, 6.0  ;;  %v606_v55 = vmin.f32 %v542_v51, 6.0  ;;  %v318_v56 = vadd.f32 %v1053_v4, %v317_v52  ;;  %v366_v57 = vadd.f32 %v1053_v4, %v365_v53 }
  0xc3   :  { %655 = vst.msk [vmem:[%s1378_s3 + $0x130] sm:$0xff] %vm616_vm1, %v590_v54  ;;  %v495_v58 = vmax.f32 %v318_v56, 0.0  ;;  %v511_v59 = vmax.f32 %v366_v57, 0.0 }
  0xc4   :  { %671 = vst.msk [vmem:[%s1378_s3 + $0x1b0] sm:$0xff] %vm616_vm1, %v606_v55  ;;  %v413_v60 = vpop.f32.mrf.mxu2  ;;  %v461_v61 = vpop.f32.mrf.mxu3 }
  0xc5   :  { %v559_v62 = vmin.f32 %v495_v58, 6.0  ;;  %v575_v63 = vmin.f32 %v511_v59, 6.0  ;;  %v414_v0 = vadd.f32 %v1053_v4, %v413_v60  ;;  %v462_v1 = vadd.f32 %v1053_v4, %v461_v61 }
  0xc7   :  { %624 = vst.msk [vmem:[%s1378_s3 + $0x38] sm:$0xff] %vm616_vm1, %v559_v62  ;;  %v527_v2 = vmax.f32 %v414_v0, 0.0  ;;  %v543_v3 = vmax.f32 %v462_v1, 0.0 }
  0xc8   :  { %640 = vst.msk [vmem:[%s1378_s3 + $0xb8] sm:$0xff] %vm616_vm1, %v575_v63  ;;  %v320_v5 = vpop.f32.mrf.mxu0  ;;  %v368_v6 = vpop.f32.mrf.mxu1 }
  0xc9   :  { %v591_v7 = vmin.f32 %v527_v2, 6.0  ;;  %v607_v8 = vmin.f32 %v543_v3, 6.0  ;;  %v321_v9 = vadd.f32 %v1053_v4, %v320_v5  ;;  %v369_v10 = vadd.f32 %v1053_v4, %v368_v6 }
  0xcb   :  { %656 = vst.msk [vmem:[%s1378_s3 + $0x138] sm:$0xff] %vm616_vm1, %v591_v7  ;;  %v496_v11 = vmax.f32 %v321_v9, 0.0  ;;  %v512_v12 = vmax.f32 %v369_v10, 0.0 }
  0xcc   :  { %672 = vst.msk [vmem:[%s1378_s3 + $0x1b8] sm:$0xff] %vm616_vm1, %v607_v8  ;;  %v416_v13 = vpop.f32.mrf.mxu2  ;;  %v464_v14 = vpop.f32.mrf.mxu3 }
  0xcd   :  { %v560_v15 = vmin.f32 %v496_v11, 6.0  ;;  %v576_v16 = vmin.f32 %v512_v12, 6.0  ;;  %v417_v17 = vadd.f32 %v1053_v4, %v416_v13  ;;  %v465_v18 = vadd.f32 %v1053_v4, %v464_v14 }
  0xcf   :  { %625 = vst.msk [vmem:[%s1378_s3 + $0x40] sm:$0xff] %vm616_vm1, %v560_v15  ;;  %v528_v19 = vmax.f32 %v417_v17, 0.0  ;;  %v544_v20 = vmax.f32 %v465_v18, 0.0 }
  0xd0   :  { %641 = vst.msk [vmem:[%s1378_s3 + $0xc0] sm:$0xff] %vm616_vm1, %v576_v16  ;;  %v323_v21 = vpop.f32.mrf.mxu0  ;;  %v371_v22 = vpop.f32.mrf.mxu1 }
  0xd1   :  { %v592_v23 = vmin.f32 %v528_v19, 6.0  ;;  %v608_v24 = vmin.f32 %v544_v20, 6.0  ;;  %v324_v25 = vadd.f32 %v1053_v4, %v323_v21  ;;  %v372_v26 = vadd.f32 %v1053_v4, %v371_v22 }
  0xd3   :  { %657 = vst.msk [vmem:[%s1378_s3 + $0x140] sm:$0xff] %vm616_vm1, %v592_v23  ;;  %v497_v27 = vmax.f32 %v324_v25, 0.0  ;;  %v513_v28 = vmax.f32 %v372_v26, 0.0 }
  0xd4   :  { %673 = vst.msk [vmem:[%s1378_s3 + $0x1c0] sm:$0xff] %vm616_vm1, %v608_v24  ;;  %v419_v29 = vpop.f32.mrf.mxu2  ;;  %v467_v30 = vpop.f32.mrf.mxu3 }
  0xd5   :  { %v561_v31 = vmin.f32 %v497_v27, 6.0  ;;  %v577_v32 = vmin.f32 %v513_v28, 6.0  ;;  %v420_v33 = vadd.f32 %v1053_v4, %v419_v29  ;;  %v468_v34 = vadd.f32 %v1053_v4, %v467_v30 }
  0xd7   :  { %626 = vst.msk [vmem:[%s1378_s3 + $0x48] sm:$0xff] %vm616_vm1, %v561_v31  ;;  %v529_v35 = vmax.f32 %v420_v33, 0.0  ;;  %v545_v36 = vmax.f32 %v468_v34, 0.0 }
  0xd8   :  { %642 = vst.msk [vmem:[%s1378_s3 + $0xc8] sm:$0xff] %vm616_vm1, %v577_v32  ;;  %v326_v37 = vpop.f32.mrf.mxu0  ;;  %v374_v38 = vpop.f32.mrf.mxu1 }
  0xd9   :  { %v593_v39 = vmin.f32 %v529_v35, 6.0  ;;  %v609_v40 = vmin.f32 %v545_v36, 6.0  ;;  %v327_v41 = vadd.f32 %v1053_v4, %v326_v37  ;;  %v375_v42 = vadd.f32 %v1053_v4, %v374_v38 }
  0xdb   :  { %658 = vst.msk [vmem:[%s1378_s3 + $0x148] sm:$0xff] %vm616_vm1, %v593_v39  ;;  %v498_v43 = vmax.f32 %v327_v41, 0.0  ;;  %v514_v44 = vmax.f32 %v375_v42, 0.0 }
  0xdc   :  { %674 = vst.msk [vmem:[%s1378_s3 + $0x1c8] sm:$0xff] %vm616_vm1, %v609_v40  ;;  %v422_v45 = vpop.f32.mrf.mxu2  ;;  %v470_v46 = vpop.f32.mrf.mxu3 }
  0xdd   :  { %v562_v47 = vmin.f32 %v498_v43, 6.0  ;;  %v578_v48 = vmin.f32 %v514_v44, 6.0  ;;  %v423_v49 = vadd.f32 %v1053_v4, %v422_v45  ;;  %v471_v50 = vadd.f32 %v1053_v4, %v470_v46 }
  0xdf   :  { %627 = vst.msk [vmem:[%s1378_s3 + $0x50] sm:$0xff] %vm616_vm1, %v562_v47  ;;  %v530_v51 = vmax.f32 %v423_v49, 0.0  ;;  %v546_v52 = vmax.f32 %v471_v50, 0.0 }
  0xe0   :  { %643 = vst.msk [vmem:[%s1378_s3 + $0xd0] sm:$0xff] %vm616_vm1, %v578_v48  ;;  %v329_v53 = vpop.f32.mrf.mxu0  ;;  %v377_v54 = vpop.f32.mrf.mxu1 }
  0xe1   :  { %v594_v55 = vmin.f32 %v530_v51, 6.0  ;;  %v610_v56 = vmin.f32 %v546_v52, 6.0  ;;  %v330_v57 = vadd.f32 %v1053_v4, %v329_v53  ;;  %v378_v58 = vadd.f32 %v1053_v4, %v377_v54 }
  0xe3   :  { %659 = vst.msk [vmem:[%s1378_s3 + $0x150] sm:$0xff] %vm616_vm1, %v594_v55  ;;  %v499_v59 = vmax.f32 %v330_v57, 0.0  ;;  %v515_v60 = vmax.f32 %v378_v58, 0.0 }
  0xe4   :  { %675 = vst.msk [vmem:[%s1378_s3 + $0x1d0] sm:$0xff] %vm616_vm1, %v610_v56  ;;  %v425_v61 = vpop.f32.mrf.mxu2  ;;  %v473_v62 = vpop.f32.mrf.mxu3 }
  0xe5   :  { %v563_v63 = vmin.f32 %v499_v59, 6.0  ;;  %v579_v0 = vmin.f32 %v515_v60, 6.0  ;;  %v426_v1 = vadd.f32 %v1053_v4, %v425_v61  ;;  %v474_v2 = vadd.f32 %v1053_v4, %v473_v62 }
  0xe7   :  { %628 = vst.msk [vmem:[%s1378_s3 + $0x58] sm:$0xff] %vm616_vm1, %v563_v63  ;;  %v531_v3 = vmax.f32 %v426_v1, 0.0  ;;  %v547_v5 = vmax.f32 %v474_v2, 0.0 }
  0xe8   :  { %644 = vst.msk [vmem:[%s1378_s3 + $0xd8] sm:$0xff] %vm616_vm1, %v579_v0  ;;  %v332_v6 = vpop.f32.mrf.mxu0  ;;  %v380_v7 = vpop.f32.mrf.mxu1 }
  0xe9   :  { %v595_v8 = vmin.f32 %v531_v3, 6.0  ;;  %v611_v9 = vmin.f32 %v547_v5, 6.0  ;;  %v333_v10 = vadd.f32 %v1053_v4, %v332_v6  ;;  %v381_v11 = vadd.f32 %v1053_v4, %v380_v7 }
  0xeb   :  { %660 = vst.msk [vmem:[%s1378_s3 + $0x158] sm:$0xff] %vm616_vm1, %v595_v8  ;;  %v500_v12 = vmax.f32 %v333_v10, 0.0  ;;  %v516_v13 = vmax.f32 %v381_v11, 0.0 }
  0xec   :  { %676 = vst.msk [vmem:[%s1378_s3 + $0x1d8] sm:$0xff] %vm616_vm1, %v611_v9  ;;  %v428_v14 = vpop.f32.mrf.mxu2  ;;  %v476_v15 = vpop.f32.mrf.mxu3 }
  0xed   :  { %v564_v16 = vmin.f32 %v500_v12, 6.0  ;;  %v580_v17 = vmin.f32 %v516_v13, 6.0  ;;  %v429_v18 = vadd.f32 %v1053_v4, %v428_v14  ;;  %v477_v19 = vadd.f32 %v1053_v4, %v476_v15 }
  0xef   :  { %629 = vst.msk [vmem:[%s1378_s3 + $0x60] sm:$0xff] %vm616_vm1, %v564_v16  ;;  %v532_v20 = vmax.f32 %v429_v18, 0.0  ;;  %v548_v21 = vmax.f32 %v477_v19, 0.0 }
  0xf0   :  { %645 = vst.msk [vmem:[%s1378_s3 + $0xe0] sm:$0xff] %vm616_vm1, %v580_v17  ;;  %v335_v22 = vpop.f32.mrf.mxu0  ;;  %v383_v23 = vpop.f32.mrf.mxu1 }
  0xf1   :  { %v596_v24 = vmin.f32 %v532_v20, 6.0  ;;  %v612_v25 = vmin.f32 %v548_v21, 6.0  ;;  %v336_v26 = vadd.f32 %v1053_v4, %v335_v22  ;;  %v384_v27 = vadd.f32 %v1053_v4, %v383_v23 }
  0xf3   :  { %661 = vst.msk [vmem:[%s1378_s3 + $0x160] sm:$0xff] %vm616_vm1, %v596_v24  ;;  %v501_v28 = vmax.f32 %v336_v26, 0.0  ;;  %v517_v29 = vmax.f32 %v384_v27, 0.0 }
  0xf4   :  { %677 = vst.msk [vmem:[%s1378_s3 + $0x1e0] sm:$0xff] %vm616_vm1, %v612_v25  ;;  %v431_v30 = vpop.f32.mrf.mxu2  ;;  %v479_v31 = vpop.f32.mrf.mxu3 }
  0xf5   :  { %v565_v32 = vmin.f32 %v501_v28, 6.0  ;;  %v581_v33 = vmin.f32 %v517_v29, 6.0  ;;  %v432_v34 = vadd.f32 %v1053_v4, %v431_v30  ;;  %v480_v35 = vadd.f32 %v1053_v4, %v479_v31 }
  0xf7   :  { %630 = vst.msk [vmem:[%s1378_s3 + $0x68] sm:$0xff] %vm616_vm1, %v565_v32  ;;  %v533_v36 = vmax.f32 %v432_v34, 0.0  ;;  %v549_v37 = vmax.f32 %v480_v35, 0.0 }
  0xf8   :  { %646 = vst.msk [vmem:[%s1378_s3 + $0xe8] sm:$0xff] %vm616_vm1, %v581_v33  ;;  %v338_v38 = vpop.f32.mrf.mxu0  ;;  %v386_v39 = vpop.f32.mrf.mxu1 }
  0xf9   :  { %v597_v40 = vmin.f32 %v533_v36, 6.0  ;;  %v613_v41 = vmin.f32 %v549_v37, 6.0  ;;  %v339_v42 = vadd.f32 %v1053_v4, %v338_v38  ;;  %v387_v43 = vadd.f32 %v1053_v4, %v386_v39 }
  0xfb   :  { %662 = vst.msk [vmem:[%s1378_s3 + $0x168] sm:$0xff] %vm616_vm1, %v597_v40  ;;  %v502_v44 = vmax.f32 %v339_v42, 0.0  ;;  %v518_v45 = vmax.f32 %v387_v43, 0.0 }
  0xfc   :  { %678 = vst.msk [vmem:[%s1378_s3 + $0x1e8] sm:$0xff] %vm616_vm1, %v613_v41  ;;  %v434_v46 = vpop.f32.mrf.mxu2  ;;  %v482_v47 = vpop.f32.mrf.mxu3 }
  0xfd   :  { %v566_v48 = vmin.f32 %v502_v44, 6.0  ;;  %v582_v49 = vmin.f32 %v518_v45, 6.0  ;;  %v435_v50 = vadd.f32 %v1053_v4, %v434_v46  ;;  %v483_v51 = vadd.f32 %v1053_v4, %v482_v47 }
  0xff   :  { %631 = vst.msk [vmem:[%s1378_s3 + $0x70] sm:$0xff] %vm616_vm1, %v566_v48  ;;  %v534_v52 = vmax.f32 %v435_v50, 0.0  ;;  %v550_v53 = vmax.f32 %v483_v51, 0.0 }
 0x100   :  { %647 = vst.msk [vmem:[%s1378_s3 + $0xf0] sm:$0xff] %vm616_vm1, %v582_v49  ;;  %v341_v54 = vpop.f32.mrf.mxu0  ;;  %v389_v55 = vpop.f32.mrf.mxu1 }
 0x101   :  { %v598_v56 = vmin.f32 %v534_v52, 6.0  ;;  %v614_v57 = vmin.f32 %v550_v53, 6.0  ;;  %v342_v58 = vadd.f32 %v1053_v4, %v341_v54  ;;  %v390_v59 = vadd.f32 %v1053_v4, %v389_v55 }
 0x103   :  { %663 = vst.msk [vmem:[%s1378_s3 + $0x170] sm:$0xff] %vm616_vm1, %v598_v56  ;;  %v503_v60 = vmax.f32 %v342_v58, 0.0  ;;  %v519_v61 = vmax.f32 %v390_v59, 0.0 }
 0x104   :  { %679 = vst.msk [vmem:[%s1378_s3 + $0x1f0] sm:$0xff] %vm616_vm1, %v614_v57  ;;  %v437_v62 = vpop.f32.mrf.mxu2  ;;  %v485_v63 = vpop.f32.mrf.mxu3 }
 0x105   :  { %v567_v0 = vmin.f32 %v503_v60, 6.0  ;;  %v583_v1 = vmin.f32 %v519_v61, 6.0  ;;  %v438_v2 = vadd.f32 %v1053_v4, %v437_v62  ;;  %v486_v3 = vadd.f32 %v1053_v4, %v485_v63 }
 0x107   :  { %632 = vst.msk [vmem:[%s1378_s3 + $0x78] sm:$0xff] %vm616_vm1, %v567_v0  ;;  %v535_v5 = vmax.f32 %v438_v2, 0.0  ;;  %v551_v6 = vmax.f32 %v486_v3, 0.0 }
 0x108   :  { %648 = vst.msk [vmem:[%s1378_s3 + $0xf8] sm:$0xff] %vm616_vm1, %v583_v1 }
 0x109   :  { %v599_v7 = vmin.f32 %v535_v5, 6.0  ;;  %v615_v8 = vmin.f32 %v551_v6, 6.0 }
 0x10b   :  { %664 = vst.msk [vmem:[%s1378_s3 + $0x178] sm:$0xff] %vm616_vm1, %v599_v7 }
 0x10c   :  { %680 = vst.msk [vmem:[%s1378_s3 + $0x1f8] sm:$0xff] %vm616_vm1, %v615_v8 }

// kernel: combined_forward.5
= control target key start
LH: loop header
LB: loop body
LE: loop exit
PB: predicated region body
PF: predicated region fallthrough
CT: control target
= control target key end

     0   :  { %vm48_vm0 = vcmask 130048   ;;  %vm1874_vm1 = vcmask 785408   ;;  %vm1988_vm2 = vcmask 195584   ;;  %s3569_s1 = inlined_call_operand.vmem [shape: f32[16,96], index: 1, kind: input, shape index: {}]   ;;  %s3570_s0 = inlined_call_operand.vmem [shape: f32[9,128,16], index: 0, kind: input, shape index: {}]   ;;  %s3571_s2 = inlined_call_operand.vmem [shape: f32[1,96], index: 2, kind: input, shape index: {}]   ;;  %s3572_s3 = inlined_call_operand.vmem [shape: f32[9,1,96], index: 3, kind: input, shape index: {}]   ;;  %s3573_s5 = inlined_call_operand.vmem [shape: f32[96,24], index: 5, kind: input, shape index: {}]   ;;  %s3574_s4 = inlined_call_operand.vmem [shape: f32[1,96], index: 4, kind: input, shape index: {}]   ;;  %s3575_s6 = inlined_call_operand.vmem [shape: f32[1,24], index: 6, kind: input, shape index: {}]   ;;  %s3576_s7 = inlined_call_operand.vmem [shape: f32[128,24], index: 7, kind: output, shape index: {}]  }
   0x1   :  { %v43_v0 = vld [vmem:[%s3569_s1 + $0x8] sm:$0xff]  ;;  %v42_v1 = vld [vmem:[%s3569_s1] sm:$0xff]  ;;  %v36_v10 = vld [vmem:[%s3570_s0 + $0x50] sm:$0xff] }
   0x2   :  { %2305 = vmatpush.msra.mxu2 %v43_v0  ;;  %2307 = vmatpush.msra.mxu3 %v43_v0  ;;  %v34_v2 = vld [vmem:[%s3570_s0 + $0x40] sm:$0xff]  ;;  %v35_v6 = vld [vmem:[%s3570_s0 + $0x48] sm:$0xff]  ;;  %v2035_v11 = vld [vmem:[%s3570_s0 + $0xd0] sm:$0xff] }
   0x3   :  { %v2033_v3 = vld [vmem:[%s3570_s0 + $0xc0] sm:$0xff]  ;;  %111 = vmatpush.msra.mxu0 %v43_v0  ;;  %293 = vmatpush.msra.mxu1 %v43_v0  ;;  %v2034_v7 = vld [vmem:[%s3570_s0 + $0xc8] sm:$0xff]  ;;  %v28_v12 = vld [vmem:[%s3570_s0 + $0x10] sm:$0xff] }
   0x4   :  { %2306 = vmatpush.msra.mxu2 %v42_v1  ;;  %2308 = vmatpush.msra.mxu3 %v42_v1  ;;  %v26_v4 = vld [vmem:[%s3570_s0] sm:$0xff]  ;;  %v27_v8 = vld [vmem:[%s3570_s0 + $0x8] sm:$0xff]  ;;  %v2027_v13 = vld [vmem:[%s3570_s0 + $0x90] sm:$0xff] }
   0x5   :  { %2017 = vmatmul.msk.f32.vlgmr.msra.gmra.mxu2 %vm48_vm0, %v34_v2  ;;  %2049 = vmatmul.msk.f32.vlgmr.msra.gmra.mxu3 %vm48_vm0, %v2033_v3  ;;  %v2025_v5 = vld [vmem:[%s3570_s0 + $0x80] sm:$0xff]  ;;  %v2026_v9 = vld [vmem:[%s3570_s0 + $0x88] sm:$0xff]  ;;  %v37_v14 = vld [vmem:[%s3570_s0 + $0x58] sm:$0xff] }
   0x6   :  { %492 = vmatpush.msrb.mxu2 %v43_v0  ;;  %691 = vmatpush.msrb.mxu3 %v43_v0  ;;  %v2036_v15 = vld [vmem:[%s3570_s0 + $0xd8] sm:$0xff]  ;;  %v38_v18 = vld [vmem:[%s3570_s0 + $0x60] sm:$0xff]  ;;  %v39_v22 = vld [vmem:[%s3570_s0 + $0x68] sm:$0xff] }
   0x7   :  { %112 = vmatpush.msra.mxu0 %v42_v1  ;;  %294 = vmatpush.msra.mxu1 %v42_v1  ;;  %v29_v16 = vld [vmem:[%s3570_s0 + $0x18] sm:$0xff]  ;;  %v2037_v19 = vld [vmem:[%s3570_s0 + $0xe0] sm:$0xff]  ;;  %v2038_v23 = vld [vmem:[%s3570_s0 + $0xe8] sm:$0xff] }
   0x8   :  { %2009 = vmatmul.msk.f32.vlgmr.msra.gmra.mxu0 %vm48_vm0, %v26_v4  ;;  %2041 = vmatmul.msk.f32.vlgmr.msra.gmra.mxu1 %vm48_vm0, %v2025_v5  ;;  %v2028_v17 = vld [vmem:[%s3570_s0 + $0x98] sm:$0xff]  ;;  %v30_v20 = vld [vmem:[%s3570_s0 + $0x20] sm:$0xff]  ;;  %v31_v24 = vld [vmem:[%s3570_s0 + $0x28] sm:$0xff] }
   0x9   :  { %890 = vmatpush.msrb.mxu0 %v43_v0  ;;  %493 = vmatpush.msrb.mxu2 %v42_v1  ;;  %v2029_v21 = vld [vmem:[%s3570_s0 + $0xa0] sm:$0xff]  ;;  %v2030_v25 = vld [vmem:[%s3570_s0 + $0xa8] sm:$0xff]  ;;  %v40_v26 = vld [vmem:[%s3570_s0 + $0x70] sm:$0xff] }
   0xa   :  { %692 = vmatpush.msrb.mxu3 %v42_v1  ;;  %1089 = vmatpush.msrb.mxu1 %v43_v0  ;;  %v2039_v27 = vld [vmem:[%s3570_s0 + $0xf0] sm:$0xff]  ;;  %v41_v30 = vld [vmem:[%s3570_s0 + $0x78] sm:$0xff]  ;;  %v2058_v34 = vld [vmem:[%s3570_s0 + $0x100] sm:$0xff] }
   0xb   :  { %1288 = vmatpush.msra.mxu2 %v43_v0  ;;  %891 = vmatpush.msrb.mxu0 %v42_v1  ;;  %v32_v28 = vld [vmem:[%s3570_s0 + $0x30] sm:$0xff]  ;;  %v2040_v31 = vld [vmem:[%s3570_s0 + $0xf8] sm:$0xff]  ;;  %v2091_v35 = vld [vmem:[%s3570_s0 + $0x180] sm:$0xff] }
   0xc   :  { %1487 = vmatpush.msra.mxu3 %v43_v0  ;;  %1090 = vmatpush.msrb.mxu1 %v42_v1  ;;  %v2031_v29 = vld [vmem:[%s3570_s0 + $0xb0] sm:$0xff]  ;;  %v33_v32 = vld [vmem:[%s3570_s0 + $0x38] sm:$0xff]  ;;  %v2124_v36 = vld [vmem:[%s3570_s0 + $0x200] sm:$0xff] }
   0xd   :  { %1686 = vmatpush.msra.mxu0 %v43_v0  ;;  %2018 = vmatmul.msk.f32.gmra.mxu2 %vm48_vm0, %v35_v6  ;;  %v2032_v33 = vld [vmem:[%s3570_s0 + $0xb8] sm:$0xff]  ;;  %v2157_v37 = vld [vmem:[%s3570_s0 + $0x280] sm:$0xff]  ;;  %v2059_v38 = vld [vmem:[%s3570_s0 + $0x108] sm:$0xff] }
   0xe   :  { %2050 = vmatmul.msk.f32.gmra.mxu3 %vm48_vm0, %v2034_v7  ;;  %1289 = vmatpush.msra.mxu2 %v42_v1  ;;  %v2092_v39 = vld [vmem:[%s3570_s0 + $0x188] sm:$0xff]  ;;  %v2060_v42 = vld [vmem:[%s3570_s0 + $0x110] sm:$0xff]  ;;  %v2061_v46 = vld [vmem:[%s3570_s0 + $0x118] sm:$0xff] }
   0xf   :  { %1488 = vmatpush.msra.mxu3 %v42_v1  ;;  %1687 = vmatpush.msra.mxu0 %v42_v1  ;;  %v2125_v40 = vld [vmem:[%s3570_s0 + $0x208] sm:$0xff]  ;;  %v2093_v43 = vld [vmem:[%s3570_s0 + $0x190] sm:$0xff]  ;;  %v2094_v47 = vld [vmem:[%s3570_s0 + $0x198] sm:$0xff] }
  0x10   :  { %2010 = vmatmul.msk.f32.gmra.mxu0 %vm48_vm0, %v27_v8  ;;  %2042 = vmatmul.msk.f32.gmra.mxu1 %vm48_vm0, %v2026_v9  ;;  %v2158_v41 = vld [vmem:[%s3570_s0 + $0x288] sm:$0xff]  ;;  %v2126_v44 = vld [vmem:[%s3570_s0 + $0x210] sm:$0xff]  ;;  %v2127_v48 = vld [vmem:[%s3570_s0 + $0x218] sm:$0xff] }
  0x11   :  { %v2159_v45 = vld [vmem:[%s3570_s0 + $0x290] sm:$0xff]  ;;  %v2160_v49 = vld [vmem:[%s3570_s0 + $0x298] sm:$0xff]  ;;  %v2062_v50 = vld [vmem:[%s3570_s0 + $0x120] sm:$0xff] }
  0x12   :  { %v2095_v51 = vld [vmem:[%s3570_s0 + $0x1a0] sm:$0xff]  ;;  %v2063_v54 = vld [vmem:[%s3570_s0 + $0x128] sm:$0xff]  ;;  %v2064_v58 = vld [vmem:[%s3570_s0 + $0x130] sm:$0xff] }
  0x13   :  { %v2128_v52 = vld [vmem:[%s3570_s0 + $0x220] sm:$0xff]  ;;  %v2096_v55 = vld [vmem:[%s3570_s0 + $0x1a8] sm:$0xff]  ;;  %v2097_v59 = vld [vmem:[%s3570_s0 + $0x1b0] sm:$0xff] }
  0x14   :  { %v2161_v53 = vld [vmem:[%s3570_s0 + $0x2a0] sm:$0xff]  ;;  %v2129_v56 = vld [vmem:[%s3570_s0 + $0x228] sm:$0xff]  ;;  %v2130_v60 = vld [vmem:[%s3570_s0 + $0x230] sm:$0xff] }
  0x15   :  { %2019 = vmatmul.msk.f32.gmra.mxu2 %vm48_vm0, %v36_v10  ;;  %v2162_v57 = vld [vmem:[%s3570_s0 + $0x2a8] sm:$0xff]  ;;  %v2163_v61 = vld [vmem:[%s3570_s0 + $0x2b0] sm:$0xff]  ;;  %v2065_v62 = vld [vmem:[%s3570_s0 + $0x138] sm:$0xff] }
  0x16   :  { %2051 = vmatmul.msk.f32.gmra.mxu3 %vm48_vm0, %v2035_v11  ;;  %v2098_v63 = vld [vmem:[%s3570_s0 + $0x1b8] sm:$0xff]  ;;  %v2066_v2 = vld [vmem:[%s3570_s0 + $0x140] sm:$0xff] }
  0x17   :  { %v2131_v0 = vld [vmem:[%s3570_s0 + $0x238] sm:$0xff]  ;;  %v2099_v3 = vld [vmem:[%s3570_s0 + $0x1c0] sm:$0xff] }
  0x18   :  { %2011 = vmatmul.msk.f32.gmra.mxu0 %vm48_vm0, %v28_v12  ;;  %2043 = vmatmul.msk.f32.gmra.mxu1 %vm48_vm0, %v2027_v13  ;;  %v2164_v1 = vld [vmem:[%s3570_s0 + $0x2b8] sm:$0xff]  ;;  %v2636_v4 = vld [vmem:[%s3571_s2] ss:$0 sm:$0xff]  ;;  %v2067_v12 = vld [vmem:[%s3570_s0 + $0x148] sm:$0xff] }
  0x19   :  { %v2132_v6 = vld [vmem:[%s3570_s0 + $0x240] sm:$0xff]  ;;  %v2100_v13 = vld [vmem:[%s3570_s0 + $0x1c8] sm:$0xff] }
  0x1a   :  { %v2165_v7 = vld [vmem:[%s3570_s0 + $0x2c0] sm:$0xff] }
  0x1d   :  { %2020 = vmatmul.msk.f32.gmra.mxu2 %vm48_vm0, %v37_v14 }
  0x1e   :  { %2052 = vmatmul.msk.f32.gmra.mxu3 %vm48_vm0, %v2036_v15  ;;  %v2659_v15 = vld [vmem:[%s3572_s3] ss:$0 sm:$0xff] }
  0x20   :  { %2012 = vmatmul.msk.f32.gmra.mxu0 %vm48_vm0, %v29_v16  ;;  %2044 = vmatmul.msk.f32.gmra.mxu1 %vm48_vm0, %v2028_v17  ;;  %v2664_v17 = vld [vmem:[%s3572_s3 + $0x1] ss:$0 sm:$0xff] }
  0x25   :  { %2021 = vmatmul.msk.f32.gmra.mxu2 %vm48_vm0, %v38_v18 }
  0x26   :  { %2053 = vmatmul.msk.f32.gmra.mxu3 %vm48_vm0, %v2037_v19 }
  0x28   :  { %2013 = vmatmul.msk.f32.gmra.mxu0 %vm48_vm0, %v30_v20  ;;  %2045 = vmatmul.msk.f32.gmra.mxu1 %vm48_vm0, %v2029_v21  ;;  %v2133_v21 = vld [vmem:[%s3570_s0 + $0x248] sm:$0xff] }
  0x2d   :  { %2022 = vmatmul.msk.f32.gmra.mxu2 %vm48_vm0, %v39_v22  ;;  %v2166_v22 = vld [vmem:[%s3570_s0 + $0x2c8] sm:$0xff] }
  0x2e   :  { %2054 = vmatmul.msk.f32.gmra.mxu3 %vm48_vm0, %v2038_v23 }
  0x30   :  { %2014 = vmatmul.msk.f32.gmra.mxu0 %vm48_vm0, %v31_v24  ;;  %2046 = vmatmul.msk.f32.gmra.mxu1 %vm48_vm0, %v2030_v25 }
  0x35   :  { %2023 = vmatmul.msk.f32.gmra.mxu2 %vm48_vm0, %v40_v26 }
  0x36   :  { %2055 = vmatmul.msk.f32.gmra.mxu3 %vm48_vm0, %v2039_v27 }
  0x38   :  { %2015 = vmatmul.msk.f32.gmra.mxu0 %vm48_vm0, %v32_v28  ;;  %2047 = vmatmul.msk.f32.gmra.mxu1 %vm48_vm0, %v2031_v29 }
  0x3d   :  { %2024 = vmatmul.msk.f32.gmra.mxu2 %vm48_vm0, %v41_v30  ;;  %v2068_v30 = vld [vmem:[%s3570_s0 + $0x150] sm:$0xff] }
  0x3e   :  { %2056 = vmatmul.msk.f32.gmra.mxu3 %vm48_vm0, %v2040_v31  ;;  %v2101_v31 = vld [vmem:[%s3570_s0 + $0x1d0] sm:$0xff] }
  0x40   :  { %2016 = vmatmul.msk.f32.gmra.mxu0 %vm48_vm0, %v33_v32  ;;  %2048 = vmatmul.msk.f32.gmra.mxu1 %vm48_vm0, %v2032_v33 }
  0x45   :  { %2074 = vmatmul.msk.f32.vlgmr.msrb.gmra.mxu2 %vm48_vm0, %v2058_v34 }
  0x46   :  { %2107 = vmatmul.msk.f32.vlgmr.msrb.gmra.mxu3 %vm48_vm0, %v2091_v35 }
  0x48   :  { %2140 = vmatmul.msk.f32.vlgmr.msrb.gmra.mxu0 %vm48_vm0, %v2124_v36  ;;  %2173 = vmatmul.msk.f32.vlgmr.msrb.gmra.mxu1 %vm48_vm0, %v2157_v37  ;;  %v2134_v37 = vld [vmem:[%s3570_s0 + $0x250] sm:$0xff] }
  0x4d   :  { %2075 = vmatmul.msk.f32.gmra.mxu2 %vm48_vm0, %v2059_v38  ;;  %v2167_v38 = vld [vmem:[%s3570_s0 + $0x2d0] sm:$0xff] }
  0x4e   :  { %2108 = vmatmul.msk.f32.gmra.mxu3 %vm48_vm0, %v2092_v39 }
  0x50   :  { %2141 = vmatmul.msk.f32.gmra.mxu0 %vm48_vm0, %v2125_v40  ;;  %2174 = vmatmul.msk.f32.gmra.mxu1 %vm48_vm0, %v2158_v41 }
  0x55   :  { %2076 = vmatmul.msk.f32.gmra.mxu2 %vm48_vm0, %v2060_v42 }
  0x56   :  { %2109 = vmatmul.msk.f32.gmra.mxu3 %vm48_vm0, %v2093_v43 }
  0x58   :  { %2142 = vmatmul.msk.f32.gmra.mxu0 %vm48_vm0, %v2126_v44  ;;  %2175 = vmatmul.msk.f32.gmra.mxu1 %vm48_vm0, %v2159_v45 }
  0x5d   :  { %2077 = vmatmul.msk.f32.gmra.mxu2 %vm48_vm0, %v2061_v46  ;;  %v2069_v46 = vld [vmem:[%s3570_s0 + $0x158] sm:$0xff] }
  0x5e   :  { %2110 = vmatmul.msk.f32.gmra.mxu3 %vm48_vm0, %v2094_v47  ;;  %v2102_v47 = vld [vmem:[%s3570_s0 + $0x1d8] sm:$0xff] }
  0x60   :  { %2143 = vmatmul.msk.f32.gmra.mxu0 %vm48_vm0, %v2127_v48  ;;  %2176 = vmatmul.msk.f32.gmra.mxu1 %vm48_vm0, %v2160_v49 }
  0x65   :  { %2078 = vmatmul.msk.f32.gmra.mxu2 %vm48_vm0, %v2062_v50 }
  0x66   :  { %2111 = vmatmul.msk.f32.gmra.mxu3 %vm48_vm0, %v2095_v51 }
  0x68   :  { %2144 = vmatmul.msk.f32.gmra.mxu0 %vm48_vm0, %v2128_v52  ;;  %2177 = vmatmul.msk.f32.gmra.mxu1 %vm48_vm0, %v2161_v53  ;;  %v2135_v53 = vld [vmem:[%s3570_s0 + $0x258] sm:$0xff] }
  0x6d   :  { %2079 = vmatmul.msk.f32.gmra.mxu2 %vm48_vm0, %v2063_v54  ;;  %v2168_v54 = vld [vmem:[%s3570_s0 + $0x2d8] sm:$0xff] }
  0x6e   :  { %2112 = vmatmul.msk.f32.gmra.mxu3 %vm48_vm0, %v2096_v55 }
  0x70   :  { %2145 = vmatmul.msk.f32.gmra.mxu0 %vm48_vm0, %v2129_v56  ;;  %2178 = vmatmul.msk.f32.gmra.mxu1 %vm48_vm0, %v2162_v57 }
  0x75   :  { %2080 = vmatmul.msk.f32.gmra.mxu2 %vm48_vm0, %v2064_v58 }
  0x76   :  { %2113 = vmatmul.msk.f32.gmra.mxu3 %vm48_vm0, %v2097_v59 }
  0x78   :  { %2146 = vmatmul.msk.f32.gmra.mxu0 %vm48_vm0, %v2130_v60  ;;  %2179 = vmatmul.msk.f32.gmra.mxu1 %vm48_vm0, %v2163_v61 }
  0x7d   :  { %2081 = vmatmul.msk.f32.gmra.mxu2 %vm48_vm0, %v2065_v62  ;;  %v2070_v62 = vld [vmem:[%s3570_s0 + $0x160] sm:$0xff] }
  0x7e   :  { %2114 = vmatmul.msk.f32.gmra.mxu3 %vm48_vm0, %v2098_v63  ;;  %v2103_v63 = vld [vmem:[%s3570_s0 + $0x1e0] sm:$0xff] }
  0x80   :  { %2147 = vmatmul.msk.f32.gmra.mxu0 %vm48_vm0, %v2131_v0  ;;  %2180 = vmatmul.msk.f32.gmra.mxu1 %vm48_vm0, %v2164_v1 }
  0x85   :  { %2082 = vmatmul.msk.f32.gmra.mxu2 %vm48_vm0, %v2066_v2  ;;  %v2638_v5 = vpop.f32.mrf.mxu0 }
  0x86   :  { %2115 = vmatmul.msk.f32.gmra.mxu3 %vm48_vm0, %v2099_v3 }
  0x88   :  { %v138_v8 = vpop.f32.mrf.mxu2  ;;  %v320_v9 = vpop.f32.mrf.mxu3  ;;  %2148 = vmatmul.msk.f32.gmra.mxu0 %vm48_vm0, %v2132_v6  ;;  %2181 = vmatmul.msk.f32.gmra.mxu1 %vm48_vm0, %v2165_v7  ;;  %v2136_v7 = vld [vmem:[%s3570_s0 + $0x260] sm:$0xff] }
  0x89   :  { %v139_v10 = vadd.f32 %v2636_v4, %v138_v8  ;;  %v321_v11 = vadd.f32 %v2636_v4, %v320_v9  ;;  %v2169_v8 = vld [vmem:[%s3570_s0 + $0x2e0] sm:$0xff] }
  0x8b   :  { %v170_v14 = vmax.f32 %v139_v10, 0.0  ;;  %v352_v16 = vmax.f32 %v321_v11, 0.0 }
  0x8d   :  { %v186_v18 = vmin.f32 %v170_v14, 6.0  ;;  %v368_v19 = vmin.f32 %v352_v16, 6.0  ;;  %2083 = vmatmul.msk.f32.gmra.mxu2 %vm48_vm0, %v2067_v12  ;;  %v2668_v20 = vpop.f32.mrf.mxu0 }
  0x8e   :  { %2116 = vmatmul.msk.f32.gmra.mxu3 %vm48_vm0, %v2100_v13 }
  0x8f   :  { %v206_v23 = vmul.f32 %v2659_v15, %v186_v18  ;;  %v389_v24 = vmul.f32 %v2664_v17, %v368_v19  ;;  %v2071_v18 = vld [vmem:[%s3570_s0 + $0x168] sm:$0xff] }
  0x90   :  { %v141_v25 = vpop.f32.mrf.mxu2  ;;  %2149 = vmatmul.msk.f32.gmra.mxu0 %vm48_vm0, %v2133_v21  ;;  %2182 = vmatmul.msk.f32.gmra.mxu1 %vm48_vm0, %v2166_v22  ;;  %v2104_v19 = vld [vmem:[%s3570_s0 + $0x1e8] sm:$0xff] }
  0x91   :  { %v323_v26 = vpop.f32.mrf.mxu3  ;;  %v2680_v27 = vadd.f32 %v389_v24, %v206_v23  ;;  %v142_v28 = vadd.f32 %v2636_v4, %v141_v25  ;;  %v296_v23 = vpop.f32.mrf.mxu1 }
  0x92   :  { %v324_v29 = vadd.f32 %v2636_v4, %v323_v26 }
  0x93   :  { %v171_v32 = vmax.f32 %v142_v28, 0.0  ;;  %v2137_v28 = vld [vmem:[%s3570_s0 + $0x268] sm:$0xff] }
  0x94   :  { %v353_v33 = vmax.f32 %v324_v29, 0.0  ;;  %v2170_v29 = vld [vmem:[%s3570_s0 + $0x2e8] sm:$0xff] }
  0x95   :  { %v187_v34 = vmin.f32 %v171_v32, 6.0  ;;  %2084 = vmatmul.msk.f32.gmra.mxu2 %vm48_vm0, %v2068_v30  ;;  %v2692_v36 = vpop.f32.mrf.mxu0 }
  0x96   :  { %v369_v35 = vmin.f32 %v353_v33, 6.0  ;;  %2117 = vmatmul.msk.f32.gmra.mxu3 %vm48_vm0, %v2101_v31 }
  0x97   :  { %v207_v39 = vmul.f32 %v2659_v15, %v187_v34 }
  0x98   :  { %v390_v40 = vmul.f32 %v2664_v17, %v369_v35  ;;  %v144_v41 = vpop.f32.mrf.mxu2  ;;  %2150 = vmatmul.msk.f32.gmra.mxu0 %vm48_vm0, %v2134_v37  ;;  %2183 = vmatmul.msk.f32.gmra.mxu1 %vm48_vm0, %v2167_v38  ;;  %v2072_v38 = vld [vmem:[%s3570_s0 + $0x170] sm:$0xff] }
  0x99   :  { %v326_v42 = vpop.f32.mrf.mxu3  ;;  %v145_v44 = vadd.f32 %v2636_v4, %v144_v41 }
  0x9a   :  { %v2704_v43 = vadd.f32 %v390_v40, %v207_v39  ;;  %v327_v45 = vadd.f32 %v2636_v4, %v326_v42  ;;  %v2105_v39 = vld [vmem:[%s3570_s0 + $0x1f0] sm:$0xff] }
  0x9b   :  { %v172_v48 = vmax.f32 %v145_v44, 0.0 }
  0x9c   :  { %v354_v49 = vmax.f32 %v327_v45, 0.0 }
  0x9d   :  { %v188_v50 = vmin.f32 %v172_v48, 6.0  ;;  %2085 = vmatmul.msk.f32.gmra.mxu2 %vm48_vm0, %v2069_v46  ;;  %v2716_v52 = vpop.f32.mrf.mxu0  ;;  %v2138_v46 = vld [vmem:[%s3570_s0 + $0x270] sm:$0xff]  ;;  %v299_v48 = vpop.f32.mrf.mxu1 }
  0x9e   :  { %v370_v51 = vmin.f32 %v354_v49, 6.0  ;;  %2118 = vmatmul.msk.f32.gmra.mxu3 %vm48_vm0, %v2102_v47  ;;  %v2171_v47 = vld [vmem:[%s3570_s0 + $0x2f0] sm:$0xff] }
  0x9f   :  { %v208_v55 = vmul.f32 %v2659_v15, %v188_v50 }
  0xa0   :  { %v391_v56 = vmul.f32 %v2664_v17, %v370_v51  ;;  %v147_v57 = vpop.f32.mrf.mxu2  ;;  %2151 = vmatmul.msk.f32.gmra.mxu0 %vm48_vm0, %v2135_v53  ;;  %2184 = vmatmul.msk.f32.gmra.mxu1 %vm48_vm0, %v2168_v54 }
  0xa1   :  { %v329_v58 = vpop.f32.mrf.mxu3  ;;  %v148_v60 = vadd.f32 %v2636_v4, %v147_v57  ;;  %v2073_v57 = vld [vmem:[%s3570_s0 + $0x178] sm:$0xff] }
  0xa2   :  { %v2728_v59 = vadd.f32 %v391_v56, %v208_v55  ;;  %v330_v61 = vadd.f32 %v2636_v4, %v329_v58  ;;  %v2106_v58 = vld [vmem:[%s3570_s0 + $0x1f8] sm:$0xff] }
  0xa3   :  { %v173_v0 = vmax.f32 %v148_v60, 0.0 }
  0xa4   :  { %v355_v1 = vmax.f32 %v330_v61, 0.0 }
  0xa5   :  { %v189_v2 = vmin.f32 %v173_v0, 6.0  ;;  %2086 = vmatmul.msk.f32.gmra.mxu2 %vm48_vm0, %v2070_v62  ;;  %v2740_v6 = vpop.f32.mrf.mxu0 }
  0xa6   :  { %v371_v3 = vmin.f32 %v355_v1, 6.0  ;;  %2119 = vmatmul.msk.f32.gmra.mxu3 %vm48_vm0, %v2103_v63  ;;  %v2139_v1 = vld [vmem:[%s3570_s0 + $0x278] sm:$0xff] }
  0xa7   :  { %v209_v9 = vmul.f32 %v2659_v15, %v189_v2  ;;  %v2172_v2 = vld [vmem:[%s3570_s0 + $0x2f8] sm:$0xff] }
  0xa8   :  { %v392_v10 = vmul.f32 %v2664_v17, %v371_v3  ;;  %v150_v11 = vpop.f32.mrf.mxu2  ;;  %2152 = vmatmul.msk.f32.gmra.mxu0 %vm48_vm0, %v2136_v7  ;;  %2185 = vmatmul.msk.f32.gmra.mxu1 %vm48_vm0, %v2169_v8  ;;  %v115_v3 = vadd.f32 %v2636_v4, %v2638_v5  ;;  %v297_v7 = vadd.f32 %v2636_v4, %v296_v23  ;;  %v2190_v5 = vld [vmem:[%s3570_s0 + $0x300] sm:$0xff] }
  0xa9   :  { %v332_v12 = vpop.f32.mrf.mxu3  ;;  %v151_v14 = vadd.f32 %v2636_v4, %v150_v11 }
  0xaa   :  { %v2752_v13 = vadd.f32 %v392_v10, %v209_v9  ;;  %v333_v16 = vadd.f32 %v2636_v4, %v332_v12  ;;  %v302_v12 = vpop.f32.mrf.mxu1 }
  0xab   :  { %v174_v21 = vmax.f32 %v151_v14, 0.0 }
  0xac   :  { %v356_v22 = vmax.f32 %v333_v16, 0.0 }
  0xad   :  { %v190_v24 = vmin.f32 %v174_v21, 6.0  ;;  %2087 = vmatmul.msk.f32.gmra.mxu2 %vm48_vm0, %v2071_v18  ;;  %v2764_v26 = vpop.f32.mrf.mxu0  ;;  %v162_v21 = vmax.f32 %v115_v3, 0.0  ;;  %v303_v3 = vadd.f32 %v2636_v4, %v302_v12 }
  0xae   :  { %v372_v25 = vmin.f32 %v356_v22, 6.0  ;;  %2120 = vmatmul.msk.f32.gmra.mxu3 %vm48_vm0, %v2104_v19  ;;  %v2223_v19 = vld [vmem:[%s3570_s0 + $0x380] sm:$0xff]  ;;  %v344_v22 = vmax.f32 %v297_v7, 0.0 }
  0xaf   :  { %v210_v30 = vmul.f32 %v2659_v15, %v190_v24 }
  0xb0   :  { %v393_v31 = vmul.f32 %v2664_v17, %v372_v25  ;;  %v153_v32 = vpop.f32.mrf.mxu2  ;;  %2153 = vmatmul.msk.f32.gmra.mxu0 %vm48_vm0, %v2137_v28  ;;  %2186 = vmatmul.msk.f32.gmra.mxu1 %vm48_vm0, %v2170_v29 }
  0xb1   :  { %v335_v33 = vpop.f32.mrf.mxu3  ;;  %v154_v35 = vadd.f32 %v2636_v4, %v153_v32  ;;  %v118_v32 = vadd.f32 %v2636_v4, %v2668_v20 }
  0xb2   :  { %v2776_v34 = vadd.f32 %v393_v31, %v210_v30  ;;  %v336_v37 = vadd.f32 %v2636_v4, %v335_v33  ;;  %v2256_v30 = vld [vmem:[%s3570_s0 + $0x400] sm:$0xff]  ;;  %v1869_v31 = vld [vmem:[%s3573_s5 + $0x58] sm:$0xff]  ;;  %v300_v33 = vadd.f32 %v2636_v4, %v299_v48  ;;  %v2191_v48 = vld [vmem:[%s3570_s0 + $0x308] sm:$0xff] }
  0xb3   :  { %v175_v40 = vmax.f32 %v154_v35, 0.0  ;;  %1927 = vmatpush.msra.mxu1 %v1869_v31  ;;  %v178_v35 = vmin.f32 %v162_v21, 6.0  ;;  %v163_v20 = vmax.f32 %v118_v32, 0.0 }
  0xb4   :  { %v357_v41 = vmax.f32 %v336_v37, 0.0  ;;  %v360_v37 = vmin.f32 %v344_v22, 6.0  ;;  %v346_v22 = vmax.f32 %v303_v3, 0.0 }
  0xb5   :  { %v191_v42 = vmin.f32 %v175_v40, 6.0  ;;  %2088 = vmatmul.msk.f32.gmra.mxu2 %vm48_vm0, %v2072_v38  ;;  %v2788_v45 = vpop.f32.mrf.mxu0 }
  0xb6   :  { %v373_v44 = vmin.f32 %v357_v41, 6.0  ;;  %2121 = vmatmul.msk.f32.gmra.mxu3 %vm48_vm0, %v2105_v39 }
  0xb7   :  { %v211_v49 = vmul.f32 %v2659_v15, %v191_v42 }
  0xb8   :  { %v394_v50 = vmul.f32 %v2664_v17, %v373_v44  ;;  %v156_v51 = vpop.f32.mrf.mxu2  ;;  %2154 = vmatmul.msk.f32.gmra.mxu0 %vm48_vm0, %v2138_v46  ;;  %2187 = vmatmul.msk.f32.gmra.mxu1 %vm48_vm0, %v2171_v47  ;;  %v345_v47 = vmax.f32 %v300_v33, 0.0 }
  0xb9   :  { %v338_v53 = vpop.f32.mrf.mxu3  ;;  %v157_v55 = vadd.f32 %v2636_v4, %v156_v51  ;;  %v381_v51 = vmul.f32 %v2664_v17, %v360_v37 }
  0xba   :  { %v2800_v54 = vadd.f32 %v394_v50, %v211_v49  ;;  %v339_v56 = vadd.f32 %v2636_v4, %v338_v53  ;;  %v2224_v49 = vld [vmem:[%s3570_s0 + $0x388] sm:$0xff]  ;;  %v198_v50 = vmul.f32 %v2659_v15, %v178_v35  ;;  %v305_v53 = vpop.f32.mrf.mxu1 }
  0xbb   :  { %v176_v60 = vmax.f32 %v157_v55, 0.0 }
  0xbc   :  { %v358_v61 = vmax.f32 %v339_v56, 0.0  ;;  %v2868_v56 = vld [vmem:[%s3572_s3 + $0x2] ss:$0 sm:$0xff]  ;;  %v397_v7 = vadd.f32 %v381_v51, %v198_v50 }
  0xbd   :  { %v192_v62 = vmin.f32 %v176_v60, 6.0  ;;  %2089 = vmatmul.msk.f32.gmra.mxu2 %vm48_vm0, %v2073_v57  ;;  %v2812_v0 = vpop.f32.mrf.mxu0 }
  0xbe   :  { %v374_v63 = vmin.f32 %v358_v61, 6.0  ;;  %2122 = vmatmul.msk.f32.gmra.mxu3 %vm48_vm0, %v2106_v58  ;;  %v2873_v58 = vld [vmem:[%s3572_s3 + $0x3] ss:$0 sm:$0xff] }
  0xbf   :  { %v212_v8 = vmul.f32 %v2659_v15, %v192_v62 }
  0xc0   :  { %v395_v9 = vmul.f32 %v2664_v17, %v374_v63  ;;  %v159_v10 = vpop.f32.mrf.mxu2  ;;  %2155 = vmatmul.msk.f32.gmra.mxu0 %vm48_vm0, %v2139_v1  ;;  %2188 = vmatmul.msk.f32.gmra.mxu1 %vm48_vm0, %v2172_v2  ;;  %v2257_v63 = vld [vmem:[%s3570_s0 + $0x408] sm:$0xff]  ;;  %v179_v1 = vmin.f32 %v163_v20, 6.0  ;;  %v121_v2 = vadd.f32 %v2636_v4, %v2692_v36  ;;  %v1868_v36 = vld [vmem:[%s3573_s5 + $0x50] sm:$0xff] }
  0xc1   :  { %v341_v11 = vpop.f32.mrf.mxu3  ;;  %v160_v16 = vadd.f32 %v2636_v4, %v159_v10  ;;  %1928 = vmatpush.msra.mxu1 %v1868_v36 }
  0xc2   :  { %v2827_v14 = vadd.f32 %v395_v9, %v212_v8  ;;  %v342_v18 = vadd.f32 %v2636_v4, %v341_v11  ;;  %v361_v8 = vmin.f32 %v345_v47, 6.0  ;;  %v199_v12 = vmul.f32 %v2659_v15, %v179_v1  ;;  %v308_v32 = vpop.f32.mrf.mxu1 }
  0xc3   :  { %v177_v23 = vmax.f32 %v160_v16, 0.0  ;;  %v164_v21 = vmax.f32 %v121_v2, 0.0 }
  0xc4   :  { %v359_v24 = vmax.f32 %v342_v18, 0.0 }
  0xc5   :  { %v193_v25 = vmin.f32 %v177_v23, 6.0  ;;  %2206 = vmatmul.msk.f32.vlgmr.msra.gmra.mxu2 %vm48_vm0, %v2190_v5  ;;  %v2839_v29 = vpop.f32.mrf.mxu0  ;;  %v2192_v23 = vld [vmem:[%s3570_s0 + $0x310] sm:$0xff] }
  0xc6   :  { %v375_v28 = vmin.f32 %v359_v24, 6.0  ;;  %2239 = vmatmul.msk.f32.vlgmr.msra.gmra.mxu3 %vm48_vm0, %v2223_v19  ;;  %v2225_v24 = vld [vmem:[%s3570_s0 + $0x390] sm:$0xff] }
  0xc7   :  { %v213_v38 = vmul.f32 %v2659_v15, %v193_v25  ;;  %v382_v25 = vmul.f32 %v2664_v17, %v361_v8 }
  0xc8   :  { %v396_v39 = vmul.f32 %v2664_v17, %v375_v28  ;;  %v495_v40 = vpop.f32.mrf.mxu2  ;;  %2272 = vmatmul.msk.f32.vlgmr.msra.gmra.mxu0 %vm48_vm0, %v2256_v30 }
  0xc9   :  { %v694_v41 = vpop.f32.mrf.mxu3  ;;  %v496_v44 = vadd.f32 %v2636_v4, %v495_v40  ;;  %v362_v40 = vmin.f32 %v346_v22, 6.0 }
  0xca   :  { %v2853_v42 = vadd.f32 %v396_v39, %v213_v38  ;;  %v695_v46 = vadd.f32 %v2636_v4, %v694_v41  ;;  %v2258_v38 = vld [vmem:[%s3570_s0 + $0x410] sm:$0xff]  ;;  %v180_v39 = vmin.f32 %v164_v21, 6.0  ;;  %v124_v41 = vadd.f32 %v2636_v4, %v2716_v52 }
  0xcb   :  { %v543_v55 = vmax.f32 %v496_v44, 0.0  ;;  %v398_v44 = vadd.f32 %v382_v25, %v199_v12  ;;  %v383_v52 = vmul.f32 %v2664_v17, %v362_v40  ;;  %v311_v12 = vpop.f32.mrf.mxu1 }
  0xcc   :  { %v742_v57 = vmax.f32 %v695_v46, 0.0  ;;  %v306_v46 = vadd.f32 %v2636_v4, %v305_v53  ;;  %v2193_v53 = vld [vmem:[%s3570_s0 + $0x318] sm:$0xff] }
  0xcd   :  { %v559_v60 = vmin.f32 %v543_v55, 6.0  ;;  %2207 = vmatmul.msk.f32.gmra.mxu2 %vm48_vm0, %v2191_v48  ;;  %v2877_v62 = vpop.f32.mrf.mxu0 }
  0xce   :  { %v758_v61 = vmin.f32 %v742_v57, 6.0  ;;  %2240 = vmatmul.msk.f32.gmra.mxu3 %vm48_vm0, %v2224_v49  ;;  %v200_v57 = vmul.f32 %v2659_v15, %v180_v39 }
  0xcf   :  { %v580_v9 = vmul.f32 %v2868_v56, %v559_v60  ;;  %v165_v60 = vmax.f32 %v124_v41, 0.0 }
  0xd0   :  { %v779_v10 = vmul.f32 %v2873_v58, %v758_v61  ;;  %v498_v11 = vpop.f32.mrf.mxu2  ;;  %2273 = vmatmul.msk.f32.gmra.mxu0 %vm48_vm0, %v2257_v63  ;;  %v2226_v61 = vld [vmem:[%s3570_s0 + $0x398] sm:$0xff]  ;;  %v347_v63 = vmax.f32 %v306_v46, 0.0 }
  0xd1   :  { %v697_v16 = vpop.f32.mrf.mxu3  ;;  %v596_v18 = vadd.f32 %v580_v9, %v397_v7  ;;  %v499_v5 = vadd.f32 %v2636_v4, %v498_v11  ;;  %v1867_v7 = vld [vmem:[%s3573_s5 + $0x48] sm:$0xff]  ;;  %v2259_v11 = vld [vmem:[%s3570_s0 + $0x418] sm:$0xff] }
  0xd2   :  { %v698_v19 = vadd.f32 %v2636_v4, %v697_v16  ;;  %1929 = vmatpush.msra.mxu1 %v1867_v7  ;;  %v181_v16 = vmin.f32 %v165_v60, 6.0  ;;  %v363_v36 = vmin.f32 %v347_v63, 6.0 }
  0xd3   :  { %v2901_v28 = vadd.f32 %v779_v10, %v596_v18  ;;  %v544_v30 = vmax.f32 %v499_v5, 0.0  ;;  %v127_v18 = vadd.f32 %v2636_v4, %v2740_v6  ;;  %v309_v5 = vadd.f32 %v2636_v4, %v308_v32 }
  0xd4   :  { %v743_v31 = vmax.f32 %v698_v19, 0.0  ;;  %v399_v19 = vadd.f32 %v383_v52, %v200_v57  ;;  %v201_v6 = vmul.f32 %v2659_v15, %v181_v16  ;;  %v384_v39 = vmul.f32 %v2664_v17, %v363_v36  ;;  %v2195_v16 = vld [vmem:[%s3570_s0 + $0x328] sm:$0xff] }
  0xd5   :  { %v560_v33 = vmin.f32 %v544_v30, 6.0  ;;  %2208 = vmatmul.msk.f32.gmra.mxu2 %vm48_vm0, %v2192_v23  ;;  %v2905_v37 = vpop.f32.mrf.mxu0  ;;  %v348_v32 = vmax.f32 %v309_v5, 0.0  ;;  %v312_v52 = vadd.f32 %v2636_v4, %v311_v12 }
  0xd6   :  { %v759_v35 = vmin.f32 %v743_v31, 6.0  ;;  %2241 = vmatmul.msk.f32.gmra.mxu3 %vm48_vm0, %v2225_v24  ;;  %v400_v57 = vadd.f32 %v384_v39, %v201_v6 }
  0xd7   :  { %v581_v20 = vmul.f32 %v2868_v56, %v560_v33  ;;  %v166_v33 = vmax.f32 %v127_v18, 0.0  ;;  %v2228_v18 = vld [vmem:[%s3570_s0 + $0x3a8] sm:$0xff]  ;;  %v349_v5 = vmax.f32 %v312_v52, 0.0 }
  0xd8   :  { %v780_v47 = vmul.f32 %v2873_v58, %v759_v35  ;;  %v501_v48 = vpop.f32.mrf.mxu2  ;;  %2274 = vmatmul.msk.f32.gmra.mxu0 %vm48_vm0, %v2258_v38  ;;  %v2194_v35 = vld [vmem:[%s3570_s0 + $0x320] sm:$0xff] }
  0xd9   :  { %v700_v49 = vpop.f32.mrf.mxu3  ;;  %v597_v50 = vadd.f32 %v581_v20, %v398_v44  ;;  %v502_v51 = vadd.f32 %v2636_v4, %v501_v48  ;;  %v2227_v38 = vld [vmem:[%s3570_s0 + $0x3a0] sm:$0xff] }
  0xda   :  { %v701_v55 = vadd.f32 %v2636_v4, %v700_v49  ;;  %v2260_v48 = vld [vmem:[%s3570_s0 + $0x420] sm:$0xff] }
  0xdb   :  { %v2926_v1 = vadd.f32 %v780_v47, %v597_v50  ;;  %v545_v2 = vmax.f32 %v502_v51, 0.0  ;;  %v1866_v49 = vld [vmem:[%s3573_s5 + $0x40] sm:$0xff]  ;;  %v182_v50 = vmin.f32 %v166_v33, 6.0  ;;  %v364_v51 = vmin.f32 %v348_v32, 6.0 }
  0xdc   :  { %v744_v3 = vmax.f32 %v701_v55, 0.0  ;;  %v130_v55 = vadd.f32 %v2636_v4, %v2764_v26  ;;  %1930 = vmatpush.msra.mxu1 %v1866_v49  ;;  %v365_v33 = vmin.f32 %v349_v5, 6.0 }
  0xdd   :  { %v561_v8 = vmin.f32 %v545_v2, 6.0  ;;  %2209 = vmatmul.msk.f32.gmra.mxu2 %vm48_vm0, %v2193_v53  ;;  %v2933_v10 = vpop.f32.mrf.mxu0  ;;  %v385_v26 = vmul.f32 %v2664_v17, %v364_v51  ;;  %v2229_v51 = vld [vmem:[%s3570_s0 + $0x3b0] sm:$0xff] }
  0xde   :  { %v760_v9 = vmin.f32 %v744_v3, 6.0  ;;  %2242 = vmatmul.msk.f32.gmra.mxu3 %vm48_vm0, %v2226_v61 }
  0xdf   :  { %v582_v21 = vmul.f32 %v2868_v56, %v561_v8  ;;  %v202_v8 = vmul.f32 %v2659_v15, %v182_v50  ;;  %v2196_v50 = vld [vmem:[%s3570_s0 + $0x330] sm:$0xff] }
  0xe0   :  { %v781_v22 = vmul.f32 %v2873_v58, %v760_v9  ;;  %v504_v23 = vpop.f32.mrf.mxu2  ;;  %2275 = vmatmul.msk.f32.gmra.mxu0 %vm48_vm0, %v2259_v11  ;;  %v167_v9 = vmax.f32 %v130_v55, 0.0  ;;  %v314_v11 = vpop.f32.mrf.mxu1  ;;  %v386_v55 = vmul.f32 %v2664_v17, %v365_v33 }
  0xe1   :  { %v703_v24 = vpop.f32.mrf.mxu3  ;;  %v598_v25 = vadd.f32 %v582_v21, %v399_v19  ;;  %v505_v30 = vadd.f32 %v2636_v4, %v504_v23  ;;  %v401_v6 = vadd.f32 %v385_v26, %v202_v8  ;;  %v136_v26 = vadd.f32 %v2636_v4, %v2812_v0 }
  0xe2   :  { %v704_v31 = vadd.f32 %v2636_v4, %v703_v24  ;;  %v2261_v24 = vld [vmem:[%s3570_s0 + $0x428] sm:$0xff] }
  0xe3   :  { %v2954_v40 = vadd.f32 %v781_v22, %v598_v25  ;;  %v546_v41 = vmax.f32 %v505_v30, 0.0  ;;  %v183_v25 = vmin.f32 %v167_v9, 6.0  ;;  %v133_v30 = vadd.f32 %v2636_v4, %v2788_v45  ;;  %v1865_v45 = vld [vmem:[%s3573_s5 + $0x38] sm:$0xff] }
  0xe4   :  { %v745_v44 = vmax.f32 %v704_v31, 0.0  ;;  %v315_v31 = vadd.f32 %v2636_v4, %v314_v11  ;;  %1931 = vmatpush.msra.mxu1 %v1865_v45 }
  0xe5   :  { %v562_v46 = vmin.f32 %v546_v41, 6.0  ;;  %2210 = vmatmul.msk.f32.gmra.mxu2 %vm48_vm0, %v2194_v35  ;;  %v2958_v47 = vpop.f32.mrf.mxu0 }
  0xe6   :  { %v761_v20 = vmin.f32 %v745_v44, 6.0  ;;  %2243 = vmatmul.msk.f32.gmra.mxu3 %vm48_vm0, %v2227_v38  ;;  %v350_v49 = vmax.f32 %v315_v31, 0.0  ;;  %v2230_v31 = vld [vmem:[%s3570_s0 + $0x3b8] sm:$0xff] }
  0xe7   :  { %v583_v60 = vmul.f32 %v2868_v56, %v562_v46 }
  0xe8   :  { %v782_v53 = vmul.f32 %v2873_v58, %v761_v20  ;;  %v507_v61 = vpop.f32.mrf.mxu2  ;;  %2276 = vmatmul.msk.f32.gmra.mxu0 %vm48_vm0, %v2260_v48  ;;  %v203_v20 = vmul.f32 %v2659_v15, %v183_v25  ;;  %v168_v48 = vmax.f32 %v133_v30, 0.0  ;;  %v366_v8 = vmin.f32 %v350_v49, 6.0  ;;  %v2197_v30 = vld [vmem:[%s3570_s0 + $0x338] sm:$0xff] }
  0xe9   :  { %v706_v63 = vpop.f32.mrf.mxu3  ;;  %v599_v2 = vadd.f32 %v583_v60, %v400_v57  ;;  %v508_v3 = vadd.f32 %v2636_v4, %v507_v61  ;;  %v169_v25 = vmax.f32 %v136_v26, 0.0 }
  0xea   :  { %v707_v7 = vadd.f32 %v2636_v4, %v706_v63  ;;  %v402_v9 = vadd.f32 %v386_v55, %v203_v20  ;;  %v387_v0 = vmul.f32 %v2664_v17, %v366_v8 }
  0xeb   :  { %v2982_v19 = vadd.f32 %v782_v53, %v599_v2  ;;  %v547_v36 = vmax.f32 %v508_v3, 0.0  ;;  %v317_v53 = vpop.f32.mrf.mxu1  ;;  %v2262_v3 = vld [vmem:[%s3570_s0 + $0x430] sm:$0xff]  ;;  %v185_v45 = vmin.f32 %v169_v25, 6.0 }
  0xec   :  { %v746_v12 = vmax.f32 %v707_v7, 0.0  ;;  %v184_v7 = vmin.f32 %v168_v48, 6.0  ;;  %v318_v11 = vadd.f32 %v2636_v4, %v317_v53 }
  0xed   :  { %v563_v21 = vmin.f32 %v547_v36, 6.0  ;;  %2211 = vmatmul.msk.f32.gmra.mxu2 %vm48_vm0, %v2195_v16  ;;  %v2986_v23 = vpop.f32.mrf.mxu0 }
  0xee   :  { %v762_v22 = vmin.f32 %v746_v12, 6.0  ;;  %2244 = vmatmul.msk.f32.gmra.mxu3 %vm48_vm0, %v2228_v18 }
  0xef   :  { %v584_v32 = vmul.f32 %v2868_v56, %v563_v21 }
  0xf0   :  { %v783_v35 = vmul.f32 %v2873_v58, %v762_v22  ;;  %v510_v38 = vpop.f32.mrf.mxu2  ;;  %2277 = vmatmul.msk.f32.gmra.mxu0 %vm48_vm0, %v2261_v24  ;;  %v204_v24 = vmul.f32 %v2659_v15, %v184_v7 }
  0xf1   :  { %v709_v39 = vpop.f32.mrf.mxu3  ;;  %v600_v41 = vadd.f32 %v584_v32, %v401_v6  ;;  %v511_v44 = vadd.f32 %v2636_v4, %v510_v38  ;;  %v351_v6 = vmax.f32 %v318_v11, 0.0  ;;  %v1864_v38 = vld [vmem:[%s3573_s5 + $0x30] sm:$0xff] }
  0xf2   :  { %v710_v46 = vadd.f32 %v2636_v4, %v709_v39  ;;  %1932 = vmatpush.msra.mxu1 %v1864_v38  ;;  %v403_v20 = vadd.f32 %v387_v0, %v204_v24 }
  0xf3   :  { %v3010_v57 = vadd.f32 %v783_v35, %v600_v41  ;;  %v548_v52 = vmax.f32 %v511_v44, 0.0  ;;  %v367_v48 = vmin.f32 %v351_v6, 6.0  ;;  %v2199_v6 = vld [vmem:[%s3570_s0 + $0x348] sm:$0xff] }
  0xf4   :  { %v747_v60 = vmax.f32 %v710_v46, 0.0  ;;  %v2263_v46 = vld [vmem:[%s3570_s0 + $0x438] sm:$0xff] }
  0xf5   :  { %v564_v61 = vmin.f32 %v548_v52, 6.0  ;;  %2212 = vmatmul.msk.f32.gmra.mxu2 %vm48_vm0, %v2196_v50  ;;  %v3014_v2 = vpop.f32.mrf.mxu0  ;;  %v388_v7 = vmul.f32 %v2664_v17, %v367_v48  ;;  %v2265_v48 = vld [vmem:[%s3570_s0 + $0x448] sm:$0xff] }
  0xf6   :  { %v763_v63 = vmin.f32 %v747_v60, 6.0  ;;  %2245 = vmatmul.msk.f32.gmra.mxu3 %vm48_vm0, %v2229_v51 }
  0xf7   :  { %v585_v16 = vmul.f32 %v2868_v56, %v564_v61  ;;  %v205_v61 = vmul.f32 %v2659_v15, %v185_v45 }
  0xf8   :  { %v784_v18 = vmul.f32 %v2873_v58, %v763_v63  ;;  %v513_v5 = vpop.f32.mrf.mxu2  ;;  %2278 = vmatmul.msk.f32.gmra.mxu0 %vm48_vm0, %v2262_v3  ;;  %v2198_v63 = vld [vmem:[%s3570_s0 + $0x340] sm:$0xff] }
  0xf9   :  { %v712_v36 = vpop.f32.mrf.mxu3  ;;  %v601_v12 = vadd.f32 %v585_v16, %v402_v9  ;;  %v514_v21 = vadd.f32 %v2636_v4, %v513_v5  ;;  %v2231_v3 = vld [vmem:[%s3570_s0 + $0x3c0] sm:$0xff]  ;;  %v1863_v5 = vld [vmem:[%s3573_s5 + $0x28] sm:$0xff] }
  0xfa   :  { %v713_v22 = vadd.f32 %v2636_v4, %v712_v36  ;;  %1933 = vmatpush.msra.mxu1 %v1863_v5  ;;  %v404_v36 = vadd.f32 %v388_v7, %v205_v61 }
  0xfb   :  { %v3035_v33 = vadd.f32 %v784_v18, %v601_v12  ;;  %v549_v32 = vmax.f32 %v514_v21, 0.0  ;;  %v2264_v18 = vld [vmem:[%s3570_s0 + $0x440] sm:$0xff] }
  0xfc   :  { %v748_v35 = vmax.f32 %v713_v22, 0.0 }
  0xfd   :  { %v565_v39 = vmin.f32 %v549_v32, 6.0  ;;  %2213 = vmatmul.msk.f32.gmra.mxu2 %vm48_vm0, %v2197_v30  ;;  %v3042_v44 = vpop.f32.mrf.mxu0  ;;  %v2232_v32 = vld [vmem:[%s3570_s0 + $0x3c8] sm:$0xff] }
  0xfe   :  { %v764_v41 = vmin.f32 %v748_v35, 6.0  ;;  %2246 = vmatmul.msk.f32.gmra.mxu3 %vm48_vm0, %v2230_v31 }
  0xff   :  { %v586_v49 = vmul.f32 %v2868_v56, %v565_v39 }
 0x100   :  { %v785_v50 = vmul.f32 %v2873_v58, %v764_v41  ;;  %v516_v51 = vpop.f32.mrf.mxu2  ;;  %2279 = vmatmul.msk.f32.gmra.mxu0 %vm48_vm0, %v2263_v46 }
 0x101   :  { %v715_v55 = vpop.f32.mrf.mxu3  ;;  %v602_v52 = vadd.f32 %v586_v49, %v403_v20  ;;  %v517_v60 = vadd.f32 %v2636_v4, %v516_v51 }
 0x102   :  { %v716_v53 = vadd.f32 %v2636_v4, %v715_v55 }
 0x103   :  { %v3060_v8 = vadd.f32 %v785_v50, %v602_v52  ;;  %v550_v26 = vmax.f32 %v517_v60, 0.0  ;;  %v3093_v50 = vld [vmem:[%s3572_s3 + $0x4] ss:$0 sm:$0xff] }
 0x104   :  { %v749_v9 = vmax.f32 %v716_v53, 0.0 }
 0x105   :  { %v566_v11 = vmin.f32 %v550_v26, 6.0  ;;  %2214 = vmatmul.msk.f32.gmra.mxu2 %vm48_vm0, %v2198_v63  ;;  %v917_v15 = vpop.f32.mrf.mxu0  ;;  %v1862_v26 = vld [vmem:[%s3573_s5 + $0x20] sm:$0xff] }
 0x106   :  { %v765_v16 = vmin.f32 %v749_v9, 6.0  ;;  %2247 = vmatmul.msk.f32.gmra.mxu3 %vm48_vm0, %v2231_v3  ;;  %v918_v17 = vadd.f32 %v2636_v4, %v917_v15  ;;  %v2200_v9 = vld [vmem:[%s3570_s0 + $0x350] sm:$0xff]  ;;  %1934 = vmatpush.msra.mxu1 %v1862_v26 }
 0x107   :  { %v587_v12 = vmul.f32 %v2868_v56, %v566_v11  ;;  %v2233_v11 = vld [vmem:[%s3570_s0 + $0x3d0] sm:$0xff] }
 0x108   :  { %v786_v21 = vmul.f32 %v2873_v58, %v765_v16  ;;  %v519_v22 = vpop.f32.mrf.mxu2  ;;  %2280 = vmatmul.msk.f32.gmra.mxu0 %vm48_vm0, %v2264_v18  ;;  %v949_v31 = vmax.f32 %v918_v17, 0.0 }
 0x109   :  { %v718_v24 = vpop.f32.mrf.mxu3  ;;  %v603_v0 = vadd.f32 %v587_v12, %v404_v36  ;;  %v520_v25 = vadd.f32 %v2636_v4, %v519_v22 }
 0x10a   :  { %v719_v30 = vadd.f32 %v2636_v4, %v718_v24  ;;  %v965_v45 = vmin.f32 %v949_v31, 6.0 }
 0x10b   :  { %v3082_v35 = vadd.f32 %v786_v21, %v603_v0  ;;  %v551_v38 = vmax.f32 %v520_v25, 0.0  ;;  %v2266_v21 = vld [vmem:[%s3570_s0 + $0x450] sm:$0xff] }
 0x10c   :  { %v750_v39 = vmax.f32 %v719_v30, 0.0  ;;  %v986_v63 = vmul.f32 %v3093_v50, %v965_v45 }
 0x10d   :  { %v567_v41 = vmin.f32 %v551_v38, 6.0  ;;  %2215 = vmatmul.msk.f32.gmra.mxu2 %vm48_vm0, %v2199_v6  ;;  %v920_v20 = vpop.f32.mrf.mxu0 }
 0x10e   :  { %v766_v46 = vmin.f32 %v750_v39, 6.0  ;;  %2248 = vmatmul.msk.f32.gmra.mxu3 %vm48_vm0, %v2232_v32  ;;  %v921_v49 = vadd.f32 %v2636_v4, %v920_v20 }
 0x10f   :  { %v588_v51 = vmul.f32 %v2868_v56, %v567_v41  ;;  %v2201_v41 = vld [vmem:[%s3570_s0 + $0x358] sm:$0xff] }
 0x110   :  { %v787_v55 = vmul.f32 %v2873_v58, %v766_v46  ;;  %v522_v52 = vpop.f32.mrf.mxu2  ;;  %v950_v53 = vmax.f32 %v921_v49, 0.0  ;;  %2281 = vmatmul.msk.f32.gmra.mxu0 %vm48_vm0, %v2265_v48  ;;  %v2234_v46 = vld [vmem:[%s3570_s0 + $0x3d8] sm:$0xff]  ;;  %v3135_v49 = vpop.f32.mrf.mxu1 }
 0x111   :  { %v721_v60 = vpop.f32.mrf.mxu3  ;;  %v604_v61 = vadd.f32 %v588_v51, %v2680_v27  ;;  %v523_v3 = vadd.f32 %v2636_v4, %v522_v52 }
 0x112   :  { %v722_v7 = vadd.f32 %v2636_v4, %v721_v60  ;;  %v966_v18 = vmin.f32 %v950_v53, 6.0 }
 0x113   :  { %v803_v27 = vadd.f32 %v787_v55, %v604_v61  ;;  %v552_v16 = vmax.f32 %v523_v3, 0.0  ;;  %v2267_v61 = vld [vmem:[%s3570_s0 + $0x458] sm:$0xff] }
 0x114   :  { %v751_v15 = vmax.f32 %v722_v7, 0.0  ;;  %v987_v25 = vmul.f32 %v3093_v50, %v966_v18 }
 0x115   :  { %v3111_v5 = vadd.f32 %v986_v63, %v803_v27  ;;  %v568_v17 = vmin.f32 %v552_v16, 6.0  ;;  %2216 = vmatmul.msk.f32.gmra.mxu2 %vm48_vm0, %v2200_v9  ;;  %v923_v12 = vpop.f32.mrf.mxu0 }
 0x116   :  { %v767_v36 = vmin.f32 %v751_v15, 6.0  ;;  %2249 = vmatmul.msk.f32.gmra.mxu3 %vm48_vm0, %v2233_v11  ;;  %v924_v22 = vadd.f32 %v2636_v4, %v923_v12 }
 0x117   :  { %v589_v24 = vmul.f32 %v2868_v56, %v568_v17  ;;  %v2202_v17 = vld [vmem:[%s3570_s0 + $0x360] sm:$0xff] }
 0x118   :  { %v788_v0 = vmul.f32 %v2873_v58, %v767_v36  ;;  %v525_v30 = vpop.f32.mrf.mxu2  ;;  %2282 = vmatmul.msk.f32.gmra.mxu0 %vm48_vm0, %v2266_v21  ;;  %v951_v39 = vmax.f32 %v924_v22, 0.0  ;;  %v2235_v36 = vld [vmem:[%s3570_s0 + $0x3e0] sm:$0xff] }
 0x119   :  { %v724_v31 = vpop.f32.mrf.mxu3  ;;  %v605_v6 = vadd.f32 %v589_v24, %v2704_v43  ;;  %v526_v32 = vadd.f32 %v2636_v4, %v525_v30  ;;  %v1861_v43 = vld [vmem:[%s3573_s5 + $0x18] sm:$0xff]  ;;  %v2268_v30 = vld [vmem:[%s3570_s0 + $0x460] sm:$0xff] }
 0x11a   :  { %v725_v38 = vadd.f32 %v2636_v4, %v724_v31  ;;  %1935 = vmatpush.msra.mxu1 %v1861_v43  ;;  %v967_v60 = vmin.f32 %v951_v39, 6.0  ;;  %v1860_v31 = vld [vmem:[%s3573_s5 + $0x10] sm:$0xff] }
 0x11b   :  { %v804_v45 = vadd.f32 %v788_v0, %v605_v6  ;;  %v553_v20 = vmax.f32 %v526_v32, 0.0  ;;  %v3171_v6 = vld [vmem:[%s3571_s2] ss:$0 sm:$0xff] }
 0x11c   :  { %v752_v48 = vmax.f32 %v725_v38, 0.0  ;;  %v988_v16 = vmul.f32 %v3093_v50, %v967_v60  ;;  %1936 = vmatpush.msra.mxu1 %v1860_v31  ;;  %v3174_v38 = vpop.f32.mrf.mxu1  ;;  %v2203_v60 = vld [vmem:[%s3570_s0 + $0x368] sm:$0xff]  ;;  %v2237_v31 = vld [vmem:[%s3570_s0 + $0x3f0] sm:$0xff] }
 0x11d   :  { %v3137_v51 = vadd.f32 %v987_v25, %v804_v45  ;;  %v569_v55 = vmin.f32 %v553_v20, 6.0  ;;  %2217 = vmatmul.msk.f32.gmra.mxu2 %vm48_vm0, %v2201_v41  ;;  %v926_v53 = vpop.f32.mrf.mxu0 }
 0x11e   :  { %v768_v52 = vmin.f32 %v752_v48, 6.0  ;;  %2250 = vmatmul.msk.f32.gmra.mxu3 %vm48_vm0, %v2234_v46  ;;  %v927_v63 = vadd.f32 %v2636_v4, %v926_v53  ;;  %v2236_v53 = vld [vmem:[%s3570_s0 + $0x3e8] sm:$0xff] }
 0x11f   :  { %v590_v3 = vmul.f32 %v2868_v56, %v569_v55 }
 0x120   :  { %v789_v7 = vmul.f32 %v2873_v58, %v768_v52  ;;  %v528_v26 = vpop.f32.mrf.mxu2  ;;  %v952_v11 = vmax.f32 %v927_v63, 0.0  ;;  %2283 = vmatmul.msk.f32.gmra.mxu0 %vm48_vm0, %v2267_v61 }
 0x121   :  { %v727_v9 = vpop.f32.mrf.mxu3  ;;  %v606_v27 = vadd.f32 %v590_v3, %v2728_v59  ;;  %v529_v15 = vadd.f32 %v2636_v4, %v528_v26 }
 0x122   :  { %v728_v18 = vadd.f32 %v2636_v4, %v727_v9  ;;  %v968_v24 = vmin.f32 %v952_v11, 6.0 }
 0x123   :  { %v805_v12 = vadd.f32 %v789_v7, %v606_v27  ;;  %v554_v21 = vmax.f32 %v529_v15, 0.0  ;;  %v2269_v27 = vld [vmem:[%s3570_s0 + $0x468] sm:$0xff] }
 0x124   :  { %v753_v22 = vmax.f32 %v728_v18, 0.0  ;;  %v989_v46 = vmul.f32 %v3093_v50, %v968_v24 }
 0x125   :  { %v3158_v0 = vadd.f32 %v988_v16, %v805_v12  ;;  %v570_v59 = vmin.f32 %v554_v21, 6.0  ;;  %2218 = vmatmul.msk.f32.gmra.mxu2 %vm48_vm0, %v2202_v17  ;;  %v929_v4 = vpop.f32.mrf.mxu0  ;;  %v3200_v21 = vpop.f32.mrf.mxu1 }
 0x126   :  { %v769_v25 = vmin.f32 %v753_v22, 6.0  ;;  %2251 = vmatmul.msk.f32.gmra.mxu3 %vm48_vm0, %v2235_v36  ;;  %v930_v32 = vadd.f32 %v3171_v6, %v929_v4  ;;  %v1859_v4 = vld [vmem:[%s3573_s5 + $0x8] sm:$0xff] }
 0x127   :  { %v591_v39 = vmul.f32 %v2868_v56, %v570_v59  ;;  %1937 = vmatpush.msra.mxu1 %v1859_v4  ;;  %v1093_v4 = vadd.f32 %v3171_v6, %v3135_v49 }
 0x128   :  { %v790_v41 = vmul.f32 %v2873_v58, %v769_v25  ;;  %v531_v45 = vpop.f32.mrf.mxu2  ;;  %2284 = vmatmul.msk.f32.gmra.mxu0 %vm48_vm0, %v2268_v30  ;;  %v953_v52 = vmax.f32 %v930_v32, 0.0  ;;  %v2204_v30 = vld [vmem:[%s3570_s0 + $0x370] sm:$0xff] }
 0x129   :  { %v730_v20 = vpop.f32.mrf.mxu3  ;;  %v607_v48 = vadd.f32 %v591_v39, %v2752_v13  ;;  %v532_v43 = vadd.f32 %v3171_v6, %v531_v45 }
 0x12a   :  { %v731_v55 = vadd.f32 %v3171_v6, %v730_v20  ;;  %v969_v9 = vmin.f32 %v953_v52, 6.0 }
 0x12b   :  { %v806_v61 = vadd.f32 %v790_v41, %v607_v48  ;;  %v555_v63 = vmax.f32 %v532_v43, 0.0  ;;  %v2270_v43 = vld [vmem:[%s3570_s0 + $0x470] sm:$0xff] }
 0x12c   :  { %v754_v3 = vmax.f32 %v731_v55, 0.0  ;;  %v990_v24 = vmul.f32 %v3093_v50, %v969_v9 }
 0x12d   :  { %v3189_v7 = vadd.f32 %v989_v46, %v806_v61  ;;  %v571_v26 = vmin.f32 %v555_v63, 6.0  ;;  %2219 = vmatmul.msk.f32.gmra.mxu2 %vm48_vm0, %v2203_v60  ;;  %v932_v11 = vpop.f32.mrf.mxu0 }
 0x12e   :  { %v770_v13 = vmin.f32 %v754_v3, 6.0  ;;  %2252 = vmatmul.msk.f32.gmra.mxu3 %vm48_vm0, %v2236_v53  ;;  %v933_v16 = vadd.f32 %v3171_v6, %v932_v11  ;;  %v2205_v11 = vld [vmem:[%s3570_s0 + $0x378] sm:$0xff] }
 0x12f   :  { %v592_v15 = vmul.f32 %v2868_v56, %v571_v26 }
 0x130   :  { %v791_v18 = vmul.f32 %v2873_v58, %v770_v13  ;;  %v534_v17 = vpop.f32.mrf.mxu2  ;;  %v954_v12 = vmax.f32 %v933_v16, 0.0  ;;  %2285 = vmatmul.msk.f32.gmra.mxu0 %vm48_vm0, %v2269_v27  ;;  %v2238_v27 = vld [vmem:[%s3570_s0 + $0x3f8] sm:$0xff]  ;;  %v894_v16 = vadd.f32 %v3171_v6, %v2839_v29 }
 0x131   :  { %v733_v36 = vpop.f32.mrf.mxu3  ;;  %v608_v22 = vadd.f32 %v592_v15, %v2776_v34  ;;  %v535_v59 = vadd.f32 %v3171_v6, %v534_v17  ;;  %v3238_v15 = vpop.f32.mrf.mxu1 }
 0x132   :  { %v734_v25 = vadd.f32 %v3171_v6, %v733_v36  ;;  %v970_v41 = vmin.f32 %v954_v12, 6.0  ;;  %v1858_v36 = vld [vmem:[%s3573_s5] sm:$0xff] }
 0x133   :  { %v807_v34 = vadd.f32 %v791_v18, %v608_v22  ;;  %v556_v32 = vmax.f32 %v535_v59, 0.0  ;;  %1938 = vmatpush.msra.mxu1 %v1858_v36 }
 0x134   :  { %v755_v39 = vmax.f32 %v734_v25, 0.0  ;;  %v991_v53 = vmul.f32 %v3093_v50, %v970_v41  ;;  %v2271_v25 = vld [vmem:[%s3570_s0 + $0x478] sm:$0xff] }
 0x135   :  { %v3215_v46 = vadd.f32 %v990_v24, %v807_v34  ;;  %v572_v45 = vmin.f32 %v556_v32, 6.0  ;;  %2220 = vmatmul.msk.f32.gmra.mxu2 %vm48_vm0, %v2204_v30  ;;  %v935_v48 = vpop.f32.mrf.mxu0 }
 0x136   :  { %v771_v20 = vmin.f32 %v755_v39, 6.0  ;;  %2253 = vmatmul.msk.f32.gmra.mxu3 %vm48_vm0, %v2237_v31  ;;  %v936_v55 = vadd.f32 %v3171_v6, %v935_v48  ;;  %v941_v31 = vmax.f32 %v894_v16, 0.0  ;;  %v3269_v16 = vld [vmem:[%s3572_s3 + $0x5] ss:$0 sm:$0xff] }
 0x137   :  { %v593_v52 = vmul.f32 %v2868_v56, %v572_v45 }
 0x138   :  { %v792_v60 = vmul.f32 %v2873_v58, %v771_v20  ;;  %v537_v61 = vpop.f32.mrf.mxu2  ;;  %2286 = vmatmul.msk.f32.gmra.mxu0 %vm48_vm0, %v2270_v43  ;;  %v955_v9 = vmax.f32 %v936_v55, 0.0  ;;  %v1140_v55 = vmax.f32 %v1093_v4, 0.0 }
 0x139   :  { %v736_v63 = vpop.f32.mrf.mxu3  ;;  %v609_v3 = vadd.f32 %v593_v52, %v2800_v54  ;;  %v538_v26 = vadd.f32 %v3171_v6, %v537_v61  ;;  %v897_v52 = vadd.f32 %v3171_v6, %v2877_v62  ;;  %v1096_v62 = vadd.f32 %v3171_v6, %v3174_v38 }
 0x13a   :  { %v737_v13 = vadd.f32 %v3171_v6, %v736_v63  ;;  %v971_v59 = vmin.f32 %v955_v9, 6.0 }
 0x13b   :  { %v808_v18 = vadd.f32 %v792_v60, %v609_v3  ;;  %v557_v54 = vmax.f32 %v538_v26, 0.0  ;;  %v957_v60 = vmin.f32 %v941_v31, 6.0  ;;  %v3262_v26 = vpop.f32.mrf.mxu1 }
 0x13c   :  { %v756_v17 = vmax.f32 %v737_v13, 0.0  ;;  %v992_v48 = vmul.f32 %v3093_v50, %v971_v59 }
 0x13d   :  { %v3243_v12 = vadd.f32 %v991_v53, %v808_v18  ;;  %v573_v22 = vmin.f32 %v557_v54, 6.0  ;;  %2221 = vmatmul.msk.f32.gmra.mxu2 %vm48_vm0, %v2205_v11  ;;  %v938_v29 = vpop.f32.mrf.mxu0  ;;  %v942_v18 = vmax.f32 %v897_v52, 0.0 }
 0x13e   :  { %v772_v24 = vmin.f32 %v756_v17, 6.0  ;;  %2254 = vmatmul.msk.f32.gmra.mxu3 %vm48_vm0, %v2238_v27  ;;  %v939_v30 = vadd.f32 %v3171_v6, %v938_v29  ;;  %v1156_v27 = vmin.f32 %v1140_v55, 6.0  ;;  %v978_v17 = vmul.f32 %v3093_v50, %v957_v60  ;;  %v3302_v55 = vld [vmem:[%s3572_s3 + $0x8] ss:$0 sm:$0xff] }
 0x13f   :  { %v594_v34 = vmul.f32 %v2868_v56, %v573_v22 }
 0x140   :  { %v793_v32 = vmul.f32 %v2873_v58, %v772_v24  ;;  %v540_v39 = vpop.f32.mrf.mxu2  ;;  %v956_v45 = vmax.f32 %v939_v30, 0.0  ;;  %2287 = vmatmul.msk.f32.gmra.mxu0 %vm48_vm0, %v2271_v25  ;;  %v1177_v38 = vmul.f32 %v3269_v16, %v1156_v27 }
 0x141   :  { %v739_v41 = vpop.f32.mrf.mxu3  ;;  %v610_v20 = vadd.f32 %v594_v34, %v2827_v14  ;;  %v541_v43 = vadd.f32 %v3171_v6, %v540_v39  ;;  %v958_v34 = vmin.f32 %v942_v18, 6.0 }
 0x142   :  { %v740_v49 = vadd.f32 %v3171_v6, %v739_v41  ;;  %v972_v3 = vmin.f32 %v956_v45, 6.0 }
 0x143   :  { %v809_v53 = vadd.f32 %v793_v32, %v610_v20  ;;  %v558_v61 = vmax.f32 %v541_v43, 0.0  ;;  %v1141_v32 = vmax.f32 %v1096_v62, 0.0  ;;  %v3293_v20 = vld [vmem:[%s3572_s3 + $0x7] ss:$0 sm:$0xff] }
 0x144   :  { %v757_v63 = vmax.f32 %v740_v49, 0.0  ;;  %v993_v24 = vmul.f32 %v3093_v50, %v972_v3  ;;  %v979_v3 = vmul.f32 %v3093_v50, %v958_v34 }
 0x145   :  { %v3264_v13 = vadd.f32 %v992_v48, %v809_v53  ;;  %v574_v14 = vmin.f32 %v558_v61, 6.0  ;;  %v1689_v11 = vpop.f32.mrf.mxu0  ;;  %v1099_v48 = vadd.f32 %v3171_v6, %v3200_v21  ;;  %v1157_v60 = vmin.f32 %v1141_v32, 6.0 }
 0x146   :  { %v773_v9 = vmin.f32 %v757_v63, 6.0  ;;  %v1690_v54 = vadd.f32 %v3171_v6, %v1689_v11  ;;  %v1102_v32 = vadd.f32 %v3171_v6, %v3238_v15 }
 0x147   :  { %v595_v36 = vmul.f32 %v2868_v56, %v574_v14  ;;  %v900_v56 = vadd.f32 %v3171_v6, %v2905_v37  ;;  %v3306_v14 = vpop.f32.mrf.mxu1  ;;  %v1142_v11 = vmax.f32 %v1099_v48, 0.0 }
 0x148   :  { %v794_v22 = vmul.f32 %v2873_v58, %v773_v9  ;;  %v1291_v59 = vpop.f32.mrf.mxu2  ;;  %v1737_v31 = vmax.f32 %v1690_v54, 0.0  ;;  %v994_v58 = vadd.f32 %v978_v17, %v2901_v28  ;;  %v1143_v15 = vmax.f32 %v1102_v32, 0.0 }
 0x149   :  { %v1490_v29 = vpop.f32.mrf.mxu3  ;;  %v611_v25 = vadd.f32 %v595_v36, %v2853_v42  ;;  %v1292_v4 = vadd.f32 %v3171_v6, %v1291_v59  ;;  %v3288_v42 = vld [vmem:[%s3572_s3 + $0x6] ss:$0 sm:$0xff]  ;;  %v943_v53 = vmax.f32 %v900_v56, 0.0  ;;  %v1158_v34 = vmin.f32 %v1142_v11, 6.0 }
 0x14a   :  { %v1491_v30 = vadd.f32 %v3171_v6, %v1490_v29  ;;  %v1753_v49 = vmin.f32 %v1737_v31, 6.0  ;;  %v1193_v63 = vadd.f32 %v1177_v38, %v994_v58  ;;  %v903_v29 = vadd.f32 %v3171_v6, %v2933_v10 }
 0x14b   :  { %v810_v39 = vadd.f32 %v794_v22, %v611_v25  ;;  %v1339_v41 = vmax.f32 %v1292_v4, 0.0  ;;  %v959_v59 = vmin.f32 %v943_v53, 6.0  ;;  %v995_v25 = vadd.f32 %v979_v3, %v2926_v1 }
 0x14c   :  { %v1538_v45 = vmax.f32 %v1491_v30, 0.0  ;;  %v1774_v17 = vmul.f32 %v3302_v55, %v1753_v49  ;;  %v3320_v30 = vld [vmem:[%s3574_s4] ss:$0 sm:$0xff]  ;;  %v944_v1 = vmax.f32 %v903_v29, 0.0  ;;  %v1105_v29 = vadd.f32 %v3171_v6, %v3262_v26 }
 0x14d   :  { %v3297_v43 = vadd.f32 %v993_v24, %v810_v39  ;;  %v1355_v37 = vmin.f32 %v1339_v41, 6.0  ;;  %v1692_v52 = vpop.f32.mrf.mxu0  ;;  %v1178_v24 = vmul.f32 %v3269_v16, %v1157_v60  ;;  %v980_v10 = vmul.f32 %v3093_v50, %v959_v59 }
 0x14e   :  { %v1554_v28 = vmin.f32 %v1538_v45, 6.0  ;;  %v1693_v61 = vadd.f32 %v3171_v6, %v1692_v52  ;;  %v1179_v60 = vmul.f32 %v3269_v16, %v1158_v34  ;;  %v1159_v32 = vmin.f32 %v1143_v15, 6.0 }
 0x14f   :  { %v1376_v21 = vmul.f32 %v3288_v42, %v1355_v37  ;;  %v1194_v37 = vadd.f32 %v1178_v24, %v995_v25 }
 0x150   :  { %v1575_v9 = vmul.f32 %v3293_v20, %v1554_v28  ;;  %v1294_v27 = vpop.f32.mrf.mxu2  ;;  %v1738_v62 = vmax.f32 %v1693_v61, 0.0 }
 0x151   :  { %v1493_v18 = vpop.f32.mrf.mxu3  ;;  %v1392_v54 = vadd.f32 %v1376_v21, %v1193_v63  ;;  %v1295_v36 = vadd.f32 %v3171_v6, %v1294_v27  ;;  %v3331_v21 = vpop.f32.mrf.mxu1 }
 0x152   :  { %v1494_v22 = vadd.f32 %v3171_v6, %v1493_v18  ;;  %v1754_v56 = vmin.f32 %v1738_v62, 6.0  ;;  %v996_v62 = vadd.f32 %v980_v10, %v2954_v40 }
 0x153   :  { %v1591_v4 = vadd.f32 %v1575_v9, %v1392_v54  ;;  %v1340_v31 = vmax.f32 %v1295_v36, 0.0  ;;  %v960_v54 = vmin.f32 %v944_v1, 6.0 }
 0x154   :  { %v1539_v38 = vmax.f32 %v1494_v22, 0.0  ;;  %v1775_v53 = vmul.f32 %v3302_v55, %v1754_v56 }
 0x155   :  { %v1790_v58 = vadd.f32 %v1774_v17, %v1591_v4  ;;  %v1356_v39 = vmin.f32 %v1340_v31, 6.0  ;;  %v1695_v45 = vpop.f32.mrf.mxu0  ;;  %v906_v17 = vadd.f32 %v3171_v6, %v2958_v47  ;;  %v981_v40 = vmul.f32 %v3093_v50, %v960_v54 }
 0x156   :  { %v1555_v41 = vmin.f32 %v1539_v38, 6.0  ;;  %v1696_v48 = vadd.f32 %v3171_v6, %v1695_v45  ;;  %v1144_v45 = vmax.f32 %v1105_v29, 0.0 }
 0x157   :  { %v1810_v28 = vadd.f32 %v3320_v30, %v1790_v58  ;;  %v1377_v49 = vmul.f32 %v3288_v42, %v1356_v39  ;;  %v945_v56 = vmax.f32 %v906_v17, 0.0  ;;  %v1195_v58 = vadd.f32 %v1179_v60, %v996_v62 }
 0x158   :  { %v1576_v52 = vmul.f32 %v3293_v20, %v1555_v41  ;;  %v1297_v61 = vpop.f32.mrf.mxu2  ;;  %v1739_v3 = vmax.f32 %v1696_v48, 0.0  ;;  %v997_v60 = vadd.f32 %v981_v40, %v2982_v19  ;;  %v1160_v62 = vmin.f32 %v1144_v45, 6.0 }
 0x159   :  { %v1496_v63 = vpop.f32.mrf.mxu3  ;;  %v1826_v9 = vmax.f32 %v1810_v28, 0.0  ;;  %v1393_v11 = vadd.f32 %v1377_v49, %v1194_v37  ;;  %v1298_v27 = vadd.f32 %v3171_v6, %v1297_v61  ;;  %v961_v61 = vmin.f32 %v945_v56, 6.0 }
 0x15a   :  { %v1497_v18 = vadd.f32 %v3171_v6, %v1496_v63  ;;  %v1755_v25 = vmin.f32 %v1739_v3, 6.0  ;;  %v909_v63 = vadd.f32 %v3171_v6, %v2986_v23  ;;  %v3353_v3 = vpop.f32.mrf.mxu1  ;;  %v1108_v23 = vadd.f32 %v3171_v6, %v3306_v14 }
 0x15b   :  { %v1842_v36 = vmin.f32 %v1826_v9, 6.0  ;;  %v1592_v22 = vadd.f32 %v1576_v52, %v1393_v11  ;;  %v1341_v24 = vmax.f32 %v1298_v27, 0.0 }
 0x15c   :  { %v1540_v59 = vmax.f32 %v1497_v18, 0.0  ;;  %v1776_v10 = vmul.f32 %v3302_v55, %v1755_v25 }
 0x15d   :  { %v1791_v4 = vadd.f32 %v1775_v53, %v1592_v22  ;;  %v1357_v31 = vmin.f32 %v1341_v24, 6.0  ;;  %2289 = vmatmul.msk.f32.vlgmr.msra.gmra.mxu1 %vm1874_vm1, %v1842_v36  ;;  %v1698_v34 = vpop.f32.mrf.mxu0  ;;  %v1180_v53 = vmul.f32 %v3269_v16, %v1159_v32  ;;  %v982_v24 = vmul.f32 %v3093_v50, %v961_v61 }
 0x15e   :  { %v1556_v38 = vmin.f32 %v1540_v59, 6.0  ;;  %v1699_v47 = vadd.f32 %v3171_v6, %v1698_v34  ;;  %v946_v59 = vmax.f32 %v909_v63, 0.0  ;;  %v1181_v34 = vmul.f32 %v3269_v16, %v1160_v62 }
 0x15f   :  { %v1811_v39 = vadd.f32 %v3320_v30, %v1791_v4  ;;  %v1378_v41 = vmul.f32 %v3288_v42, %v1357_v31  ;;  %v1196_v25 = vadd.f32 %v1180_v53, %v997_v60 }
 0x160   :  { %v1577_v26 = vmul.f32 %v3293_v20, %v1556_v38  ;;  %v1300_v1 = vpop.f32.mrf.mxu2  ;;  %v1740_v37 = vmax.f32 %v1699_v47, 0.0  ;;  %v962_v45 = vmin.f32 %v946_v59, 6.0 }
 0x161   :  { %v1499_v48 = vpop.f32.mrf.mxu3  ;;  %v1394_v28 = vadd.f32 %v1378_v41, %v1195_v58  ;;  %v1301_v49 = vadd.f32 %v3171_v6, %v1300_v1  ;;  %v1827_v15 = vmax.f32 %v1811_v39, 0.0  ;;  %v912_v1 = vadd.f32 %v3171_v6, %v3014_v2 }
 0x162   :  { %v1500_v52 = vadd.f32 %v3171_v6, %v1499_v48  ;;  %v1756_v54 = vmin.f32 %v1740_v37, 6.0  ;;  %v3372_v60 = vpop.f32.mrf.mxu1 }
 0x163   :  { %v1593_v9 = vadd.f32 %v1577_v26, %v1394_v28  ;;  %v1342_v11 = vmax.f32 %v1301_v49, 0.0  ;;  %v1843_v18 = vmin.f32 %v1827_v15, 6.0  ;;  %v998_v26 = vadd.f32 %v982_v24, %v3010_v57 }
 0x164   :  { %v1541_v27 = vmax.f32 %v1500_v52, 0.0  ;;  %v1777_v40 = vmul.f32 %v3302_v55, %v1756_v54  ;;  %v1111_v52 = vadd.f32 %v3171_v6, %v3331_v21  ;;  %v947_v2 = vmax.f32 %v912_v1, 0.0 }
 0x165   :  { %v1792_v17 = vadd.f32 %v1776_v10, %v1593_v9  ;;  %v1358_v36 = vmin.f32 %v1342_v11, 6.0  ;;  %2290 = vmatmul.msk.f32.gmra.mxu1 %vm1874_vm1, %v1843_v18  ;;  %v1701_v19 = vpop.f32.mrf.mxu0  ;;  %v1145_v10 = vmax.f32 %v1108_v23, 0.0  ;;  %v983_v9 = vmul.f32 %v3093_v50, %v962_v45 }
 0x166   :  { %v1557_v22 = vmin.f32 %v1541_v27, 6.0  ;;  %v1702_v29 = vadd.f32 %v3171_v6, %v1701_v19  ;;  %v1197_v18 = vadd.f32 %v1181_v34, %v998_v26  ;;  %v915_v34 = vadd.f32 %v3171_v6, %v3042_v44 }
 0x167   :  { %v1812_v4 = vadd.f32 %v3320_v30, %v1792_v17  ;;  %v1379_v31 = vmul.f32 %v3288_v42, %v1358_v36  ;;  %v1161_v11 = vmin.f32 %v1145_v10, 6.0  ;;  %v1146_v17 = vmax.f32 %v1111_v52, 0.0 }
 0x168   :  { %v1578_v38 = vmul.f32 %v3293_v20, %v1557_v22  ;;  %v1303_v32 = vpop.f32.mrf.mxu2  ;;  %v1741_v47 = vmax.f32 %v1702_v29, 0.0  ;;  %v948_v10 = vmax.f32 %v915_v34, 0.0  ;;  %v1114_v1 = vadd.f32 %v3171_v6, %v3353_v3 }
 0x169   :  { %v1502_v56 = vpop.f32.mrf.mxu3  ;;  %v1395_v58 = vadd.f32 %v1379_v31, %v1196_v25  ;;  %v1304_v39 = vadd.f32 %v3171_v6, %v1303_v32  ;;  %v1828_v41 = vmax.f32 %v1812_v4, 0.0  ;;  %v999_v4 = vadd.f32 %v983_v9, %v3035_v33 }
 0x16a   :  { %v1503_v14 = vadd.f32 %v3171_v6, %v1502_v56  ;;  %v1757_v15 = vmin.f32 %v1741_v47, 6.0  ;;  %v1182_v31 = vmul.f32 %v3269_v16, %v1161_v11 }
 0x16b   :  { %v1594_v48 = vadd.f32 %v1578_v38, %v1395_v58  ;;  %v1343_v37 = vmax.f32 %v1304_v39, 0.0  ;;  %v1844_v49 = vmin.f32 %v1828_v41, 6.0  ;;  %v963_v38 = vmin.f32 %v947_v2, 6.0 }
 0x16c   :  { %v1542_v28 = vmax.f32 %v1503_v14, 0.0  ;;  %v1778_v36 = vmul.f32 %v3302_v55, %v1757_v15  ;;  %v1162_v39 = vmin.f32 %v1146_v17, 6.0 }
 0x16d   :  { %v1793_v53 = vadd.f32 %v1777_v40, %v1594_v48  ;;  %v1359_v61 = vmin.f32 %v1343_v37, 6.0  ;;  %2291 = vmatmul.msk.f32.gmra.mxu1 %vm1874_vm1, %v1844_v49  ;;  %v1704_v57 = vpop.f32.mrf.mxu0  ;;  %v984_v33 = vmul.f32 %v3093_v50, %v963_v38  ;;  %v1198_v48 = vadd.f32 %v1182_v31, %v999_v4  ;;  %v1119_v37 = vpop.f32.mrf.mxu1 }
 0x16e   :  { %v1558_v63 = vmin.f32 %v1542_v28, 6.0  ;;  %v1705_v27 = vadd.f32 %v3171_v6, %v1704_v57 }
 0x16f   :  { %v1813_v62 = vadd.f32 %v3320_v30, %v1793_v53  ;;  %v1380_v21 = vmul.f32 %v3288_v42, %v1359_v61  ;;  %v1000_v2 = vadd.f32 %v984_v33, %v3060_v8  ;;  %v1117_v8 = vadd.f32 %v3171_v6, %v3372_v60 }
 0x170   :  { %v1579_v54 = vmul.f32 %v3293_v20, %v1558_v63  ;;  %v1306_v22 = vpop.f32.mrf.mxu2  ;;  %v1742_v24 = vmax.f32 %v1705_v27, 0.0  ;;  %v1183_v27 = vmul.f32 %v3269_v16, %v1162_v39 }
 0x171   :  { %v1505_v19 = vpop.f32.mrf.mxu3  ;;  %v1396_v59 = vadd.f32 %v1380_v21, %v1197_v18  ;;  %v1307_v23 = vadd.f32 %v3171_v6, %v1306_v22  ;;  %v1829_v25 = vmax.f32 %v1813_v62, 0.0  ;;  %v964_v18 = vmin.f32 %v948_v10, 6.0 }
 0x172   :  { %v1506_v29 = vadd.f32 %v3171_v6, %v1505_v19  ;;  %v1758_v58 = vmin.f32 %v1742_v24, 6.0  ;;  %v1147_v62 = vmax.f32 %v1114_v1, 0.0  ;;  %v1199_v31 = vadd.f32 %v1183_v27, %v1000_v2 }
 0x173   :  { %v1595_v40 = vadd.f32 %v1579_v54, %v1396_v59  ;;  %v1344_v32 = vmax.f32 %v1307_v23, 0.0  ;;  %v1845_v47 = vmin.f32 %v1829_v25, 6.0  ;;  %v1148_v33 = vmax.f32 %v1117_v8, 0.0 }
 0x174   :  { %v1543_v56 = vmax.f32 %v1506_v29, 0.0  ;;  %v1779_v15 = vmul.f32 %v3302_v55, %v1758_v58  ;;  %v985_v29 = vmul.f32 %v3093_v50, %v964_v18  ;;  %v1163_v25 = vmin.f32 %v1147_v62, 6.0 }
 0x175   :  { %v1794_v14 = vadd.f32 %v1778_v36, %v1595_v40  ;;  %v1360_v41 = vmin.f32 %v1344_v32, 6.0  ;;  %2292 = vmatmul.msk.f32.gmra.mxu1 %vm1874_vm1, %v1845_v47  ;;  %v1707_v45 = vpop.f32.mrf.mxu0  ;;  %v1122_v39 = vpop.f32.mrf.mxu1 }
 0x176   :  { %v1559_v26 = vmin.f32 %v1543_v56, 6.0  ;;  %v1708_v44 = vadd.f32 %v3171_v6, %v1707_v45  ;;  %v1184_v45 = vmul.f32 %v3269_v16, %v1163_v25 }
 0x177   :  { %v1814_v28 = vadd.f32 %v3320_v30, %v1794_v14  ;;  %v1381_v49 = vmul.f32 %v3288_v42, %v1360_v41 }
 0x178   :  { %v1580_v52 = vmul.f32 %v3293_v20, %v1559_v26  ;;  %v1309_v53 = vpop.f32.mrf.mxu2  ;;  %v1743_v63 = vmax.f32 %v1708_v44, 0.0  ;;  %v1001_v26 = vadd.f32 %v985_v29, %v3082_v35 }
 0x179   :  { %v1508_v61 = vpop.f32.mrf.mxu3  ;;  %v1397_v57 = vadd.f32 %v1381_v49, %v1198_v48  ;;  %v1310_v9 = vadd.f32 %v3171_v6, %v1309_v53  ;;  %v1830_v11 = vmax.f32 %v1814_v28, 0.0 }
 0x17a   :  { %v1509_v3 = vadd.f32 %v3171_v6, %v1508_v61  ;;  %v1759_v22 = vmin.f32 %v1743_v63, 6.0  ;;  %v1164_v61 = vmin.f32 %v1148_v33, 6.0  ;;  %v1120_v63 = vadd.f32 %v3171_v6, %v1119_v37 }
 0x17b   :  { %v1596_v21 = vadd.f32 %v1580_v52, %v1397_v57  ;;  %v1345_v54 = vmax.f32 %v1310_v9, 0.0  ;;  %v1846_v36 = vmin.f32 %v1830_v11, 6.0  ;;  %v1200_v35 = vadd.f32 %v1184_v45, %v1001_v26 }
 0x17c   :  { %v1544_v17 = vmax.f32 %v1509_v3, 0.0  ;;  %v1780_v32 = vmul.f32 %v3302_v55, %v1759_v22  ;;  %v1149_v22 = vmax.f32 %v1120_v63, 0.0 }
 0x17d   :  { %v1795_v19 = vadd.f32 %v1779_v15, %v1596_v21  ;;  %v1361_v24 = vmin.f32 %v1345_v54, 6.0  ;;  %2293 = vmatmul.msk.f32.gmra.mxu1 %vm1874_vm1, %v1846_v36  ;;  %v1710_v23 = vpop.f32.mrf.mxu0  ;;  %v1185_v36 = vmul.f32 %v3269_v16, %v1164_v61 }
 0x17e   :  { %v1560_v59 = vmin.f32 %v1544_v17, 6.0  ;;  %v1711_v4 = vadd.f32 %v3171_v6, %v1710_v23 }
 0x17f   :  { %v1815_v38 = vadd.f32 %v3320_v30, %v1795_v19  ;;  %v1382_v34 = vmul.f32 %v3288_v42, %v1361_v24  ;;  %v1125_v19 = vpop.f32.mrf.mxu1 }
 0x180   :  { %v1581_v40 = vmul.f32 %v3293_v20, %v1560_v59  ;;  %v1312_v56 = vpop.f32.mrf.mxu2  ;;  %v1744_v58 = vmax.f32 %v1711_v4, 0.0 }
 0x181   :  { %v1511_v47 = vpop.f32.mrf.mxu3  ;;  %v1398_v50 = vadd.f32 %v1382_v34, %v1199_v31  ;;  %v1313_v14 = vadd.f32 %v3171_v6, %v1312_v56  ;;  %v1831_v41 = vmax.f32 %v1815_v38, 0.0  ;;  %v1165_v34 = vmin.f32 %v1149_v22, 6.0 }
 0x182   :  { %v1512_v60 = vadd.f32 %v3171_v6, %v1511_v47  ;;  %v1760_v28 = vmin.f32 %v1744_v58, 6.0  ;;  %v1201_v56 = vadd.f32 %v1185_v36, %v3111_v5 }
 0x183   :  { %v1597_v10 = vadd.f32 %v1581_v40, %v1398_v50  ;;  %v1346_v1 = vmax.f32 %v1313_v14, 0.0  ;;  %v1847_v48 = vmin.f32 %v1831_v41, 6.0  ;;  %v1123_v40 = vadd.f32 %v3171_v6, %v1122_v39 }
 0x184   :  { %v1545_v44 = vmax.f32 %v1512_v60, 0.0  ;;  %v1781_v2 = vmul.f32 %v3302_v55, %v1760_v28 }
 0x185   :  { %v1796_v49 = vadd.f32 %v1780_v32, %v1597_v10  ;;  %v1362_v52 = vmin.f32 %v1346_v1, 6.0  ;;  %2294 = vmatmul.msk.f32.gmra.mxu1 %vm1874_vm1, %v1847_v48  ;;  %v1713_v53 = vpop.f32.mrf.mxu0  ;;  %v1186_v1 = vmul.f32 %v3269_v16, %v1165_v34  ;;  %v1150_v5 = vmax.f32 %v1123_v40, 0.0 }
 0x186   :  { %v1561_v15 = vmin.f32 %v1545_v44, 6.0  ;;  %v1714_v57 = vadd.f32 %v3171_v6, %v1713_v53 }
 0x187   :  { %v1816_v9 = vadd.f32 %v3320_v30, %v1796_v49  ;;  %v1383_v3 = vmul.f32 %v3288_v42, %v1362_v52 }
 0x188   :  { %v1582_v11 = vmul.f32 %v3293_v20, %v1561_v15  ;;  %v1315_v27 = vpop.f32.mrf.mxu2  ;;  %v1745_v62 = vmax.f32 %v1714_v57, 0.0  ;;  %v1128_v15 = vpop.f32.mrf.mxu1 }
 0x189   :  { %v1514_v18 = vpop.f32.mrf.mxu3  ;;  %v1399_v21 = vadd.f32 %v1383_v3, %v1200_v35  ;;  %v1316_v54 = vadd.f32 %v3171_v6, %v1315_v27  ;;  %v1832_v37 = vmax.f32 %v1816_v9, 0.0  ;;  %v1166_v35 = vmin.f32 %v1150_v5, 6.0 }
 0x18a   :  { %v1515_v17 = vadd.f32 %v3171_v6, %v1514_v18  ;;  %v1761_v25 = vmin.f32 %v1745_v62, 6.0  ;;  %v1126_v9 = vadd.f32 %v3171_v6, %v1125_v19 }
 0x18b   :  { %v1598_v24 = vadd.f32 %v1582_v11, %v1399_v21  ;;  %v1347_v59 = vmax.f32 %v1316_v54, 0.0  ;;  %v1848_v29 = vmin.f32 %v1832_v37, 6.0  ;;  %v1202_v11 = vadd.f32 %v1186_v1, %v3137_v51 }
 0x18c   :  { %v1546_v23 = vmax.f32 %v1515_v17, 0.0  ;;  %v1782_v14 = vmul.f32 %v3302_v55, %v1761_v25  ;;  %v1151_v51 = vmax.f32 %v1126_v9, 0.0 }
 0x18d   :  { %v1797_v8 = vadd.f32 %v1781_v2, %v1598_v24  ;;  %v1363_v4 = vmin.f32 %v1347_v59, 6.0  ;;  %2295 = vmatmul.msk.f32.gmra.mxu1 %vm1874_vm1, %v1848_v29  ;;  %v1716_v38 = vpop.f32.mrf.mxu0  ;;  %v1187_v24 = vmul.f32 %v3269_v16, %v1166_v35 }
 0x18e   :  { %v1562_v31 = vmin.f32 %v1546_v23, 6.0  ;;  %v1717_v32 = vadd.f32 %v3171_v6, %v1716_v38  ;;  %v1167_v40 = vmin.f32 %v1151_v51, 6.0 }
 0x18f   :  { %v1817_v47 = vadd.f32 %v3320_v30, %v1797_v8  ;;  %v1384_v58 = vmul.f32 %v3288_v42, %v1363_v4 }
 0x190   :  { %v1583_v50 = vmul.f32 %v3293_v20, %v1562_v31  ;;  %v1318_v60 = vpop.f32.mrf.mxu2  ;;  %v1746_v26 = vmax.f32 %v1717_v32, 0.0  ;;  %v1129_v32 = vadd.f32 %v3171_v6, %v1128_v15 }
 0x191   :  { %v1517_v41 = vpop.f32.mrf.mxu3  ;;  %v1400_v45 = vadd.f32 %v1384_v58, %v1201_v56  ;;  %v1319_v33 = vadd.f32 %v3171_v6, %v1318_v60  ;;  %v1833_v10 = vmax.f32 %v1817_v47, 0.0  ;;  %v1203_v47 = vadd.f32 %v1187_v24, %v3158_v0  ;;  %v1131_v58 = vpop.f32.mrf.mxu1 }
 0x192   :  { %v1518_v39 = vadd.f32 %v3171_v6, %v1517_v41  ;;  %v1762_v52 = vmin.f32 %v1746_v26, 6.0  ;;  %v1188_v0 = vmul.f32 %v3269_v16, %v1167_v40  ;;  %v1132_v9 = vadd.f32 %v3171_v6, %v1131_v58 }
 0x193   :  { %v1599_v44 = vadd.f32 %v1583_v50, %v1400_v45  ;;  %v1348_v48 = vmax.f32 %v1319_v33, 0.0  ;;  %v1849_v49 = vmin.f32 %v1833_v10, 6.0 }
 0x194   :  { %v1547_v28 = vmax.f32 %v1518_v39, 0.0  ;;  %v1783_v62 = vmul.f32 %v3302_v55, %v1762_v52  ;;  %v1153_v51 = vmax.f32 %v1132_v9, 0.0 }
 0x195   :  { %v1798_v53 = vadd.f32 %v1782_v14, %v1599_v44  ;;  %v1364_v61 = vmin.f32 %v1348_v48, 6.0  ;;  %2296 = vmatmul.msk.f32.gmra.mxu1 %vm1874_vm1, %v1849_v49  ;;  %v1719_v57 = vpop.f32.mrf.mxu0  ;;  %v1152_v44 = vmax.f32 %v1129_v32, 0.0 }
 0x196   :  { %v1563_v63 = vmin.f32 %v1547_v28, 6.0  ;;  %v1720_v3 = vadd.f32 %v3171_v6, %v1719_v57  ;;  %v1169_v40 = vmin.f32 %v1153_v51, 6.0 }
 0x197   :  { %v1818_v2 = vadd.f32 %v3320_v30, %v1798_v53  ;;  %v1385_v27 = vmul.f32 %v3288_v42, %v1364_v61  ;;  %v1168_v35 = vmin.f32 %v1152_v44, 6.0 }
 0x198   :  { %v1584_v18 = vmul.f32 %v3293_v20, %v1563_v63  ;;  %v1321_v21 = vpop.f32.mrf.mxu2  ;;  %v1747_v17 = vmax.f32 %v1720_v3, 0.0 }
 0x199   :  { %v1520_v54 = vpop.f32.mrf.mxu3  ;;  %v1401_v37 = vadd.f32 %v1385_v27, %v1202_v11  ;;  %v1322_v36 = vadd.f32 %v3171_v6, %v1321_v21  ;;  %v1834_v19 = vmax.f32 %v1818_v2, 0.0  ;;  %v1204_v11 = vadd.f32 %v1188_v0, %v3189_v7 }
 0x19a   :  { %v1521_v22 = vadd.f32 %v3171_v6, %v1520_v54  ;;  %v1763_v8 = vmin.f32 %v1747_v17, 6.0  ;;  %v1189_v7 = vmul.f32 %v3269_v16, %v1168_v35 }
 0x19b   :  { %v1600_v59 = vadd.f32 %v1584_v18, %v1401_v37  ;;  %v1349_v23 = vmax.f32 %v1322_v36, 0.0  ;;  %v1850_v25 = vmin.f32 %v1834_v19, 6.0  ;;  %v1134_v37 = vpop.f32.mrf.mxu1 }
 0x19c   :  { %v1548_v29 = vmax.f32 %v1521_v22, 0.0  ;;  %v1784_v41 = vmul.f32 %v3302_v55, %v1763_v8  ;;  %v1135_v32 = vadd.f32 %v3171_v6, %v1134_v37 }
 0x19d   :  { %v1799_v4 = vadd.f32 %v1783_v62, %v1600_v59  ;;  %v1365_v31 = vmin.f32 %v1349_v23, 6.0  ;;  %2297 = vmatmul.msk.f32.gmra.mxu1 %vm1874_vm1, %v1850_v25  ;;  %v1722_v34 = vpop.f32.mrf.mxu0 }
 0x19e   :  { %v1564_v38 = vmin.f32 %v1548_v29, 6.0  ;;  %v1723_v56 = vadd.f32 %v3171_v6, %v1722_v34 }
 0x19f   :  { %v1819_v50 = vadd.f32 %v3320_v30, %v1799_v4  ;;  %v1386_v14 = vmul.f32 %v3288_v42, %v1365_v31 }
 0x1a0   :  { %v1585_v60 = vmul.f32 %v3293_v20, %v1564_v38  ;;  %v1324_v26 = vpop.f32.mrf.mxu2  ;;  %v1748_v33 = vmax.f32 %v1723_v56, 0.0 }
 0x1a1   :  { %v1523_v45 = vpop.f32.mrf.mxu3  ;;  %v1402_v39 = vadd.f32 %v1386_v14, %v1203_v47  ;;  %v1325_v10 = vadd.f32 %v3171_v6, %v1324_v26  ;;  %v1835_v5 = vmax.f32 %v1819_v50, 0.0  ;;  %v1205_v47 = vadd.f32 %v1189_v7, %v3215_v46 }
 0x1a2   :  { %v1524_v1 = vadd.f32 %v3171_v6, %v1523_v45  ;;  %v1764_v15 = vmin.f32 %v1748_v33, 6.0  ;;  %v1190_v46 = vmul.f32 %v3269_v16, %v1169_v40 }
 0x1a3   :  { %v1601_v48 = vadd.f32 %v1585_v60, %v1402_v39  ;;  %v1350_v28 = vmax.f32 %v1325_v10, 0.0  ;;  %v1851_v52 = vmin.f32 %v1835_v5, 6.0  ;;  %v2322_v39 = vld [vmem:[%s3571_s2] ss:$0 sm:$0xff]  ;;  %v1154_v5 = vmax.f32 %v1135_v32, 0.0  ;;  %v1137_v0 = vpop.f32.mrf.mxu1 }
 0x1a4   :  { %v1549_v49 = vmax.f32 %v1524_v1, 0.0  ;;  %v1785_v62 = vmul.f32 %v3302_v55, %v1764_v15  ;;  %v1138_v35 = vadd.f32 %v2322_v39, %v1137_v0 }
 0x1a5   :  { %v1800_v53 = vadd.f32 %v1784_v41, %v1601_v48  ;;  %v1366_v61 = vmin.f32 %v1350_v28, 6.0  ;;  %2298 = vmatmul.msk.f32.gmra.mxu1 %vm1874_vm1, %v1851_v52  ;;  %v1725_v57 = vpop.f32.mrf.mxu0 }
 0x1a6   :  { %v1565_v63 = vmin.f32 %v1549_v49, 6.0  ;;  %v1726_v3 = vadd.f32 %v3171_v6, %v1725_v57  ;;  %v1170_v57 = vmin.f32 %v1154_v5, 6.0 }
 0x1a7   :  { %v1820_v2 = vadd.f32 %v3320_v30, %v1800_v53  ;;  %v1387_v27 = vmul.f32 %v3288_v42, %v1366_v61 }
 0x1a8   :  { %v1586_v18 = vmul.f32 %v3293_v20, %v1565_v63  ;;  %v1327_v21 = vpop.f32.mrf.mxu2  ;;  %v1749_v17 = vmax.f32 %v1726_v3, 0.0  ;;  %v1206_v3 = vadd.f32 %v1190_v46, %v3243_v12 }
 0x1a9   :  { %v1526_v54 = vpop.f32.mrf.mxu3  ;;  %v1403_v36 = vadd.f32 %v1387_v27, %v1204_v11  ;;  %v1328_v22 = vadd.f32 %v3171_v6, %v1327_v21  ;;  %v1836_v24 = vmax.f32 %v1820_v2, 0.0 }
 0x1aa   :  { %v1527_v19 = vadd.f32 %v3171_v6, %v1526_v54  ;;  %v1765_v8 = vmin.f32 %v1749_v17, 6.0 }
 0x1ab   :  { %v1602_v59 = vadd.f32 %v1586_v18, %v1403_v36  ;;  %v1351_v23 = vmax.f32 %v1328_v22, 0.0  ;;  %v1852_v25 = vmin.f32 %v1836_v24, 6.0  ;;  %v1155_v24 = vmax.f32 %v1138_v35, 0.0 }
 0x1ac   :  { %v1550_v29 = vmax.f32 %v1527_v19, 0.0  ;;  %v1786_v60 = vmul.f32 %v3302_v55, %v1765_v8  ;;  %v1191_v19 = vmul.f32 %v3269_v16, %v1170_v57 }
 0x1ad   :  { %v1801_v4 = vadd.f32 %v1785_v62, %v1602_v59  ;;  %v1367_v31 = vmin.f32 %v1351_v23, 6.0  ;;  %2299 = vmatmul.msk.f32.gmra.mxu1 %vm1874_vm1, %v1852_v25  ;;  %v1728_v34 = vpop.f32.mrf.mxu0 }
 0x1ae   :  { %v1566_v38 = vmin.f32 %v1550_v29, 6.0  ;;  %v1729_v56 = vadd.f32 %v3171_v6, %v1728_v34  ;;  %v1207_v34 = vadd.f32 %v1191_v19, %v3264_v13 }
 0x1af   :  { %v1821_v58 = vadd.f32 %v3320_v30, %v1801_v4  ;;  %v1388_v50 = vmul.f32 %v3288_v42, %v1367_v31  ;;  %v1171_v31 = vmin.f32 %v1155_v24, 6.0 }
 0x1b0   :  { %v1587_v14 = vmul.f32 %v3293_v20, %v1566_v38  ;;  %v1330_v41 = vpop.f32.mrf.mxu2  ;;  %v1750_v45 = vmax.f32 %v1729_v56, 0.0 }
 0x1b1   :  { %v1529_v26 = vpop.f32.mrf.mxu3  ;;  %v1404_v33 = vadd.f32 %v1388_v50, %v1205_v47  ;;  %v1331_v10 = vadd.f32 %v2322_v39, %v1330_v41  ;;  %v1837_v1 = vmax.f32 %v1821_v58, 0.0 }
 0x1b2   :  { %v1530_v6 = vadd.f32 %v2322_v39, %v1529_v26  ;;  %v1766_v52 = vmin.f32 %v1750_v45, 6.0 }
 0x1b3   :  { %v1603_v44 = vadd.f32 %v1587_v14, %v1404_v33  ;;  %v1352_v48 = vmax.f32 %v1331_v10, 0.0  ;;  %v1853_v49 = vmin.f32 %v1837_v1, 6.0  ;;  %v1192_v33 = vmul.f32 %v3269_v16, %v1171_v31 }
 0x1b4   :  { %v1551_v28 = vmax.f32 %v1530_v6, 0.0  ;;  %v1787_v18 = vmul.f32 %v3302_v55, %v1766_v52 }
 0x1b5   :  { %v1802_v15 = vadd.f32 %v1786_v60, %v1603_v44  ;;  %v1368_v53 = vmin.f32 %v1352_v48, 6.0  ;;  %2300 = vmatmul.msk.f32.gmra.mxu1 %vm1874_vm1, %v1853_v49  ;;  %v1731_v63 = vpop.f32.mrf.mxu0  ;;  %v1208_v48 = vadd.f32 %v1192_v33, %v3297_v43 }
 0x1b6   :  { %v1567_v61 = vmin.f32 %v1551_v28, 6.0  ;;  %v1732_v9 = vadd.f32 %v2322_v39, %v1731_v63 }
 0x1b7   :  { %v1822_v11 = vadd.f32 %v3320_v30, %v1802_v15  ;;  %v1389_v2 = vmul.f32 %v3288_v42, %v1368_v53 }
 0x1b8   :  { %v1588_v27 = vmul.f32 %v3293_v20, %v1567_v61  ;;  %v1333_v62 = vpop.f32.mrf.mxu2  ;;  %v1751_v54 = vmax.f32 %v1732_v9, 0.0 }
 0x1b9   :  { %v1532_v21 = vpop.f32.mrf.mxu3  ;;  %v1405_v17 = vadd.f32 %v1389_v2, %v1206_v3  ;;  %v1334_v37 = vadd.f32 %v2322_v39, %v1333_v62  ;;  %v1838_v22 = vmax.f32 %v1822_v11, 0.0 }
 0x1ba   :  { %v1533_v36 = vadd.f32 %v2322_v39, %v1532_v21  ;;  %v1767_v23 = vmin.f32 %v1751_v54, 6.0 }
 0x1bb   :  { %v1604_v7 = vadd.f32 %v1588_v27, %v1405_v17  ;;  %v1353_v12 = vmax.f32 %v1334_v37, 0.0  ;;  %v1854_v59 = vmin.f32 %v1838_v22, 6.0 }
 0x1bc   :  { %v1552_v51 = vmax.f32 %v1533_v36, 0.0  ;;  %v1788_v47 = vmul.f32 %v3302_v55, %v1767_v23 }
 0x1bd   :  { %v1803_v29 = vadd.f32 %v1787_v18, %v1604_v7  ;;  %v1369_v25 = vmin.f32 %v1353_v12, 6.0  ;;  %2301 = vmatmul.msk.f32.gmra.mxu1 %vm1874_vm1, %v1854_v59  ;;  %v1734_v4 = vpop.f32.mrf.mxu0 }
 0x1be   :  { %v1568_v8 = vmin.f32 %v1552_v51, 6.0  ;;  %v1735_v38 = vadd.f32 %v2322_v39, %v1734_v4 }
 0x1bf   :  { %v1823_v40 = vadd.f32 %v3320_v30, %v1803_v29  ;;  %v1390_v32 = vmul.f32 %v3288_v42, %v1369_v25 }
 0x1c0   :  { %v1589_v56 = vmul.f32 %v3293_v20, %v1568_v8  ;;  %v1336_v58 = vpop.f32.mrf.mxu2  ;;  %v1752_v14 = vmax.f32 %v1735_v38, 0.0 }
 0x1c1   :  { %v1535_v50 = vpop.f32.mrf.mxu3  ;;  %v1406_v60 = vadd.f32 %v1390_v32, %v1207_v34  ;;  %v1337_v41 = vadd.f32 %v2322_v39, %v1336_v58  ;;  %v1839_v45 = vmax.f32 %v1823_v40, 0.0 }
 0x1c2   :  { %v1536_v26 = vadd.f32 %v2322_v39, %v1535_v50  ;;  %v1768_v44 = vmin.f32 %v1752_v14, 6.0 }
 0x1c3   :  { %v1605_v10 = vadd.f32 %v1589_v56, %v1406_v60  ;;  %v1354_v6 = vmax.f32 %v1337_v41, 0.0  ;;  %v1855_v1 = vmin.f32 %v1839_v45, 6.0 }
 0x1c4   :  { %v1553_v13 = vmax.f32 %v1536_v26, 0.0  ;;  %v1789_v16 = vmul.f32 %v3302_v55, %v1768_v44 }
 0x1c5   :  { %v1804_v46 = vadd.f32 %v1788_v47, %v1605_v10  ;;  %v1370_v5 = vmin.f32 %v1354_v6, 6.0  ;;  %2302 = vmatmul.msk.f32.gmra.mxu1 %vm1874_vm1, %v1855_v1 }
 0x1c6   :  { %v1569_v0 = vmin.f32 %v1553_v13, 6.0 }
 0x1c7   :  { %v1824_v28 = vadd.f32 %v3320_v30, %v1804_v46  ;;  %v1391_v49 = vmul.f32 %v3288_v42, %v1370_v5  ;;  %v2320_v42 = vld [vmem:[%s3575_s6] ss:$0 sm:$0xff] }
 0x1c8   :  { %v1590_v39 = vmul.f32 %v3293_v20, %v1569_v0 }
 0x1c9   :  { %v1407_v52 = vadd.f32 %v1391_v49, %v1208_v48  ;;  %v1840_v15 = vmax.f32 %v1824_v28, 0.0 }
 0x1cb   :  { %v1606_v53 = vadd.f32 %v1590_v39, %v1407_v52  ;;  %v1856_v61 = vmin.f32 %v1840_v15, 6.0 }
 0x1cd   :  { %v1805_v63 = vadd.f32 %v1789_v16, %v1606_v53  ;;  %2303 = vmatmul.msk.f32.gmra.mxu1 %vm1874_vm1, %v1856_v61 }
 0x1cf   :  { %v1825_v57 = vadd.f32 %v3320_v30, %v1805_v63 }
 0x1d1   :  { %v1841_v35 = vmax.f32 %v1825_v57, 0.0 }
 0x1d3   :  { %v1857_v9 = vmin.f32 %v1841_v35, 6.0 }
 0x1d5   :  { %2304 = vmatmul.msk.f32.gmra.mxu1 %vm1874_vm1, %v1857_v9 }
 0x1da   :  { %v1940_v20 = vpop.f32.mrf.mxu1 }
 0x1db   :  { %v1941_v43 = vadd.f32 %v2320_v42, %v1940_v20 }
 0x1dd   :  { %1989 = vst.msk [vmem:[%s3576_s7] sm:$0xff] %vm1988_vm2, %v1941_v43 }
 0x1e2   :  { %v1943_v55 = vpop.f32.mrf.mxu1 }
 0x1e3   :  { %v1944_v3 = vadd.f32 %v2320_v42, %v1943_v55 }
 0x1e5   :  { %1990 = vst.msk [vmem:[%s3576_s7 + $0x8] sm:$0xff] %vm1988_vm2, %v1944_v3 }
 0x1ea   :  { %v1946_v30 = vpop.f32.mrf.mxu1 }
 0x1eb   :  { %v1947_v11 = vadd.f32 %v2320_v42, %v1946_v30 }
 0x1ed   :  { %1991 = vst.msk [vmem:[%s3576_s7 + $0x10] sm:$0xff] %vm1988_vm2, %v1947_v11 }
 0x1f2   :  { %v1949_v2 = vpop.f32.mrf.mxu1 }
 0x1f3   :  { %v1950_v27 = vadd.f32 %v2320_v42, %v1949_v2 }
 0x1f5   :  { %1992 = vst.msk [vmem:[%s3576_s7 + $0x18] sm:$0xff] %vm1988_vm2, %v1950_v27 }
 0x1fa   :  { %v1952_v18 = vpop.f32.mrf.mxu1 }
 0x1fb   :  { %v1953_v62 = vadd.f32 %v2320_v42, %v1952_v18 }
 0x1fd   :  { %1993 = vst.msk [vmem:[%s3576_s7 + $0x20] sm:$0xff] %vm1988_vm2, %v1953_v62 }
 0x202   :  { %v1955_v21 = vpop.f32.mrf.mxu1 }
 0x203   :  { %v1956_v54 = vadd.f32 %v2320_v42, %v1955_v21 }
 0x205   :  { %1994 = vst.msk [vmem:[%s3576_s7 + $0x28] sm:$0xff] %vm1988_vm2, %v1956_v54 }
 0x20a   :  { %v1958_v17 = vpop.f32.mrf.mxu1 }
 0x20b   :  { %v1959_v37 = vadd.f32 %v2320_v42, %v1958_v17 }
 0x20d   :  { %1995 = vst.msk [vmem:[%s3576_s7 + $0x30] sm:$0xff] %vm1988_vm2, %v1959_v37 }
 0x212   :  { %v1961_v36 = vpop.f32.mrf.mxu1 }
 0x213   :  { %v1962_v22 = vadd.f32 %v2320_v42, %v1961_v36 }
 0x215   :  { %1996 = vst.msk [vmem:[%s3576_s7 + $0x38] sm:$0xff] %vm1988_vm2, %v1962_v22 }
 0x21a   :  { %v1964_v19 = vpop.f32.mrf.mxu1 }
 0x21b   :  { %v1965_v24 = vadd.f32 %v2320_v42, %v1964_v19 }
 0x21d   :  { %1997 = vst.msk [vmem:[%s3576_s7 + $0x40] sm:$0xff] %vm1988_vm2, %v1965_v24 }
 0x222   :  { %v1967_v7 = vpop.f32.mrf.mxu1 }
 0x223   :  { %v1968_v12 = vadd.f32 %v2320_v42, %v1967_v7 }
 0x225   :  { %1998 = vst.msk [vmem:[%s3576_s7 + $0x48] sm:$0xff] %vm1988_vm2, %v1968_v12 }
 0x22a   :  { %v1970_v51 = vpop.f32.mrf.mxu1 }
 0x22b   :  { %v1971_v59 = vadd.f32 %v2320_v42, %v1970_v51 }
 0x22d   :  { %1999 = vst.msk [vmem:[%s3576_s7 + $0x50] sm:$0xff] %vm1988_vm2, %v1971_v59 }
 0x232   :  { %v1973_v23 = vpop.f32.mrf.mxu1 }
 0x233   :  { %v1974_v29 = vadd.f32 %v2320_v42, %v1973_v23 }
 0x235   :  { %2000 = vst.msk [vmem:[%s3576_s7 + $0x58] sm:$0xff] %vm1988_vm2, %v1974_v29 }
 0x23a   :  { %v1976_v25 = vpop.f32.mrf.mxu1 }
 0x23b   :  { %v1977_v8 = vadd.f32 %v2320_v42, %v1976_v25 }
 0x23d   :  { %2001 = vst.msk [vmem:[%s3576_s7 + $0x60] sm:$0xff] %vm1988_vm2, %v1977_v8 }
 0x242   :  { %v1979_v4 = vpop.f32.mrf.mxu1 }
 0x243   :  { %v1980_v31 = vadd.f32 %v2320_v42, %v1979_v4 }
 0x245   :  { %2002 = vst.msk [vmem:[%s3576_s7 + $0x68] sm:$0xff] %vm1988_vm2, %v1980_v31 }
 0x24a   :  { %v1982_v38 = vpop.f32.mrf.mxu1 }
 0x24b   :  { %v1983_v34 = vadd.f32 %v2320_v42, %v1982_v38 }
 0x24d   :  { %2003 = vst.msk [vmem:[%s3576_s7 + $0x70] sm:$0xff] %vm1988_vm2, %v1983_v34 }
 0x252   :  { %v1985_v40 = vpop.f32.mrf.mxu1 }
 0x253   :  { %v1986_v32 = vadd.f32 %v2320_v42, %v1985_v40 }
 0x255   :  { %2004 = vst.msk [vmem:[%s3576_s7 + $0x78] sm:$0xff] %vm1988_vm2, %v1986_v32 }

// kernel: combined_forward.6
= control target key start
LH: loop header
LB: loop body
LE: loop exit
PB: predicated region body
PF: predicated region fallthrough
CT: control target
= control target key end

     0   :  { %s3048_s30 = smov 0   ;;  %s3050_s10 = smov 0   ;;  %s4578_s0 = inlined_call_operand.vmem [shape: f32[9,128,24], index: 0, kind: input, shape index: {}]   ;;  %s4579_s1 = inlined_call_operand.vmem [shape: f32[24,144], index: 1, kind: input, shape index: {}]   ;;  %s4580_s2 = inlined_call_operand.vmem [shape: f32[1,144], index: 2, kind: input, shape index: {}]   ;;  %s4581_s3 = inlined_call_operand.vmem [shape: f32[9,1,144], index: 3, kind: input, shape index: {}]   ;;  %s4582_s4 = inlined_call_operand.vmem [shape: f32[1,144], index: 4, kind: input, shape index: {}]   ;;  %s4583_s5 = inlined_call_operand.vmem [shape: f32[144,24], index: 5, kind: input, shape index: {}]   ;;  %s4584_s6 = inlined_call_operand.vmem [shape: f32[1,24], index: 6, kind: input, shape index: {}]   ;;  %s4585_s7 = inlined_call_operand.vmem [shape: f32[24,64], index: 7, kind: input, shape index: {}]   ;;  %s4586_s8 = inlined_call_operand.vmem [shape: f32[1,64], index: 8, kind: input, shape index: {}]   ;;  %s4587_s9 = inlined_call_operand.vmem [shape: f32[2,1,64], index: 9, kind: output, shape index: {}]  }
   0x1   :  { %s3052_s11 = smov 0  }
   0x2 LB: > { %s2683_s12 = sadd.s32 4294967295, %s2995_s11   ;;  %s3065_s13 = sadd.s32 1, %s2995_s11   ;;  %s2995_s11 = sphi %s3052_s11, %s4687_s11   ;;  %s2991_s10 = sphi %s3050_s10, %s4686_s10   ;;  %s2987_s30 = sphi %s3048_s30, %s4685_s30  }
   0x3   : > { %s23_s14 = ssub.s32 %s2995_s11, %s3065_s13  ;;  %s26_s15 = sadd.s32 1, %s2991_s10 }
   0x4   : > { %p24_p0 = scmp.eq.s32.totalorder %s23_s14, 0  ;;  %p33_p1 = scmp.ne.s32.totalorder %s2991_s10, %s2987_s30 }
   0x5   : > { %p34_p2 = scmp.eq.s32.totalorder %s2995_s11, 0  ;;  %p2686_p4 = scmp.ge.s32.totalorder %s2995_s11, 2 }
   0x6   : > { %s3074_s16 = scalar_select %p24_p0, %s2991_s10, %s26_s15  }
   0x7   : > { %p35_p3 = por %p34_p2, %p33_p1  ;;  %277 = sbr.rel (%p2686_p4) target bundleno = 88 (0x58), region = 48 }
   0xc   : > { %280 = sbr.rel (!%p35_p3) target bundleno = 88 (0x58), region = 52  ;;  %s282_s17 = sand.u32 (%p35_p3), 1, %s2991_s10  }
   0xd   : > { %s2924_s18 = sshll.u32 (%p35_p3), %s2995_s11, 6  ;;  %s2934_s19 = smul.u32 (%p35_p3), 576, %s282_s17 }
   0xe   : > { %s3082_s22 = scalar_lea.vmem (%p35_p3), %s4578_s0, %s2924_s18 }
   0xf   : > { %v458_v0 = vld [vmem:[%s3082_s22] sm:$0xff] (%p35_p3)  ;;  %v460_v1 = vld [vmem:[%s3082_s22 + $0x8] sm:$0xff] (%p35_p3)  ;;  %v462_v2 = vld [vmem:[%s3082_s22 + $0x10] sm:$0xff] (%p35_p3)  ;;  %s3087_s23 = scalar_lea.vmem (%p35_p3), [#allocation2], %s2934_s19 }
  0x10   : > { %459 = vst [vmem:[%s3087_s23] sm:$0xff] (%p35_p3), %v458_v0  ;;  %v464_v3 = vld [vmem:[%s3082_s22 + $0x18] sm:$0xff] (%p35_p3)  ;;  %v466_v4 = vld [vmem:[%s3082_s22 + $0x20] sm:$0xff] (%p35_p3)  ;;  %v468_v5 = vld [vmem:[%s3082_s22 + $0x28] sm:$0xff] (%p35_p3) }
  0x11   : > { %461 = vst [vmem:[%s3087_s23 + $0x8] sm:$0xff] %v460_v1  ;;  %v470_v6 = vld [vmem:[%s3082_s22 + $0x30] sm:$0xff]  ;;  %v472_v7 = vld [vmem:[%s3082_s22 + $0x38] sm:$0xff]  ;;  %v474_v8 = vld [vmem:[%s3082_s22 + $0x80] sm:$0xff] }
  0x12   : > { %463 = vst [vmem:[%s3087_s23 + $0x10] sm:$0xff] %v462_v2  ;;  %v476_v9 = vld [vmem:[%s3082_s22 + $0x88] sm:$0xff]  ;;  %v478_v10 = vld [vmem:[%s3082_s22 + $0x90] sm:$0xff]  ;;  %v480_v11 = vld [vmem:[%s3082_s22 + $0x98] sm:$0xff] }
  0x13   : > { %465 = vst [vmem:[%s3087_s23 + $0x18] sm:$0xff] %v464_v3  ;;  %v482_v12 = vld [vmem:[%s3082_s22 + $0xa0] sm:$0xff]  ;;  %v484_v13 = vld [vmem:[%s3082_s22 + $0xa8] sm:$0xff]  ;;  %v486_v14 = vld [vmem:[%s3082_s22 + $0xb0] sm:$0xff] }
  0x14   : > { %467 = vst [vmem:[%s3087_s23 + $0x20] sm:$0xff] %v466_v4  ;;  %v488_v15 = vld [vmem:[%s3082_s22 + $0xb8] sm:$0xff]  ;;  %v490_v16 = vld [vmem:[%s3082_s22 + $0x100] sm:$0xff]  ;;  %v492_v17 = vld [vmem:[%s3082_s22 + $0x108] sm:$0xff] }
  0x15   : > { %469 = vst [vmem:[%s3087_s23 + $0x28] sm:$0xff] %v468_v5  ;;  %v494_v18 = vld [vmem:[%s3082_s22 + $0x110] sm:$0xff]  ;;  %v496_v19 = vld [vmem:[%s3082_s22 + $0x118] sm:$0xff]  ;;  %v498_v20 = vld [vmem:[%s3082_s22 + $0x120] sm:$0xff] }
  0x16   : > { %471 = vst [vmem:[%s3087_s23 + $0x30] sm:$0xff] %v470_v6  ;;  %v500_v21 = vld [vmem:[%s3082_s22 + $0x128] sm:$0xff]  ;;  %v502_v22 = vld [vmem:[%s3082_s22 + $0x130] sm:$0xff]  ;;  %v504_v23 = vld [vmem:[%s3082_s22 + $0x138] sm:$0xff] }
  0x17   : > { %473 = vst [vmem:[%s3087_s23 + $0x38] sm:$0xff] %v472_v7  ;;  %v506_v24 = vld [vmem:[%s3082_s22 + $0x180] sm:$0xff]  ;;  %v508_v25 = vld [vmem:[%s3082_s22 + $0x188] sm:$0xff]  ;;  %v510_v26 = vld [vmem:[%s3082_s22 + $0x190] sm:$0xff] }
  0x18   : > { %475 = vst [vmem:[%s3087_s23 + $0x40] sm:$0xff] %v474_v8  ;;  %v512_v27 = vld [vmem:[%s3082_s22 + $0x198] sm:$0xff]  ;;  %v514_v28 = vld [vmem:[%s3082_s22 + $0x1a0] sm:$0xff]  ;;  %v516_v29 = vld [vmem:[%s3082_s22 + $0x1a8] sm:$0xff] }
  0x19   : > { %477 = vst [vmem:[%s3087_s23 + $0x48] sm:$0xff] %v476_v9  ;;  %v518_v30 = vld [vmem:[%s3082_s22 + $0x1b0] sm:$0xff]  ;;  %v520_v31 = vld [vmem:[%s3082_s22 + $0x1b8] sm:$0xff]  ;;  %v522_v32 = vld [vmem:[%s3082_s22 + $0x200] sm:$0xff] }
  0x1a   : > { %479 = vst [vmem:[%s3087_s23 + $0x50] sm:$0xff] %v478_v10  ;;  %v524_v33 = vld [vmem:[%s3082_s22 + $0x208] sm:$0xff]  ;;  %v526_v34 = vld [vmem:[%s3082_s22 + $0x210] sm:$0xff]  ;;  %v528_v35 = vld [vmem:[%s3082_s22 + $0x218] sm:$0xff] }
  0x1b   : > { %481 = vst [vmem:[%s3087_s23 + $0x58] sm:$0xff] %v480_v11  ;;  %v530_v36 = vld [vmem:[%s3082_s22 + $0x220] sm:$0xff]  ;;  %v532_v37 = vld [vmem:[%s3082_s22 + $0x228] sm:$0xff]  ;;  %v534_v38 = vld [vmem:[%s3082_s22 + $0x230] sm:$0xff] }
  0x1c   : > { %483 = vst [vmem:[%s3087_s23 + $0x60] sm:$0xff] %v482_v12  ;;  %v536_v39 = vld [vmem:[%s3082_s22 + $0x238] sm:$0xff]  ;;  %v538_v40 = vld [vmem:[%s3082_s22 + $0x280] sm:$0xff]  ;;  %v540_v41 = vld [vmem:[%s3082_s22 + $0x288] sm:$0xff] }
  0x1d   : > { %485 = vst [vmem:[%s3087_s23 + $0x68] sm:$0xff] %v484_v13  ;;  %v542_v42 = vld [vmem:[%s3082_s22 + $0x290] sm:$0xff]  ;;  %v544_v43 = vld [vmem:[%s3082_s22 + $0x298] sm:$0xff]  ;;  %v546_v44 = vld [vmem:[%s3082_s22 + $0x2a0] sm:$0xff] }
  0x1e   : > { %487 = vst [vmem:[%s3087_s23 + $0x70] sm:$0xff] %v486_v14  ;;  %v548_v45 = vld [vmem:[%s3082_s22 + $0x2a8] sm:$0xff]  ;;  %v550_v46 = vld [vmem:[%s3082_s22 + $0x2b0] sm:$0xff]  ;;  %v552_v47 = vld [vmem:[%s3082_s22 + $0x2b8] sm:$0xff] }
  0x1f   : > { %489 = vst [vmem:[%s3087_s23 + $0x78] sm:$0xff] %v488_v15  ;;  %v554_v48 = vld [vmem:[%s3082_s22 + $0x300] sm:$0xff]  ;;  %v556_v49 = vld [vmem:[%s3082_s22 + $0x308] sm:$0xff]  ;;  %v558_v50 = vld [vmem:[%s3082_s22 + $0x310] sm:$0xff] }
  0x20   : > { %491 = vst [vmem:[%s3087_s23 + $0x80] sm:$0xff] %v490_v16  ;;  %v560_v51 = vld [vmem:[%s3082_s22 + $0x318] sm:$0xff]  ;;  %v562_v52 = vld [vmem:[%s3082_s22 + $0x320] sm:$0xff]  ;;  %v564_v53 = vld [vmem:[%s3082_s22 + $0x328] sm:$0xff] }
  0x21   : > { %493 = vst [vmem:[%s3087_s23 + $0x88] sm:$0xff] %v492_v17  ;;  %v566_v54 = vld [vmem:[%s3082_s22 + $0x330] sm:$0xff]  ;;  %v568_v55 = vld [vmem:[%s3082_s22 + $0x338] sm:$0xff]  ;;  %v570_v56 = vld [vmem:[%s3082_s22 + $0x380] sm:$0xff] }
  0x22   : > { %495 = vst [vmem:[%s3087_s23 + $0x90] sm:$0xff] %v494_v18  ;;  %v572_v57 = vld [vmem:[%s3082_s22 + $0x388] sm:$0xff]  ;;  %v574_v58 = vld [vmem:[%s3082_s22 + $0x390] sm:$0xff]  ;;  %v576_v59 = vld [vmem:[%s3082_s22 + $0x398] sm:$0xff] }
  0x23   : > { %497 = vst [vmem:[%s3087_s23 + $0x98] sm:$0xff] %v496_v19  ;;  %v578_v60 = vld [vmem:[%s3082_s22 + $0x3a0] sm:$0xff]  ;;  %v580_v61 = vld [vmem:[%s3082_s22 + $0x3a8] sm:$0xff]  ;;  %v582_v62 = vld [vmem:[%s3082_s22 + $0x3b0] sm:$0xff] }
  0x24   : > { %499 = vst [vmem:[%s3087_s23 + $0xa0] sm:$0xff] %v498_v20  ;;  %v584_v63 = vld [vmem:[%s3082_s22 + $0x3b8] sm:$0xff]  ;;  %v586_v0 = vld [vmem:[%s3082_s22 + $0x400] sm:$0xff]  ;;  %v588_v1 = vld [vmem:[%s3082_s22 + $0x408] sm:$0xff] }
  0x25   : > { %501 = vst [vmem:[%s3087_s23 + $0xa8] sm:$0xff] %v500_v21  ;;  %v590_v2 = vld [vmem:[%s3082_s22 + $0x410] sm:$0xff]  ;;  %v592_v3 = vld [vmem:[%s3082_s22 + $0x418] sm:$0xff]  ;;  %v594_v4 = vld [vmem:[%s3082_s22 + $0x420] sm:$0xff] }
  0x26   : > { %503 = vst [vmem:[%s3087_s23 + $0xb0] sm:$0xff] %v502_v22  ;;  %v596_v5 = vld [vmem:[%s3082_s22 + $0x428] sm:$0xff]  ;;  %v598_v6 = vld [vmem:[%s3082_s22 + $0x430] sm:$0xff]  ;;  %v600_v7 = vld [vmem:[%s3082_s22 + $0x438] sm:$0xff] }
  0x27   : > { %505 = vst [vmem:[%s3087_s23 + $0xb8] sm:$0xff] %v504_v23 }
  0x28   : > { %507 = vst [vmem:[%s3087_s23 + $0xc0] sm:$0xff] %v506_v24 }
  0x29   : > { %509 = vst [vmem:[%s3087_s23 + $0xc8] sm:$0xff] %v508_v25 }
  0x2a   : > { %511 = vst [vmem:[%s3087_s23 + $0xd0] sm:$0xff] %v510_v26 }
  0x2b   : > { %513 = vst [vmem:[%s3087_s23 + $0xd8] sm:$0xff] %v512_v27 }
  0x2c   : > { %515 = vst [vmem:[%s3087_s23 + $0xe0] sm:$0xff] %v514_v28 }
  0x2d   : > { %517 = vst [vmem:[%s3087_s23 + $0xe8] sm:$0xff] %v516_v29 }
  0x2e   : > { %519 = vst [vmem:[%s3087_s23 + $0xf0] sm:$0xff] %v518_v30 }
  0x2f   : > { %521 = vst [vmem:[%s3087_s23 + $0xf8] sm:$0xff] %v520_v31 }
  0x30   : > { %523 = vst [vmem:[%s3087_s23 + $0x100] sm:$0xff] %v522_v32 }
  0x31   : > { %525 = vst [vmem:[%s3087_s23 + $0x108] sm:$0xff] %v524_v33 }
  0x32   : > { %527 = vst [vmem:[%s3087_s23 + $0x110] sm:$0xff] %v526_v34 }
  0x33   : > { %529 = vst [vmem:[%s3087_s23 + $0x118] sm:$0xff] %v528_v35 }
  0x34   : > { %531 = vst [vmem:[%s3087_s23 + $0x120] sm:$0xff] %v530_v36 }
  0x35   : > { %533 = vst [vmem:[%s3087_s23 + $0x128] sm:$0xff] %v532_v37 }
  0x36   : > { %535 = vst [vmem:[%s3087_s23 + $0x130] sm:$0xff] %v534_v38 }
  0x37   : > { %537 = vst [vmem:[%s3087_s23 + $0x138] sm:$0xff] %v536_v39 }
  0x38   : > { %539 = vst [vmem:[%s3087_s23 + $0x140] sm:$0xff] %v538_v40 }
  0x39   : > { %541 = vst [vmem:[%s3087_s23 + $0x148] sm:$0xff] %v540_v41 }
  0x3a   : > { %543 = vst [vmem:[%s3087_s23 + $0x150] sm:$0xff] %v542_v42 }
  0x3b   : > { %545 = vst [vmem:[%s3087_s23 + $0x158] sm:$0xff] %v544_v43 }
  0x3c   : > { %547 = vst [vmem:[%s3087_s23 + $0x160] sm:$0xff] %v546_v44 }
  0x3d   : > { %549 = vst [vmem:[%s3087_s23 + $0x168] sm:$0xff] %v548_v45 }
  0x3e   : > { %551 = vst [vmem:[%s3087_s23 + $0x170] sm:$0xff] %v550_v46 }
  0x3f   : > { %553 = vst [vmem:[%s3087_s23 + $0x178] sm:$0xff] %v552_v47 }
  0x40   : > { %555 = vst [vmem:[%s3087_s23 + $0x180] sm:$0xff] %v554_v48 }
  0x41   : > { %557 = vst [vmem:[%s3087_s23 + $0x188] sm:$0xff] %v556_v49 }
  0x42   : > { %559 = vst [vmem:[%s3087_s23 + $0x190] sm:$0xff] %v558_v50 }
  0x43   : > { %561 = vst [vmem:[%s3087_s23 + $0x198] sm:$0xff] %v560_v51 }
  0x44   : > { %563 = vst [vmem:[%s3087_s23 + $0x1a0] sm:$0xff] %v562_v52 }
  0x45   : > { %565 = vst [vmem:[%s3087_s23 + $0x1a8] sm:$0xff] %v564_v53 }
  0x46   : > { %567 = vst [vmem:[%s3087_s23 + $0x1b0] sm:$0xff] %v566_v54 }
  0x47   : > { %569 = vst [vmem:[%s3087_s23 + $0x1b8] sm:$0xff] %v568_v55 }
  0x48   : > { %571 = vst [vmem:[%s3087_s23 + $0x1c0] sm:$0xff] %v570_v56 }
  0x49   : > { %573 = vst [vmem:[%s3087_s23 + $0x1c8] sm:$0xff] %v572_v57 }
  0x4a   : > { %575 = vst [vmem:[%s3087_s23 + $0x1d0] sm:$0xff] %v574_v58 }
  0x4b   : > { %577 = vst [vmem:[%s3087_s23 + $0x1d8] sm:$0xff] %v576_v59 }
  0x4c   : > { %579 = vst [vmem:[%s3087_s23 + $0x1e0] sm:$0xff] %v578_v60 }
  0x4d   : > { %581 = vst [vmem:[%s3087_s23 + $0x1e8] sm:$0xff] %v580_v61 }
  0x4e   : > { %583 = vst [vmem:[%s3087_s23 + $0x1f0] sm:$0xff] %v582_v62 }
  0x4f   : > { %585 = vst [vmem:[%s3087_s23 + $0x1f8] sm:$0xff] %v584_v63 }
  0x50   : > { %587 = vst [vmem:[%s3087_s23 + $0x200] sm:$0xff] %v586_v0 }
  0x51   : > { %589 = vst [vmem:[%s3087_s23 + $0x208] sm:$0xff] %v588_v1 }
  0x52   : > { %591 = vst [vmem:[%s3087_s23 + $0x210] sm:$0xff] %v590_v2 }
  0x53   : > { %593 = vst [vmem:[%s3087_s23 + $0x218] sm:$0xff] %v592_v3 }
  0x54   : > { %595 = vst [vmem:[%s3087_s23 + $0x220] sm:$0xff] %v594_v4 }
  0x55   : > { %597 = vst [vmem:[%s3087_s23 + $0x228] sm:$0xff] %v596_v5 }
  0x56   : > { %599 = vst [vmem:[%s3087_s23 + $0x230] sm:$0xff] %v598_v6 }
  0x57   : > { %601 = vst [vmem:[%s3087_s23 + $0x238] sm:$0xff] %v600_v7 }
  0x58 PF: > { %p2689_p5 = scmp.ge.s32.totalorder %s2995_s11, 1  ;;  %p606_p6 = scmp.lt.s32.totalorder %s2995_s11, 3 }
  0x5a   : > { %p607_p7 = pnand %p2689_p5, %p606_p6 }
  0x5c   : > { %610 = sbr.rel (%p607_p7) target bundleno = 860 (0x35c), region = 90 }
  0x61   : > { %v3235_v8 = vld [vmem:[%s4579_s1 + $0x20] sm:$0xff]  ;;  %v3240_v9 = vld [vmem:[%s4579_s1 + $0x10] sm:$0xff]  ;;  %s613_s28 = sand.u32 1, %s2987_s30   ;;  %vm670_vm0 = vcmask 195584   ;;  %v3272_v14 = vld [vmem:[%s4579_s1 + $0x28] sm:$0xff]  ;;  %vm2395_vm1 = vcmask 130048  }
  0x62   : > { %2925 = vmatpush.msra.mxu1 %v3235_v8  ;;  %2926 = vmatpush.msra.mxu2 %v3235_v8  ;;  %s2935_s29 = smul.u32 576, %s613_s28  ;;  %v3249_v10 = vld [vmem:[%s4579_s1] sm:$0xff]  ;;  %v3285_v16 = vld [vmem:[%s4579_s1 + $0x18] sm:$0xff]  ;;  %v3293_v17 = vld [vmem:[%s4579_s1 + $0x8] sm:$0xff]  ;;  %vm2598_vm2 = vcmask 523264   ;;  %p647_p8 = scmp.lt.s32.totalorder %s2683_s12, 1 }
  0x63   : > { %2927 = vmatpush.msra.mxu3 %v3235_v8  ;;  %708 = vmatpush.msra.mxu0 %v3235_v8  ;;  %vm2628_vm4 = vcmask 516096  }
  0x64   : > { %2928 = vmatpush.msra.mxu1 %v3240_v9  ;;  %2929 = vmatpush.msra.mxu2 %v3240_v9  ;;  %s3255_s30 = scalar_lea.vmem [#allocation2], %s2935_s29  ;;  %s4689_s12 = smov (!%p647_p8, %s2683_s12), 1 }
  0x65   : > { %2930 = vmatpush.msra.mxu3 %v3240_v9  ;;  %v3258_v11 = vld [vmem:[%s3255_s30 + $0x10] sm:$0xff]  ;;  %v3261_v12 = vld [vmem:[%s3255_s30 + $0x20] sm:$0xff]  ;;  %709 = vmatpush.msra.mxu0 %v3240_v9  ;;  %v653_v18 = vld [vmem:[%s3255_s30 + $0x18] sm:$0xff]  ;;  %s649_s17 = scalar_lea.vmem %s4587_s9, %s4689_s12 }
  0x66   : > { %v3264_v13 = vld [vmem:[%s3255_s30 + $0x30] sm:$0xff]  ;;  %2931 = vmatpush.msra.mxu1 %v3249_v10  ;;  %2932 = vmatpush.msra.mxu2 %v3249_v10  ;;  %v650_v15 = vld [vmem:[%s3255_s30] sm:$0xff]  ;;  %v3302_v19 = vld [vmem:[%s3255_s30 + $0x28] sm:$0xff] }
  0x67   : > { %2933 = vmatpush.msra.mxu3 %v3249_v10  ;;  %2692 = vmatmul.msk.f32.vlgmr.msra.gmra.mxu1 %vm670_vm0, %v3258_v11  ;;  %v3305_v20 = vld [vmem:[%s3255_s30 + $0x38] sm:$0xff]  ;;  %v651_v21 = vld [vmem:[%s3255_s30 + $0x8] sm:$0xff]  ;;  %v2706_v22 = vld [vmem:[%s3255_s30 + $0x40] sm:$0xff] }
  0x68   : > { %2694 = vmatmul.msk.f32.vlgmr.msra.gmra.mxu2 %vm670_vm0, %v3261_v12  ;;  %2696 = vmatmul.msk.f32.vlgmr.msra.gmra.mxu3 %vm670_vm0, %v3264_v13  ;;  %v2731_v23 = vld [vmem:[%s3255_s30 + $0x80] sm:$0xff]  ;;  %v2707_v24 = vld [vmem:[%s3255_s30 + $0x48] sm:$0xff]  ;;  %v2708_v26 = vld [vmem:[%s3255_s30 + $0x50] sm:$0xff] }
  0x69   : > { %749 = vmatpush.msrb.mxu1 %v3272_v14  ;;  %710 = vmatpush.msra.mxu0 %v3249_v10  ;;  %v2732_v25 = vld [vmem:[%s3255_s30 + $0x88] sm:$0xff]  ;;  %v2733_v27 = vld [vmem:[%s3255_s30 + $0x90] sm:$0xff]  ;;  %v2709_v28 = vld [vmem:[%s3255_s30 + $0x58] sm:$0xff] }
  0x6a   : > { %2690 = vmatmul.msk.f32.vlgmr.msra.gmra.mxu0 %vm670_vm0, %v650_v15  ;;  %877 = vmatpush.msrb.mxu2 %v3235_v8  ;;  %v2734_v29 = vld [vmem:[%s3255_s30 + $0x98] sm:$0xff]  ;;  %v2710_v30 = vld [vmem:[%s3255_s30 + $0x60] sm:$0xff]  ;;  %v2711_v32 = vld [vmem:[%s3255_s30 + $0x68] sm:$0xff] }
  0x6b   : > { %750 = vmatpush.msrb.mxu1 %v3285_v16  ;;  %918 = vmatpush.msrb.mxu3 %v3272_v14  ;;  %v2735_v31 = vld [vmem:[%s3255_s30 + $0xa0] sm:$0xff]  ;;  %v2736_v33 = vld [vmem:[%s3255_s30 + $0xa8] sm:$0xff]  ;;  %v2712_v34 = vld [vmem:[%s3255_s30 + $0x70] sm:$0xff] }
  0x6c   : > { %878 = vmatpush.msrb.mxu2 %v3240_v9  ;;  %1063 = vmatpush.msrb.mxu0 %v3235_v8  ;;  %v2737_v35 = vld [vmem:[%s3255_s30 + $0xb0] sm:$0xff]  ;;  %v2713_v36 = vld [vmem:[%s3255_s30 + $0x78] sm:$0xff]  ;;  %v2756_v38 = vld [vmem:[%s3255_s30 + $0xc0] sm:$0xff] }
  0x6d   : > { %751 = vmatpush.msrb.mxu1 %v3293_v17  ;;  %919 = vmatpush.msrb.mxu3 %v3285_v16  ;;  %v3394_v37 = vld [vmem:[%s3255_s30 + $0xb8] sm:$0xff]  ;;  %v3403_v39 = vld [vmem:[%s3255_s30 + $0x100] sm:$0xff]  ;;  %v2757_v40 = vld [vmem:[%s3255_s30 + $0xc8] sm:$0xff] }
  0x6e   : > { %879 = vmatpush.msrb.mxu2 %v3249_v10  ;;  %1064 = vmatpush.msrb.mxu0 %v3240_v9  ;;  %v3423_v41 = vld [vmem:[%s3255_s30 + $0x108] sm:$0xff]  ;;  %v2758_v42 = vld [vmem:[%s3255_s30 + $0xd0] sm:$0xff]  ;;  %v2759_v44 = vld [vmem:[%s3255_s30 + $0xd8] sm:$0xff] }
  0x6f   : > { %1104 = vmatpush.msra.mxu1 %v3272_v14  ;;  %920 = vmatpush.msrb.mxu3 %v3293_v17  ;;  %v3433_v43 = vld [vmem:[%s3255_s30 + $0x110] sm:$0xff]  ;;  %v3442_v45 = vld [vmem:[%s3255_s30 + $0x118] sm:$0xff]  ;;  %v2760_v46 = vld [vmem:[%s3255_s30 + $0xe0] sm:$0xff] }
  0x70   : > { %2693 = vmatmul.msk.f32.gmra.mxu1 %vm670_vm0, %v653_v18  ;;  %2695 = vmatmul.msk.f32.gmra.mxu2 %vm670_vm0, %v3302_v19  ;;  %v3451_v47 = vld [vmem:[%s3255_s30 + $0x120] sm:$0xff]  ;;  %v2761_v48 = vld [vmem:[%s3255_s30 + $0xe8] sm:$0xff]  ;;  %v2762_v51 = vld [vmem:[%s3255_s30 + $0xf0] sm:$0xff] }
  0x71   : > { %2697 = vmatmul.msk.f32.gmra.mxu3 %vm670_vm0, %v3305_v20  ;;  %1105 = vmatpush.msra.mxu1 %v3285_v16  ;;  %v3460_v49 = vld [vmem:[%s3255_s30 + $0x128] sm:$0xff]  ;;  %v3473_v53 = vld [vmem:[%s3255_s30 + $0x130] sm:$0xff]  ;;  %v2763_v57 = vld [vmem:[%s3255_s30 + $0xf8] sm:$0xff] }
  0x72   : > { %2691 = vmatmul.msk.f32.gmra.mxu0 %vm670_vm0, %v651_v21  ;;  %1249 = vmatpush.msra.mxu2 %v3235_v8  ;;  %v3489_v59 = vld [vmem:[%s3255_s30 + $0x138] sm:$0xff]  ;;  %v2806_v63 = vld [vmem:[%s3255_s30 + $0x140] sm:$0xff]  ;;  %v2807_v5 = vld [vmem:[%s3255_s30 + $0x148] sm:$0xff] }
  0x73   : > { %1065 = vmatpush.msrb.mxu0 %v3249_v10  ;;  %1106 = vmatpush.msra.mxu1 %v3293_v17  ;;  %v3505_v1 = vld [vmem:[%s3255_s30 + $0x180] sm:$0xff]  ;;  %v3526_v7 = vld [vmem:[%s3255_s30 + $0x188] sm:$0xff] }
  0x74   : > { %1290 = vmatpush.msra.mxu3 %v3272_v14  ;;  %1250 = vmatpush.msra.mxu2 %v3240_v9 }
  0x75   : > { %1435 = vmatpush.msra.mxu0 %v3235_v8 }
  0x76   : > { %1291 = vmatpush.msra.mxu3 %v3285_v16  ;;  %1251 = vmatpush.msra.mxu2 %v3249_v10 }
  0x77   : > { %1436 = vmatpush.msra.mxu0 %v3240_v9 }
  0x78   : > { %2698 = vmatmul.msk.f32.vlgmr.msrb.gmra.mxu1 %vm670_vm0, %v650_v15  ;;  %2714 = vmatmul.msk.f32.vlgmr.msrb.gmra.mxu2 %vm670_vm0, %v2706_v22 }
  0x79   : > { %2722 = vmatmul.msk.f32.vlgmr.msrb.gmra.mxu3 %vm670_vm0, %v2706_v22  ;;  %1476 = vmatpush.msrb.mxu1 %v3272_v14 }
  0x7a   : > { %1292 = vmatpush.msra.mxu3 %v3293_v17  ;;  %2739 = vmatmul.msk.f32.vlgmr.msrb.gmra.mxu0 %vm670_vm0, %v2731_v23 }
  0x7b   : > { %1621 = vmatpush.msrb.mxu2 %v3235_v8  ;;  %1437 = vmatpush.msra.mxu0 %v3249_v10 }
  0x7c   : > { %1477 = vmatpush.msrb.mxu1 %v3285_v16  ;;  %1662 = vmatpush.msrb.mxu3 %v3272_v14 }
  0x7d   : > { %1622 = vmatpush.msrb.mxu2 %v3240_v9  ;;  %1807 = vmatpush.msrb.mxu0 %v3235_v8 }
  0x7e   : > { %1478 = vmatpush.msrb.mxu1 %v3293_v17  ;;  %1663 = vmatpush.msrb.mxu3 %v3285_v16 }
  0x7f   : > { %1623 = vmatpush.msrb.mxu2 %v3249_v10  ;;  %1808 = vmatpush.msrb.mxu0 %v3240_v9 }
  0x80   : > { %2699 = vmatmul.msk.f32.gmra.mxu1 %vm670_vm0, %v651_v21  ;;  %2715 = vmatmul.msk.f32.gmra.mxu2 %vm670_vm0, %v2707_v24 }
  0x81   : > { %2723 = vmatmul.msk.f32.gmra.mxu3 %vm670_vm0, %v2707_v24  ;;  %1809 = vmatpush.msrb.mxu0 %v3249_v10 }
  0x82   : > { %1664 = vmatpush.msrb.mxu3 %v3293_v17  ;;  %2740 = vmatmul.msk.f32.gmra.mxu0 %vm670_vm0, %v2732_v25 }
  0x88   : > { %2700 = vmatmul.msk.f32.gmra.mxu1 %vm670_vm0, %v3258_v11  ;;  %2716 = vmatmul.msk.f32.gmra.mxu2 %vm670_vm0, %v2708_v26  ;;  %v2808_v11 = vld [vmem:[%s3255_s30 + $0x150] sm:$0xff] }
  0x89   : > { %2724 = vmatmul.msk.f32.gmra.mxu3 %vm670_vm0, %v2708_v26  ;;  %v2810_v26 = vld [vmem:[%s3255_s30 + $0x160] sm:$0xff] }
  0x8a   : > { %2741 = vmatmul.msk.f32.gmra.mxu0 %vm670_vm0, %v2733_v27 }
  0x90   : > { %2701 = vmatmul.msk.f32.gmra.mxu1 %vm670_vm0, %v653_v18  ;;  %2717 = vmatmul.msk.f32.gmra.mxu2 %vm670_vm0, %v2709_v28  ;;  %v3560_v18 = vld [vmem:[%s4580_s2] sm:$0x3] }
  0x91   : > { %2725 = vmatmul.msk.f32.gmra.mxu3 %vm670_vm0, %v2709_v28  ;;  %v3572_v21 = vperm.slane %v3560_v18, 0  ;;  %v3589_v28 = vld [vmem:[%s3255_s30 + $0x1a0] sm:$0xff] }
  0x92   : > { %2742 = vmatmul.msk.f32.gmra.mxu0 %vm670_vm0, %v2734_v29 }
  0x98   : > { %2702 = vmatmul.msk.f32.gmra.mxu1 %vm670_vm0, %v3261_v12  ;;  %2718 = vmatmul.msk.f32.gmra.mxu2 %vm670_vm0, %v2710_v30 }
  0x99   : > { %2726 = vmatmul.msk.f32.gmra.mxu3 %vm670_vm0, %v2710_v30  ;;  %v3598_v30 = vld [vmem:[%s4581_s3] sm:$0x3] }
  0x9a   : > { %2743 = vmatmul.msk.f32.gmra.mxu0 %vm670_vm0, %v2735_v31 }
  0xa0   : > { %2703 = vmatmul.msk.f32.gmra.mxu1 %vm670_vm0, %v3302_v19  ;;  %2719 = vmatmul.msk.f32.gmra.mxu2 %vm670_vm0, %v2711_v32 }
  0xa1   : > { %2727 = vmatmul.msk.f32.gmra.mxu3 %vm670_vm0, %v2711_v32 }
  0xa2   : > { %2744 = vmatmul.msk.f32.gmra.mxu0 %vm670_vm0, %v2736_v33 }
  0xa8   : > { %2704 = vmatmul.msk.f32.gmra.mxu1 %vm670_vm0, %v3264_v13  ;;  %2720 = vmatmul.msk.f32.gmra.mxu2 %vm670_vm0, %v2712_v34  ;;  %v3544_v13 = vld [vmem:[%s3255_s30 + $0x190] sm:$0xff] }
  0xa9   : > { %2728 = vmatmul.msk.f32.gmra.mxu3 %vm670_vm0, %v2712_v34 }
  0xaa   : > { %2745 = vmatmul.msk.f32.gmra.mxu0 %vm670_vm0, %v2737_v35 }
  0xb0   : > { %2705 = vmatmul.msk.f32.gmra.mxu1 %vm670_vm0, %v3305_v20  ;;  %2721 = vmatmul.msk.f32.gmra.mxu2 %vm670_vm0, %v2713_v36  ;;  %v3567_v20 = vld [vmem:[%s3255_s30 + $0x198] sm:$0xff] }
  0xb1   : > { %2729 = vmatmul.msk.f32.gmra.mxu3 %vm670_vm0, %v2713_v36 }
  0xb2   : > { %2746 = vmatmul.msk.f32.gmra.mxu0 %vm670_vm0, %v3394_v37 }
  0xb8   : > { %2747 = vmatmul.msk.f32.vlgmr.msra.gmra.mxu1 %vm670_vm0, %v2731_v23  ;;  %2764 = vmatmul.msk.f32.vlgmr.msra.gmra.mxu2 %vm670_vm0, %v2756_v38 }
  0xb9   : > { %2772 = vmatmul.msk.f32.vlgmr.msra.gmra.mxu3 %vm670_vm0, %v2756_v38  ;;  %1848 = vmatpush.msra.mxu1 %v3272_v14  ;;  %v3608_v38 = vperm.slane %v3598_v30, 0 }
  0xba   : > { %1993 = vmatpush.msra.mxu2 %v3235_v8  ;;  %2789 = vmatmul.msk.f32.vlgmr.msra.gmra.mxu0 %vm670_vm0, %v3403_v39 }
  0xbb   : > { %2034 = vmatpush.msra.mxu3 %v3272_v14  ;;  %1849 = vmatpush.msra.mxu1 %v3285_v16 }
  0xbc   : > { %1994 = vmatpush.msra.mxu2 %v3240_v9  ;;  %2179 = vmatpush.msra.mxu0 %v3235_v8 }
  0xbd   : > { %2035 = vmatpush.msra.mxu3 %v3285_v16  ;;  %1850 = vmatpush.msra.mxu1 %v3293_v17 }
  0xbe   : > { %1995 = vmatpush.msra.mxu2 %v3249_v10  ;;  %2180 = vmatpush.msra.mxu0 %v3240_v9 }
  0xbf   : > { %2036 = vmatpush.msra.mxu3 %v3293_v17 }
  0xc0   : > { %2748 = vmatmul.msk.f32.gmra.mxu1 %vm670_vm0, %v2732_v25  ;;  %2765 = vmatmul.msk.f32.gmra.mxu2 %vm670_vm0, %v2757_v40 }
  0xc1   : > { %2773 = vmatmul.msk.f32.gmra.mxu3 %vm670_vm0, %v2757_v40  ;;  %2181 = vmatpush.msra.mxu0 %v3249_v10  ;;  %v3613_v40 = vld [vmem:[%s4581_s3 + $0x2] sm:$0x3] }
  0xc2   : > { %2790 = vmatmul.msk.f32.gmra.mxu0 %vm670_vm0, %v3423_v41 }
  0xc8   : > { %2749 = vmatmul.msk.f32.gmra.mxu1 %vm670_vm0, %v2733_v27  ;;  %2766 = vmatmul.msk.f32.gmra.mxu2 %vm670_vm0, %v2758_v42 }
  0xc9   : > { %2774 = vmatmul.msk.f32.gmra.mxu3 %vm670_vm0, %v2758_v42  ;;  %v3620_v42 = vld [vmem:[%s3255_s30 + $0x1a8] sm:$0xff] }
  0xca   : > { %2791 = vmatmul.msk.f32.gmra.mxu0 %vm670_vm0, %v3433_v43 }
  0xd0   : > { %2750 = vmatmul.msk.f32.gmra.mxu1 %vm670_vm0, %v2734_v29  ;;  %2767 = vmatmul.msk.f32.gmra.mxu2 %vm670_vm0, %v2759_v44 }
  0xd1   : > { %2775 = vmatmul.msk.f32.gmra.mxu3 %vm670_vm0, %v2759_v44 }
  0xd2   : > { %2792 = vmatmul.msk.f32.gmra.mxu0 %vm670_vm0, %v3442_v45 }
  0xd8   : > { %2751 = vmatmul.msk.f32.gmra.mxu1 %vm670_vm0, %v2735_v31  ;;  %2768 = vmatmul.msk.f32.gmra.mxu2 %vm670_vm0, %v2760_v46 }
  0xd9   : > { %2776 = vmatmul.msk.f32.gmra.mxu3 %vm670_vm0, %v2760_v46 }
  0xda   : > { %2793 = vmatmul.msk.f32.gmra.mxu0 %vm670_vm0, %v3451_v47 }
  0xe0   : > { %2752 = vmatmul.msk.f32.gmra.mxu1 %vm670_vm0, %v2736_v33  ;;  %2769 = vmatmul.msk.f32.gmra.mxu2 %vm670_vm0, %v2761_v48 }
  0xe1   : > { %2777 = vmatmul.msk.f32.gmra.mxu3 %vm670_vm0, %v2761_v48 }
  0xe2   : > { %2794 = vmatmul.msk.f32.gmra.mxu0 %vm670_vm0, %v3460_v49 }
  0xe4   : > { %v3466_v50 = vpop.f32.mrf.mxu1 }
  0xe7   : > { %v3470_v52 = vpop.f32.mrf.mxu0 }
  0xe8   : > { %2753 = vmatmul.msk.f32.gmra.mxu1 %vm670_vm0, %v2737_v35  ;;  %2770 = vmatmul.msk.f32.gmra.mxu2 %vm670_vm0, %v2762_v51 }
  0xe9   : > { %2778 = vmatmul.msk.f32.gmra.mxu3 %vm670_vm0, %v2762_v51 }
  0xea   : > { %2795 = vmatmul.msk.f32.gmra.mxu0 %vm670_vm0, %v3473_v53 }
  0xeb   : > { %v724_v54 = vpop.f32.mrf.mxu2  ;;  %v3479_v55 = vpop.f32.mrf.mxu3 }
  0xec   : > { %v725_v24 = vadd.f32 %v724_v54, %v3572_v21 }
  0xed   : > { %v3481_v56 = vpop.f32.mrf.mxu1 }
  0xee   : > { %v785_v29 = vmax.f32 %v725_v24, 0.0  ;;  %v3646_v24 = vld [vmem:[%s3255_s30 + $0x1b0] sm:$0xff] }
  0xef   : > { %v3486_v58 = vpop.f32.mrf.mxu0 }
  0xf0   : > { %2754 = vmatmul.msk.f32.gmra.mxu1 %vm670_vm0, %v3394_v37  ;;  %2771 = vmatmul.msk.f32.gmra.mxu2 %vm670_vm0, %v2763_v57  ;;  %v801_v33 = vmin.f32 %v785_v29, 6.0  ;;  %v2811_v37 = vld [vmem:[%s3255_s30 + $0x168] sm:$0xff] }
  0xf1   : > { %2779 = vmatmul.msk.f32.gmra.mxu3 %vm670_vm0, %v2763_v57 }
  0xf2   : > { %2796 = vmatmul.msk.f32.gmra.mxu0 %vm670_vm0, %v3489_v59 }
  0xf3   : > { %v727_v60 = vpop.f32.mrf.mxu2 }
  0xf4   : > { %v3495_v61 = vpop.f32.mrf.mxu3  ;;  %v728_v34 = vadd.f32 %v727_v60, %v3572_v21 }
  0xf5   : > { %v3497_v62 = vpop.f32.mrf.mxu1 }
  0xf6   : > { %v787_v44 = vmax.f32 %v728_v34, 0.0 }
  0xf7   : > { %v3502_v0 = vpop.f32.mrf.mxu0 }
  0xf8   : > { %2797 = vmatmul.msk.f32.vlgmr.msrb.gmra.mxu1 %vm670_vm0, %v3403_v39  ;;  %2814 = vmatmul.msk.f32.vlgmr.msrb.gmra.mxu2 %vm670_vm0, %v2806_v63  ;;  %v803_v51 = vmin.f32 %v787_v44, 6.0  ;;  %v734_v44 = vadd.f32 %v3495_v61, %v3572_v21 }
  0xf9   : > { %2822 = vmatmul.msk.f32.vlgmr.msrb.gmra.mxu3 %vm670_vm0, %v2806_v63  ;;  %2220 = vmatpush.msrb.mxu1 %v3272_v14  ;;  %v2812_v63 = vld [vmem:[%s3255_s30 + $0x170] sm:$0xff] }
  0xfa   : > { %2839 = vmatmul.msk.f32.vlgmr.msrb.gmra.mxu0 %vm670_vm0, %v3505_v1 }
  0xfb   : > { %v3512_v2 = vpop.f32.mrf.mxu2  ;;  %2221 = vmatpush.msrb.mxu1 %v3285_v16 }
  0xfc   : > { %v3514_v3 = vpop.f32.mrf.mxu3 }
  0xfd   : > { %v3517_v4 = vpop.f32.mrf.mxu1  ;;  %2222 = vmatpush.msrb.mxu1 %v3293_v17  ;;  %v2809_v17 = vld [vmem:[%s3255_s30 + $0x158] sm:$0xff] }
  0xff   : > { %v3523_v6 = vpop.f32.mrf.mxu0 }
 0x100   : > { %2798 = vmatmul.msk.f32.gmra.mxu1 %vm670_vm0, %v3423_v41  ;;  %2815 = vmatmul.msk.f32.gmra.mxu2 %vm670_vm0, %v2807_v5 }
 0x101   : > { %2823 = vmatmul.msk.f32.gmra.mxu3 %vm670_vm0, %v2807_v5  ;;  %v731_v5 = vadd.f32 %v3479_v55, %v3572_v21 }
 0x102   : > { %2840 = vmatmul.msk.f32.gmra.mxu0 %vm670_vm0, %v3526_v7 }
 0x103   : > { %v3532_v8 = vpop.f32.mrf.mxu2 }
 0x104   : > { %v3534_v9 = vpop.f32.mrf.mxu3 }
 0x105   : > { %v3536_v10 = vpop.f32.mrf.mxu1 }
 0x107   : > { %v3541_v12 = vpop.f32.mrf.mxu0 }
 0x108   : > { %2799 = vmatmul.msk.f32.gmra.mxu1 %vm670_vm0, %v3433_v43  ;;  %2816 = vmatmul.msk.f32.gmra.mxu2 %vm670_vm0, %v2808_v11  ;;  %v823_v43 = vmul.f32 %v3608_v38, %v801_v33 }
 0x109   : > { %2824 = vmatmul.msk.f32.gmra.mxu3 %vm670_vm0, %v2808_v11 }
 0x10a   : > { %2841 = vmatmul.msk.f32.gmra.mxu0 %vm670_vm0, %v3544_v13 }
 0x10b   : > { %v3550_v14 = vpop.f32.mrf.mxu2 }
 0x10c   : > { %v3552_v15 = vpop.f32.mrf.mxu3 }
 0x10d   : > { %v3554_v16 = vpop.f32.mrf.mxu1 }
 0x10f   : > { %v3564_v19 = vpop.f32.mrf.mxu0 }
 0x110   : > { %2800 = vmatmul.msk.f32.gmra.mxu1 %vm670_vm0, %v3442_v45  ;;  %2817 = vmatmul.msk.f32.gmra.mxu2 %vm670_vm0, %v2809_v17  ;;  %v3624_v45 = vperm.slane %v3613_v40, 0 }
 0x111   : > { %2825 = vmatmul.msk.f32.gmra.mxu3 %vm670_vm0, %v2809_v17 }
 0x112   : > { %2842 = vmatmul.msk.f32.gmra.mxu0 %vm670_vm0, %v3567_v20 }
 0x113   : > { %v3576_v22 = vpop.f32.mrf.mxu2 }
 0x114   : > { %v3578_v23 = vpop.f32.mrf.mxu3 }
 0x115   : > { %v3581_v25 = vpop.f32.mrf.mxu1 }
 0x117   : > { %v3586_v27 = vpop.f32.mrf.mxu0 }
 0x118   : > { %2801 = vmatmul.msk.f32.gmra.mxu1 %vm670_vm0, %v3451_v47  ;;  %4593 = vst [vmem:[#allocation3_spill] sm:$0xff] %v3586_v27  ;;  %2818 = vmatmul.msk.f32.gmra.mxu2 %vm670_vm0, %v2810_v26 }
 0x119   : > { %2826 = vmatmul.msk.f32.gmra.mxu3 %vm670_vm0, %v2810_v26  ;;  %v825_v26 = vmul.f32 %v3608_v38, %v803_v51 }
 0x11a   : > { %2843 = vmatmul.msk.f32.gmra.mxu0 %vm670_vm0, %v3589_v28 }
 0x11b   : > { %v893_v31 = vpop.f32.mrf.mxu2 }
 0x11c   : > { %v3600_v32 = vpop.f32.mrf.mxu3  ;;  %v894_v35 = vadd.f32 %v893_v31, %v3572_v21  ;;  %v789_v31 = vmax.f32 %v731_v5, 0.0 }
 0x11d   : > { %v3604_v36 = vpop.f32.mrf.mxu1 }
 0x11e   : > { %v954_v39 = vmax.f32 %v894_v35, 0.0 }
 0x11f   : > { %v3617_v41 = vpop.f32.mrf.mxu0 }
 0x120   : > { %2802 = vmatmul.msk.f32.gmra.mxu1 %vm670_vm0, %v3460_v49  ;;  %4594 = vst [vmem:[#allocation4_spill] sm:$0xff] %v3617_v41  ;;  %v970_v46 = vmin.f32 %v954_v39, 6.0  ;;  %2819 = vmatmul.msk.f32.gmra.mxu2 %vm670_vm0, %v2811_v37  ;;  %v2813_v39 = vld [vmem:[%s3255_s30 + $0x178] sm:$0xff] }
 0x121   : > { %2827 = vmatmul.msk.f32.gmra.mxu3 %vm670_vm0, %v2811_v37 }
 0x122   : > { %v993_v47 = vmul.f32 %v3624_v45, %v970_v46  ;;  %2844 = vmatmul.msk.f32.gmra.mxu0 %vm670_vm0, %v3620_v42 }
 0x123   : > { %v896_v48 = vpop.f32.mrf.mxu2 }
 0x124   : > { %v3631_v49 = vpop.f32.mrf.mxu3  ;;  %v3633_v54 = vadd.f32 %v993_v47, %v823_v43  ;;  %v897_v57 = vadd.f32 %v896_v48, %v3572_v21  ;;  %v805_v43 = vmin.f32 %v789_v31, 6.0  ;;  %v3669_v48 = vld [vmem:[%s3255_s30 + $0x1b8] sm:$0xff]  ;;  %v2856_v31 = vld [vmem:[%s3255_s30 + $0x1c0] sm:$0xff] }
 0x125   : > { %v3636_v60 = vpop.f32.mrf.mxu1 }
 0x126   : > { %4595 = vst [vmem:[#allocation5_spill] sm:$0xff] %v3633_v54  ;;  %v956_v11 = vmax.f32 %v897_v57, 0.0  ;;  %v827_v57 = vmul.f32 %v3608_v38, %v805_v43  ;;  %v2861_v54 = vld [vmem:[%s3255_s30 + $0x1e8] sm:$0xff] }
 0x127   : > { %v3643_v17 = vpop.f32.mrf.mxu0 }
 0x128   : > { %2803 = vmatmul.msk.f32.gmra.mxu1 %vm670_vm0, %v3473_v53  ;;  %4596 = vst [vmem:[#allocation6_spill] sm:$0xff] %v3643_v17  ;;  %v972_v29 = vmin.f32 %v956_v11, 6.0  ;;  %2820 = vmatmul.msk.f32.gmra.mxu2 %vm670_vm0, %v2812_v63  ;;  %v3807_v17 = vld [vmem:[%s3255_s30 + $0x230] sm:$0xff] }
 0x129   : > { %2828 = vmatmul.msk.f32.gmra.mxu3 %vm670_vm0, %v2812_v63  ;;  %v791_v63 = vmax.f32 %v734_v44, 0.0  ;;  %4618 = vst [vmem:[#allocation28_spill] sm:$0xff] %v3807_v17 }
 0x12a   : > { %v995_v55 = vmul.f32 %v3624_v45, %v972_v29  ;;  %2845 = vmatmul.msk.f32.gmra.mxu0 %vm670_vm0, %v3646_v24 }
 0x12b   : > { %v899_v33 = vpop.f32.mrf.mxu2 }
 0x12c   : > { %v3654_v53 = vpop.f32.mrf.mxu3  ;;  %v3656_v34 = vadd.f32 %v995_v55, %v825_v26  ;;  %v900_v35 = vadd.f32 %v899_v33, %v3572_v21  ;;  %v807_v55 = vmin.f32 %v791_v63, 6.0 }
 0x12d   : > { %v3659_v37 = vpop.f32.mrf.mxu1 }
 0x12e   : > { %4597 = vst [vmem:[#allocation7_spill] sm:$0xff] %v3656_v34  ;;  %v958_v46 = vmax.f32 %v900_v35, 0.0  ;;  %v829_v44 = vmul.f32 %v3608_v38, %v807_v55  ;;  %v3748_v34 = vld [vmem:[%s3255_s30 + $0x218] sm:$0xff] }
 0x12f   : > { %4598 = vst [vmem:[#allocation8_spill] sm:$0xff] %v3659_v37  ;;  %v3666_v47 = vpop.f32.mrf.mxu0 }
 0x130   : > { %2804 = vmatmul.msk.f32.gmra.mxu1 %vm670_vm0, %v3489_v59  ;;  %4599 = vst [vmem:[#allocation9_spill] sm:$0xff] %v3666_v47  ;;  %v974_v51 = vmin.f32 %v958_v46, 6.0  ;;  %2821 = vmatmul.msk.f32.gmra.mxu2 %vm670_vm0, %v2813_v39  ;;  %v719_v47 = vadd.f32 %v3466_v50, %v3572_v21 }
 0x131   : > { %2829 = vmatmul.msk.f32.gmra.mxu3 %vm670_vm0, %v2813_v39  ;;  %v3690_v39 = vld [vmem:[%s3255_s30 + $0x200] sm:$0xff] }
 0x132   : > { %v997_v61 = vmul.f32 %v3624_v45, %v974_v51  ;;  %2846 = vmatmul.msk.f32.gmra.mxu0 %vm670_vm0, %v3669_v48 }
 0x133   : > { %v902_v5 = vpop.f32.mrf.mxu2 }
 0x134   : > { %v3677_v59 = vpop.f32.mrf.mxu3  ;;  %v3679_v11 = vadd.f32 %v997_v61, %v827_v57  ;;  %v903_v26 = vadd.f32 %v902_v5, %v3572_v21  ;;  %v2857_v61 = vld [vmem:[%s3255_s30 + $0x1c8] sm:$0xff] }
 0x135   : > { %4600 = vst [vmem:[#allocation10_spill] sm:$0xff] %v3677_v59  ;;  %v3682_v29 = vpop.f32.mrf.mxu1 }
 0x136   : > { %4601 = vst [vmem:[#allocation11_spill] sm:$0xff] %v3679_v11  ;;  %v960_v33 = vmax.f32 %v903_v26, 0.0  ;;  %v3712_v26 = vld [vmem:[%s3255_s30 + $0x208] sm:$0xff] }
 0x137   : > { %v3687_v35 = vpop.f32.mrf.mxu0 }
 0x138   : > { %2847 = vmatmul.msk.f32.vlgmr.msra.gmra.mxu1 %vm670_vm0, %v3505_v1  ;;  %4602 = vst [vmem:[#allocation12_spill] sm:$0xff] %v3687_v35  ;;  %v976_v43 = vmin.f32 %v960_v33, 6.0  ;;  %2864 = vmatmul.msk.f32.vlgmr.msra.gmra.mxu2 %vm670_vm0, %v2856_v31 }
 0x139   : > { %2872 = vmatmul.msk.f32.vlgmr.msra.gmra.mxu3 %vm670_vm0, %v2856_v31 }
 0x13a   : > { %v999_v46 = vmul.f32 %v3624_v45, %v976_v43  ;;  %2889 = vmatmul.msk.f32.vlgmr.msra.gmra.mxu0 %vm670_vm0, %v3690_v39 }
 0x13b   : > { %v3698_v51 = vpop.f32.mrf.mxu2 }
 0x13c   : > { %4603 = vst [vmem:[#allocation13_spill] sm:$0xff] %v3698_v51  ;;  %v3700_v1 = vpop.f32.mrf.mxu3  ;;  %v3702_v57 = vadd.f32 %v999_v46, %v829_v44  ;;  %v3730_v44 = vld [vmem:[%s3255_s30 + $0x210] sm:$0xff] }
 0x13d   : > { %v3704_v63 = vpop.f32.mrf.mxu1 }
 0x13e   : > { %4604 = vst [vmem:[#allocation14_spill] sm:$0xff] %v3702_v57  ;;  %v2859_v57 = vld [vmem:[%s3255_s30 + $0x1d8] sm:$0xff] }
 0x13f   : > { %v3709_v5 = vpop.f32.mrf.mxu0 }
 0x140   : > { %2848 = vmatmul.msk.f32.gmra.mxu1 %vm670_vm0, %v3526_v7  ;;  %4605 = vst [vmem:[#allocation15_spill] sm:$0xff] %v3709_v5  ;;  %2865 = vmatmul.msk.f32.gmra.mxu2 %vm670_vm0, %v2857_v61  ;;  %v2858_v7 = vld [vmem:[%s3255_s30 + $0x1d0] sm:$0xff] }
 0x141   : > { %2873 = vmatmul.msk.f32.gmra.mxu3 %vm670_vm0, %v2857_v61 }
 0x142   : > { %2890 = vmatmul.msk.f32.gmra.mxu0 %vm670_vm0, %v3712_v26 }
 0x143   : > { %v3718_v31 = vpop.f32.mrf.mxu2 }
 0x144   : > { %4606 = vst [vmem:[#allocation16_spill] sm:$0xff] %v3718_v31  ;;  %v3720_v55 = vpop.f32.mrf.mxu3  ;;  %v3793_v31 = vperm.slane %v3560_v18, 1  ;;  %v713_v18 = vadd.f32 %v3470_v52, %v3572_v21 }
 0x145   : > { %v3722_v33 = vpop.f32.mrf.mxu1 }
 0x146   : > { %v1109_v50 = vadd.f32 %v3682_v29, %v3793_v31  ;;  %v777_v51 = vmax.f32 %v713_v18, 0.0  ;;  %v722_v29 = vadd.f32 %v3481_v56, %v3572_v21  ;;  %v3836_v18 = vperm.slane %v3598_v30, 1 }
 0x147   : > { %v3727_v43 = vpop.f32.mrf.mxu0  ;;  %v757_v30 = vadd.f32 %v3517_v4, %v3793_v31 }
 0x148   : > { %2849 = vmatmul.msk.f32.gmra.mxu1 %vm670_vm0, %v3544_v13  ;;  %4607 = vst [vmem:[#allocation17_spill] sm:$0xff] %v3727_v43  ;;  %2866 = vmatmul.msk.f32.gmra.mxu2 %vm670_vm0, %v2858_v7 }
 0x149   : > { %2874 = vmatmul.msk.f32.gmra.mxu3 %vm670_vm0, %v2858_v7 }
 0x14a   : > { %2891 = vmatmul.msk.f32.gmra.mxu0 %vm670_vm0, %v3730_v44 }
 0x14b   : > { %v3736_v46 = vpop.f32.mrf.mxu2 }
 0x14c   : > { %4608 = vst [vmem:[#allocation18_spill] sm:$0xff] %v3736_v46  ;;  %v3741_v11 = vpop.f32.mrf.mxu3  ;;  %v2860_v46 = vld [vmem:[%s3255_s30 + $0x1e0] sm:$0xff] }
 0x14d   : > { %v3738_v61 = vpop.f32.mrf.mxu1 }
 0x14f   : > { %v3745_v13 = vpop.f32.mrf.mxu0 }
 0x150   : > { %2850 = vmatmul.msk.f32.gmra.mxu1 %vm670_vm0, %v3567_v20  ;;  %4609 = vst [vmem:[#allocation19_spill] sm:$0xff] %v3745_v13  ;;  %2867 = vmatmul.msk.f32.gmra.mxu2 %vm670_vm0, %v2859_v57  ;;  %v3764_v13 = vld [vmem:[%s3255_s30 + $0x220] sm:$0xff] }
 0x151   : > { %2875 = vmatmul.msk.f32.gmra.mxu3 %vm670_vm0, %v2859_v57 }
 0x152   : > { %2892 = vmatmul.msk.f32.gmra.mxu0 %vm670_vm0, %v3748_v34 }
 0x153   : > { %v3754_v7 = vpop.f32.mrf.mxu2 }
 0x154   : > { %4610 = vst [vmem:[#allocation20_spill] sm:$0xff] %v3754_v7  ;;  %v3766_v5 = vpop.f32.mrf.mxu3 }
 0x155   : > { %v3756_v43 = vpop.f32.mrf.mxu1 }
 0x157   : > { %v3761_v20 = vpop.f32.mrf.mxu0 }
 0x158   : > { %2851 = vmatmul.msk.f32.gmra.mxu1 %vm670_vm0, %v3589_v28  ;;  %4611 = vst [vmem:[#allocation21_spill] sm:$0xff] %v3761_v20  ;;  %2868 = vmatmul.msk.f32.gmra.mxu2 %vm670_vm0, %v2860_v46  ;;  %v3782_v20 = vld [vmem:[%s3255_s30 + $0x228] sm:$0xff] }
 0x159   : > { %2876 = vmatmul.msk.f32.gmra.mxu3 %vm670_vm0, %v2860_v46  ;;  %4614 = vst [vmem:[#allocation24_spill] sm:$0xff] %v3782_v20 }
 0x15a   : > { %2893 = vmatmul.msk.f32.gmra.mxu0 %vm670_vm0, %v3764_v13 }
 0x15b   : > { %v3772_v57 = vpop.f32.mrf.mxu2 }
 0x15c   : > { %4612 = vst [vmem:[#allocation22_spill] sm:$0xff] %v3772_v57  ;;  %v3786_v46 = vpop.f32.mrf.mxu3 }
 0x15d   : > { %v3774_v7 = vpop.f32.mrf.mxu1 }
 0x15f   : > { %v3779_v28 = vpop.f32.mrf.mxu0 }
 0x160   : > { %2852 = vmatmul.msk.f32.gmra.mxu1 %vm670_vm0, %v3620_v42  ;;  %4613 = vst [vmem:[#allocation23_spill] sm:$0xff] %v3779_v28  ;;  %2869 = vmatmul.msk.f32.gmra.mxu2 %vm670_vm0, %v2861_v54  ;;  %v2862_v42 = vld [vmem:[%s3255_s30 + $0x1f0] sm:$0xff]  ;;  %v923_v28 = vadd.f32 %v3514_v3, %v3793_v31 }
 0x161   : > { %2877 = vmatmul.msk.f32.gmra.mxu3 %vm670_vm0, %v2861_v54 }
 0x162   : > { %2894 = vmatmul.msk.f32.gmra.mxu0 %vm670_vm0, %v3782_v20  ;;  %v947_v3 = vmax.f32 %v923_v28, 0.0  ;;  %v1133_v28 = vmax.f32 %v1109_v50, 0.0  ;;  %v3846_v50 = vld [vmem:[%s3255_s30 + $0x238] sm:$0xff] }
 0x163   : > { %v3790_v57 = vpop.f32.mrf.mxu2  ;;  %4622 = vst [vmem:[#allocation32_spill] sm:$0xff] %v3846_v50 }
 0x164   : > { %4615 = vst [vmem:[#allocation25_spill] sm:$0xff] %v3790_v57  ;;  %v754_v57 = vadd.f32 %v3497_v62, %v3793_v31  ;;  %v3823_v41 = vpop.f32.mrf.mxu3  ;;  %v963_v20 = vmin.f32 %v947_v3, 6.0 }
 0x165   : > { %v3795_v35 = vpop.f32.mrf.mxu1 }
 0x166   : > { %4616 = vst [vmem:[#allocation26_spill] sm:$0xff] %v3795_v35  ;;  %v778_v62 = vmax.f32 %v754_v57, 0.0  ;;  %v2755_v57 = vld [vmem:[%s4581_s3 + $0x4] sm:$0x3] }
 0x167   : > { %v3804_v54 = vpop.f32.mrf.mxu0 }
 0x168   : > { %2853 = vmatmul.msk.f32.gmra.mxu1 %vm670_vm0, %v3646_v24  ;;  %4617 = vst [vmem:[#allocation27_spill] sm:$0xff] %v3804_v54  ;;  %2870 = vmatmul.msk.f32.gmra.mxu2 %vm670_vm0, %v2862_v42  ;;  %v781_v24 = vmax.f32 %v719_v47, 0.0  ;;  %v1295_v54 = vadd.f32 %v3700_v1, %v3793_v31  ;;  %v3831_v47 = vperm.slane %v3613_v40, 1  ;;  %v926_v1 = vadd.f32 %v3534_v9, %v3793_v31 }
 0x169   : > { %2878 = vmatmul.msk.f32.gmra.mxu3 %vm670_vm0, %v2862_v42  ;;  %v2863_v42 = vld [vmem:[%s3255_s30 + $0x1f8] sm:$0xff]  ;;  %v793_v40 = vmin.f32 %v777_v51, 6.0  ;;  %v716_v9 = vadd.f32 %v3486_v58, %v3572_v21  ;;  %v794_v3 = vmin.f32 %v778_v62, 6.0  ;;  %v1112_v58 = vadd.f32 %v3704_v63, %v3793_v31 }
 0x16a   : > { %2895 = vmatmul.msk.f32.gmra.mxu0 %vm670_vm0, %v3807_v17  ;;  %v1319_v17 = vmax.f32 %v1295_v54, 0.0  ;;  %v1149_v54 = vmin.f32 %v1133_v28, 6.0  ;;  %v986_v51 = vmul.f32 %v3831_v47, %v963_v20  ;;  %v3864_v62 = vperm.slane %v2755_v57, 0 }
 0x16b   : > { %v3821_v52 = vpop.f32.mrf.mxu2  ;;  %v949_v4 = vmax.f32 %v926_v1, 0.0  ;;  %v1298_v28 = vadd.f32 %v3720_v55, %v3793_v31  ;;  %v3879_v63 = vmul.f32 %v3608_v38, %v793_v40  ;;  %v779_v20 = vmax.f32 %v716_v9, 0.0  ;;  %v3891_v9 = vld [vmem:[%s4581_s3 + $0x8] sm:$0x3] }
 0x16c   : > { %4619 = vst [vmem:[#allocation29_spill] sm:$0xff] %v3821_v52  ;;  %v797_v52 = vmin.f32 %v781_v24, 6.0  ;;  %v3855_v24 = vld [vmem:[%s4581_s3 + $0x6] sm:$0x3]  ;;  %v1335_v59 = vmin.f32 %v1319_v17, 6.0  ;;  %v816_v1 = vmul.f32 %v3836_v18, %v794_v3  ;;  %v1135_v17 = vmax.f32 %v1112_v58, 0.0  ;;  %v3893_v3 = vpop.f32.mrf.mxu3 }
 0x16d   : > { %v3825_v37 = vpop.f32.mrf.mxu1  ;;  %4623 = vst [vmem:[#allocation33_spill] sm:$0xff] %v3855_v24  ;;  %v965_v35 = vmin.f32 %v949_v4, 6.0  ;;  %v929_v40 = vadd.f32 %v3552_v15, %v3793_v31  ;;  %v795_v15 = vmin.f32 %v779_v20, 6.0  ;;  %v760_v4 = vadd.f32 %v3536_v10, %v3793_v31 }
 0x16e   : > { %4620 = vst [vmem:[#allocation30_spill] sm:$0xff] %v3825_v37  ;;  %v3869_v37 = vmul.f32 %v3608_v38, %v797_v52  ;;  %v1002_v55 = vadd.f32 %v986_v51, %v816_v1  ;;  %v1068_v51 = vadd.f32 %v3502_v0, %v3572_v21  ;;  %v1301_v0 = vadd.f32 %v3741_v11, %v3793_v31 }
 0x16f   : > { %v3843_v56 = vpop.f32.mrf.mxu0  ;;  %4626 = vst [vmem:[#allocation36_spill] sm:$0xff] %v3891_v9  ;;  %v951_v20 = vmax.f32 %v929_v40, 0.0 }
 0x170   : > { %2854 = vmatmul.msk.f32.gmra.mxu1 %vm670_vm0, %v3669_v48  ;;  %4621 = vst [vmem:[#allocation31_spill] sm:$0xff] %v3843_v56  ;;  %2871 = vmatmul.msk.f32.gmra.mxu2 %vm670_vm0, %v2863_v42  ;;  %v783_v48 = vmax.f32 %v722_v29, 0.0  ;;  %v3859_v56 = vperm.slane %v2755_v57, 1  ;;  %v3872_v29 = vperm.slane %v3855_v24, 1  ;;  %v780_v57 = vmax.f32 %v757_v30, 0.0 }
 0x171   : > { %2879 = vmatmul.msk.f32.gmra.mxu3 %vm670_vm0, %v2863_v42  ;;  %4624 = vst [vmem:[#allocation34_spill] sm:$0xff] %v3869_v37  ;;  %v882_v37 = vadd.f32 %v3512_v2, %v3572_v21 }
 0x172   : > { %2896 = vmatmul.msk.f32.gmra.mxu0 %vm670_vm0, %v3846_v50  ;;  %v799_v27 = vmin.f32 %v783_v48, 6.0  ;;  %v1172_v52 = vmul.f32 %v3859_v56, %v1149_v54  ;;  %v1358_v30 = vmul.f32 %v3872_v29, %v1335_v59  ;;  %v1321_v48 = vmax.f32 %v1298_v28, 0.0 }
 0x173   : > { %v3876_v42 = vpop.f32.mrf.mxu2  ;;  %v796_v58 = vmin.f32 %v780_v57, 6.0  ;;  %v1151_v59 = vmin.f32 %v1135_v17, 6.0  ;;  %v3919_v17 = vmul.f32 %v3608_v38, %v795_v15 }
 0x174   : > { %4625 = vst [vmem:[#allocation35_spill] sm:$0xff] %v3876_v42  ;;  %v1188_v1 = vadd.f32 %v1172_v52, %v1002_v55  ;;  %v3910_v42 = vmul.f32 %v3608_v38, %v799_v27  ;;  %v1132_v27 = vmax.f32 %v1068_v51, 0.0  ;;  %v782_v55 = vmax.f32 %v760_v4, 0.0 }
 0x175   : > { %v1480_v50 = vpop.f32.mrf.mxu1  ;;  %v932_v38 = vadd.f32 %v3578_v23, %v3793_v31  ;;  %v1323_v51 = vmax.f32 %v1301_v0, 0.0 }
 0x176   : > { %v1481_v24 = vadd.f32 %v1480_v50, %v3793_v31  ;;  %v3897_v50 = vperm.slane %v3891_v9, 1  ;;  %v1374_v57 = vadd.f32 %v1358_v30, %v1188_v1  ;;  %v1337_v9 = vmin.f32 %v1321_v48, 6.0 }
 0x177   : > { %v3901_v2 = vpop.f32.mrf.mxu0  ;;  %v967_v1 = vmin.f32 %v951_v20, 6.0  ;;  %v3939_v20 = vpop.f32.mrf.mxu3 }
 0x178   : > { %v1505_v54 = vmax.f32 %v1481_v24, 0.0  ;;  %2897 = vmatmul.msk.f32.vlgmr.msrb.gmra.mxu1 %vm670_vm0, %v3690_v39  ;;  %4627 = vst [vmem:[#allocation37_spill] sm:$0xff] %v3901_v2  ;;  %v1115_v24 = vadd.f32 %v3722_v33, %v3793_v31  ;;  %v946_v39 = vmax.f32 %v882_v37, 0.0  ;;  %v988_v2 = vmul.f32 %v3831_v47, %v965_v35 }
 0x179   : > { %v818_v33 = vmul.f32 %v3836_v18, %v796_v58  ;;  %v1174_v35 = vmul.f32 %v3859_v56, %v1151_v59  ;;  %v1360_v58 = vmul.f32 %v3872_v29, %v1337_v9  ;;  %v1118_v9 = vadd.f32 %v3738_v61, %v3793_v31 }
 0x17a   : > { %v1521_v28 = vmin.f32 %v1505_v54, 6.0  ;;  %v1137_v40 = vmax.f32 %v1115_v24, 0.0  ;;  %v962_v11 = vmin.f32 %v946_v39, 6.0  ;;  %v885_v54 = vadd.f32 %v3532_v8, %v3572_v21 }
 0x17b   : > { %v3916_v52 = vpop.f32.mrf.mxu2  ;;  %v1004_v15 = vadd.f32 %v988_v2, %v818_v33  ;;  %v1148_v24 = vmin.f32 %v1132_v27, 6.0  ;;  %v1071_v39 = vadd.f32 %v3523_v6, %v3572_v21  ;;  %v763_v8 = vadd.f32 %v3554_v16, %v3793_v31 }
 0x17c   : > { %v1544_v10 = vmul.f32 %v3897_v50, %v1521_v28  ;;  %v798_v28 = vmin.f32 %v782_v55, 6.0  ;;  %v1153_v2 = vmin.f32 %v1137_v40, 6.0  ;;  %v948_v0 = vmax.f32 %v885_v54, 0.0 }
 0x17d   : > { %v1483_v37 = vpop.f32.mrf.mxu1  ;;  %v1190_v23 = vadd.f32 %v1174_v35, %v1004_v15  ;;  %v953_v33 = vmax.f32 %v932_v38, 0.0  ;;  %v1339_v55 = vmin.f32 %v1323_v51, 6.0  ;;  %v1304_v6 = vadd.f32 %v3766_v5, %v3793_v31 }
 0x17e   : > { %v3923_v30 = vadd.f32 %v1544_v10, %v1374_v57  ;;  %v1484_v48 = vadd.f32 %v1483_v37, %v3793_v31  ;;  %v990_v10 = vmul.f32 %v3831_v47, %v967_v1  ;;  %v1171_v35 = vmul.f32 %v3864_v62, %v1148_v24 }
 0x17f   : > { %v3933_v59 = vpop.f32.mrf.mxu0  ;;  %v1376_v27 = vadd.f32 %v1360_v58, %v1190_v23  ;;  %v820_v61 = vmul.f32 %v3836_v18, %v798_v28  ;;  %v1134_v40 = vmax.f32 %v1071_v39, 0.0  ;;  %v1176_v54 = vmul.f32 %v3859_v56, %v1153_v2 }
 0x180   : > { %v1507_v4 = vmax.f32 %v1484_v48, 0.0  ;;  %2898 = vmatmul.msk.f32.gmra.mxu1 %vm670_vm0, %v3712_v26  ;;  %v985_v26 = vmul.f32 %v3624_v45, %v962_v11  ;;  %v784_v48 = vmax.f32 %v763_v8, 0.0  ;;  %v1139_v1 = vmax.f32 %v1118_v9, 0.0 }
 0x181   : > { %v964_v58 = vmin.f32 %v948_v0, 6.0  ;;  %v969_v51 = vmin.f32 %v953_v33, 6.0  ;;  %v1006_v24 = vadd.f32 %v990_v10, %v820_v61  ;;  %v1362_v28 = vmul.f32 %v3872_v29, %v1339_v55 }
 0x182   : > { %v1523_v57 = vmin.f32 %v1507_v4, 6.0  ;;  %v1001_v5 = vadd.f32 %v985_v26, %v3879_v63  ;;  %v935_v4 = vadd.f32 %v3600_v32, %v3793_v31  ;;  %v1325_v39 = vmax.f32 %v1304_v6, 0.0  ;;  %v3974_v6 = vpop.f32.mrf.mxu3 }
 0x183   : > { %v3948_v37 = vpop.f32.mrf.mxu2  ;;  %v1150_v2 = vmin.f32 %v1134_v40, 6.0  ;;  %v800_v9 = vmin.f32 %v784_v48, 6.0  ;;  %v1074_v63 = vadd.f32 %v3541_v12, %v3572_v21  ;;  %v1192_v26 = vadd.f32 %v1176_v54, %v1006_v24 }
 0x184   : > { %v1546_v16 = vmul.f32 %v3897_v50, %v1523_v57  ;;  %v766_v57 = vadd.f32 %v3581_v25, %v3793_v31  ;;  %v1155_v32 = vmin.f32 %v1139_v1, 6.0  ;;  %v1121_v0 = vadd.f32 %v3756_v43, %v3793_v31 }
 0x185   : > { %v1486_v11 = vpop.f32.mrf.mxu1  ;;  %v3970_v33 = vadd.f32 %v1171_v35, %v1001_v5  ;;  %v955_v55 = vmax.f32 %v935_v4, 0.0  ;;  %v1341_v12 = vmin.f32 %v1325_v39, 6.0  ;;  %v1307_v25 = vadd.f32 %v3786_v46, %v3793_v31 }
 0x186   : > { %v3953_v38 = vadd.f32 %v1546_v16, %v1376_v27  ;;  %v1487_v15 = vadd.f32 %v1486_v11, %v3793_v31  ;;  %v992_v27 = vmul.f32 %v3831_v47, %v969_v51  ;;  %v1378_v16 = vadd.f32 %v1362_v28, %v1192_v26  ;;  %v2388_v28 = vld [vmem:[%s4583_s5 + $0x78] sm:$0xff]  ;;  %v2387_v26 = vld [vmem:[%s4583_s5 + $0x70] sm:$0xff] }
 0x187   : > { %v3962_v23 = vpop.f32.mrf.mxu0  ;;  %v1173_v43 = vmul.f32 %v3864_v62, %v1150_v2  ;;  %v822_v35 = vmul.f32 %v3836_v18, %v800_v9  ;;  %v1136_v48 = vmax.f32 %v1074_v63, 0.0  ;;  %v786_v11 = vmax.f32 %v766_v57, 0.0  ;;  %2420 = vmatpush.msrb.mxu2 %v2388_v28 }
 0x188   : > { %4628 = vst [vmem:[#allocation38_spill] sm:$0xff] %v3953_v38  ;;  %v1509_v8 = vmax.f32 %v1487_v15, 0.0  ;;  %2899 = vmatmul.msk.f32.gmra.mxu1 %vm670_vm0, %v3730_v44  ;;  %v987_v44 = vmul.f32 %v3624_v45, %v964_v58  ;;  %v1178_v1 = vmul.f32 %v3859_v56, %v1155_v32  ;;  %v1141_v15 = vmax.f32 %v1121_v0, 0.0 }
 0x189   : > { %v888_v51 = vadd.f32 %v3550_v14, %v3572_v21  ;;  %v971_v4 = vmin.f32 %v955_v55, 6.0  ;;  %v938_v24 = vadd.f32 %v3631_v49, %v3793_v31  ;;  %v1008_v39 = vadd.f32 %v992_v27, %v822_v35  ;;  %2421 = vmatpush.msrb.mxu2 %v2387_v26 }
 0x18a   : > { %v1525_v10 = vmin.f32 %v1509_v8, 6.0  ;;  %v1003_v46 = vadd.f32 %v987_v44, %v3919_v17  ;;  %v1364_v8 = vmul.f32 %v3872_v29, %v1341_v12  ;;  %v1327_v2 = vmax.f32 %v1307_v25, 0.0 }
 0x18b   : > { %v3979_v40 = vpop.f32.mrf.mxu2  ;;  %v1152_v14 = vmin.f32 %v1136_v48, 6.0  ;;  %v891_v63 = vadd.f32 %v3576_v22, %v3572_v21  ;;  %v802_v49 = vmin.f32 %v786_v11, 6.0  ;;  %v769_v57 = vadd.f32 %v3604_v36, %v3793_v31  ;;  %v2386_v36 = vld [vmem:[%s4583_s5 + $0x68] sm:$0xff] }
 0x18c   : > { %v1548_v61 = vmul.f32 %v3897_v50, %v1525_v10  ;;  %v1194_v32 = vadd.f32 %v1178_v1, %v1008_v39  ;;  %v1157_v0 = vmin.f32 %v1141_v15, 6.0  ;;  %v4009_v44 = vadd.f32 %v1173_v43, %v1003_v46  ;;  %2422 = vmatpush.msrb.mxu2 %v2386_v36  ;;  %v2385_v15 = vld [vmem:[%s4583_s5 + $0x60] sm:$0xff]  ;;  %v2384_v39 = vld [vmem:[%s4583_s5 + $0x58] sm:$0xff] }
 0x18d   : > { %v1489_v54 = vpop.f32.mrf.mxu1  ;;  %v950_v27 = vmax.f32 %v888_v51, 0.0  ;;  %v994_v22 = vmul.f32 %v3831_v47, %v971_v4  ;;  %v957_v55 = vmax.f32 %v938_v24, 0.0  ;;  %v1343_v12 = vmin.f32 %v1327_v2, 6.0 }
 0x18e   : > { %v3984_v5 = vadd.f32 %v1548_v61, %v1378_v16  ;;  %v1490_v58 = vadd.f32 %v1489_v54, %v3793_v31  ;;  %v1380_v16 = vadd.f32 %v1364_v8, %v1194_v32  ;;  %v1310_v25 = vadd.f32 %v3823_v41, %v3793_v31  ;;  %v4023_v54 = vpop.f32.mrf.mxu3  ;;  %2423 = vmatpush.msrb.mxu2 %v2385_v15  ;;  %v2383_v32 = vld [vmem:[%s4583_s5 + $0x50] sm:$0xff] }
 0x18f   : > { %v3998_v17 = vpop.f32.mrf.mxu0  ;;  %v952_v43 = vmax.f32 %v891_v63, 0.0  ;;  %v824_v35 = vmul.f32 %v3836_v18, %v802_v49  ;;  %v1077_v48 = vadd.f32 %v3564_v19, %v3572_v21  ;;  %v788_v11 = vmax.f32 %v769_v57, 0.0 }
 0x190   : > { %4629 = vst [vmem:[#allocation39_spill] sm:$0xff] %v3984_v5  ;;  %v1511_v9 = vmax.f32 %v1490_v58, 0.0  ;;  %2900 = vmatmul.msk.f32.gmra.mxu1 %vm670_vm0, %v3748_v34  ;;  %v1124_v34 = vadd.f32 %v3774_v7, %v3793_v31  ;;  %v1180_v41 = vmul.f32 %v3859_v56, %v1157_v0  ;;  %v966_v4 = vmin.f32 %v950_v27, 6.0  ;;  %2424 = vmatpush.msrb.mxu2 %v2384_v39  ;;  %v4634_v39 = vld [vmem:[#allocation34_spill] sm:$0xff] }
 0x191   : > { %v4033_v24 = vmul.f32 %v3864_v62, %v1152_v14  ;;  %v973_v19 = vmin.f32 %v957_v55, 6.0  ;;  %v941_v28 = vadd.f32 %v3654_v53, %v3793_v31  ;;  %v1010_v8 = vadd.f32 %v994_v22, %v824_v35  ;;  %v4632_v55 = vld [vmem:[#allocation3_spill] sm:$0xff] }
 0x192   : > { %v1527_v10 = vmin.f32 %v1511_v9, 6.0  ;;  %v1143_v58 = vmax.f32 %v1124_v34, 0.0  ;;  %v1366_v2 = vmul.f32 %v3872_v29, %v1343_v12  ;;  %v1329_v9 = vmax.f32 %v1310_v25, 0.0  ;;  %2425 = vmatpush.msrb.mxu2 %v2383_v32 }
 0x193   : > { %v4018_v7 = vpop.f32.mrf.mxu2  ;;  %v968_v14 = vmin.f32 %v952_v43, 6.0  ;;  %v1138_v57 = vmax.f32 %v1077_v48, 0.0  ;;  %v804_v26 = vmin.f32 %v788_v11, 6.0  ;;  %v772_v53 = vadd.f32 %v3636_v60, %v3793_v31  ;;  %v2382_v60 = vld [vmem:[%s4583_s5 + $0x48] sm:$0xff] }
 0x194   : > { %v1550_v61 = vmul.f32 %v3897_v50, %v1527_v10  ;;  %v1196_v0 = vadd.f32 %v1180_v41, %v1010_v8  ;;  %v1159_v34 = vmin.f32 %v1143_v58, 6.0  ;;  %v4631_v10 = vld [vmem:[#allocation26_spill] sm:$0xff]  ;;  %v1080_v36 = vadd.f32 %v4632_v55, %v3572_v21  ;;  %2426 = vmatpush.msrb.mxu2 %v2382_v60  ;;  %v4637_v55 = vld [vmem:[#allocation8_spill] sm:$0xff] }
 0x195   : > { %v1492_v1 = vpop.f32.mrf.mxu1  ;;  %v1127_v27 = vadd.f32 %v4631_v10, %v3793_v31  ;;  %v959_v12 = vmax.f32 %v941_v28, 0.0  ;;  %v1313_v43 = vadd.f32 %v3893_v3, %v3793_v31  ;;  %v991_v11 = vmul.f32 %v3624_v45, %v968_v14 }
 0x196   : > { %v4029_v46 = vadd.f32 %v1550_v61, %v1380_v16  ;;  %v1493_v51 = vadd.f32 %v1492_v1, %v3793_v31  ;;  %v996_v16 = vmul.f32 %v3831_v47, %v973_v19  ;;  %v1382_v25 = vadd.f32 %v1366_v2, %v1196_v0  ;;  %v4076_v14 = vpop.f32.mrf.mxu3 }
 0x197   : > { %v4043_v49 = vpop.f32.mrf.mxu0  ;;  %v1345_v61 = vmin.f32 %v1329_v9, 6.0  ;;  %v1154_v1 = vmin.f32 %v1138_v57, 6.0  ;;  %v826_v15 = vmul.f32 %v3836_v18, %v804_v26  ;;  %v790_v41 = vmax.f32 %v772_v53, 0.0  ;;  %v4635_v9 = vld [vmem:[#allocation10_spill] sm:$0xff] }
 0x198   : > { %4630 = vst [vmem:[#allocation40_spill] sm:$0xff] %v4029_v46  ;;  %v1513_v63 = vmax.f32 %v1493_v51, 0.0  ;;  %2901 = vmatmul.msk.f32.gmra.mxu1 %vm670_vm0, %v3764_v13  ;;  %v989_v13 = vmul.f32 %v3624_v45, %v966_v4  ;;  %v2381_v51 = vld [vmem:[%s4583_s5 + $0x40] sm:$0xff]  ;;  %v1182_v4 = vmul.f32 %v3859_v56, %v1159_v34  ;;  %v1145_v19 = vmax.f32 %v1127_v27, 0.0  ;;  %v2380_v57 = vld [vmem:[%s4583_s5 + $0x38] sm:$0xff]  ;;  %v4636_v34 = vld [vmem:[#allocation24_spill] sm:$0xff] }
 0x199   : > { %2427 = vmatpush.msrb.mxu2 %v2381_v51  ;;  %v1140_v45 = vmax.f32 %v1080_v36, 0.0  ;;  %v975_v2 = vmin.f32 %v959_v12, 6.0  ;;  %v1012_v26 = vadd.f32 %v996_v16, %v826_v15  ;;  %v1368_v53 = vmul.f32 %v3872_v29, %v1345_v61  ;;  %v2379_v16 = vld [vmem:[%s4583_s5 + $0x30] sm:$0xff] }
 0x19a   : > { %v1529_v22 = vmin.f32 %v1513_v63, 6.0  ;;  %v1005_v8 = vadd.f32 %v989_v13, %v4634_v39  ;;  %v944_v63 = vadd.f32 %v4635_v9, %v3793_v31  ;;  %v1331_v32 = vmax.f32 %v1313_v43, 0.0 }
 0x19b   : > { %v4062_v48 = vpop.f32.mrf.mxu2  ;;  %2428 = vmatpush.msrb.mxu2 %v2380_v57  ;;  %v1007_v27 = vadd.f32 %v991_v11, %v3910_v42  ;;  %v806_v13 = vmin.f32 %v790_v41, 6.0  ;;  %v775_v36 = vadd.f32 %v4637_v55, %v3793_v31  ;;  %v1198_v12 = vadd.f32 %v1182_v4, %v1012_v26  ;;  %v4639_v42 = vld [vmem:[#allocation4_spill] sm:$0xff]  ;;  %v2377_v57 = vld [vmem:[%s4583_s5 + $0x20] sm:$0xff] }
 0x19c   : > { %v1552_v35 = vmul.f32 %v3897_v50, %v1529_v22  ;;  %v1177_v22 = vmul.f32 %v3864_v62, %v1154_v1  ;;  %v1161_v60 = vmin.f32 %v1145_v19, 6.0  ;;  %v1083_v11 = vadd.f32 %v4639_v42, %v3572_v21  ;;  %v2378_v41 = vld [vmem:[%s4583_s5 + $0x28] sm:$0xff] }
 0x19d   : > { %v1495_v58 = vpop.f32.mrf.mxu1  ;;  %2429 = vmatpush.msrb.mxu2 %v2379_v16  ;;  %v998_v1 = vmul.f32 %v3831_v47, %v975_v2  ;;  %v961_v15 = vmax.f32 %v944_v63, 0.0  ;;  %v1347_v51 = vmin.f32 %v1331_v32, 6.0  ;;  %v1316_v4 = vadd.f32 %v3939_v20, %v3793_v31 }
 0x19e   : > { %v4070_v3 = vadd.f32 %v1552_v35, %v1382_v25  ;;  %v1496_v28 = vadd.f32 %v1495_v58, %v3793_v31  ;;  %v4638_v25 = vld [vmem:[#allocation30_spill] sm:$0xff]  ;;  %v1156_v35 = vmin.f32 %v1140_v45, 6.0  ;;  %v1384_v58 = vadd.f32 %v1368_v53, %v1198_v12  ;;  %v4642_v12 = vld [vmem:[#allocation28_spill] sm:$0xff] }
 0x19f   : > { %v4084_v10 = vpop.f32.mrf.mxu0  ;;  %v1130_v61 = vadd.f32 %v4638_v25, %v3793_v31  ;;  %2430 = vmatpush.msrb.mxu2 %v2378_v41  ;;  %v4107_v39 = vadd.f32 %v4033_v24, %v1005_v8  ;;  %v4109_v45 = vadd.f32 %v1177_v22, %v1007_v27  ;;  %v828_v2 = vmul.f32 %v3836_v18, %v806_v13  ;;  %v2376_v22 = vld [vmem:[%s4583_s5 + $0x18] sm:$0xff]  ;;  %v2375_v41 = vld [vmem:[%s4583_s5 + $0x10] sm:$0xff] }
 0x1a0   : > { %4633 = vst [vmem:[#allocation26_spill] sm:$0xff] %v4070_v3  ;;  %v1515_v0 = vmax.f32 %v1496_v28, 0.0  ;;  %2902 = vmatmul.msk.f32.gmra.mxu1 %vm670_vm0, %v4636_v34  ;;  %v792_v9 = vmax.f32 %v775_v36, 0.0  ;;  %v1184_v20 = vmul.f32 %v3859_v56, %v1161_v60  ;;  %v1179_v24 = vmul.f32 %v3864_v62, %v1156_v35  ;;  %v4641_v34 = vld [vmem:[#allocation13_spill] sm:$0xff] }
 0x1a1   : > { %v1147_v26 = vmax.f32 %v1130_v61, 0.0  ;;  %2431 = vmatpush.msrb.mxu2 %v2377_v57  ;;  %v1142_v8 = vmax.f32 %v1083_v11, 0.0  ;;  %v1254_v27 = vadd.f32 %v4641_v34, %v3572_v21  ;;  %v977_v13 = vmin.f32 %v961_v15, 6.0  ;;  %v4643_v61 = vld [vmem:[#allocation6_spill] sm:$0xff]  ;;  %v4644_v35 = vld [vmem:[#allocation9_spill] sm:$0xff]  ;;  %v4137_v15 = vpop.f32.mrf.mxu3  ;;  %v4648_v57 = vld [vmem:[#allocation12_spill] sm:$0xff] }
 0x1a2   : > { %v1531_v43 = vmin.f32 %v1515_v0, 6.0  ;;  %v1014_v0 = vadd.f32 %v998_v1, %v828_v2  ;;  %v1370_v55 = vmul.f32 %v3872_v29, %v1347_v51  ;;  %v1333_v36 = vmax.f32 %v1316_v4, 0.0  ;;  %v4645_v11 = vld [vmem:[#allocation33_spill] sm:$0xff]  ;;  %4646 = vst [vmem:[#allocation34_spill] sm:$0xff] %v4137_v15  ;;  %v4649_v34 = vld [vmem:[#allocation16_spill] sm:$0xff] }
 0x1a3   : > { %v4104_v28 = vpop.f32.mrf.mxu2  ;;  %2432 = vmatpush.msrb.mxu2 %v2376_v22  ;;  %v808_v25 = vmin.f32 %v792_v9, 6.0  ;;  %v1089_v42 = vadd.f32 %v4644_v35, %v3572_v21  ;;  %v4135_v1 = vperm.slane %v4645_v11, 0  ;;  %v1158_v9 = vmin.f32 %v1142_v8, 6.0 }
 0x1a4   : > { %v1554_v19 = vmul.f32 %v3897_v50, %v1531_v43  ;;  %v1086_v43 = vadd.f32 %v4643_v61, %v3572_v21  ;;  %v1200_v4 = vadd.f32 %v1184_v20, %v1014_v0  ;;  %v1257_v22 = vadd.f32 %v4649_v34, %v3572_v21  ;;  %v2374_v20 = vld [vmem:[%s4583_s5 + $0x8] sm:$0xff] }
 0x1a5   : > { %v1498_v63 = vpop.f32.mrf.mxu1  ;;  %2433 = vmatpush.msrb.mxu2 %v2375_v41  ;;  %v1349_v35 = vmin.f32 %v1333_v36, 6.0  ;;  %v830_v0 = vmul.f32 %v3836_v18, %v808_v25  ;;  %v4652_v25 = vld [vmem:[#allocation15_spill] sm:$0xff]  ;;  %v1818_v38 = vadd.f32 %v3962_v23, %v3572_v21 }
 0x1a6   : > { %v4116_v53 = vadd.f32 %v1554_v19, %v1384_v58  ;;  %v1499_v32 = vadd.f32 %v1498_v63, %v3793_v31  ;;  %v4647_v58 = vld [vmem:[#allocation36_spill] sm:$0xff]  ;;  %v1163_v19 = vmin.f32 %v1147_v26, 6.0  ;;  %v1318_v63 = vmax.f32 %v1254_v27, 0.0  ;;  %v4650_v26 = vld [vmem:[#allocation5_spill] sm:$0xff] }
 0x1a7   : > { %v4128_v60 = vpop.f32.mrf.mxu0  ;;  %v4143_v51 = vperm.slane %v4647_v58, 0  ;;  %v1386_v61 = vadd.f32 %v1370_v55, %v1200_v4  ;;  %v4157_v8 = vadd.f32 %v1179_v24, %v4650_v26  ;;  %v1144_v27 = vmax.f32 %v1086_v43, 0.0  ;;  %2434 = vmatpush.msrb.mxu2 %v2374_v20  ;;  %v2373_v24 = vld [vmem:[%s4583_s5] sm:$0xff]  ;;  %v4655_v20 = vld [vmem:[#allocation17_spill] sm:$0xff] }
 0x1a8   : > { %4640 = vst [vmem:[#allocation3_spill] sm:$0xff] %v4116_v53  ;;  %v1517_v16 = vmax.f32 %v1499_v32, 0.0  ;;  %2903 = vmatmul.msk.f32.gmra.mxu1 %vm670_vm0, %v4642_v12  ;;  %v1440_v32 = vadd.f32 %v4648_v57, %v3572_v21  ;;  %v1000_v12 = vmul.f32 %v3831_v47, %v977_v13  ;;  %v1186_v47 = vmul.f32 %v3859_v56, %v1163_v19  ;;  %v2390_v56 = vld [vmem:[%s4583_s5 + $0x88] sm:$0xff] }
 0x1a9   : > { %v1626_v13 = vadd.f32 %v3916_v52, %v3572_v21  ;;  %v1334_v4 = vmin.f32 %v1318_v63, 6.0  ;;  %v1320_v18 = vmax.f32 %v1257_v22, 0.0  ;;  %v1443_v43 = vadd.f32 %v4652_v25, %v3572_v21  ;;  %2435 = vmatpush.msrb.mxu2 %v2373_v24  ;;  %2475 = vmatpush.msrb.mxu3 %v2390_v56 }
 0x1aa   : > { %v1533_v2 = vmin.f32 %v1517_v16, 6.0  ;;  %v1146_v16 = vmax.f32 %v1089_v42, 0.0  ;;  %v1016_v52 = vadd.f32 %v1000_v12, %v830_v0  ;;  %v4653_v42 = vld [vmem:[#allocation18_spill] sm:$0xff]  ;;  %v1372_v57 = vmul.f32 %v3872_v29, %v1349_v35  ;;  %v4187_v29 = vld [vmem:[%s4581_s3 + $0xa] sm:$0x3]  ;;  %v4656_v35 = vld [vmem:[#allocation37_spill] sm:$0xff] }
 0x1ab   : > { %v4151_v58 = vpop.f32.mrf.mxu2  ;;  %v1260_v19 = vadd.f32 %v4653_v42, %v3572_v21  ;;  %v1160_v22 = vmin.f32 %v1144_v27, 6.0  ;;  %v1446_v26 = vadd.f32 %v4655_v20, %v3572_v21  ;;  %v1690_v0 = vmax.f32 %v1626_v13, 0.0  ;;  %v4659_v20 = vld [vmem:[#allocation7_spill] sm:$0xff] }
 0x1ac   : > { %v1556_v11 = vmul.f32 %v3897_v50, %v1533_v2  ;;  %v1504_v2 = vmax.f32 %v1440_v32, 0.0  ;;  %v1181_v32 = vmul.f32 %v3864_v62, %v1158_v9  ;;  %v1202_v12 = vadd.f32 %v1186_v47, %v1016_v52  ;;  %v4658_v47 = vld [vmem:[#allocation20_spill] sm:$0xff] }
 0x1ad   : > { %v1501_v41 = vpop.f32.mrf.mxu1  ;;  %v1357_v24 = vmul.f32 %v4135_v1, %v1334_v4  ;;  %v1336_v9 = vmin.f32 %v1320_v18, 6.0  ;;  %v1506_v27 = vmax.f32 %v1443_v43, 0.0  ;;  %v1322_v56 = vmax.f32 %v1260_v19, 0.0 }
 0x1ae   : > { %v4163_v55 = vadd.f32 %v1556_v11, %v1386_v61  ;;  %v1502_v36 = vadd.f32 %v1501_v41, %v3793_v31  ;;  %v4654_v61 = vld [vmem:[#allocation32_spill] sm:$0xff]  ;;  %v1162_v11 = vmin.f32 %v1146_v16, 6.0  ;;  %v1812_v41 = vadd.f32 %v4656_v35, %v3572_v21  ;;  %v4192_v16 = vpop.f32.mrf.mxu3 }
 0x1af   : > { %v4179_v63 = vpop.f32.mrf.mxu0  ;;  %v1520_v25 = vmin.f32 %v1504_v2, 6.0  ;;  %4657 = vst [vmem:[#allocation24_spill] sm:$0xff] %v4192_v16  ;;  %v1263_v13 = vadd.f32 %v4658_v47, %v3572_v21  ;;  %v1388_v52 = vadd.f32 %v1372_v57, %v1202_v12  ;;  %v1508_v4 = vmax.f32 %v1446_v26, 0.0  ;;  %v4218_v26 = vld [vmem:[%s4581_s3 + $0xc] sm:$0x3] }
 0x1b0   : > { %4651 = vst [vmem:[#allocation10_spill] sm:$0xff] %v4163_v55  ;;  %v1519_v34 = vmax.f32 %v1502_v36, 0.0  ;;  %2904 = vmatmul.msk.f32.gmra.mxu1 %vm670_vm0, %v4654_v61  ;;  %v4200_v55 = vadd.f32 %v1181_v32, %v4659_v20  ;;  %v4204_v2 = vperm.slane %v4187_v29, 0  ;;  %v1706_v43 = vmin.f32 %v1690_v0, 6.0 }
 0x1b1   : > { %v1876_v19 = vmax.f32 %v1812_v41, 0.0  ;;  %v1629_v57 = vadd.f32 %v3948_v37, %v3572_v21  ;;  %v1373_v32 = vadd.f32 %v1357_v24, %v3970_v33  ;;  %v1543_v35 = vmul.f32 %v4143_v51, %v1520_v25  ;;  %v4661_v37 = vld [vmem:[#allocation19_spill] sm:$0xff] }
 0x1b2   : > { %v1535_v36 = vmin.f32 %v1519_v34, 6.0  ;;  %v1183_v34 = vmul.f32 %v3864_v62, %v1160_v22  ;;  %v1522_v22 = vmin.f32 %v1506_v27, 6.0  ;;  %v1359_v0 = vmul.f32 %v4135_v1, %v1336_v9 }
 0x1b3   : > { %v4197_v61 = vpop.f32.mrf.mxu2  ;;  %v1338_v41 = vmin.f32 %v1322_v56, 6.0  ;;  %v1449_v47 = vadd.f32 %v4661_v37, %v3572_v21  ;;  %v1524_v33 = vmin.f32 %v1508_v4, 6.0  ;;  %v1729_v25 = vmul.f32 %v4204_v2, %v1706_v43  ;;  %v4242_v43 = vld [vmem:[%s4581_s3 + $0xe] sm:$0x3] }
 0x1b4   : > { %v1558_v42 = vmul.f32 %v3897_v50, %v1535_v36  ;;  %v1185_v50 = vmul.f32 %v3864_v62, %v1162_v11  ;;  %v1324_v36 = vmax.f32 %v1263_v13, 0.0  ;;  %v1815_v11 = vadd.f32 %v3933_v59, %v3572_v21  ;;  %v4663_v13 = vld [vmem:[#allocation14_spill] sm:$0xff] }
 0x1b5   : > { %v4206_v18 = vpop.f32.mrf.mxu1  ;;  %v1892_v27 = vmin.f32 %v1876_v19, 6.0  ;;  %v4231_v9 = vperm.slane %v4218_v26, 0  ;;  %v1692_v56 = vmax.f32 %v1629_v57, 0.0  ;;  %v1559_v37 = vadd.f32 %v1543_v35, %v1373_v32  ;;  %v4247_v19 = vld [vmem:[%s4581_s3 + $0x10] sm:$0x3] }
 0x1b6   : > { %v4210_v12 = vadd.f32 %v1558_v42, %v1388_v52  ;;  %v4662_v42 = vld [vmem:[#allocation11_spill] sm:$0xff]  ;;  %v4234_v20 = vadd.f32 %v1185_v50, %v4663_v13  ;;  %v1375_v4 = vadd.f32 %v1359_v0, %v4009_v44  ;;  %v1361_v59 = vmul.f32 %v4135_v1, %v1338_v41  ;;  %v4664_v50 = vld [vmem:[#allocation21_spill] sm:$0xff]  ;;  %v4252_v35 = vpop.f32.mrf.mxu3 }
 0x1b7   : > { %v2183_v52 = vpop.f32.mrf.mxu0  ;;  %v4224_v62 = vadd.f32 %v1183_v34, %v4662_v42  ;;  %v1545_v34 = vmul.f32 %v4143_v51, %v1522_v22  ;;  %v1547_v57 = vmul.f32 %v4143_v51, %v1524_v33  ;;  %v1452_v44 = vadd.f32 %v4664_v50, %v3572_v21  ;;  %4665 = vst [vmem:[#allocation30_spill] sm:$0xff] %v4252_v35 }
 0x1b8   : > { %4660 = vst [vmem:[#allocation8_spill] sm:$0xff] %v4210_v12  ;;  %v2184_v24 = vadd.f32 %v2183_v52, %v3572_v21  ;;  %v1340_v12 = vmin.f32 %v1324_v36, 6.0  ;;  %v1510_v52 = vmax.f32 %v1449_v47, 0.0  ;;  %v1878_v32 = vmax.f32 %v1815_v11, 0.0 }
 0x1b9   : > { %v1745_v41 = vadd.f32 %v1729_v25, %v1559_v37  ;;  %v1915_v36 = vmul.f32 %v4231_v9, %v1892_v27  ;;  %v1708_v47 = vmin.f32 %v1692_v56, 6.0  ;;  %v4261_v33 = vperm.slane %v4242_v43, 0  ;;  %v4666_v25 = vld [vmem:[#allocation22_spill] sm:$0xff] }
 0x1ba   : > { %v2248_v42 = vmax.f32 %v2184_v24, 0.0  ;;  %v1632_v24 = vadd.f32 %v3979_v40, %v3572_v21  ;;  %v4264_v11 = vperm.slane %v4247_v19, 0  ;;  %v1377_v50 = vadd.f32 %v1361_v59, %v4107_v39  ;;  %v4277_v39 = vld [vmem:[%s4582_s4] sm:$0x3] }
 0x1bb   : > { %v1997_v53 = vpop.f32.mrf.mxu2  ;;  %v1526_v35 = vmin.f32 %v1510_v52, 6.0  ;;  %v1266_v27 = vadd.f32 %v4666_v25, %v3572_v21  ;;  %v1561_v37 = vadd.f32 %v1545_v34, %v1375_v4  ;;  %v1894_v46 = vmin.f32 %v1878_v32, 6.0 }
 0x1bc   : > { %v1998_v22 = vadd.f32 %v1997_v53, %v3572_v21  ;;  %v2264_v3 = vmin.f32 %v2248_v42, 6.0  ;;  %v1363_v53 = vmul.f32 %v4135_v1, %v1340_v12  ;;  %v1512_v16 = vmax.f32 %v1452_v44, 0.0 }
 0x1bd   : > { %v4255_v0 = vpop.f32.mrf.mxu1  ;;  %v1731_v42 = vmul.f32 %v4204_v2, %v1708_v47  ;;  %v1694_v5 = vmax.f32 %v1632_v24, 0.0  ;;  %v1931_v12 = vadd.f32 %v1915_v36, %v1745_v41  ;;  %v1563_v52 = vadd.f32 %v1547_v57, %v1377_v50 }
 0x1be   : > { %v2062_v13 = vmax.f32 %v1998_v22, 0.0  ;;  %v2287_v34 = vmul.f32 %v4264_v11, %v2264_v3  ;;  %v1379_v44 = vadd.f32 %v1363_v53, %v4109_v45  ;;  %v1549_v32 = vmul.f32 %v4143_v51, %v1526_v35  ;;  %v4292_v35 = vpop.f32.mrf.mxu3 }
 0x1bf   : > { %v2186_v56 = vpop.f32.mrf.mxu0  ;;  %v1326_v47 = vmax.f32 %v1266_v27, 0.0  ;;  %v1917_v23 = vmul.f32 %v4231_v9, %v1894_v46  ;;  %v4285_v25 = vperm.slane %v4277_v39, 0  ;;  %v1710_v3 = vmin.f32 %v1694_v5, 6.0  ;;  %4667 = vst [vmem:[#allocation4_spill] sm:$0xff] %v4292_v35 }
 0x1c0   : > { %v2078_v40 = vmin.f32 %v2062_v13, 6.0  ;;  %v2187_v22 = vadd.f32 %v2186_v56, %v3572_v21  ;;  %v1747_v56 = vadd.f32 %v1731_v42, %v1561_v37  ;;  %v1635_v45 = vadd.f32 %v4018_v7, %v3572_v21 }
 0x1c1   : > { %v1528_v57 = vmin.f32 %v1512_v16, 6.0  ;;  %v1342_v27 = vmin.f32 %v1326_v47, 6.0  ;;  %v1821_v5 = vadd.f32 %v3998_v17, %v3572_v21  ;;  %v1565_v37 = vadd.f32 %v1549_v32, %v1379_v44 }
 0x1c2   : > { %v2101_v59 = vmul.f32 %v4261_v33, %v2078_v40  ;;  %v2250_v4 = vmax.f32 %v2187_v22, 0.0  ;;  %v1880_v40 = vmax.f32 %v1818_v38, 0.0  ;;  %v4668_v22 = vld [vmem:[#allocation25_spill] sm:$0xff] }
 0x1c3   : > { %v2000_v24 = vpop.f32.mrf.mxu2  ;;  %v1365_v17 = vmul.f32 %v4135_v1, %v1342_v27  ;;  %v1882_v32 = vmax.f32 %v1821_v5, 0.0  ;;  %v4314_v27 = vperm.slane %v4187_v29, 1 }
 0x1c4   : > { %v2117_v13 = vadd.f32 %v2101_v59, %v1931_v12  ;;  %v2001_v41 = vadd.f32 %v2000_v24, %v3572_v21  ;;  %v2266_v46 = vmin.f32 %v2250_v4, 6.0  ;;  %v1269_v12 = vadd.f32 %v4668_v22, %v3572_v21  ;;  %v4669_v59 = vld [vmem:[#allocation23_spill] sm:$0xff] }
 0x1c5   : > { %v4288_v36 = vpop.f32.mrf.mxu1  ;;  %v1455_v24 = vadd.f32 %v4669_v59, %v3572_v21  ;;  %v1733_v4 = vmul.f32 %v4204_v2, %v1710_v3  ;;  %v1896_v47 = vmin.f32 %v1880_v40, 6.0 }
 0x1c6   : > { %v2303_v50 = vadd.f32 %v2287_v34, %v2117_v13  ;;  %v2064_v53 = vmax.f32 %v2001_v41, 0.0  ;;  %v1933_v34 = vadd.f32 %v1917_v23, %v1747_v56  ;;  %v1696_v13 = vmax.f32 %v1635_v45, 0.0  ;;  %v4322_v29 = vpop.f32.mrf.mxu3 }
 0x1c7   : > { %v2189_v38 = vpop.f32.mrf.mxu0  ;;  %v2289_v59 = vmul.f32 %v4264_v11, %v2266_v46  ;;  %v1328_v15 = vmax.f32 %v1269_v12, 0.0  ;;  %v1514_v44 = vmax.f32 %v1455_v24, 0.0  ;;  %v1749_v40 = vadd.f32 %v1733_v4, %v1563_v52 }
 0x1c8   : > { %v2325_v7 = vadd.f32 %v4285_v25, %v2303_v50  ;;  %v2080_v16 = vmin.f32 %v2064_v53, 6.0  ;;  %v2190_v42 = vadd.f32 %v2189_v38, %v3572_v21  ;;  %v1551_v53 = vmul.f32 %v4143_v51, %v1528_v57  ;;  %v2389_v57 = vld [vmem:[%s4583_s5 + $0x80] sm:$0xff] }
 0x1c9   : > { %v1919_v45 = vmul.f32 %v4231_v9, %v1896_v47  ;;  %v1638_v46 = vadd.f32 %v4062_v48, %v3572_v21  ;;  %v1344_v52 = vmin.f32 %v1328_v15, 6.0  ;;  %2476 = vmatpush.msrb.mxu3 %v2389_v57  ;;  %v1824_v48 = vadd.f32 %v4043_v49, %v3572_v21 }
 0x1ca   : > { %v2341_v41 = vmax.f32 %v2325_v7, 0.0  ;;  %v2103_v22 = vmul.f32 %v4261_v33, %v2080_v16  ;;  %v2252_v35 = vmax.f32 %v2190_v42, 0.0  ;;  %v1712_v7 = vmin.f32 %v1696_v13, 6.0 }
 0x1cb   : > { %v2003_v50 = vpop.f32.mrf.mxu2  ;;  %v1381_v16 = vadd.f32 %v1365_v17, %v4157_v8  ;;  %v1530_v42 = vmin.f32 %v1514_v44, 6.0  ;;  %v1698_v8 = vmax.f32 %v1638_v46, 0.0 }
 0x1cc   : > { %v2357_v38 = vmin.f32 %v2341_v41, 6.0  ;;  %v2119_v23 = vadd.f32 %v2103_v22, %v1933_v34  ;;  %v2004_v56 = vadd.f32 %v2003_v50, %v3572_v21  ;;  %v2268_v5 = vmin.f32 %v2252_v35, 6.0  ;;  %v4670_v41 = vld [vmem:[#allocation27_spill] sm:$0xff] }
 0x1cd   : > { %v4308_v3 = vpop.f32.mrf.mxu1  ;;  %v1898_v34 = vmin.f32 %v1882_v32, 6.0  ;;  %v1458_v22 = vadd.f32 %v4670_v41, %v3572_v21  ;;  %v1735_v15 = vmul.f32 %v4204_v2, %v1712_v7  ;;  %v1567_v50 = vadd.f32 %v1551_v53, %v1381_v16  ;;  %v4672_v41 = vld [vmem:[#allocation35_spill] sm:$0xff] }
 0x1ce   : > { %v2305_v12 = vadd.f32 %v2289_v59, %v2119_v23  ;;  %v2066_v24 = vmax.f32 %v2004_v56, 0.0  ;;  %2436 = vmatmul.f32.vlgmr.msrb.gmra.mxu2 %v2357_v38  ;;  %v1935_v59 = vadd.f32 %v1919_v45, %v1749_v40  ;;  %v2291_v44 = vmul.f32 %v4264_v11, %v2268_v5  ;;  %v4671_v56 = vld [vmem:[#allocation29_spill] sm:$0xff] }
 0x1cf   : > { %v2192_v4 = vpop.f32.mrf.mxu0  ;;  %v1367_v38 = vmul.f32 %v4135_v1, %v1344_v52  ;;  %v1553_v23 = vmul.f32 %v4143_v51, %v1530_v42  ;;  %v1921_v40 = vmul.f32 %v4231_v9, %v1898_v34  ;;  %v1884_v45 = vmax.f32 %v1824_v48, 0.0  ;;  %v4673_v48 = vld [vmem:[#allocation31_spill] sm:$0xff] }
 0x1d0   : > { %v2082_v47 = vmin.f32 %v2066_v24, 6.0  ;;  %v2193_v35 = vadd.f32 %v2192_v4, %v3572_v21  ;;  %v2327_v13 = vadd.f32 %v4285_v25, %v2305_v12  ;;  %v1272_v12 = vadd.f32 %v4671_v56, %v3572_v21 }
 0x1d1   : > { %v1751_v5 = vadd.f32 %v1735_v15, %v1565_v37  ;;  %v1714_v4 = vmin.f32 %v1698_v8, 6.0  ;;  %v1641_v53 = vadd.f32 %v4104_v28, %v3572_v21  ;;  %v1516_v52 = vmax.f32 %v1458_v22, 0.0 }
 0x1d2   : > { %v2105_v17 = vmul.f32 %v4261_v33, %v2082_v47  ;;  %v2254_v32 = vmax.f32 %v2193_v35, 0.0  ;;  %v2343_v49 = vmax.f32 %v2327_v13, 0.0  ;;  %v1330_v13 = vmax.f32 %v1272_v12, 0.0  ;;  %v4351_v12 = vpop.f32.mrf.mxu3 }
 0x1d3   : > { %v2006_v24 = vpop.f32.mrf.mxu2  ;;  %v1275_v34 = vadd.f32 %v4672_v41, %v3572_v21  ;;  %v1900_v15 = vmin.f32 %v1884_v45, 6.0  ;;  %v1700_v56 = vmax.f32 %v1641_v53, 0.0 }
 0x1d4   : > { %v2121_v7 = vadd.f32 %v2105_v17, %v1935_v59  ;;  %v2007_v46 = vadd.f32 %v2006_v24, %v3572_v21  ;;  %v2359_v16 = vmin.f32 %v2343_v49, 6.0  ;;  %v2270_v35 = vmin.f32 %v2254_v32, 6.0 }
 0x1d5   : > { %v4337_v57 = vpop.f32.mrf.mxu1  ;;  %v1461_v59 = vadd.f32 %v4673_v48, %v3572_v21  ;;  %v1827_v17 = vadd.f32 %v4084_v10, %v3572_v21  ;;  %v1937_v32 = vadd.f32 %v1921_v40, %v1751_v5  ;;  %v1737_v49 = vmul.f32 %v4204_v2, %v1714_v4 }
 0x1d6   : > { %v2307_v42 = vadd.f32 %v2291_v44, %v2121_v7  ;;  %v2068_v47 = vmax.f32 %v2007_v46, 0.0  ;;  %2439 = vmatmul.f32.gmra.mxu2 %v2359_v16  ;;  %v1383_v44 = vadd.f32 %v1367_v38, %v4200_v55  ;;  %v2293_v10 = vmul.f32 %v4264_v11, %v2270_v35 }
 0x1d7   : > { %v2195_v37 = vpop.f32.mrf.mxu0  ;;  %v1346_v45 = vmin.f32 %v1330_v13, 6.0  ;;  %v1532_v16 = vmin.f32 %v1516_v52, 6.0  ;;  %v1886_v41 = vmax.f32 %v1827_v17, 0.0  ;;  %v1923_v55 = vmul.f32 %v4231_v9, %v1900_v15 }
 0x1d8   : > { %v2084_v8 = vmin.f32 %v2068_v47, 6.0  ;;  %v2196_v28 = vadd.f32 %v2195_v37, %v3572_v21  ;;  %v2329_v22 = vadd.f32 %v4285_v25, %v2307_v42  ;;  %v1332_v47 = vmax.f32 %v1275_v34, 0.0 }
 0x1d9   : > { %v1518_v42 = vmax.f32 %v1461_v59, 0.0  ;;  %v1753_v4 = vadd.f32 %v1737_v49, %v1567_v50  ;;  %v1716_v53 = vmin.f32 %v1700_v56, 6.0  ;;  %v1644_v35 = vadd.f32 %v4151_v58, %v3572_v21 }
 0x1da   : > { %v2107_v24 = vmul.f32 %v4261_v33, %v2084_v8  ;;  %v2256_v7 = vmax.f32 %v2196_v28, 0.0  ;;  %v2345_v46 = vmax.f32 %v2329_v22, 0.0  ;;  %v1569_v8 = vadd.f32 %v1553_v23, %v1383_v44 }
 0x1db   : > { %v2009_v48 = vpop.f32.mrf.mxu2  ;;  %v1369_v17 = vmul.f32 %v4135_v1, %v1346_v45  ;;  %v1348_v59 = vmin.f32 %v1332_v47, 6.0  ;;  %v1667_v15 = vadd.f32 %v3974_v6, %v3793_v31  ;;  %v1902_v28 = vmin.f32 %v1886_v41, 6.0 }
 0x1dc   : > { %v2123_v38 = vadd.f32 %v2107_v24, %v1937_v32  ;;  %v2010_v40 = vadd.f32 %v2009_v48, %v3572_v21  ;;  %v2361_v37 = vmin.f32 %v2345_v46, 6.0  ;;  %v2272_v34 = vmin.f32 %v2256_v7, 6.0 }
 0x1dd   : > { %v4357_v5 = vpop.f32.mrf.mxu1  ;;  %v1830_v50 = vadd.f32 %v4128_v60, %v3572_v21  ;;  %v1534_v44 = vmin.f32 %v1518_v42, 6.0  ;;  %v1939_v49 = vadd.f32 %v1923_v55, %v1753_v4  ;;  %v1739_v56 = vmul.f32 %v4204_v2, %v1716_v53 }
 0x1de   : > { %v2309_v13 = vadd.f32 %v2293_v10, %v2123_v38  ;;  %v2070_v52 = vmax.f32 %v2010_v40, 0.0  ;;  %2442 = vmatmul.f32.gmra.mxu2 %v2361_v37  ;;  %v1702_v24 = vmax.f32 %v1644_v35, 0.0  ;;  %v2295_v6 = vmul.f32 %v4264_v11, %v2272_v34  ;;  %v4375_v38 = vpop.f32.mrf.mxu3 }
 0x1df   : > { %v2198_v22 = vpop.f32.mrf.mxu0  ;;  %v1385_v45 = vadd.f32 %v1369_v17, %v4224_v62  ;;  %v1555_v60 = vmul.f32 %v4143_v51, %v1532_v16  ;;  %v1371_v47 = vmul.f32 %v4135_v1, %v1348_v59  ;;  %v1691_v41 = vmax.f32 %v1667_v15, 0.0 }
 0x1e0   : > { %v2086_v32 = vmin.f32 %v2070_v52, 6.0  ;;  %v2199_v58 = vadd.f32 %v2198_v22, %v3572_v21  ;;  %v2331_v23 = vadd.f32 %v4285_v25, %v2309_v13  ;;  %v1925_v42 = vmul.f32 %v4231_v9, %v1902_v28 }
 0x1e1   : > { %v1888_v55 = vmax.f32 %v1830_v50, 0.0  ;;  %v1755_v35 = vadd.f32 %v1739_v56, %v1569_v8  ;;  %v1718_v37 = vmin.f32 %v1702_v24, 6.0  ;;  %v1647_v62 = vadd.f32 %v4197_v61, %v3572_v21 }
 0x1e2   : > { %v2109_v10 = vmul.f32 %v4261_v33, %v2086_v32  ;;  %v2258_v7 = vmax.f32 %v2199_v58, 0.0  ;;  %v2347_v46 = vmax.f32 %v2331_v23, 0.0  ;;  %v1557_v1 = vmul.f32 %v4143_v51, %v1534_v44 }
 0x1e3   : > { %v2012_v48 = vpop.f32.mrf.mxu2  ;;  %v1387_v17 = vadd.f32 %v1371_v47, %v4234_v20  ;;  %v1707_v59 = vmin.f32 %v1691_v41, 6.0  ;;  %v1670_v15 = vadd.f32 %v4023_v54, %v3793_v31  ;;  %v1833_v28 = vadd.f32 %v4179_v63, %v3572_v21 }
 0x1e4   : > { %v2125_v40 = vadd.f32 %v2109_v10, %v1939_v49  ;;  %v2013_v4 = vadd.f32 %v2012_v48, %v3572_v21  ;;  %v2363_v16 = vmin.f32 %v2347_v46, 6.0  ;;  %v2274_v34 = vmin.f32 %v2258_v7, 6.0 }
 0x1e5   : > { %v4378_v53 = vpop.f32.mrf.mxu1  ;;  %v1853_v61 = vadd.f32 %v4206_v18, %v3793_v31  ;;  %v1941_v32 = vadd.f32 %v1925_v42, %v1755_v35  ;;  %v1741_v20 = vmul.f32 %v4204_v2, %v1718_v37  ;;  %v1904_v58 = vmin.f32 %v1888_v55, 6.0 }
 0x1e6   : > { %v2311_v13 = vadd.f32 %v2295_v6, %v2125_v40  ;;  %v2072_v52 = vmax.f32 %v2013_v4, 0.0  ;;  %2445 = vmatmul.f32.gmra.mxu2 %v2363_v16  ;;  %v1704_v23 = vmax.f32 %v1647_v62, 0.0  ;;  %v2297_v44 = vmul.f32 %v4264_v11, %v2274_v34 }
 0x1e7   : > { %v2201_v8 = vpop.f32.mrf.mxu0  ;;  %v1571_v56 = vadd.f32 %v1555_v60, %v1385_v45  ;;  %v1730_v24 = vmul.f32 %v4314_v27, %v1707_v59  ;;  %v1890_v18 = vmax.f32 %v1833_v28, 0.0  ;;  %v2039_v10 = vadd.f32 %v4351_v12, %v3793_v31  ;;  %v2044_v60 = vpop.f32.mrf.mxu3 }
 0x1e8   : > { %v2088_v22 = vmin.f32 %v2072_v52, 6.0  ;;  %v2202_v51 = vadd.f32 %v2201_v8, %v3572_v21  ;;  %v2333_v50 = vadd.f32 %v4285_v25, %v2311_v13  ;;  %v1693_v7 = vmax.f32 %v1670_v15, 0.0 }
 0x1e9   : > { %v1877_v46 = vmax.f32 %v1853_v61, 0.0  ;;  %v1757_v42 = vadd.f32 %v1741_v20, %v1571_v56  ;;  %v1927_v55 = vmul.f32 %v4231_v9, %v1904_v58  ;;  %v1720_v40 = vmin.f32 %v1704_v23, 6.0 }
 0x1ea   : > { %v2111_v54 = vmul.f32 %v4261_v33, %v2088_v22  ;;  %v2260_v63 = vmax.f32 %v2202_v51, 0.0  ;;  %v2349_v49 = vmax.f32 %v2333_v50, 0.0  ;;  %v1573_v45 = vadd.f32 %v1557_v1, %v1387_v17 }
 0x1eb   : > { %v2015_v6 = vpop.f32.mrf.mxu2  ;;  %v1746_v12 = vadd.f32 %v1730_v24, %v3923_v30  ;;  %v1906_v16 = vmin.f32 %v1890_v18, 6.0  ;;  %v4404_v13 = vperm.slane %v4218_v26, 1  ;;  %v2063_v52 = vmax.f32 %v2039_v10, 0.0 }
 0x1ec   : > { %v2127_v47 = vadd.f32 %v2111_v54, %v1941_v32  ;;  %v2016_v41 = vadd.f32 %v2015_v6, %v3572_v21  ;;  %v2365_v4 = vmin.f32 %v2349_v49, 6.0  ;;  %v2276_v62 = vmin.f32 %v2260_v63, 6.0 }
 0x1ed   : > { %v4399_v48 = vpop.f32.mrf.mxu1  ;;  %v1893_v59 = vmin.f32 %v1877_v46, 6.0  ;;  %v1709_v1 = vmin.f32 %v1693_v7, 6.0  ;;  %v1943_v17 = vadd.f32 %v1927_v55, %v1757_v42  ;;  %v1743_v61 = vmul.f32 %v4204_v2, %v1720_v40 }
 0x1ee   : > { %v2313_v35 = vadd.f32 %v2297_v44, %v2127_v47  ;;  %v2074_v37 = vmax.f32 %v2016_v41, 0.0  ;;  %2448 = vmatmul.f32.gmra.mxu2 %v2365_v4  ;;  %v1856_v30 = vadd.f32 %v4255_v0, %v3793_v31  ;;  %v2299_v26 = vmul.f32 %v4264_v11, %v2276_v62 }
 0x1ef   : > { %v2204_v34 = vpop.f32.mrf.mxu0  ;;  %v1673_v32 = vadd.f32 %v4076_v14, %v3793_v31  ;;  %v2079_v20 = vmin.f32 %v2063_v52, 6.0  ;;  %v4416_v58 = vperm.slane %v4242_v43, 1  ;;  %v2042_v23 = vadd.f32 %v4375_v38, %v3793_v31  ;;  %v2047_v42 = vpop.f32.mrf.mxu3 }
 0x1f0   : > { %v2090_v15 = vmin.f32 %v2074_v37, 6.0  ;;  %v2205_v28 = vadd.f32 %v2204_v34, %v3572_v21  ;;  %v2335_v8 = vadd.f32 %v4285_v25, %v2313_v35  ;;  %v1929_v54 = vmul.f32 %v4231_v9, %v1906_v16 }
 0x1f1   : > { %v1916_v0 = vmul.f32 %v4404_v13, %v1893_v59  ;;  %v1759_v56 = vadd.f32 %v1743_v61, %v1573_v45  ;;  %v1879_v24 = vmax.f32 %v1856_v30, 0.0  ;;  %v1732_v43 = vmul.f32 %v4314_v27, %v1709_v1 }
 0x1f2   : > { %v2113_v22 = vmul.f32 %v4261_v33, %v2090_v15  ;;  %v2262_v51 = vmax.f32 %v2205_v28, 0.0  ;;  %v2351_v50 = vmax.f32 %v2335_v8, 0.0  ;;  %v2102_v38 = vmul.f32 %v4416_v58, %v2079_v20 }
 0x1f3   : > { %v2018_v2 = vpop.f32.mrf.mxu2  ;;  %v2065_v46 = vmax.f32 %v2042_v23, 0.0  ;;  %v4427_v47 = vperm.slane %v4247_v19, 1  ;;  %v1859_v41 = vadd.f32 %v4288_v36, %v3793_v31  ;;  %v1945_v4 = vadd.f32 %v1929_v54, %v1759_v56 }
 0x1f4   : > { %v2129_v44 = vadd.f32 %v2113_v22, %v1943_v17  ;;  %v2019_v63 = vadd.f32 %v2018_v2, %v3572_v21  ;;  %v2367_v18 = vmin.f32 %v2351_v50, 6.0  ;;  %v2278_v7 = vmin.f32 %v2262_v51, 6.0  ;;  %v4675_v51 = vld [vmem:[#allocation38_spill] sm:$0xff] }
 0x1f5   : > { %v2224_v49 = vpop.f32.mrf.mxu1  ;;  %v1695_v21 = vmax.f32 %v1673_v32, 0.0  ;;  %v1932_v45 = vadd.f32 %v1916_v0, %v1746_v12  ;;  %v1895_v35 = vmin.f32 %v1879_v24, 6.0  ;;  %v2045_v62 = vadd.f32 %v2044_v60, %v3793_v31 }
 0x1f6   : > { %v2225_v14 = vadd.f32 %v2224_v49, %v3793_v31  ;;  %v2315_v10 = vadd.f32 %v2299_v26, %v2129_v44  ;;  %v2076_v6 = vmax.f32 %v2019_v63, 0.0  ;;  %2451 = vmatmul.f32.gmra.mxu2 %v2367_v18  ;;  %v2301_v19 = vmul.f32 %v4264_v11, %v2278_v7  ;;  %v4674_v11 = vld [vmem:[#allocation34_spill] sm:$0xff] }
 0x1f7   : > { %v2118_v34 = vadd.f32 %v2102_v38, %v1932_v45  ;;  %v2081_v59 = vmin.f32 %v2065_v46, 6.0  ;;  %v4437_v36 = vperm.slane %v4277_v39, 1  ;;  %v1711_v28 = vmin.f32 %v1695_v21, 6.0 }
 0x1f8   : > { %v2249_v9 = vmax.f32 %v2225_v14, 0.0  ;;  %v2092_v55 = vmin.f32 %v2076_v6, 6.0  ;;  %v2337_v40 = vadd.f32 %v4285_v25, %v2315_v10  ;;  %v1881_v8 = vmax.f32 %v1859_v41, 0.0  ;;  %v2050_v14 = vpop.f32.mrf.mxu3  ;;  %v4676_v41 = vld [vmem:[#allocation39_spill] sm:$0xff] }
 0x1f9   : > { %v1918_v61 = vmul.f32 %v4404_v13, %v1895_v35  ;;  %v1676_v30 = vadd.f32 %v4674_v11, %v3793_v31  ;;  %v2067_v22 = vmax.f32 %v2045_v62, 0.0  ;;  %v1748_v50 = vadd.f32 %v1732_v43, %v4675_v51 }
 0x1fa   : > { %v2265_v37 = vmin.f32 %v2249_v9, 6.0  ;;  %v2115_v16 = vmul.f32 %v4261_v33, %v2092_v55  ;;  %v2353_v52 = vmax.f32 %v2337_v40, 0.0  ;;  %v2104_v39 = vmul.f32 %v4416_v58, %v2081_v59 }
 0x1fb   : > { %v1734_v23 = vmul.f32 %v4314_v27, %v1711_v28  ;;  %v1897_v2 = vmin.f32 %v1881_v8, 6.0  ;;  %v1934_v0 = vadd.f32 %v1918_v61, %v1748_v50  ;;  %v1862_v44 = vadd.f32 %v4308_v3, %v3793_v31 }
 0x1fc   : > { %v2288_v15 = vmul.f32 %v4427_v47, %v2265_v37  ;;  %v2131_v1 = vadd.f32 %v2115_v16, %v1945_v4  ;;  %v2369_v17 = vmin.f32 %v2353_v52, 6.0  ;;  %v1697_v56 = vmax.f32 %v1676_v30, 0.0  ;;  %v4677_v4 = vld [vmem:[#allocation24_spill] sm:$0xff] }
 0x1fd   : > { %v2227_v12 = vpop.f32.mrf.mxu1  ;;  %v2083_v24 = vmin.f32 %v2067_v22, 6.0  ;;  %v2120_v43 = vadd.f32 %v2104_v39, %v1934_v0  ;;  %v2048_v10 = vadd.f32 %v2047_v42, %v3793_v31  ;;  %v1920_v38 = vmul.f32 %v4404_v13, %v1897_v2  ;;  %v4679_v39 = vld [vmem:[#allocation30_spill] sm:$0xff] }
 0x1fe   : > { %v2304_v60 = vadd.f32 %v2288_v15, %v2118_v34  ;;  %v2228_v33 = vadd.f32 %v2227_v12, %v3793_v31  ;;  %v2317_v26 = vadd.f32 %v2301_v19, %v2131_v1  ;;  %2454 = vmatmul.f32.gmra.mxu2 %v2369_v17  ;;  %v1883_v9 = vmax.f32 %v1862_v44, 0.0 }
 0x1ff   : > { %v1750_v55 = vadd.f32 %v1734_v23, %v4676_v41  ;;  %v1713_v40 = vmin.f32 %v1697_v56, 6.0  ;;  %v1679_v45 = vadd.f32 %v4677_v4, %v3793_v31  ;;  %v2106_v42 = vmul.f32 %v4416_v58, %v2083_v24  ;;  %v4681_v4 = vld [vmem:[#allocation26_spill] sm:$0xff] }
 0x200   : > { %v2326_v32 = vadd.f32 %v4437_v36, %v2304_v60  ;;  %v2251_v20 = vmax.f32 %v2228_v33, 0.0  ;;  %v2339_v54 = vadd.f32 %v4285_v25, %v2317_v26  ;;  %v2069_v35 = vmax.f32 %v2048_v10, 0.0  ;;  %v2053_v60 = vpop.f32.mrf.mxu3  ;;  %v4678_v26 = vld [vmem:[#allocation40_spill] sm:$0xff] }
 0x201   : > { %v1936_v16 = vadd.f32 %v1920_v38, %v1750_v55  ;;  %v1899_v19 = vmin.f32 %v1883_v9, 6.0  ;;  %v1865_v52 = vadd.f32 %v4337_v57, %v3793_v31  ;;  %v1736_v15 = vmul.f32 %v4314_v27, %v1713_v40 }
 0x202   : > { %v2342_v63 = vmax.f32 %v2326_v32, 0.0  ;;  %v2267_v49 = vmin.f32 %v2251_v20, 6.0  ;;  %v2355_v18 = vmax.f32 %v2339_v54, 0.0  ;;  %v1699_v28 = vmax.f32 %v1679_v45, 0.0 }
 0x203   : > { %v2122_v8 = vadd.f32 %v2106_v42, %v1936_v16  ;;  %v2085_v1 = vmin.f32 %v2069_v35, 6.0  ;;  %v2051_v12 = vadd.f32 %v2050_v14, %v3793_v31  ;;  %v1922_v11 = vmul.f32 %v4404_v13, %v1899_v19 }
 0x204   : > { %v2358_v6 = vmin.f32 %v2342_v63, 6.0  ;;  %v2290_v7 = vmul.f32 %v4427_v47, %v2267_v49  ;;  %v2371_v46 = vmin.f32 %v2355_v18, 6.0  ;;  %v1885_v30 = vmax.f32 %v1865_v52, 0.0 }
 0x205   : > { %v2230_v25 = vpop.f32.mrf.mxu1  ;;  %v1752_v51 = vadd.f32 %v1736_v15, %v4678_v26  ;;  %v1715_v50 = vmin.f32 %v1699_v28, 6.0  ;;  %v1682_v32 = vadd.f32 %v4679_v39, %v3793_v31  ;;  %v2108_v20 = vmul.f32 %v4416_v58, %v2085_v1 }
 0x206   : > { %v2306_v21 = vadd.f32 %v2290_v7, %v2120_v43  ;;  %v2231_v3 = vadd.f32 %v2230_v25, %v3793_v31  ;;  %2906 = vmatmul.msk.f32.vlgmr.msrb.gmra.mxu3 %vm2395_vm1, %v2358_v6  ;;  %2457 = vmatmul.f32.gmra.mxu2 %v2371_v46  ;;  %v2071_v23 = vmax.f32 %v2051_v12, 0.0  ;;  %v1868_v0 = vadd.f32 %v4357_v5, %v3793_v31 }
 0x207   : > { %v1938_v44 = vadd.f32 %v1922_v11, %v1752_v51  ;;  %v1901_v63 = vmin.f32 %v1885_v30, 6.0  ;;  %v1738_v24 = vmul.f32 %v4314_v27, %v1715_v50  ;;  %v1701_v14 = vmax.f32 %v1682_v32, 0.0 }
 0x208   : > { %v2328_v37 = vadd.f32 %v4437_v36, %v2306_v21  ;;  %v2253_v62 = vmax.f32 %v2231_v3, 0.0  ;;  %v2054_v18 = vadd.f32 %v2053_v60, %v3793_v31  ;;  %v2087_v10 = vmin.f32 %v2071_v23, 6.0  ;;  %v4680_v3 = vld [vmem:[#allocation4_spill] sm:$0xff]  ;;  %v2056_v40 = vpop.f32.mrf.mxu3 }
 0x209   : > { %v2124_v43 = vadd.f32 %v2108_v20, %v1938_v44  ;;  %v1887_v38 = vmax.f32 %v1868_v0, 0.0  ;;  %v1924_v46 = vmul.f32 %v4404_v13, %v1901_v63  ;;  %v1717_v21 = vmin.f32 %v1701_v14, 6.0 }
 0x20a   : > { %v2269_v34 = vmin.f32 %v2253_v62, 6.0  ;;  %v2344_v59 = vmax.f32 %v2328_v37, 0.0  ;;  %v1685_v41 = vadd.f32 %v4680_v3, %v3793_v31  ;;  %v2073_v55 = vmax.f32 %v2054_v18, 0.0 }
 0x20b   : > { %v1754_v45 = vadd.f32 %v1738_v24, %v4681_v4  ;;  %v2110_v42 = vmul.f32 %v4416_v58, %v2087_v10  ;;  %v1903_v62 = vmin.f32 %v1887_v38, 6.0  ;;  %v1871_v19 = vadd.f32 %v4378_v53, %v3793_v31  ;;  %v2512_v53 = vld [vmem:[%s4585_s7 + $0x10] sm:$0xff] }
 0x20c   : > { %v2292_v17 = vmul.f32 %v4427_v47, %v2269_v34  ;;  %v2360_v61 = vmin.f32 %v2344_v59, 6.0  ;;  %v1740_v59 = vmul.f32 %v4314_v27, %v1717_v21  ;;  %v1703_v15 = vmax.f32 %v1685_v41, 0.0  ;;  %2554 = vmatpush.msrb.mxu0 %v2512_v53 }
 0x20d   : > { %v2233_v33 = vpop.f32.mrf.mxu1  ;;  %v1940_v16 = vadd.f32 %v1924_v46, %v1754_v45  ;;  %v2089_v28 = vmin.f32 %v2073_v55, 6.0  ;;  %v2057_v1 = vadd.f32 %v2056_v40, %v3793_v31  ;;  %v1688_v51 = vadd.f32 %v4322_v29, %v3793_v31 }
 0x20e   : > { %v2308_v22 = vadd.f32 %v2292_v17, %v2122_v8  ;;  %v2234_v57 = vadd.f32 %v2233_v33, %v3793_v31  ;;  %2907 = vmatmul.msk.f32.gmra.mxu3 %vm2395_vm1, %v2360_v61  ;;  %v1926_v61 = vmul.f32 %v4404_v13, %v1903_v62  ;;  %v1889_v33 = vmax.f32 %v1871_v19, 0.0 }
 0x20f   : > { %v2126_v8 = vadd.f32 %v2110_v42, %v1940_v16  ;;  %v1719_v26 = vmin.f32 %v1703_v15, 6.0  ;;  %v2112_v50 = vmul.f32 %v4416_v58, %v2089_v28  ;;  %v2075_v39 = vmax.f32 %v2057_v1, 0.0  ;;  %v4684_v15 = vld [vmem:[#allocation8_spill] sm:$0xff] }
 0x210   : > { %v2330_v2 = vadd.f32 %v4437_v36, %v2308_v22  ;;  %v2255_v54 = vmax.f32 %v2234_v57, 0.0  ;;  %v4682_v22 = vld [vmem:[#allocation3_spill] sm:$0xff]  ;;  %v1874_v0 = vadd.f32 %v4399_v48, %v3793_v31  ;;  %v4683_v48 = vld [vmem:[#allocation10_spill] sm:$0xff] }
 0x211   : > { %v1756_v57 = vadd.f32 %v1740_v59, %v4682_v22  ;;  %v2091_v29 = vmin.f32 %v2075_v39, 6.0 }
 0x212   : > { %v2271_v49 = vmin.f32 %v2255_v54, 6.0  ;;  %v2346_v56 = vmax.f32 %v2330_v2, 0.0  ;;  %v2059_v2 = vpop.f32.mrf.mxu3  ;;  %v1905_v54 = vmin.f32 %v1889_v33, 6.0 }
 0x213   : > { %v1942_v23 = vadd.f32 %v1926_v61, %v1756_v57  ;;  %v2060_v14 = vadd.f32 %v2059_v2, %v3793_v31 }
 0x214   : > { %v2294_v6 = vmul.f32 %v4427_v47, %v2271_v49  ;;  %v2362_v7 = vmin.f32 %v2346_v56, 6.0  ;;  %v1742_v49 = vmul.f32 %v4314_v27, %v1719_v26  ;;  %v1705_v56 = vmax.f32 %v1688_v51, 0.0 }
 0x215   : > { %v2236_v25 = vpop.f32.mrf.mxu1  ;;  %v2128_v24 = vadd.f32 %v2112_v50, %v1942_v23  ;;  %v2077_v21 = vmax.f32 %v2060_v14, 0.0 }
 0x216   : > { %v2310_v9 = vadd.f32 %v2294_v6, %v2124_v43  ;;  %v2237_v5 = vadd.f32 %v2236_v25, %v3793_v31  ;;  %2908 = vmatmul.msk.f32.gmra.mxu3 %vm2395_vm1, %v2362_v7  ;;  %v1928_v6 = vmul.f32 %v4404_v13, %v1905_v54  ;;  %v1891_v7 = vmax.f32 %v1874_v0, 0.0  ;;  %v2966_v0 = vld [vmem:[%s3255_s30 + $0x108] sm:$0xff] }
 0x217   : > { %v1758_v46 = vadd.f32 %v1742_v49, %v4683_v48 }
 0x218   : > { %v2332_v35 = vadd.f32 %v4437_v36, %v2310_v9  ;;  %v2257_v37 = vmax.f32 %v2237_v5, 0.0  ;;  %v1721_v9 = vmin.f32 %v1705_v56, 6.0  ;;  %v2114_v5 = vmul.f32 %v4416_v58, %v2091_v29  ;;  %v2967_v29 = vld [vmem:[%s3255_s30 + $0x110] sm:$0xff] }
 0x219   : > { %v1944_v55 = vadd.f32 %v1928_v6, %v1758_v46  ;;  %v1907_v40 = vmin.f32 %v1891_v7, 6.0  ;;  %v2968_v7 = vld [vmem:[%s3255_s30 + $0x118] sm:$0xff] }
 0x21a   : > { %v2273_v52 = vmin.f32 %v2257_v37, 6.0  ;;  %v2348_v34 = vmax.f32 %v2332_v35, 0.0  ;;  %v1744_v42 = vmul.f32 %v4314_v27, %v1721_v9  ;;  %v2093_v37 = vmin.f32 %v2077_v21, 6.0 }
 0x21b   : > { %v2130_v35 = vadd.f32 %v2114_v5, %v1944_v55  ;;  %v2969_v5 = vld [vmem:[%s3255_s30 + $0x120] sm:$0xff] }
 0x21c   : > { %v2296_v12 = vmul.f32 %v4427_v47, %v2273_v52  ;;  %v2364_v17 = vmin.f32 %v2348_v34, 6.0  ;;  %v1930_v52 = vmul.f32 %v4404_v13, %v1907_v40  ;;  %v1760_v28 = vadd.f32 %v1744_v42, %v4684_v15  ;;  %v2972_v15 = vld [vmem:[%s3255_s30 + $0x138] sm:$0xff] }
 0x21d   : > { %v2239_v60 = vpop.f32.mrf.mxu1 }
 0x21e   : > { %v2312_v11 = vadd.f32 %v2296_v12, %v2126_v8  ;;  %v2240_v30 = vadd.f32 %v2239_v60, %v3793_v31  ;;  %2909 = vmatmul.msk.f32.gmra.mxu3 %vm2395_vm1, %v2364_v17  ;;  %v2116_v8 = vmul.f32 %v4416_v58, %v2093_v37  ;;  %v1946_v12 = vadd.f32 %v1930_v52, %v1760_v28  ;;  %v2511_v58 = vld [vmem:[%s4585_s7 + $0x8] sm:$0xff] }
 0x21f   : > { %2555 = vmatpush.msrb.mxu0 %v2511_v58 }
 0x220   : > { %v2334_v32 = vadd.f32 %v4437_v36, %v2312_v11  ;;  %v2259_v20 = vmax.f32 %v2240_v30, 0.0  ;;  %v2132_v60 = vadd.f32 %v2116_v8, %v1946_v12 }
 0x222   : > { %v2275_v44 = vmin.f32 %v2259_v20, 6.0  ;;  %v2350_v63 = vmax.f32 %v2334_v32, 0.0  ;;  %v2965_v32 = vld [vmem:[%s3255_s30 + $0x100] sm:$0xff] }
 0x224   : > { %v2298_v18 = vmul.f32 %v4427_v47, %v2275_v44  ;;  %v2366_v43 = vmin.f32 %v2350_v63, 6.0 }
 0x225   : > { %v2242_v10 = vpop.f32.mrf.mxu1 }
 0x226   : > { %v2314_v38 = vadd.f32 %v2298_v18, %v2128_v24  ;;  %v2243_v25 = vadd.f32 %v2242_v10, %v3793_v31  ;;  %2910 = vmatmul.msk.f32.gmra.mxu3 %vm2395_vm1, %v2366_v43 }
 0x228   : > { %v2336_v3 = vadd.f32 %v4437_v36, %v2314_v38  ;;  %v2261_v41 = vmax.f32 %v2243_v25, 0.0 }
 0x22a   : > { %v2277_v4 = vmin.f32 %v2261_v41, 6.0  ;;  %v2352_v45 = vmax.f32 %v2336_v3, 0.0 }
 0x22c   : > { %v2300_v62 = vmul.f32 %v4427_v47, %v2277_v4  ;;  %v2368_v16 = vmin.f32 %v2352_v45, 6.0  ;;  %v2970_v4 = vld [vmem:[%s3255_s30 + $0x128] sm:$0xff] }
 0x22d   : > { %v2245_v19 = vpop.f32.mrf.mxu1 }
 0x22e   : > { %v2316_v34 = vadd.f32 %v2300_v62, %v2130_v35  ;;  %v2246_v59 = vadd.f32 %v2245_v19, %v3793_v31  ;;  %2911 = vmatmul.msk.f32.gmra.mxu3 %vm2395_vm1, %v2368_v16  ;;  %v2971_v62 = vld [vmem:[%s3255_s30 + $0x130] sm:$0xff] }
 0x230   : > { %v2338_v1 = vadd.f32 %v4437_v36, %v2316_v34  ;;  %v2263_v27 = vmax.f32 %v2246_v59, 0.0 }
 0x232   : > { %v2279_v17 = vmin.f32 %v2263_v27, 6.0  ;;  %v2354_v61 = vmax.f32 %v2338_v1, 0.0 }
 0x234   : > { %v2302_v33 = vmul.f32 %v4427_v47, %v2279_v17  ;;  %v2370_v11 = vmin.f32 %v2354_v61, 6.0  ;;  %v2510_v47 = vld [vmem:[%s4585_s7] sm:$0xff] }
 0x235   : > { %2556 = vmatpush.msrb.mxu0 %v2510_v47  ;;  %v2962_v61 = vld [vmem:[%s4586_s8] ss:$0 sm:$0xff] }
 0x236   : > { %v2318_v13 = vadd.f32 %v2302_v33, %v2132_v60  ;;  %2912 = vmatmul.msk.f32.gmra.mxu3 %vm2395_vm1, %v2370_v11 }
 0x238   : > { %v2340_v31 = vadd.f32 %v4437_v36, %v2318_v13  ;;  %v2961_v36 = vld [vmem:[%s4584_s6] ss:$0 sm:$0xff] }
 0x23a   : > { %v2356_v30 = vmax.f32 %v2340_v31, 0.0 }
 0x23c   : > { %v2372_v53 = vmin.f32 %v2356_v30, 6.0 }
 0x23e   : > { %2913 = vmatmul.msk.f32.gmra.mxu3 %vm2395_vm1, %v2372_v53 }
 0x251   : > { %v2437_v22 = vpop.f32.mrf.mxu2 }
 0x252   : > { %v2438_v26 = vadd.f32 %v2961_v36, %v2437_v22 }
 0x259   : > { %v2440_v57 = vpop.f32.mrf.mxu2 }
 0x25a   : > { %v2441_v23 = vadd.f32 %v2961_v36, %v2440_v57 }
 0x261   : > { %v2443_v39 = vpop.f32.mrf.mxu2 }
 0x262   : > { %v2444_v49 = vadd.f32 %v2961_v36, %v2443_v39 }
 0x269   : > { %v2446_v63 = vpop.f32.mrf.mxu2 }
 0x26a   : > { %v2447_v43 = vadd.f32 %v2961_v36, %v2446_v63 }
 0x271   : > { %v2449_v18 = vpop.f32.mrf.mxu2 }
 0x272   : > { %v2450_v25 = vadd.f32 %v2961_v36, %v2449_v18 }
 0x279   : > { %v2452_v48 = vpop.f32.mrf.mxu2 }
 0x27a   : > { %v2453_v3 = vadd.f32 %v2961_v36, %v2452_v48 }
 0x281   : > { %v2455_v40 = vpop.f32.mrf.mxu2 }
 0x282   : > { %v2456_v42 = vadd.f32 %v2961_v36, %v2455_v40 }
 0x289   : > { %v2478_v51 = vpop.f32.mrf.mxu3  ;;  %v2458_v19 = vpop.f32.mrf.mxu2 }
 0x28a   : > { %v2479_v50 = vadd.f32 %v2478_v51, %v2438_v26  ;;  %v2459_v52 = vadd.f32 %v2961_v36, %v2458_v19 }
 0x28c   : > { %v2502_v20 = vadd.f32 %v2965_v32, %v2479_v50 }
 0x28e   : > { %2914 = vmatmul.msk.f32.vlgmr.msrb.gmra.mxu0 %vm670_vm0, %v2502_v20 }
 0x291   : > { %v2481_v2 = vpop.f32.mrf.mxu3 }
 0x292   : > { %v2482_v54 = vadd.f32 %v2481_v2, %v2441_v23 }
 0x294   : > { %v2503_v44 = vadd.f32 %v2966_v0, %v2482_v54  ;;  %v2997_v54 = vmov 64.0  }
 0x295   : > { %2963 = vrcp.f32 %v2997_v54 }
 0x296   : > { %2915 = vmatmul.msk.f32.gmra.mxu0 %vm670_vm0, %v2503_v44 }
 0x299   : > { %v2484_v56 = vpop.f32.mrf.mxu3 }
 0x29a   : > { %v2485_v24 = vadd.f32 %v2484_v56, %v2444_v49 }
 0x29c   : > { %v2504_v14 = vadd.f32 %v2967_v29, %v2485_v24 }
 0x29e   : > { %2916 = vmatmul.msk.f32.gmra.mxu0 %vm670_vm0, %v2504_v14 }
 0x2a1   : > { %v2487_v10 = vpop.f32.mrf.mxu3 }
 0x2a2   : > { %v2488_v6 = vadd.f32 %v2487_v10, %v2447_v43  ;;  %v2964_v10 = vpop.eup %2963 }
 0x2a3   : > { %vm2625_vm3 = vweird.f32 %v2964_v10 }
 0x2a4   : > { %v2505_v38 = vadd.f32 %v2968_v7, %v2488_v6 }
 0x2a6   : > { %2917 = vmatmul.msk.f32.gmra.mxu0 %vm670_vm0, %v2505_v38 }
 0x2a9   : > { %v2490_v46 = vpop.f32.mrf.mxu3 }
 0x2aa   : > { %v2491_v9 = vadd.f32 %v2490_v46, %v2450_v25 }
 0x2ac   : > { %v2506_v21 = vadd.f32 %v2969_v5, %v2491_v9  ;;  %v2621_v5 = vmul.f32 64.0, %v2964_v10 }
 0x2ae   : > { %2918 = vmatmul.msk.f32.gmra.mxu0 %vm670_vm0, %v2506_v21  ;;  %v2622_v40 = vsub.f32 1.0, %v2621_v5 }
 0x2b1   : > { %v2493_v41 = vpop.f32.mrf.mxu3 }
 0x2b2   : > { %v2494_v55 = vadd.f32 %v2493_v41, %v2453_v3 }
 0x2b4   : > { %v2507_v45 = vadd.f32 %v2970_v4, %v2494_v55 }
 0x2b6   : > { %2919 = vmatmul.msk.f32.gmra.mxu0 %vm670_vm0, %v2507_v45 }
 0x2b9   : > { %v2496_v35 = vpop.f32.mrf.mxu3 }
 0x2ba   : > { %v2497_v37 = vadd.f32 %v2496_v35, %v2456_v42  ;;  %v2623_v42 = vmul.f32 %v2964_v10, %v2622_v40 }
 0x2bc   : > { %v2508_v16 = vadd.f32 %v2971_v62, %v2497_v37  ;;  %v2624_v62 = vadd.f32 %v2964_v10, %v2623_v42 }
 0x2be   : > { %2920 = vmatmul.msk.f32.gmra.mxu0 %vm670_vm0, %v2508_v16 }
 0x2c1   : > { %v2499_v34 = vpop.f32.mrf.mxu3 }
 0x2c2   : > { %v2500_v59 = vadd.f32 %v2499_v34, %v2459_v52  ;;  %v2626_v52 = vsel %vm2625_vm3, %v2964_v10, %v2624_v62 }
 0x2c4   : > { %v2509_v28 = vadd.f32 %v2972_v15, %v2500_v59 }
 0x2c6   : > { %2921 = vmatmul.msk.f32.gmra.mxu0 %vm670_vm0, %v2509_v28 }
 0x30b   : > { %v2558_v8 = vpop.f32.mrf.mxu0 }
 0x30c   : > { %v2559_v33 = vadd.f32 %v2962_v61, %v2558_v8 }
 0x30e   : > { %v2582_v53 = vmax.f32 %v2559_v33, 0.0 }
 0x310   : > { %v2590_v26 = vmin.f32 %v2582_v53, 6.0 }
 0x312   : > { %v2599_v0 = vsel %vm2598_vm2, %v2590_v26, 0.0 }
 0x313   : > { %v2561_v1 = vpop.f32.mrf.mxu0 }
 0x314   : > { %v2562_v60 = vadd.f32 %v2962_v61, %v2561_v1 }
 0x316   : > { %v2583_v31 = vmax.f32 %v2562_v60, 0.0 }
 0x318   : > { %v2591_v22 = vmin.f32 %v2583_v31, 6.0 }
 0x31a   : > { %v2600_v32 = vsel %vm2598_vm2, %v2591_v22, 0.0 }
 0x31b   : > { %v2564_v27 = vpop.f32.mrf.mxu0  ;;  %v2601_v56 = vadd.f32 %v2600_v32, %v2599_v0 }
 0x31c   : > { %v2565_v11 = vadd.f32 %v2962_v61, %v2564_v27 }
 0x31e   : > { %v2584_v58 = vmax.f32 %v2565_v11, 0.0 }
 0x320   : > { %v2592_v51 = vmin.f32 %v2584_v58, 6.0 }
 0x322   : > { %v2602_v44 = vsel %vm2598_vm2, %v2592_v51, 0.0 }
 0x323   : > { %v2567_v12 = vpop.f32.mrf.mxu0  ;;  %v2603_v14 = vadd.f32 %v2602_v44, %v2601_v56 }
 0x324   : > { %v2568_v30 = vadd.f32 %v2962_v61, %v2567_v12 }
 0x326   : > { %v2585_v57 = vmax.f32 %v2568_v30, 0.0 }
 0x328   : > { %v2593_v20 = vmin.f32 %v2585_v57, 6.0 }
 0x32a   : > { %v2604_v24 = vsel %vm2598_vm2, %v2593_v20, 0.0 }
 0x32b   : > { %v2570_v17 = vpop.f32.mrf.mxu0  ;;  %v2605_v6 = vadd.f32 %v2604_v24, %v2603_v14 }
 0x32c   : > { %v2571_v47 = vadd.f32 %v2962_v61, %v2570_v17 }
 0x32e   : > { %v2586_v50 = vmax.f32 %v2571_v47, 0.0 }
 0x330   : > { %v2594_v63 = vmin.f32 %v2586_v50, 6.0 }
 0x332   : > { %v2606_v18 = vsel %vm2598_vm2, %v2594_v63, 0.0 }
 0x333   : > { %v2573_v13 = vpop.f32.mrf.mxu0  ;;  %v2607_v48 = vadd.f32 %v2606_v18, %v2605_v6 }
 0x334   : > { %v2574_v36 = vadd.f32 %v2962_v61, %v2573_v13 }
 0x336   : > { %v2587_v23 = vmax.f32 %v2574_v36, 0.0 }
 0x338   : > { %v2595_v29 = vmin.f32 %v2587_v23, 6.0 }
 0x33a   : > { %v2608_v38 = vsel %vm2598_vm2, %v2595_v29, 0.0 }
 0x33b   : > { %v2576_v39 = vpop.f32.mrf.mxu0  ;;  %v2609_v21 = vadd.f32 %v2608_v38, %v2607_v48 }
 0x33c   : > { %v2577_v2 = vadd.f32 %v2962_v61, %v2576_v39 }
 0x33e   : > { %v2588_v49 = vmax.f32 %v2577_v2, 0.0 }
 0x340   : > { %v2596_v43 = vmin.f32 %v2588_v49, 6.0 }
 0x342   : > { %v2610_v46 = vsel %vm2598_vm2, %v2596_v43, 0.0 }
 0x343   : > { %v2579_v7 = vpop.f32.mrf.mxu0  ;;  %v2611_v41 = vadd.f32 %v2610_v46, %v2609_v21 }
 0x344   : > { %v2580_v25 = vadd.f32 %v2962_v61, %v2579_v7 }
 0x346   : > { %v2589_v9 = vmax.f32 %v2580_v25, 0.0 }
 0x348   : > { %v2597_v3 = vmin.f32 %v2589_v9, 6.0 }
 0x34a   : > { %v2612_v55 = vsel %vm2598_vm2, %v2597_v3, 0.0 }
 0x34b   : > { %v2613_v4 = vadd.f32 %v2612_v55, %v2611_v41 }
 0x34d   : > { %v2614_v45 = vrot.slane %v2613_v4, 4 }
 0x34f   : > { %v2615_v35 = vadd.f32 %v2614_v45, %v2613_v4 }
 0x351   : > { %v2616_v37 = vrot.slane %v2615_v35, 2 }
 0x353   : > { %v2617_v16 = vadd.f32 %v2616_v37, %v2615_v35 }
 0x355   : > { %v2618_v19 = vrot.slane %v2617_v16, 1 }
 0x357   : > { %v2619_v34 = vadd.f32 %v2618_v19, %v2617_v16 }
 0x359   : > { %v2627_v59 = vmul.f32 %v2626_v52, %v2619_v34 }
 0x35b   : > { %2629 = vst.msk [vmem:[%s649_s17] sm:$0x1] %vm2628_vm4, %v2627_v59 }
 0x35c PF: > { %p16_p9 = scmp.ge.s32.totalorder %s3065_s13, 4   ;;  %s4685_s30 = smov %s2991_s10 }
 0x35d   : > { %s4686_s10 = smov %s3074_s16  ;;  %s4687_s11 = smov %s3065_s13 }
 0x35e   :  { %18 = sbr.rel (!%p16_p9) target bundleno = 2 (0x2), region = 145 }

// kernel: combined_forward.7
= control target key start
LH: loop header
LB: loop body
LE: loop exit
PB: predicated region body
PF: predicated region fallthrough
CT: control target
= control target key end

     0   :  { %s1908_s28 = smov 0   ;;  %s1910_s29 = smov 0   ;;  %s2273_s0 = inlined_call_operand.vmem [shape: f32[2,8,192], index: 0, kind: input, shape index: {}]   ;;  %s2274_s1 = inlined_call_operand.vmem [shape: f32[192,32], index: 1, kind: input, shape index: {}]   ;;  %s2275_s2 = inlined_call_operand.vmem [shape: f32[8,32], index: 2, kind: input, shape index: {}]   ;;  %s2276_s3 = inlined_call_operand.vmem [shape: f32[1,8], index: 3, kind: input, shape index: {}]   ;;  %s2277_s4 = inlined_call_operand.vmem [shape: f32[2,1,64], index: 4, kind: input, shape index: {}]   ;;  %s2278_s5 = inlined_call_operand.vmem [shape: f32[2,1,32], index: 5, kind: input, shape index: {}]   ;;  %s2279_s6 = inlined_call_operand.vmem [shape: f32[2,1,32], index: 6, kind: input, shape index: {}]   ;;  %s2280_s7 = inlined_call_operand.vmem [shape: f32[2,32,96], index: 7, kind: input, shape index: {}]   ;;  %s2281_s8 = inlined_call_operand.vmem [shape: f32[2,1,96], index: 8, kind: input, shape index: {}]   ;;  %s2282_s9 = inlined_call_operand.vmem [shape: f32[2,32,32], index: 9, kind: input, shape index: {}]   ;;  %s2283_s10 = inlined_call_operand.vmem [shape: f32[2,1,32], index: 10, kind: input, shape index: {}]   ;;  %s2284_s11 = inlined_call_operand.vmem [shape: f32[2,1,32], index: 11, kind: input, shape index: {}]   ;;  %s2285_s12 = inlined_call_operand.vmem [shape: f32[2,1,32], index: 12, kind: input, shape index: {}]   ;;  %s2286_s13 = inlined_call_operand.vmem [shape: f32[2,32,128], index: 13, kind: input, shape index: {}]   ;;  %s2287_s14 = inlined_call_operand.vmem [shape: f32[2,1,128], index: 14, kind: input, shape index: {}]   ;;  %s2288_s15 = inlined_call_operand.vmem [shape: f32[2,128,32], index: 15, kind: input, shape index: {}]   ;;  %s2289_s16 = inlined_call_operand.vmem [shape: f32[2,1,32], index: 16, kind: input, shape index: {}]   ;;  %s2290_s17 = inlined_call_operand.vmem [shape: f32[1,32], index: 17, kind: input, shape index: {}]   ;;  %s2291_s18 = inlined_call_operand.vmem [shape: f32[1,32], index: 18, kind: input, shape index: {}]   ;;  %s2292_s19 = inlined_call_operand.vmem [shape: f32[64,8], index: 19, kind: input, shape index: {}]   ;;  %s2293_s20 = inlined_call_operand.vmem [shape: f32[32,8], index: 20, kind: input, shape index: {}]   ;;  %s2294_s21 = inlined_call_operand.vmem [shape: f32[1,8], index: 21, kind: input, shape index: {}]   ;;  %s2295_s22 = inlined_call_operand.vmem [shape: f32[2,1,8], index: 22, kind: output, shape index: {}]  }
   0x1   :  { %2303 = sst [smem:[#allocation9_spill]] %s2273_s0  ;;  %s1912_s30 = smov 0  }
   0x2   :  { %2304 = sst [smem:[#allocation10_spill]] %s2274_s1 }
   0x3   :  { %2305 = sst [smem:[#allocation11_spill]] %s2275_s2 }
   0x4   :  { %2306 = sst [smem:[#allocation12_spill]] %s2276_s3  ;;  %s1906_s3 = smov 0  }
   0x5   :  { %2307 = sst [smem:[#allocation13_spill]] %s2277_s4  ;;  %s1914_s4 = smov 0  }
   0x6   :  { %2308 = sst [smem:[#allocation14_spill]] %s2278_s5 }
   0x7   :  { %2309 = sst [smem:[#allocation15_spill]] %s2279_s6 }
   0x8   :  { %2310 = sst [smem:[#allocation16_spill]] %s2280_s7 }
   0x9   :  { %2311 = sst [smem:[#allocation17_spill]] %s2282_s9 }
   0xa   :  { %2312 = sst [smem:[#allocation18_spill]] %s2288_s15 }
   0xb   :  { %2313 = sst [smem:[#allocation19_spill]] %s2290_s17 }
   0xc   :  { %2314 = sst [smem:[#allocation20_spill]] %s2291_s18 }
   0xd   :  { %2315 = sst [smem:[#allocation21_spill]] %s2292_s19 }
   0xe   :  { %2316 = sst [smem:[#allocation22_spill]] %s2293_s20 }
   0xf   :  { %2317 = sst [smem:[#allocation23_spill]] %s2294_s21 }
  0x10   :  { %2318 = sst [smem:[#allocation24_spill]] %s2295_s22 }
  0x11 LB: > { %2319 = sst [smem:[#allocation3_spill]] %s1766_s3  ;;  %s41_s0 = sadd.s32 1, %s1774_s29  ;;  %s1782_s4 = sphi %s1914_s4, %s32_s4   ;;  %s1778_s30 = sphi %s1912_s30, %s2361_s30   ;;  %s1774_s29 = sphi %s1910_s29, %s2360_s29   ;;  %s1770_s28 = sphi %s1908_s28, %s2359_s28   ;;  %s1766_s3 = sphi %s1906_s3, %s2358_s3  }
  0x12   : > { %2320 = sst [smem:[#allocation4_spill]] %s1774_s29  ;;  %s44_s23 = sadd.s32 1, %s1778_s30 }
  0x13   : > { %2321 = sst [smem:[#allocation5_spill]] %s1778_s30  ;;  %p42_p0 = scmp.ge.s32.totalorder %s41_s0, 2 }
  0x14   : > { %2322 = sst [smem:[#allocation6_spill]] %s1782_s4  ;;  %p1635_p1 = scmp.ge.s32.totalorder %s1782_s4, 1 }
  0x15   : > { %p736_p2 = scmp.lt.s32.totalorder %s1782_s4, 5  ;;  %s2363_s0 = smov (%p42_p0, %s41_s0), 0 }
  0x16   : > { %2323 = sst [smem:[#allocation7_spill]] %s2363_s0  ;;  %s2365_s23 = smov (!%p42_p0, %s44_s23), %s1778_s30 }
  0x17   : > { %p737_p3 = pnand %p1635_p1, %p736_p2  ;;  %p46_p4 = scmp.ge.s32.totalorder %s2365_s23, 2 }
  0x18   : > { %p843_p5 = scmp.lt.s32.totalorder (!%p737_p3), %s1770_s28, 1  ;;  %p851_p6 = scmp.lt.s32.totalorder (!%p737_p3), %s1766_s3, 1 }
  0x19   : > { %s2367_s23 = smov (%p46_p4, %s2365_s23), 0  ;;  %740 = sbr.rel (%p737_p3) target bundleno = 2503 (0x9c7), region = 108 }
  0x1a   : > { %2324 = sst [smem:[#allocation8_spill]] %s2367_s23 }
  0x1b   : > { %s2326_s23 = sld [smem:[#allocation9_spill]] (!%p737_p3) }
  0x1c   : > { %s2329_s7 = sld [smem:[#allocation16_spill]] (!%p737_p3) }
  0x1d   : > { %s2330_s9 = sld [smem:[#allocation17_spill]] (!%p737_p3) }
  0x1e   : > { %s2369_s28 = smov (!%p843_p5, %s1770_s28), 1  ;;  %s2331_s4 = sld [smem:[#allocation18_spill]] }
  0x1f   : > { %s1942_s1 = scalar_select %p851_p6, %s1766_s3, 1 }
  0x20   : > { %s1663_s5 = sshll.u32 %s2369_s28, 4  ;;  %s2332_s26 = sld [smem:[#allocation24_spill]] }
  0x21   : > { %s1952_s0 = scalar_lea.vmem %s2326_s23, %s1663_s5  ;;  %s1664_s3 = sshll.u32 %s1942_s1, 5 }
  0x22   : > { %s1966_s24 = scalar_lea.vmem %s2329_s7, %s1664_s3  ;;  %s1992_s25 = scalar_lea.vmem %s2286_s13, %s1664_s3 }
  0x23   : > { %s1975_s27 = scalar_lea.vmem %s2330_s9, %s1664_s3  ;;  %s1667_s21 = sshll.u32 %s1942_s1, 7 }
  0x24   : > { %s894_s17 = scalar_lea.vmem %s2289_s16, %s1942_s1  ;;  %s2006_s7 = scalar_lea.vmem %s2331_s4, %s1667_s21 }
  0x25   : > { %s2333_s3 = sld [smem:[#allocation3_spill]] }
  0x26   : > { %s897_s19 = scalar_lea.vmem %s2332_s26, %s2369_s28 }
  0x2b   : > { %p1646_p7 = scmp.ne.s32.totalorder %s2333_s3, 0 }
  0x2c   : > { %s2334_s5 = sld [smem:[#allocation10_spill]] (!%p1646_p7) }
  0x2d   : > { %901 = sbr.rel (%p1646_p7) target bundleno = 213 (0xd5), region = 112  ;;  %s2335_s26 = sld [smem:[#allocation11_spill]] (!%p1646_p7) }
  0x32   : > { %v920_v0 = vld [vmem:[%s2334_s5 + $0x78] sm:$0xff]  ;;  %v919_v1 = vld [vmem:[%s2334_s5 + $0x70] sm:$0xff]  ;;  %v918_v2 = vld [vmem:[%s2334_s5 + $0x68] sm:$0xff]  ;;  %vm929_vm0 = vcmask 523264   ;;  %vm974_vm1 = vcmask 261120  }
  0x33   : > { %933 = vmatpush.msra.mxu0 %v920_v0  ;;  %v928_v3 = vld [vmem:[%s2334_s5 + $0xb8] sm:$0xff]  ;;  %v927_v4 = vld [vmem:[%s2334_s5 + $0xb0] sm:$0xff]  ;;  %v917_v5 = vld [vmem:[%s2334_s5 + $0x60] sm:$0xff] }
  0x34   : > { %961 = vmatpush.msra.mxu1 %v928_v3  ;;  %v926_v6 = vld [vmem:[%s2334_s5 + $0xa8] sm:$0xff]  ;;  %v916_v7 = vld [vmem:[%s2334_s5 + $0x58] sm:$0xff]  ;;  %v925_v8 = vld [vmem:[%s2334_s5 + $0xa0] sm:$0xff] }
  0x35   : > { %934 = vmatpush.msra.mxu0 %v919_v1  ;;  %v915_v9 = vld [vmem:[%s2334_s5 + $0x50] sm:$0xff]  ;;  %v924_v10 = vld [vmem:[%s2334_s5 + $0x98] sm:$0xff]  ;;  %v914_v11 = vld [vmem:[%s2334_s5 + $0x48] sm:$0xff] }
  0x36   : > { %962 = vmatpush.msra.mxu1 %v927_v4  ;;  %v923_v12 = vld [vmem:[%s2334_s5 + $0x90] sm:$0xff]  ;;  %v913_v13 = vld [vmem:[%s2334_s5 + $0x40] sm:$0xff]  ;;  %v922_v14 = vld [vmem:[%s2334_s5 + $0x88] sm:$0xff] }
  0x37   : > { %935 = vmatpush.msra.mxu0 %v918_v2  ;;  %v912_v15 = vld [vmem:[%s2334_s5 + $0x38] sm:$0xff]  ;;  %v921_v16 = vld [vmem:[%s2334_s5 + $0x80] sm:$0xff]  ;;  %v911_v17 = vld [vmem:[%s2334_s5 + $0x30] sm:$0xff] }
  0x38   : > { %963 = vmatpush.msra.mxu1 %v926_v6  ;;  %v904_v18 = vld [vmem:[%s1952_s0 + $0x8] sm:$0xff]  ;;  %v909_v20 = vld [vmem:[%s2334_s5 + $0x20] sm:$0xff]  ;;  %v908_v21 = vld [vmem:[%s2334_s5 + $0x18] sm:$0xff] }
  0x39   : > { %936 = vmatpush.msra.mxu0 %v917_v5  ;;  %v910_v19 = vld [vmem:[%s2334_s5 + $0x28] sm:$0xff]  ;;  %v907_v22 = vld [vmem:[%s2334_s5 + $0x10] sm:$0xff]  ;;  %v905_v24 = vld [vmem:[%s2334_s5] sm:$0xff] }
  0x3a   : > { %964 = vmatpush.msra.mxu1 %v925_v8  ;;  %v906_v23 = vld [vmem:[%s2334_s5 + $0x8] sm:$0xff]  ;;  %v903_v25 = vld [vmem:[%s1952_s0] sm:$0xff] }
  0x3b   : > { %937 = vmatpush.msra.mxu0 %v916_v7  ;;  %v902_v28 = vld [vmem:[%s2335_s26] sm:$0xff] }
  0x3c   : > { %965 = vmatpush.msra.mxu1 %v924_v10 }
  0x3d   : > { %938 = vmatpush.msra.mxu0 %v915_v9 }
  0x3e   : > { %966 = vmatpush.msra.mxu1 %v923_v12 }
  0x3f   : > { %939 = vmatpush.msra.mxu0 %v914_v11 }
  0x40   : > { %967 = vmatpush.msra.mxu1 %v922_v14 }
  0x41   : > { %940 = vmatpush.msra.mxu0 %v913_v13 }
  0x42   : > { %968 = vmatpush.msra.mxu1 %v921_v16 }
  0x43   : > { %941 = vmatpush.msra.mxu0 %v912_v15  ;;  %1647 = vmatmul.msk.f32.vlgmr.msra.gmra.mxu1 %vm929_vm0, %v904_v18 }
  0x45   : > { %942 = vmatpush.msra.mxu0 %v911_v17 }
  0x47   : > { %943 = vmatpush.msra.mxu0 %v910_v19 }
  0x49   : > { %944 = vmatpush.msra.mxu0 %v909_v20 }
  0x4b   : > { %945 = vmatpush.msra.mxu0 %v908_v21 }
  0x4d   : > { %946 = vmatpush.msra.mxu0 %v907_v22 }
  0x4f   : > { %947 = vmatpush.msra.mxu0 %v906_v23 }
  0x51   : > { %948 = vmatpush.msra.mxu0 %v905_v24 }
  0x52   : > { %949 = vmatmul.f32.vlgmr.msra.gmra.mxu0 %v903_v25 }
  0xc0   : > { %v970_v26 = vpop.f32.mrf.mxu1 }
  0xcf   : > { %v950_v27 = vpop.f32.mrf.mxu0 }
  0xd0   : > { %v971_v29 = vadd.f32 %v970_v26, %v950_v27 }
  0xd2   : > { %v973_v30 = vadd.f32 %v971_v29, %v902_v28 }
  0xd4   : > { %975 = vst.msk [vmem:[#allocation2] sm:$0xff] %vm974_vm1, %v973_v30 }
  0xd5 PF: > { %vm979_vm2 = vcmask 261120   ;;  %v1784_v33 = vmov 32.0   ;;  %v1020_v45 = vld [vmem:[%s1966_s24 + $0x18] sm:$0xff]  ;;  %v1019_v46 = vld [vmem:[%s1966_s24 + $0x10] sm:$0xff]  ;;  %v1018_v47 = vld [vmem:[%s1966_s24 + $0x8] sm:$0xff]  ;;  %s2336_s18 = sld [smem:[#allocation14_spill]]  ;;  %s2340_s23 = scalar_lea.vmem %s2281_s8, %s1942_s1 }
  0xd6   : > { %1724 = vrcp.f32 %v1784_v33  ;;  %1040 = vmatpush.msra.mxu2 %v1020_v45  ;;  %v1017_v48 = vld [vmem:[%s1966_s24] sm:$0xff]  ;;  %s2338_s2 = sld [smem:[#allocation15_spill]]  ;;  %s1785_s29 = smov 112   ;;  %vm1051_vm7 = vcmask 130048   ;;  %vm1082_vm8 = vcmask 64512  }
  0xd7   : > { %v1717_v0 = vld [vmem:[%s2340_s23] ss:$0 sm:$0xff]  ;;  %s1786_s30 = smov 96   ;;  %s1787_s21 = smov 80  }
  0xd8   : > { %1041 = vmatpush.msra.mxu2 %v1019_v46  ;;  %s2341_s0 = sld [smem:[#allocation12_spill]]  ;;  %s1788_s24 = smov 48  }
  0xd9   : > { %s2344_s23 = scalar_lea.vmem %s2285_s12, %s1942_s1  ;;  %s2346_s26 = sld [smem:[#allocation3_spill]] }
  0xda   : > { %1042 = vmatpush.msra.mxu2 %v1018_v47 }
  0xdb   : > { %v2090_v31 = vld [vmem:[#allocation2] sm:$0xff]  ;;  %s2337_s20 = scalar_lea.vmem %s2336_s18, %s1942_s1  ;;  %s1789_s18 = smov 64  }
  0xdc   : > { %v980_v32 = vsel %vm979_vm2, %v2090_v31, 0.0  ;;  %v1725_v34 = vpop.eup %1724  ;;  %1043 = vmatpush.msra.mxu2 %v1017_v48  ;;  %v1715_v58 = vld [vmem:[%s2337_s20] ss:$0 sm:$0xff]  ;;  %s2339_s22 = scalar_lea.vmem %s2338_s2, %s1942_s1  ;;  %s1790_s20 = smov 16  }
  0xdd   : > { %981 = vadd.xlane.f32.xlu0 %v980_v32  ;;  %v984_v35 = vmul.f32 32.0, %v1725_v34  ;;  %vm988_vm3 = vweird.f32 %v1725_v34  ;;  %v1716_v61 = vld [vmem:[%s2339_s22] ss:$0 sm:$0xff]  ;;  %s2342_s2 = scalar_lea.vmem %s2283_s10, %s1942_s1  ;;  %s2343_s22 = scalar_lea.vmem %s2284_s11, %s1942_s1 }
  0xde   : > { %v1718_v6 = vld [vmem:[%s2341_s0] ss:$0 sm:$0xff] }
  0xdf   : > { %v985_v36 = vsub.f32 1.0, %v984_v35  ;;  %v1194_v35 = vld [vmem:[%s1975_s27 + $0x10] sm:$0xff]  ;;  %p1657_p8 = scmp.eq.s32.totalorder %s2346_s26, 1 }
  0xe1   : > { %v986_v37 = vmul.f32 %v1725_v34, %v985_v36  ;;  %v1193_v36 = vld [vmem:[%s1975_s27 + $0x8] sm:$0xff] }
  0xe3   : > { %v987_v38 = vadd.f32 %v1725_v34, %v986_v37 }
  0xe5   : > { %v2094_v39 = vsel %vm988_vm3, %v1725_v34, %v987_v38  ;;  %v1195_v34 = vld [vmem:[%s1975_s27 + $0x18] sm:$0xff] }
 0x150   : > { %v982_v40 = vpop.xlane.xlu0 %981 }
 0x151   : > { %v990_v41 = vmul.f32 %v2094_v39, %v982_v40  ;;  %v1192_v40 = vld [vmem:[%s1975_s27] sm:$0xff] }
 0x153   : > { %v991_v42 = vsub.f32 %v2090_v31, %v990_v41 }
 0x155   : > { %v992_v43 = vmul.f32 %v991_v42, %v991_v42 }
 0x157   : > { %v993_v44 = vsel %vm979_vm2, %v992_v43, 0.0  ;;  %v1719_v43 = vld [vmem:[%s2342_s2] ss:$0 sm:$0xff] }
 0x158   : > { %994 = vadd.xlane.f32.xlu0 %v993_v44 }
 0x1cb   : > { %v995_v49 = vpop.xlane.xlu0 %994 }
 0x1cc   : > { %v996_v50 = vmul.f32 %v995_v49, %v2094_v39 }
 0x1ce   : > { %v997_v51 = vadd.f32 1e-06, %v996_v50 }
 0x1d0   : > { %1726 = vrsqrt.f32 %v997_v51  ;;  %vm1004_vm5 = vweird.f32 %v997_v51 }
 0x1d6   : > { %v1727_v52 = vpop.eup %1726 }
 0x1d7   : > { %v999_v53 = vmul.f32 %v1727_v52, %v997_v51  ;;  %vm1005_vm4 = vweird.f32 %v1727_v52 }
 0x1d8   : > { %vm1006_vm6 = vmor %vm1004_vm5, %vm1005_vm4 }
 0x1d9   : > { %v1000_v54 = vmul.f32 %v1727_v52, %v999_v53  ;;  %v1260_v53 = vld [vmem:[%s1992_s25 + $0x18] sm:$0xff] }
 0x1db   : > { %v1001_v55 = vmul.f32 0.5, %v1000_v54  ;;  %v1258_v54 = vld [vmem:[%s1992_s25 + $0x8] sm:$0xff] }
 0x1dd   : > { %v1002_v56 = vsub.f32 1.5, %v1001_v55  ;;  %v1257_v55 = vld [vmem:[%s1992_s25] sm:$0xff] }
 0x1df   : > { %v1003_v57 = vmul.f32 %v1727_v52, %v1002_v56  ;;  %v1312_v56 = vld [vmem:[%s2006_s7 + $0x78] sm:$0xff] }
 0x1e0   : > { %1313 = vmatpush.msra.mxu0 %v1312_v56 }
 0x1e1   : > { %v1007_v59 = vsel %vm1006_vm6, %v1727_v52, %v1003_v57  ;;  %v1311_v57 = vld [vmem:[%s2006_s7 + $0x70] sm:$0xff] }
 0x1e2   : > { %v1008_v60 = vmul.f32 %v1007_v59, %v991_v42  ;;  %1314 = vmatpush.msra.mxu0 %v1311_v57 }
 0x1e4   : > { %v1012_v62 = vmul.f32 %v1715_v58, %v1008_v60  ;;  %v1310_v58 = vld [vmem:[%s2006_s7 + $0x68] sm:$0xff] }
 0x1e5   : > { %1315 = vmatpush.msra.mxu0 %v1310_v58 }
 0x1e6   : > { %v1016_v63 = vadd.f32 %v1716_v61, %v1012_v62 }
 0x1e8   : > { %1648 = vmatmul.msk.f32.vlgmr.msra.gmra.mxu2 %vm979_vm2, %v1016_v63 }
 0x26b   : > { %v1045_v1 = vpop.f32.mrf.mxu2 }
 0x26c   : > { %v1046_v2 = vadd.f32 %v1717_v0, %v1045_v1 }
 0x26e   : > { %1120 = vrot.lane.b32.xlu2 %v1046_v2, %s1785_s29  ;;  %1049 = vrot.lane.b32.xlu1 %v1046_v2, %s1786_s30 }
 0x276   : > { %1122 = vrot.lane.b32.xlu1 %v1046_v2, %s1787_s21  ;;  %s2345_s21 = scalar_lea.vmem %s2287_s14, %s1942_s1 }
 0x2c8   : > { %v1121_v5 = vpop.permute.xlu2 %1120 }
 0x2e0   : > { %v1050_v3 = vpop.permute.xlu1 %1049 }
 0x2e1   : > { %1649 = vmatpush.xpose.msk.msra.mxu1 %vm1051_vm7, %v1050_v3 }
 0x2e4   : > { %1650 = vmatmul.msk.f32.vlgmr.msra.gmra.mxu1 %vm1051_vm7, %v1046_v2 }
 0x2e5   : > { %1211 = vmatpush.msrb.mxu1 %v1195_v34 }
 0x2e7   : > { %1212 = vmatpush.msrb.mxu1 %v1194_v35 }
 0x2e8   : > { %v1123_v4 = vpop.permute.xlu1 %1122 }
 0x2e9   : > { %1652 = vmatpush.xpose.msk.msra.mxu3 %vm1051_vm7, %v1123_v4  ;;  %1213 = vmatpush.msrb.mxu1 %v1193_v36  ;;  %v1720_v4 = vld [vmem:[%s2343_s22] ss:$0 sm:$0xff] }
 0x2ea   : > { %v1723_v36 = vld [vmem:[%s894_s17] ss:$0 sm:$0xff] }
 0x2eb   : > { %1214 = vmatpush.msrb.mxu1 %v1192_v40 }
 0x2ec   : > { %1653 = vmatmul.msk.f32.vlgmr.msra.gmra.mxu3 %vm1051_vm7, %v1121_v5 }
 0x2ed   : > { %1280 = vmatpush.msrb.mxu3 %v1260_v53 }
 0x361   : > { %v1073_v7 = vpop.f32.mrf.mxu1 }
 0x362   : > { %v1076_v8 = vmul.f32 0.25, %v1073_v7  ;;  %v1721_v7 = vld [vmem:[%s2344_s23] ss:$0 sm:$0xff] }
 0x364   : > { %v1081_v9 = vadd.f32 %v1718_v6, %v1076_v8 }
 0x366   : > { %v1083_v10 = vsel %vm1082_vm8, %v1081_v9, -inf }
 0x367   : > { %1084 = vmax.xlane.f32.xlu2 %v1083_v10  ;;  %v1309_v10 = vld [vmem:[%s2006_s7 + $0x60] sm:$0xff] }
 0x368   : > { %1316 = vmatpush.msra.mxu0 %v1309_v10 }
 0x36f   : > { %v1145_v11 = vpop.f32.mrf.mxu3 }
 0x370   : > { %v1148_v12 = vmul.f32 0.25, %v1145_v11  ;;  %v1308_v11 = vld [vmem:[%s2006_s7 + $0x58] sm:$0xff] }
 0x371   : > { %1317 = vmatpush.msra.mxu0 %v1308_v11 }
 0x372   : > { %v1149_v13 = vadd.f32 %v1718_v6, %v1148_v12  ;;  %v1307_v12 = vld [vmem:[%s2006_s7 + $0x50] sm:$0xff] }
 0x373   : > { %1318 = vmatpush.msra.mxu0 %v1307_v12 }
 0x374   : > { %v1150_v14 = vsel %vm1082_vm8, %v1149_v13, -inf }
 0x375   : > { %1151 = vmax.xlane.f32.xlu0 %v1150_v14  ;;  %v1305_v14 = vld [vmem:[%s2006_s7 + $0x40] sm:$0xff] }
 0x37f   : > { %1161 = vrot.lane.b32.xlu2 %v1046_v2, %s1788_s24 }
 0x3da   : > { %v1085_v15 = vpop.xlane.xlu2 %1084 }
 0x3db   : > { %v1086_v16 = vsub.f32 %v1081_v9, %v1085_v15  ;;  %v1304_v15 = vld [vmem:[%s2006_s7 + $0x38] sm:$0xff] }
 0x3dd   : > { %v1087_v17 = vmul.f32 1.442695, %v1086_v16  ;;  %v1303_v16 = vld [vmem:[%s2006_s7 + $0x30] sm:$0xff] }
 0x3df   : > { %1728 = vpow2.f32 %v1087_v17  ;;  %v1302_v17 = vld [vmem:[%s2006_s7 + $0x28] sm:$0xff] }
 0x3e2   : > { %v1162_v30 = vpop.permute.xlu2 %1161 }
 0x3e5   : > { %v1729_v18 = vpop.eup %1728 }
 0x3e6   : > { %v1089_v19 = vsel %vm1082_vm8, %v1729_v18, 0.0 }
 0x3e7   : > { %1090 = vadd.xlane.f32.xlu1 %v1089_v19  ;;  %v1300_v19 = vld [vmem:[%s2006_s7 + $0x18] sm:$0xff] }
 0x3e8   : > { %v1152_v20 = vpop.xlane.xlu0 %1151 }
 0x3e9   : > { %v1153_v21 = vsub.f32 %v1149_v13, %v1152_v20  ;;  %v1306_v13 = vld [vmem:[%s2006_s7 + $0x48] sm:$0xff]  ;;  %v1299_v20 = vld [vmem:[%s2006_s7 + $0x10] sm:$0xff] }
 0x3ea   : > { %1319 = vmatpush.msra.mxu0 %v1306_v13 }
 0x3eb   : > { %v1154_v22 = vmul.f32 1.442695, %v1153_v21  ;;  %v1298_v21 = vld [vmem:[%s2006_s7 + $0x8] sm:$0xff] }
 0x3ec   : > { %1320 = vmatpush.msra.mxu0 %v1305_v14 }
 0x3ed   : > { %1730 = vpow2.f32 %v1154_v22  ;;  %v1297_v22 = vld [vmem:[%s2006_s7] sm:$0xff] }
 0x3ee   : > { %1321 = vmatpush.msra.mxu0 %v1304_v15 }
 0x3f0   : > { %1322 = vmatpush.msra.mxu0 %v1303_v16 }
 0x3f2   : > { %1323 = vmatpush.msra.mxu0 %v1302_v17 }
 0x3f3   : > { %v1731_v23 = vpop.eup %1730 }
 0x3f4   : > { %v1156_v24 = vsel %vm1082_vm8, %v1731_v23, 0.0 }
 0x3f5   : > { %1157 = vadd.xlane.f32.xlu0 %v1156_v24 }
 0x409   : > { %1094 = vrot.lane.b32.xlu0 %v1046_v2, %s1789_s18 }
 0x45a   : > { %v1091_v25 = vpop.xlane.xlu1 %1090 }
 0x45b   : > { %1732 = vrcp.f32 %v1091_v25 }
 0x461   : > { %v1733_v27 = vpop.eup %1732 }
 0x462   : > { %v1093_v29 = vmul.f32 %v1733_v27, %v1729_v18  ;;  %v1301_v18 = vld [vmem:[%s2006_s7 + $0x20] sm:$0xff] }
 0x463   : > { %1324 = vmatpush.msra.mxu0 %v1301_v18 }
 0x465   : > { %1325 = vmatpush.msra.mxu0 %v1300_v19 }
 0x467   : > { %1326 = vmatpush.msra.mxu0 %v1299_v20 }
 0x468   : > { %v1158_v26 = vpop.xlane.xlu0 %1157 }
 0x469   : > { %1734 = vrcp.f32 %v1158_v26  ;;  %1327 = vmatpush.msra.mxu0 %v1298_v21 }
 0x46b   : > { %1328 = vmatpush.msra.mxu0 %v1297_v22 }
 0x46f   : > { %v1735_v32 = vpop.eup %1734 }
 0x470   : > { %v1160_v33 = vmul.f32 %v1735_v32, %v1731_v23  ;;  %v1722_v23 = vld [vmem:[%s2345_s21] ss:$0 sm:$0xff] }
 0x47b   : > { %v1095_v28 = vpop.permute.xlu0 %1094 }
 0x47c   : > { %1115 = vmatpush.msrb.mxu2 %v1095_v28 }
 0x47d   : > { %1651 = vmatmul.msk.f32.vlgmr.msrb.gmra.mxu2 %vm1082_vm8, %v1093_v29 }
 0x47e   : > { %1182 = vmatpush.msra.mxu2 %v1162_v30 }
 0x485   : > { %1654 = vmatmul.msk.f32.vlgmr.msra.gmra.mxu2 %vm1082_vm8, %v1160_v33 }
 0x500   : > { %v1117_v37 = vpop.f32.mrf.mxu2 }
 0x508   : > { %v1184_v38 = vpop.f32.mrf.mxu2 }
 0x509   : > { %1188 = vrot.lane.b32.xlu0 %v1184_v38, %s1790_s20 }
 0x57b   : > { %v1189_v41 = vpop.permute.xlu0 %1188 }
 0x57c   : > { %v1191_v42 = vsel %vm1051_vm7, %v1117_v37, %v1189_v41 }
 0x57d   : > { %1655 = vmatmul.msk.f32.vlgmr.msrb.gmra.mxu1 %vm979_vm2, %v1191_v42 }
 0x5fa   : > { %v1216_v44 = vpop.f32.mrf.mxu1 }
 0x5fb   : > { %v1219_v45 = vadd.f32 %v1216_v44, %v2090_v31  ;;  %v1259_v31 = vld [vmem:[%s1992_s25 + $0x10] sm:$0xff] }
 0x5fc   : > { %1281 = vmatpush.msrb.mxu3 %v1259_v31 }
 0x5fd   : > { %v2145_v46 = vadd.f32 %v1719_v43, %v1219_v45 }
 0x5fe   : > { %1282 = vmatpush.msrb.mxu3 %v1258_v54 }
 0x5ff   : > { %v1227_v47 = vsel %vm979_vm2, %v2145_v46, 0.0 }
 0x600   : > { %1228 = vadd.xlane.f32.xlu1 %v1227_v47  ;;  %1283 = vmatpush.msrb.mxu3 %v1257_v55 }
 0x673   : > { %v1229_v48 = vpop.xlane.xlu1 %1228 }
 0x674   : > { %v1230_v49 = vmul.f32 %v1229_v48, %v2094_v39 }
 0x676   : > { %v1231_v50 = vsub.f32 %v2145_v46, %v1230_v49 }
 0x678   : > { %v1232_v51 = vmul.f32 %v1231_v50, %v1231_v50 }
 0x67a   : > { %v1233_v52 = vsel %vm979_vm2, %v1232_v51, 0.0 }
 0x67b   : > { %1234 = vadd.xlane.f32.xlu0 %v1233_v52 }
 0x6ee   : > { %v1235_v59 = vpop.xlane.xlu0 %1234 }
 0x6ef   : > { %v1236_v60 = vmul.f32 %v1235_v59, %v2094_v39 }
 0x6f1   : > { %v1237_v61 = vadd.f32 1e-06, %v1236_v60 }
 0x6f3   : > { %1736 = vrsqrt.f32 %v1237_v61  ;;  %vm1244_vm10 = vweird.f32 %v1237_v61 }
 0x6f9   : > { %v1737_v62 = vpop.eup %1736 }
 0x6fa   : > { %v1239_v63 = vmul.f32 %v1737_v62, %v1237_v61  ;;  %vm1245_vm9 = vweird.f32 %v1737_v62 }
 0x6fb   : > { %vm1246_vm11 = vmor %vm1244_vm10, %vm1245_vm9 }
 0x6fc   : > { %v1240_v0 = vmul.f32 %v1737_v62, %v1239_v63 }
 0x6fe   : > { %v1241_v1 = vmul.f32 0.5, %v1240_v0 }
 0x700   : > { %v1242_v2 = vsub.f32 1.5, %v1241_v1 }
 0x702   : > { %v1243_v3 = vmul.f32 %v1737_v62, %v1242_v2 }
 0x704   : > { %v1247_v5 = vsel %vm1246_vm11, %v1737_v62, %v1243_v3 }
 0x705   : > { %v1248_v6 = vmul.f32 %v1247_v5, %v1231_v50 }
 0x707   : > { %v1252_v8 = vmul.f32 %v1720_v4, %v1248_v6 }
 0x709   : > { %v1256_v9 = vadd.f32 %v1721_v7, %v1252_v8 }
 0x70b   : > { %1656 = vmatmul.msk.f32.vlgmr.msrb.gmra.mxu3 %vm979_vm2, %v1256_v9 }
 0x78e   : > { %v1285_v24 = vpop.f32.mrf.mxu3 }
 0x78f   : > { %v1286_v25 = vadd.f32 %v1722_v23, %v1285_v24 }
 0x791   : > { %v1288_v26 = vmul.f32 %v1286_v25, %v1286_v25 }
 0x793   : > { %v1289_v27 = vmul.f32 %v1288_v26, %v1286_v25 }
 0x795   : > { %v1290_v28 = vmul.f32 0.044715, %v1289_v27 }
 0x797   : > { %v1291_v29 = vadd.f32 %v1290_v28, %v1286_v25 }
 0x799   : > { %v1292_v30 = vmul.f32 0.7978846, %v1291_v29 }
 0x79b   : > { %1738 = vtanh.f32 %v1292_v30 }
 0x7a1   : > { %v1739_v32 = vpop.eup %1738 }
 0x7a2   : > { %v1294_v33 = vadd.f32 1.0, %v1739_v32 }
 0x7a4   : > { %v1295_v34 = vmul.f32 0.5, %v1294_v33 }
 0x7a6   : > { %v1296_v35 = vmul.f32 %v1295_v34, %v1286_v25 }
 0x7a8   : > { %1329 = vmatmul.f32.vlgmr.msra.gmra.mxu0 %v1296_v35 }
 0x824   : > { %1342 = sbr.rel (%p1657_p8) target bundleno = 2091 (0x82b), region = 116 }
 0x825   : > { %v1330_v37 = vpop.f32.mrf.mxu0 }
 0x826   : > { %v1333_v38 = vadd.f32 %v1330_v37, %v2145_v46 }
 0x828   : > { %v1338_v40 = vadd.f32 %v1723_v36, %v1333_v38 }
 0x82a   : > { %1343 = vst.msk [vmem:[#allocation2] sm:$0xff] %vm979_vm2, %v1338_v40 }
 0x82b PF: > { %s2347_s0 = sld [smem:[#allocation3_spill]] }
 0x831   : > { %p1658_p9 = scmp.ne.s32.totalorder %s2347_s0, 1 }
 0x832   : > { %s2348_s24 = sld [smem:[#allocation21_spill]] (!%p1658_p9) }
 0x833   : > { %1347 = sbr.rel (%p1658_p9) target bundleno = 2503 (0x9c7), region = 120  ;;  %s2349_s3 = sld [smem:[#allocation22_spill]] (!%p1658_p9) }
 0x834   : > { %s2351_s25 = sld [smem:[#allocation13_spill]] (!%p1658_p9) }
 0x835   : > { %s2353_s29 = sld [smem:[#allocation19_spill]] (!%p1658_p9) }
 0x836   : > { %s2354_s7 = sld [smem:[#allocation20_spill]] (!%p1658_p9) }
 0x837   : > { %s2355_s0 = sld [smem:[#allocation23_spill]] (!%p1658_p9) }
 0x838   : > { %v1350_v41 = vsel %vm979_vm2, %v1338_v40, 0.0  ;;  %v1388_v47 = vld [vmem:[%s2348_s24 + $0x38] sm:$0xff]  ;;  %v1387_v48 = vld [vmem:[%s2348_s24 + $0x30] sm:$0xff]  ;;  %v1386_v49 = vld [vmem:[%s2348_s24 + $0x28] sm:$0xff]  ;;  %vm1416_vm12 = vcmask 523264   ;;  %vm1442_vm0 = vcmask 57344  }
 0x839   : > { %1351 = vadd.xlane.f32.xlu0 %v1350_v41  ;;  %1428 = vmatpush.msra.mxu1 %v1388_v47  ;;  %v1385_v50 = vld [vmem:[%s2348_s24 + $0x20] sm:$0xff]  ;;  %s2350_s6 = smov %s2349_s3  ;;  %v1392_v51 = vld [vmem:[%s2349_s3 + $0x18] sm:$0xff]  ;;  %v1383_v31 = vld [vmem:[%s2348_s24 + $0x10] sm:$0xff] }
 0x83a   : > { %v1384_v52 = vld [vmem:[%s2348_s24 + $0x18] sm:$0xff]  ;;  %v1391_v53 = vld [vmem:[%s2350_s6 + $0x10] sm:$0xff]  ;;  %1408 = vmatpush.msra.mxu0 %v1392_v51  ;;  %v1390_v54 = vld [vmem:[%s2350_s6 + $0x8] sm:$0xff]  ;;  %s2352_s22 = scalar_lea.vmem %s2351_s25, %s2369_s28 }
 0x83b   : > { %1429 = vmatpush.msra.mxu1 %v1387_v48  ;;  %v1382_v55 = vld [vmem:[%s2348_s24 + $0x8] sm:$0xff]  ;;  %v1389_v56 = vld [vmem:[%s2350_s6] sm:$0xff] }
 0x83c   : > { %1409 = vmatpush.msra.mxu0 %v1391_v53  ;;  %v1381_v57 = vld [vmem:[%s2348_s24] sm:$0xff] }
 0x83d   : > { %1430 = vmatpush.msra.mxu1 %v1386_v49  ;;  %v1380_v58 = vld [vmem:[%s2352_s22] sm:$0x1] }
 0x83e   : > { %1410 = vmatpush.msra.mxu0 %v1390_v54  ;;  %v1740_v4 = vld [vmem:[%s2353_s29] ss:$0 sm:$0xff] }
 0x83f   : > { %1431 = vmatpush.msra.mxu1 %v1385_v50  ;;  %v1440_v11 = vld [vmem:[%s2355_s0] sm:$0x1] }
 0x840   : > { %1411 = vmatpush.msra.mxu0 %v1389_v56 }
 0x841   : > { %1432 = vmatpush.msra.mxu1 %v1384_v52 }
 0x843   : > { %1433 = vmatpush.msra.mxu1 %v1383_v31 }
 0x845   : > { %1434 = vmatpush.msra.mxu1 %v1382_v55 }
 0x847   : > { %1435 = vmatpush.msra.mxu1 %v1381_v57 }
 0x848   : > { %1660 = vmatmul.msk.f32.vlgmr.msra.gmra.mxu1 %vm1416_vm12, %v1380_v58 }
 0x8ac   : > { %v1352_v42 = vpop.xlane.xlu0 %1351 }
 0x8ad   : > { %v1353_v43 = vmul.f32 %v1352_v42, %v2094_v39 }
 0x8af   : > { %v1354_v44 = vsub.f32 %v1338_v40, %v1353_v43 }
 0x8b1   : > { %v1355_v45 = vmul.f32 %v1354_v44, %v1354_v44 }
 0x8b3   : > { %v1356_v46 = vsel %vm979_vm2, %v1355_v45, 0.0 }
 0x8b4   : > { %1357 = vadd.xlane.f32.xlu0 %v1356_v46 }
 0x8c5   : > { %v1437_v9 = vpop.f32.mrf.mxu1 }
 0x927   : > { %v1358_v59 = vpop.xlane.xlu0 %1357 }
 0x928   : > { %v1359_v60 = vmul.f32 %v1358_v59, %v2094_v39  ;;  %v1741_v39 = vld [vmem:[%s2354_s7] ss:$0 sm:$0xff] }
 0x92a   : > { %v1360_v61 = vadd.f32 1e-06, %v1359_v60 }
 0x92c   : > { %1742 = vrsqrt.f32 %v1360_v61  ;;  %vm1367_vm14 = vweird.f32 %v1360_v61 }
 0x932   : > { %v1743_v62 = vpop.eup %1742 }
 0x933   : > { %v1362_v63 = vmul.f32 %v1743_v62, %v1360_v61  ;;  %vm1368_vm13 = vweird.f32 %v1743_v62 }
 0x934   : > { %vm1369_vm15 = vmor %vm1367_vm14, %vm1368_vm13 }
 0x935   : > { %v1363_v0 = vmul.f32 %v1743_v62, %v1362_v63 }
 0x937   : > { %v1364_v1 = vmul.f32 0.5, %v1363_v0 }
 0x939   : > { %v1365_v2 = vsub.f32 1.5, %v1364_v1 }
 0x93b   : > { %v1366_v3 = vmul.f32 %v1743_v62, %v1365_v2 }
 0x93d   : > { %v1370_v5 = vsel %vm1369_vm15, %v1743_v62, %v1366_v3 }
 0x93e   : > { %v1371_v6 = vmul.f32 %v1370_v5, %v1354_v44 }
 0x940   : > { %v1375_v7 = vmul.f32 %v1740_v4, %v1371_v6 }
 0x942   : > { %v1379_v8 = vadd.f32 %v1741_v39, %v1375_v7 }
 0x944   : > { %1659 = vmatmul.msk.f32.vlgmr.msra.gmra.mxu0 %vm979_vm2, %v1379_v8 }
 0x9c1   : > { %v1413_v10 = vpop.f32.mrf.mxu0 }
 0x9c2   : > { %v1438_v12 = vadd.f32 %v1437_v9, %v1413_v10 }
 0x9c4   : > { %v1441_v13 = vadd.f32 %v1440_v11, %v1438_v12 }
 0x9c6   : > { %1443 = vst.msk [vmem:[%s897_s19] sm:$0x1] %vm1442_vm0, %v1441_v13 }
 0x9c7 PF: > { %s2357_s20 = sld [smem:[#allocation6_spill]] }
 0x9c8   : > { %s2358_s3 = sld [smem:[#allocation4_spill]] }
 0x9c9   : > { %s2359_s28 = sld [smem:[#allocation5_spill]] }
 0x9ca   : > { %s2360_s29 = sld [smem:[#allocation7_spill]] }
 0x9cb   : > { %s2361_s30 = sld [smem:[#allocation8_spill]] }
 0x9cd   : > { %s32_s4 = sadd.s32 1, %s2357_s20  }
 0x9ce   : > { %p29_p10 = scmp.ge.s32.totalorder %s32_s4, 6  }
 0x9d0   :  { %31 = sbr.rel (!%p29_p10) target bundleno = 17 (0x11), region = 189 }

</bundles_post_ra>
